<compile_context>
chip_gen: v5e
topology: v5e:2x2
jax: 0.10.0
libtpu: 0.0.40
codegen_flags: <defaults>
</compile_context>

<pallas_src>
import functools
import numpy as np

import jax
import jax.numpy as jnp
from jax.experimental import pallas as pl
from jax.experimental.pallas import tpu as pltpu

# ----------------------------- configuration (small shapes) -----------------
B           = 2            # batch
NUM_PATCHES = 32           # tokens fed to the decoder
EMBED       = 32           # embed_dim
DEPTH       = 2
HEADS       = 4
HEAD_DIM    = EMBED // HEADS
MLP_RATIO   = 4.0
HID         = int(EMBED * MLP_RATIO)   # 128 -> lane-dense MLP intermediate
NUM_CLASSES = 128                      # head output dim (multiple of 128 -> lane-dense)
RET_TOKENS  = 16                       # return_token_num used in __main__
LN_EPS      = 1e-5
REF_PREC    = jax.lax.Precision.HIGH   # bf16_3x in the reference == kernel's manual 3x


# --------------------------- shared math helpers ----------------------------
def _ln(x, w, b, eps=LN_EPS):
    mu = jnp.mean(x, axis=-1, keepdims=True)
    var = jnp.mean((x - mu) ** 2, axis=-1, keepdims=True)
    return (x - mu) * jax.lax.rsqrt(var + eps) * w + b


def _gelu_exact(x):
    # nn.GELU default (erf form); tanh approximation would diverge from torch.
    return 0.5 * x * (1.0 + jax.lax.erf(x * (1.0 / np.sqrt(2.0))))


def _split_bf16(a):
    hi = a.astype(jnp.bfloat16)
    lo = (a - hi.astype(jnp.float32)).astype(jnp.bfloat16)
    return hi, lo


def _dot3(a, b, eq=None):
    """f32 matmul as 3 bf16 MXU passes (== lax.Precision.HIGH / bf16_3x).

    Mosaic's dot_general lowering only accepts DEFAULT/HIGHEST precision, so the
    bf16_3x decomposition is written out explicitly.  The split casts are tiny VPU
    ops; matmul MXU pushes are halved vs. the previous HIGHEST (6-pass f32) kernel.
    """
    ah, al = _split_bf16(a)
    bh, bl = _split_bf16(b)
    if eq is None:
        mm = lambda u, w: jnp.dot(u, w, preferred_element_type=jnp.float32)
    else:
        mm = lambda u, w: jnp.einsum(eq, u, w, preferred_element_type=jnp.float32)
    return mm(ah, bh) + mm(ah, bl) + mm(al, bh)


# ------------------------------ fused Pallas kernel --------------------------
def _decoder_kernel(x_ref, vec_ref, big_ref, w2_ref, tail_ref, o_ref,
                    *, depth, num_heads, n_out):
    Bv, N, D = x_ref.shape
    H = num_heads
    hd = D // H
    scale = hd ** -0.5
    M = Bv * N

    x = x_ref[...].reshape(M, D)          # tokens flattened: all matmuls see M rows

    def split_heads(m2d):                 # (M, H*hd) -> (H*B, N, hd)
        return jnp.concatenate(
            [m2d[:, h * hd:(h + 1) * hd].reshape(Bv, N, hd) for h in range(H)],
            axis=0)

    # DEPTH == 2 -> statically unrolled.  If depth is increased, switch this to
    # lax.fori_loop over the already-stacked per-layer weights.
    for l in range(depth):
        vec = vec_ref[l]                  # (7, 128): ln1w ln1b bproj ln2w ln2b b2 b1
        big = big_ref[l]                  # (32, 256): [wqkv(96) | wproj(32) | w1(128)]
        ln1w, ln1b = vec[0:1, :D], vec[1:2, :D]
        bproj      = vec[2:3, :D]
        ln2w, ln2b = vec[3:4, :D], vec[4:5, :D]
        b2, b1     = vec[5:6, :D], vec[6:7, :]
        wqkv  = big[:, :3 * D]            # (D, 3D)
        wproj = big[:, 3 * D:4 * D]       # (D, D)
        w1    = big[:, 4 * D:]            # (D, HID)
        w2    = w2_ref[l]                 # (HID, D)

        # ------------------------------ attention ------------------------------
        h = _ln(x, ln1w, ln1b)
        qkv = _dot3(h, wqkv)                          # ONE fused (M,D)@(D,3D)
        q = split_heads(qkv[:, :D]) * scale           # torch scales q before q@k^T
        k = split_heads(qkv[:, D:2 * D])
        v = split_heads(qkv[:, 2 * D:])
        s = _dot3(q, k, eq='bqd,bkd->bqk')            # (H*B, N, N)
        m = jnp.max(s, axis=-1, keepdims=True)
        e = jnp.exp(s - m)
        lsum = jnp.sum(e, axis=-1, keepdims=True)
        inv = pl.reciprocal(lsum, approx=True)        # EUP slot (off the VALU)
        inv = inv * (2.0 - lsum * inv)                # 1 NR step on (H*B,N,1): ~free
        p = e * inv
        ctx = _dot3(p, v, eq='bqk,bkd->bqd')          # (H*B, N, hd)
        ctx2d = jnp.concatenate(
            [ctx[h * Bv:(h + 1) * Bv].reshape(M, hd) for h in range(H)], axis=1)
        x = x + _dot3(ctx2d, wproj) + bproj           # fused out-proj: ONE (M,D)@(D,D)

        # --------------------------------- mlp ---------------------------------
        h2 = _ln(x, ln2w, ln2b)
        hmid = _gelu_exact(_dot3(h2, w1) + b1)        # (M, HID) lane-dense
        x = x + _dot3(hmid, w2) + b2

    # ------------------- last tokens -> LayerNorm -> Linear head -----------------
    tail = tail_ref[...]                              # (D+3, 128)
    head_w = tail[0:D, :]
    norm_w = tail[D:D + 1, :D]
    norm_b = tail[D + 1:D + 2, :D]
    head_b = tail[D + 2:D + 3, :]
    xt = x.reshape(Bv, N, D)[:, N - n_out:, :].reshape(Bv * n_out, D)
    xt = _ln(xt, norm_w, norm_b)
    out = _dot3(xt, head_w) + head_b                  # (B*n_out, 128) lane-dense store
    o_ref[...] = out.reshape(Bv, n_out, -1)


# ------------------------------ Pallas wrapper -------------------------------
def decoder_forward(x, packed, return_token_num):
    """Pallas-backed PretrainVisionTransformerDecoder.forward(x, return_token_num)."""
    Bv, N, D = x.shape
    if return_token_num > N:
        raise ValueError("return_token_num must be <= number of tokens")
    n_out = return_token_num if return_token_num > 0 else N
    kernel = functools.partial(_decoder_kernel, depth=DEPTH, num_heads=HEADS,
                               n_out=n_out)
    vmem = pl.BlockSpec(memory_space=pltpu.MemorySpace.VMEM)  # whole array in VMEM
    return pl.pallas_call(
        kernel,
        out_shape=jax.ShapeDtypeStruct((Bv, n_out, NUM_CLASSES), jnp.float32),
        in_specs=[vmem] * 5,
        out_specs=vmem,
    )(x, packed["vec"], packed["big"], packed["w2"], packed["tail"])


# -------------------------- parameter init / packing -------------------------
def _xavier_t(k, out_f, in_f):
    # torch xavier_uniform on (out, in), returned transposed to (in, out)
    bound = float(np.sqrt(6.0 / (in_f + out_f)))
    return jax.random.uniform(k, (out_f, in_f), jnp.float32, -bound, bound).T


def init_params(key):
    """Per-layer weights in (input, output) layout + final norm/head.

    torch's _init_weights sets LN weights/biases to 1/0 and Linear biases to 0;
    they are randomized (near those values) here so the numerical check exercises
    every parameter path of the forward pass.
    """
    kb, kt = jax.random.split(key)
    keys = jax.random.split(kb, DEPTH)
    blocks = []
    for i in range(DEPTH):
        bk = jax.random.split(keys[i], 11)
        nrm = lambda k, n: 0.05 * jax.random.normal(k, (1, n), jnp.float32)
        blocks.append(dict(
            ln1_w=1.0 + 0.1 * jax.random.normal(bk[4], (1, EMBED), jnp.float32),
            ln1_b=nrm(bk[5], EMBED),
            wqkv_t=_xavier_t(bk[0], 3 * EMBED, EMBED),   # (D, 3D), qkv_bias=False
            wproj_t=_xavier_t(bk[1], EMBED, EMBED),      # (D, D)
            bproj=nrm(bk[6], EMBED),
            ln2_w=1.0 + 0.1 * jax.random.normal(bk[7], (1, EMBED), jnp.float32),
            ln2_b=nrm(bk[8], EMBED),
            w1_t=_xavier_t(bk[2], HID, EMBED),           # (D, HID)
            b1=nrm(bk[9], HID),
            w2_t=_xavier_t(bk[3], EMBED, HID),           # (HID, D)
            b2=nrm(bk[10], EMBED),
        ))
    kt1, kt2, kt3, kt4 = jax.random.split(kt, 4)
    tail = dict(
        norm_w=1.0 + 0.1 * jax.random.normal(kt1, (1, EMBED), jnp.float32),
        norm_b=0.05 * jax.random.normal(kt2, (1, EMBED), jnp.float32),
        head_w=_xavier_t(kt3, NUM_CLASSES, EMBED),       # (D, C)
        head_b=0.05 * jax.random.normal(kt4, (1, NUM_CLASSES), jnp.float32),
    )
    return blocks, tail


def pack_for_kernel(blocks, tail):
    """Consolidate the 16 parameter tensors into 4 padded slabs (fewer DMAs):
       vec  : (DEPTH, 7, 128)   ln1_w, ln1_b, bproj, ln2_w, ln2_b, b2, b1
       big  : (DEPTH, 32, 256)  [wqkv (96) | wproj (32) | w1 (128)] along lanes
       w2   : (DEPTH, 128, 32)
       tail : (EMBED+3, 128)    head_w rows, norm_w, norm_b, head_b
    """
    def pad128(v):
        return jnp.pad(v, ((0, 0), (0, 128 - v.shape[1])))

    vec_rows, big_rows, w2_rows = [], [], []
    for b in blocks:
        vec_rows.append(jnp.concatenate(
            [pad128(b["ln1_w"]), pad128(b["ln1_b"]), pad128(b["bproj"]),
             pad128(b["ln2_w"]), pad128(b["ln2_b"]), pad128(b["b2"]), b["b1"]],
            axis=0))                                                  # (7, 128)
        big_rows.append(jnp.concatenate(
            [b["wqkv_t"], b["wproj_t"], b["w1_t"]], axis=1))          # (32, 256)
        w2_rows.append(b["w2_t"])                                     # (128, 32)
    tail_slab = jnp.concatenate(
        [tail["head_w"], pad128(tail["norm_w"]), pad128(tail["norm_b"]),
         tail["head_b"]], axis=0)                                     # (35, 128)
    return dict(vec=jnp.stack(vec_rows), big=jnp.stack(big_rows),
                w2=jnp.stack(w2_rows), tail=tail_slab)


# ------------------------------- pure-JAX reference --------------------------
def _ref_block(xb, bp):
    d = xb.shape[-1]
    hd = d // HEADS
    scale = hd ** -0.5
    h = _ln(xb, bp["ln1_w"], bp["ln1_b"])
    qkv = jnp.dot(h, bp["wqkv_t"], precision=REF_PREC)               # (N, 3D)
    qkv = qkv.reshape(-1, 3, HEADS, hd).transpose(1, 2, 0, 3)        # (3, H, N, hd)
    q, k, v = qkv[0] * scale, qkv[1], qkv[2]
    s = jnp.einsum('hqd,hkd->hqk', q, k, precision=REF_PREC)
    p = jax.nn.softmax(s, axis=-1)
    o = jnp.einsum('hqk,hkd->hqd', p, v, precision=REF_PREC)
    o = o.transpose(1, 0, 2).reshape(-1, d)
    xb = xb + jnp.dot(o, bp["wproj_t"], precision=REF_PREC) + bp["bproj"]
    h2 = _ln(xb, bp["ln2_w"], bp["ln2_b"])
    m = _gelu_exact(jnp.dot(h2, bp["w1_t"], precision=REF_PREC) + bp["b1"])
    return xb + jnp.dot(m, bp["w2_t"], precision=REF_PREC) + bp["b2"]


def reference_forward(x, blocks, tail, return_token_num):
    for bp in blocks:
        x = jax.vmap(lambda xb, _bp=bp: _ref_block(xb, _bp))(x)
    if return_token_num > 0:
        x = x[:, -return_token_num:]
    x = _ln(x, tail["norm_w"], tail["norm_b"])
    return jnp.dot(x, tail["head_w"], precision=REF_PREC) + tail["head_b"]


# ------------------------------------ main -----------------------------------
if __name__ == "__main__":
    key = jax.random.PRNGKey(0)
    kx, kp = jax.random.split(key)

    x = jax.random.normal(kx, (B, NUM_PATCHES, EMBED), jnp.float32)
    blocks, tail = init_params(kp)
    packed = pack_for_kernel(blocks, tail)

    fwd = jax.jit(decoder_forward, static_argnums=2)
    out = jax.block_until_ready(fwd(x, packed, RET_TOKENS))
    assert out.shape == (B, RET_TOKENS, NUM_CLASSES)

    ref = jax.block_until_ready(
        jax.jit(reference_forward, static_argnums=3)(x, blocks, tail, RET_TOKENS))
    # Kernel uses an explicit bf16_3x decomposition; reference uses Precision.HIGH
    # (XLA bf16_3x).  5e-4 bounds the residual rounding-order / softmax differences
    # while still being far below any real-bug signal.
    np.testing.assert_allclose(np.asarray(out), np.asarray(ref),
                               rtol=5e-4, atol=5e-4)

    print("KERNEL_OK")
</pallas_src>

<mosaic_0001>
module attributes {stable_mosaic.version = 11 : i64} {
  func.func @_decoder_kernel(%arg0: memref<2x32x32xf32, #tpu.memory_space<vmem>>, %arg1: memref<2x7x128xf32, #tpu.memory_space<vmem>>, %arg2: memref<2x32x256xf32, #tpu.memory_space<vmem>>, %arg3: memref<2x128x32xf32, #tpu.memory_space<vmem>>, %arg4: memref<35x128xf32, #tpu.memory_space<vmem>>, %arg5: memref<2x16x128xf32, #tpu.memory_space<vmem>>) attributes {dimension_semantics = [], scalar_prefetch = 0 : i64, scratch_operands = 0 : i64, tpu.core_type = #tpu.core_type<tc>} {
    %c0 = arith.constant 0 : index
    %c0_0 = arith.constant 0 : index
    %c0_1 = arith.constant 0 : index
    %0 = vector.load %arg0[%c0, %c0_0, %c0_1] : memref<2x32x32xf32, #tpu.memory_space<vmem>>, vector<2x32x32xf32>
    %1 = vector.shape_cast %0 : vector<2x32x32xf32> to vector<64x32xf32>
    %c0_2 = arith.constant 0 : index
    %c0_3 = arith.constant 0 : index
    %c0_4 = arith.constant 0 : index
    %2 = vector.load %arg1[%c0_2, %c0_3, %c0_4] : memref<2x7x128xf32, #tpu.memory_space<vmem>>, vector<1x7x128xf32>
    %3 = vector.shape_cast %2 : vector<1x7x128xf32> to vector<7x128xf32>
    %c0_5 = arith.constant 0 : index
    %c0_6 = arith.constant 0 : index
    %c0_7 = arith.constant 0 : index
    %4 = vector.load %arg2[%c0_5, %c0_6, %c0_7] : memref<2x32x256xf32, #tpu.memory_space<vmem>>, vector<1x32x256xf32>
    %5 = vector.shape_cast %4 : vector<1x32x256xf32> to vector<32x256xf32>
    %6 = vector.extract_strided_slice %3 {offsets = [0, 0], sizes = [1, 32], strides = [1, 1]} : vector<7x128xf32> to vector<1x32xf32>
    %7 = vector.extract_strided_slice %3 {offsets = [1, 0], sizes = [1, 32], strides = [1, 1]} : vector<7x128xf32> to vector<1x32xf32>
    %8 = vector.extract_strided_slice %3 {offsets = [2, 0], sizes = [1, 32], strides = [1, 1]} : vector<7x128xf32> to vector<1x32xf32>
    %9 = vector.extract_strided_slice %3 {offsets = [3, 0], sizes = [1, 32], strides = [1, 1]} : vector<7x128xf32> to vector<1x32xf32>
    %10 = vector.extract_strided_slice %3 {offsets = [4, 0], sizes = [1, 32], strides = [1, 1]} : vector<7x128xf32> to vector<1x32xf32>
    %11 = vector.extract_strided_slice %3 {offsets = [5, 0], sizes = [1, 32], strides = [1, 1]} : vector<7x128xf32> to vector<1x32xf32>
    %12 = vector.extract_strided_slice %3 {offsets = [6, 0], sizes = [1, 128], strides = [1, 1]} : vector<7x128xf32> to vector<1x128xf32>
    %13 = vector.extract_strided_slice %5 {offsets = [0, 0], sizes = [32, 96], strides = [1, 1]} : vector<32x256xf32> to vector<32x96xf32>
    %14 = vector.extract_strided_slice %5 {offsets = [0, 96], sizes = [32, 32], strides = [1, 1]} : vector<32x256xf32> to vector<32x32xf32>
    %15 = vector.extract_strided_slice %5 {offsets = [0, 128], sizes = [32, 128], strides = [1, 1]} : vector<32x256xf32> to vector<32x128xf32>
    %c0_8 = arith.constant 0 : index
    %c0_9 = arith.constant 0 : index
    %c0_10 = arith.constant 0 : index
    %16 = vector.load %arg3[%c0_8, %c0_9, %c0_10] : memref<2x128x32xf32, #tpu.memory_space<vmem>>, vector<1x128x32xf32>
    %17 = vector.shape_cast %16 : vector<1x128x32xf32> to vector<128x32xf32>
    %cst = arith.constant dense<0.000000e+00> : vector<64xf32>
    %18 = vector.multi_reduction <add>, %1, %cst [1] : vector<64x32xf32> to vector<64xf32>
    %19 = vector.shape_cast %18 : vector<64xf32> to vector<64x1xf32>
    %cst_11 = arith.constant 3.200000e+01 : f32
    %20 = vector.broadcast %cst_11 : f32 to vector<64x1xf32>
    %21 = arith.divf %19, %20 : vector<64x1xf32>
    %22 = vector.broadcast %21 : vector<64x1xf32> to vector<64x32xf32>
    %23 = arith.subf %1, %22 : vector<64x32xf32>
    %24 = arith.mulf %23, %23 : vector<64x32xf32>
    %cst_12 = arith.constant dense<0.000000e+00> : vector<64xf32>
    %25 = vector.multi_reduction <add>, %24, %cst_12 [1] : vector<64x32xf32> to vector<64xf32>
    %26 = vector.shape_cast %25 : vector<64xf32> to vector<64x1xf32>
    %cst_13 = arith.constant 3.200000e+01 : f32
    %27 = vector.broadcast %cst_13 : f32 to vector<64x1xf32>
    %28 = arith.divf %26, %27 : vector<64x1xf32>
    %29 = vector.broadcast %21 : vector<64x1xf32> to vector<64x32xf32>
    %30 = arith.subf %1, %29 : vector<64x32xf32>
    %cst_14 = arith.constant 9.99999974E-6 : f32
    %31 = vector.broadcast %cst_14 : f32 to vector<64x1xf32>
    %32 = arith.addf %28, %31 : vector<64x1xf32>
    %33 = math.rsqrt %32 : vector<64x1xf32>
    %34 = vector.broadcast %33 : vector<64x1xf32> to vector<64x32xf32>
    %35 = arith.mulf %30, %34 : vector<64x32xf32>
    %36 = vector.broadcast %6 : vector<1x32xf32> to vector<64x32xf32>
    %37 = arith.mulf %35, %36 : vector<64x32xf32>
    %38 = vector.broadcast %7 : vector<1x32xf32> to vector<64x32xf32>
    %39 = arith.addf %37, %38 : vector<64x32xf32>
    %40 = arith.truncf %39 : vector<64x32xf32> to vector<64x32xbf16>
    %41 = arith.extf %40 : vector<64x32xbf16> to vector<64x32xf32>
    %42 = arith.subf %39, %41 : vector<64x32xf32>
    %43 = arith.truncf %42 : vector<64x32xf32> to vector<64x32xbf16>
    %44 = arith.truncf %13 : vector<32x96xf32> to vector<32x96xbf16>
    %45 = arith.extf %44 : vector<32x96xbf16> to vector<32x96xf32>
    %46 = arith.subf %13, %45 : vector<32x96xf32>
    %47 = arith.truncf %46 : vector<32x96xf32> to vector<32x96xbf16>
    %cst_15 = arith.constant dense<0.000000e+00> : vector<64x96xf32>
    %48 = tpu.matmul %40, %44, %cst_15 {dimension_numbers = #tpu.dot_dimension_numbers<[1], [0], [0], [1], [0, 0, 1, 1], [], []>} : vector<64x32xbf16>, vector<32x96xbf16>, vector<64x96xf32> -> vector<64x96xf32>
    %cst_16 = arith.constant dense<0.000000e+00> : vector<64x96xf32>
    %49 = tpu.matmul %40, %47, %cst_16 {dimension_numbers = #tpu.dot_dimension_numbers<[1], [0], [0], [1], [0, 0, 1, 1], [], []>} : vector<64x32xbf16>, vector<32x96xbf16>, vector<64x96xf32> -> vector<64x96xf32>
    %50 = arith.addf %48, %49 : vector<64x96xf32>
    %cst_17 = arith.constant dense<0.000000e+00> : vector<64x96xf32>
    %51 = tpu.matmul %43, %44, %cst_17 {dimension_numbers = #tpu.dot_dimension_numbers<[1], [0], [0], [1], [0, 0, 1, 1], [], []>} : vector<64x32xbf16>, vector<32x96xbf16>, vector<64x96xf32> -> vector<64x96xf32>
    %52 = arith.addf %50, %51 : vector<64x96xf32>
    %53 = vector.extract_strided_slice %52 {offsets = [0, 0], sizes = [64, 32], strides = [1, 1]} : vector<64x96xf32> to vector<64x32xf32>
    %54 = vector.extract_strided_slice %53 {offsets = [0, 0], sizes = [64, 8], strides = [1, 1]} : vector<64x32xf32> to vector<64x8xf32>
    %55 = vector.shape_cast %54 : vector<64x8xf32> to vector<2x32x8xf32>
    %56 = vector.extract_strided_slice %53 {offsets = [0, 8], sizes = [64, 8], strides = [1, 1]} : vector<64x32xf32> to vector<64x8xf32>
    %57 = vector.shape_cast %56 : vector<64x8xf32> to vector<2x32x8xf32>
    %58 = vector.extract_strided_slice %53 {offsets = [0, 16], sizes = [64, 8], strides = [1, 1]} : vector<64x32xf32> to vector<64x8xf32>
    %59 = vector.shape_cast %58 : vector<64x8xf32> to vector<2x32x8xf32>
    %60 = vector.extract_strided_slice %53 {offsets = [0, 24], sizes = [64, 8], strides = [1, 1]} : vector<64x32xf32> to vector<64x8xf32>
    %61 = vector.shape_cast %60 : vector<64x8xf32> to vector<2x32x8xf32>
    %62 = tpu.concatenate %55, %57, %59, %61 in 0 : vector<2x32x8xf32>, vector<2x32x8xf32>, vector<2x32x8xf32>, vector<2x32x8xf32> -> vector<8x32x8xf32>
    %cst_18 = arith.constant 0.353553385 : f32
    %63 = vector.broadcast %cst_18 : f32 to vector<8x32x8xf32>
    %64 = arith.mulf %62, %63 : vector<8x32x8xf32>
    %65 = vector.extract_strided_slice %52 {offsets = [0, 32], sizes = [64, 32], strides = [1, 1]} : vector<64x96xf32> to vector<64x32xf32>
    %66 = vector.extract_strided_slice %65 {offsets = [0, 0], sizes = [64, 8], strides = [1, 1]} : vector<64x32xf32> to vector<64x8xf32>
    %67 = vector.shape_cast %66 : vector<64x8xf32> to vector<2x32x8xf32>
    %68 = vector.extract_strided_slice %65 {offsets = [0, 8], sizes = [64, 8], strides = [1, 1]} : vector<64x32xf32> to vector<64x8xf32>
    %69 = vector.shape_cast %68 : vector<64x8xf32> to vector<2x32x8xf32>
    %70 = vector.extract_strided_slice %65 {offsets = [0, 16], sizes = [64, 8], strides = [1, 1]} : vector<64x32xf32> to vector<64x8xf32>
    %71 = vector.shape_cast %70 : vector<64x8xf32> to vector<2x32x8xf32>
    %72 = vector.extract_strided_slice %65 {offsets = [0, 24], sizes = [64, 8], strides = [1, 1]} : vector<64x32xf32> to vector<64x8xf32>
    %73 = vector.shape_cast %72 : vector<64x8xf32> to vector<2x32x8xf32>
    %74 = tpu.concatenate %67, %69, %71, %73 in 0 : vector<2x32x8xf32>, vector<2x32x8xf32>, vector<2x32x8xf32>, vector<2x32x8xf32> -> vector<8x32x8xf32>
    %75 = vector.extract_strided_slice %52 {offsets = [0, 64], sizes = [64, 32], strides = [1, 1]} : vector<64x96xf32> to vector<64x32xf32>
    %76 = vector.extract_strided_slice %75 {offsets = [0, 0], sizes = [64, 8], strides = [1, 1]} : vector<64x32xf32> to vector<64x8xf32>
    %77 = vector.shape_cast %76 : vector<64x8xf32> to vector<2x32x8xf32>
    %78 = vector.extract_strided_slice %75 {offsets = [0, 8], sizes = [64, 8], strides = [1, 1]} : vector<64x32xf32> to vector<64x8xf32>
    %79 = vector.shape_cast %78 : vector<64x8xf32> to vector<2x32x8xf32>
    %80 = vector.extract_strided_slice %75 {offsets = [0, 16], sizes = [64, 8], strides = [1, 1]} : vector<64x32xf32> to vector<64x8xf32>
    %81 = vector.shape_cast %80 : vector<64x8xf32> to vector<2x32x8xf32>
    %82 = vector.extract_strided_slice %75 {offsets = [0, 24], sizes = [64, 8], strides = [1, 1]} : vector<64x32xf32> to vector<64x8xf32>
    %83 = vector.shape_cast %82 : vector<64x8xf32> to vector<2x32x8xf32>
    %84 = tpu.concatenate %77, %79, %81, %83 in 0 : vector<2x32x8xf32>, vector<2x32x8xf32>, vector<2x32x8xf32>, vector<2x32x8xf32> -> vector<8x32x8xf32>
    %85 = arith.truncf %64 : vector<8x32x8xf32> to vector<8x32x8xbf16>
    %86 = arith.extf %85 : vector<8x32x8xbf16> to vector<8x32x8xf32>
    %87 = arith.subf %64, %86 : vector<8x32x8xf32>
    %88 = arith.truncf %87 : vector<8x32x8xf32> to vector<8x32x8xbf16>
    %89 = arith.truncf %74 : vector<8x32x8xf32> to vector<8x32x8xbf16>
    %90 = arith.extf %89 : vector<8x32x8xbf16> to vector<8x32x8xf32>
    %91 = arith.subf %74, %90 : vector<8x32x8xf32>
    %92 = arith.truncf %91 : vector<8x32x8xf32> to vector<8x32x8xbf16>
    "tpu.trace_start"() <{level = 10 : i32, message = "bqd,bkd->bqk"}> : () -> ()
    %cst_19 = arith.constant dense<0.000000e+00> : vector<8x32x32xf32>
    %93 = tpu.matmul %85, %89, %cst_19 {dimension_numbers = #tpu.dot_dimension_numbers<[2], [2], [1], [1], [0, 0, 0, 1, 1, 1], [0], [0]>} : vector<8x32x8xbf16>, vector<8x32x8xbf16>, vector<8x32x32xf32> -> vector<8x32x32xf32>
    %cst_20 = arith.constant dense<0.000000e+00> : vector<8x32x32xf32>
    %94 = tpu.matmul %85, %92, %cst_20 {dimension_numbers = #tpu.dot_dimension_numbers<[2], [2], [1], [1], [0, 0, 0, 1, 1, 1], [0], [0]>} : vector<8x32x8xbf16>, vector<8x32x8xbf16>, vector<8x32x32xf32> -> vector<8x32x32xf32>
    "tpu.trace_stop"() : () -> ()
    %95 = arith.addf %93, %94 : vector<8x32x32xf32>
    "tpu.trace_start"() <{level = 10 : i32, message = "bqd,bkd->bqk"}> : () -> ()
    %cst_21 = arith.constant dense<0.000000e+00> : vector<8x32x32xf32>
    %96 = tpu.matmul %88, %89, %cst_21 {dimension_numbers = #tpu.dot_dimension_numbers<[2], [2], [1], [1], [0, 0, 0, 1, 1, 1], [0], [0]>} : vector<8x32x8xbf16>, vector<8x32x8xbf16>, vector<8x32x32xf32> -> vector<8x32x32xf32>
    "tpu.trace_stop"() : () -> ()
    %97 = arith.addf %95, %96 : vector<8x32x32xf32>
    %cst_22 = arith.constant dense<0xFF800000> : vector<8x32xf32>
    %98 = vector.multi_reduction <maximumf>, %97, %cst_22 [2] : vector<8x32x32xf32> to vector<8x32xf32>
    %99 = vector.shape_cast %98 : vector<8x32xf32> to vector<8x32x1xf32>
    %100 = vector.broadcast %99 : vector<8x32x1xf32> to vector<8x32x32xf32>
    %101 = arith.subf %97, %100 : vector<8x32x32xf32>
    %102 = math.exp %101 : vector<8x32x32xf32>
    %cst_23 = arith.constant dense<0.000000e+00> : vector<8x32xf32>
    %103 = vector.multi_reduction <add>, %102, %cst_23 [2] : vector<8x32x32xf32> to vector<8x32xf32>
    %104 = vector.shape_cast %103 : vector<8x32xf32> to vector<8x32x1xf32>
    %105 = tpu.reciprocal %104 {approx = true} : vector<8x32x1xf32> -> vector<8x32x1xf32>
    %106 = arith.mulf %104, %105 : vector<8x32x1xf32>
    %cst_24 = arith.constant 2.000000e+00 : f32
    %107 = vector.broadcast %cst_24 : f32 to vector<8x32x1xf32>
    %108 = arith.subf %107, %106 : vector<8x32x1xf32>
    %109 = arith.mulf %105, %108 : vector<8x32x1xf32>
    %110 = vector.broadcast %109 : vector<8x32x1xf32> to vector<8x32x32xf32>
    %111 = arith.mulf %102, %110 : vector<8x32x32xf32>
    %112 = arith.truncf %111 : vector<8x32x32xf32> to vector<8x32x32xbf16>
    %113 = arith.extf %112 : vector<8x32x32xbf16> to vector<8x32x32xf32>
    %114 = arith.subf %111, %113 : vector<8x32x32xf32>
    %115 = arith.truncf %114 : vector<8x32x32xf32> to vector<8x32x32xbf16>
    %116 = arith.truncf %84 : vector<8x32x8xf32> to vector<8x32x8xbf16>
    %117 = arith.extf %116 : vector<8x32x8xbf16> to vector<8x32x8xf32>
    %118 = arith.subf %84, %117 : vector<8x32x8xf32>
    %119 = arith.truncf %118 : vector<8x32x8xf32> to vector<8x32x8xbf16>
    "tpu.trace_start"() <{level = 10 : i32, message = "bqk,bkd->bqd"}> : () -> ()
    %cst_25 = arith.constant dense<0.000000e+00> : vector<8x32x8xf32>
    %120 = tpu.matmul %112, %116, %cst_25 {dimension_numbers = #tpu.dot_dimension_numbers<[2], [1], [1], [2], [0, 0, 0, 1, 1, 2], [0], [0]>} : vector<8x32x32xbf16>, vector<8x32x8xbf16>, vector<8x32x8xf32> -> vector<8x32x8xf32>
    %cst_26 = arith.constant dense<0.000000e+00> : vector<8x32x8xf32>
    %121 = tpu.matmul %112, %119, %cst_26 {dimension_numbers = #tpu.dot_dimension_numbers<[2], [1], [1], [2], [0, 0, 0, 1, 1, 2], [0], [0]>} : vector<8x32x32xbf16>, vector<8x32x8xbf16>, vector<8x32x8xf32> -> vector<8x32x8xf32>
    "tpu.trace_stop"() : () -> ()
    %122 = arith.addf %120, %121 : vector<8x32x8xf32>
    "tpu.trace_start"() <{level = 10 : i32, message = "bqk,bkd->bqd"}> : () -> ()
    %cst_27 = arith.constant dense<0.000000e+00> : vector<8x32x8xf32>
    %123 = tpu.matmul %115, %116, %cst_27 {dimension_numbers = #tpu.dot_dimension_numbers<[2], [1], [1], [2], [0, 0, 0, 1, 1, 2], [0], [0]>} : vector<8x32x32xbf16>, vector<8x32x8xbf16>, vector<8x32x8xf32> -> vector<8x32x8xf32>
    "tpu.trace_stop"() : () -> ()
    %124 = arith.addf %122, %123 : vector<8x32x8xf32>
    %125 = vector.extract_strided_slice %124 {offsets = [0, 0, 0], sizes = [2, 32, 8], strides = [1, 1, 1]} : vector<8x32x8xf32> to vector<2x32x8xf32>
    %126 = vector.shape_cast %125 : vector<2x32x8xf32> to vector<64x8xf32>
    %127 = vector.extract_strided_slice %124 {offsets = [2, 0, 0], sizes = [2, 32, 8], strides = [1, 1, 1]} : vector<8x32x8xf32> to vector<2x32x8xf32>
    %128 = vector.shape_cast %127 : vector<2x32x8xf32> to vector<64x8xf32>
    %129 = vector.extract_strided_slice %124 {offsets = [4, 0, 0], sizes = [2, 32, 8], strides = [1, 1, 1]} : vector<8x32x8xf32> to vector<2x32x8xf32>
    %130 = vector.shape_cast %129 : vector<2x32x8xf32> to vector<64x8xf32>
    %131 = vector.extract_strided_slice %124 {offsets = [6, 0, 0], sizes = [2, 32, 8], strides = [1, 1, 1]} : vector<8x32x8xf32> to vector<2x32x8xf32>
    %132 = vector.shape_cast %131 : vector<2x32x8xf32> to vector<64x8xf32>
    %133 = tpu.concatenate %126, %128, %130, %132 in 1 : vector<64x8xf32>, vector<64x8xf32>, vector<64x8xf32>, vector<64x8xf32> -> vector<64x32xf32>
    %134 = arith.truncf %133 : vector<64x32xf32> to vector<64x32xbf16>
    %135 = arith.extf %134 : vector<64x32xbf16> to vector<64x32xf32>
    %136 = arith.subf %133, %135 : vector<64x32xf32>
    %137 = arith.truncf %136 : vector<64x32xf32> to vector<64x32xbf16>
    %138 = arith.truncf %14 : vector<32x32xf32> to vector<32x32xbf16>
    %139 = arith.extf %138 : vector<32x32xbf16> to vector<32x32xf32>
    %140 = arith.subf %14, %139 : vector<32x32xf32>
    %141 = arith.truncf %140 : vector<32x32xf32> to vector<32x32xbf16>
    %cst_28 = arith.constant dense<0.000000e+00> : vector<64x32xf32>
    %142 = tpu.matmul %134, %138, %cst_28 {dimension_numbers = #tpu.dot_dimension_numbers<[1], [0], [0], [1], [0, 0, 1, 1], [], []>} : vector<64x32xbf16>, vector<32x32xbf16>, vector<64x32xf32> -> vector<64x32xf32>
    %cst_29 = arith.constant dense<0.000000e+00> : vector<64x32xf32>
    %143 = tpu.matmul %134, %141, %cst_29 {dimension_numbers = #tpu.dot_dimension_numbers<[1], [0], [0], [1], [0, 0, 1, 1], [], []>} : vector<64x32xbf16>, vector<32x32xbf16>, vector<64x32xf32> -> vector<64x32xf32>
    %144 = arith.addf %142, %143 : vector<64x32xf32>
    %cst_30 = arith.constant dense<0.000000e+00> : vector<64x32xf32>
    %145 = tpu.matmul %137, %138, %cst_30 {dimension_numbers = #tpu.dot_dimension_numbers<[1], [0], [0], [1], [0, 0, 1, 1], [], []>} : vector<64x32xbf16>, vector<32x32xbf16>, vector<64x32xf32> -> vector<64x32xf32>
    %146 = arith.addf %144, %145 : vector<64x32xf32>
    %147 = arith.addf %1, %146 : vector<64x32xf32>
    %148 = vector.broadcast %8 : vector<1x32xf32> to vector<64x32xf32>
    %149 = arith.addf %147, %148 : vector<64x32xf32>
    %cst_31 = arith.constant dense<0.000000e+00> : vector<64xf32>
    %150 = vector.multi_reduction <add>, %149, %cst_31 [1] : vector<64x32xf32> to vector<64xf32>
    %151 = vector.shape_cast %150 : vector<64xf32> to vector<64x1xf32>
    %cst_32 = arith.constant 3.200000e+01 : f32
    %152 = vector.broadcast %cst_32 : f32 to vector<64x1xf32>
    %153 = arith.divf %151, %152 : vector<64x1xf32>
    %154 = vector.broadcast %153 : vector<64x1xf32> to vector<64x32xf32>
    %155 = arith.subf %149, %154 : vector<64x32xf32>
    %156 = arith.mulf %155, %155 : vector<64x32xf32>
    %cst_33 = arith.constant dense<0.000000e+00> : vector<64xf32>
    %157 = vector.multi_reduction <add>, %156, %cst_33 [1] : vector<64x32xf32> to vector<64xf32>
    %158 = vector.shape_cast %157 : vector<64xf32> to vector<64x1xf32>
    %cst_34 = arith.constant 3.200000e+01 : f32
    %159 = vector.broadcast %cst_34 : f32 to vector<64x1xf32>
    %160 = arith.divf %158, %159 : vector<64x1xf32>
    %161 = vector.broadcast %153 : vector<64x1xf32> to vector<64x32xf32>
    %162 = arith.subf %149, %161 : vector<64x32xf32>
    %cst_35 = arith.constant 9.99999974E-6 : f32
    %163 = vector.broadcast %cst_35 : f32 to vector<64x1xf32>
    %164 = arith.addf %160, %163 : vector<64x1xf32>
    %165 = math.rsqrt %164 : vector<64x1xf32>
    %166 = vector.broadcast %165 : vector<64x1xf32> to vector<64x32xf32>
    %167 = arith.mulf %162, %166 : vector<64x32xf32>
    %168 = vector.broadcast %9 : vector<1x32xf32> to vector<64x32xf32>
    %169 = arith.mulf %167, %168 : vector<64x32xf32>
    %170 = vector.broadcast %10 : vector<1x32xf32> to vector<64x32xf32>
    %171 = arith.addf %169, %170 : vector<64x32xf32>
    %172 = arith.truncf %171 : vector<64x32xf32> to vector<64x32xbf16>
    %173 = arith.extf %172 : vector<64x32xbf16> to vector<64x32xf32>
    %174 = arith.subf %171, %173 : vector<64x32xf32>
    %175 = arith.truncf %174 : vector<64x32xf32> to vector<64x32xbf16>
    %176 = arith.truncf %15 : vector<32x128xf32> to vector<32x128xbf16>
    %177 = arith.extf %176 : vector<32x128xbf16> to vector<32x128xf32>
    %178 = arith.subf %15, %177 : vector<32x128xf32>
    %179 = arith.truncf %178 : vector<32x128xf32> to vector<32x128xbf16>
    %cst_36 = arith.constant dense<0.000000e+00> : vector<64x128xf32>
    %180 = tpu.matmul %172, %176, %cst_36 {dimension_numbers = #tpu.dot_dimension_numbers<[1], [0], [0], [1], [0, 0, 1, 1], [], []>} : vector<64x32xbf16>, vector<32x128xbf16>, vector<64x128xf32> -> vector<64x128xf32>
    %cst_37 = arith.constant dense<0.000000e+00> : vector<64x128xf32>
    %181 = tpu.matmul %172, %179, %cst_37 {dimension_numbers = #tpu.dot_dimension_numbers<[1], [0], [0], [1], [0, 0, 1, 1], [], []>} : vector<64x32xbf16>, vector<32x128xbf16>, vector<64x128xf32> -> vector<64x128xf32>
    %182 = arith.addf %180, %181 : vector<64x128xf32>
    %cst_38 = arith.constant dense<0.000000e+00> : vector<64x128xf32>
    %183 = tpu.matmul %175, %176, %cst_38 {dimension_numbers = #tpu.dot_dimension_numbers<[1], [0], [0], [1], [0, 0, 1, 1], [], []>} : vector<64x32xbf16>, vector<32x128xbf16>, vector<64x128xf32> -> vector<64x128xf32>
    %184 = arith.addf %182, %183 : vector<64x128xf32>
    %185 = vector.broadcast %12 : vector<1x128xf32> to vector<64x128xf32>
    %186 = arith.addf %184, %185 : vector<64x128xf32>
    %cst_39 = arith.constant 5.000000e-01 : f32
    %187 = vector.broadcast %cst_39 : f32 to vector<64x128xf32>
    %188 = arith.mulf %187, %186 : vector<64x128xf32>
    %cst_40 = arith.constant 0.707106769 : f32
    %189 = vector.broadcast %cst_40 : f32 to vector<64x128xf32>
    %190 = arith.mulf %186, %189 : vector<64x128xf32>
    %191 = math.erf %190 : vector<64x128xf32>
    %cst_41 = arith.constant 1.000000e+00 : f32
    %192 = vector.broadcast %cst_41 : f32 to vector<64x128xf32>
    %193 = arith.addf %192, %191 : vector<64x128xf32>
    %194 = arith.mulf %188, %193 : vector<64x128xf32>
    %195 = arith.truncf %194 : vector<64x128xf32> to vector<64x128xbf16>
    %196 = arith.extf %195 : vector<64x128xbf16> to vector<64x128xf32>
    %197 = arith.subf %194, %196 : vector<64x128xf32>
    %198 = arith.truncf %197 : vector<64x128xf32> to vector<64x128xbf16>
    %199 = arith.truncf %17 : vector<128x32xf32> to vector<128x32xbf16>
    %200 = arith.extf %199 : vector<128x32xbf16> to vector<128x32xf32>
    %201 = arith.subf %17, %200 : vector<128x32xf32>
    %202 = arith.truncf %201 : vector<128x32xf32> to vector<128x32xbf16>
    %cst_42 = arith.constant dense<0.000000e+00> : vector<64x32xf32>
    %203 = tpu.matmul %195, %199, %cst_42 {dimension_numbers = #tpu.dot_dimension_numbers<[1], [0], [0], [1], [0, 0, 1, 1], [], []>} : vector<64x128xbf16>, vector<128x32xbf16>, vector<64x32xf32> -> vector<64x32xf32>
    %cst_43 = arith.constant dense<0.000000e+00> : vector<64x32xf32>
    %204 = tpu.matmul %195, %202, %cst_43 {dimension_numbers = #tpu.dot_dimension_numbers<[1], [0], [0], [1], [0, 0, 1, 1], [], []>} : vector<64x128xbf16>, vector<128x32xbf16>, vector<64x32xf32> -> vector<64x32xf32>
    %205 = arith.addf %203, %204 : vector<64x32xf32>
    %cst_44 = arith.constant dense<0.000000e+00> : vector<64x32xf32>
    %206 = tpu.matmul %198, %199, %cst_44 {dimension_numbers = #tpu.dot_dimension_numbers<[1], [0], [0], [1], [0, 0, 1, 1], [], []>} : vector<64x128xbf16>, vector<128x32xbf16>, vector<64x32xf32> -> vector<64x32xf32>
    %207 = arith.addf %205, %206 : vector<64x32xf32>
    %208 = arith.addf %149, %207 : vector<64x32xf32>
    %209 = vector.broadcast %11 : vector<1x32xf32> to vector<64x32xf32>
    %210 = arith.addf %208, %209 : vector<64x32xf32>
    %c1 = arith.constant 1 : index
    %c0_45 = arith.constant 0 : index
    %c0_46 = arith.constant 0 : index
    %211 = vector.load %arg1[%c1, %c0_45, %c0_46] : memref<2x7x128xf32, #tpu.memory_space<vmem>>, vector<1x7x128xf32>
    %212 = vector.shape_cast %211 : vector<1x7x128xf32> to vector<7x128xf32>
    %c1_47 = arith.constant 1 : index
    %c0_48 = arith.constant 0 : index
    %c0_49 = arith.constant 0 : index
    %213 = vector.load %arg2[%c1_47, %c0_48, %c0_49] : memref<2x32x256xf32, #tpu.memory_space<vmem>>, vector<1x32x256xf32>
    %214 = vector.shape_cast %213 : vector<1x32x256xf32> to vector<32x256xf32>
    %215 = vector.extract_strided_slice %212 {offsets = [0, 0], sizes = [1, 32], strides = [1, 1]} : vector<7x128xf32> to vector<1x32xf32>
    %216 = vector.extract_strided_slice %212 {offsets = [1, 0], sizes = [1, 32], strides = [1, 1]} : vector<7x128xf32> to vector<1x32xf32>
    %217 = vector.extract_strided_slice %212 {offsets = [2, 0], sizes = [1, 32], strides = [1, 1]} : vector<7x128xf32> to vector<1x32xf32>
    %218 = vector.extract_strided_slice %212 {offsets = [3, 0], sizes = [1, 32], strides = [1, 1]} : vector<7x128xf32> to vector<1x32xf32>
    %219 = vector.extract_strided_slice %212 {offsets = [4, 0], sizes = [1, 32], strides = [1, 1]} : vector<7x128xf32> to vector<1x32xf32>
    %220 = vector.extract_strided_slice %212 {offsets = [5, 0], sizes = [1, 32], strides = [1, 1]} : vector<7x128xf32> to vector<1x32xf32>
    %221 = vector.extract_strided_slice %212 {offsets = [6, 0], sizes = [1, 128], strides = [1, 1]} : vector<7x128xf32> to vector<1x128xf32>
    %222 = vector.extract_strided_slice %214 {offsets = [0, 0], sizes = [32, 96], strides = [1, 1]} : vector<32x256xf32> to vector<32x96xf32>
    %223 = vector.extract_strided_slice %214 {offsets = [0, 96], sizes = [32, 32], strides = [1, 1]} : vector<32x256xf32> to vector<32x32xf32>
    %224 = vector.extract_strided_slice %214 {offsets = [0, 128], sizes = [32, 128], strides = [1, 1]} : vector<32x256xf32> to vector<32x128xf32>
    %c1_50 = arith.constant 1 : index
    %c0_51 = arith.constant 0 : index
    %c0_52 = arith.constant 0 : index
    %225 = vector.load %arg3[%c1_50, %c0_51, %c0_52] : memref<2x128x32xf32, #tpu.memory_space<vmem>>, vector<1x128x32xf32>
    %226 = vector.shape_cast %225 : vector<1x128x32xf32> to vector<128x32xf32>
    %cst_53 = arith.constant dense<0.000000e+00> : vector<64xf32>
    %227 = vector.multi_reduction <add>, %210, %cst_53 [1] : vector<64x32xf32> to vector<64xf32>
    %228 = vector.shape_cast %227 : vector<64xf32> to vector<64x1xf32>
    %cst_54 = arith.constant 3.200000e+01 : f32
    %229 = vector.broadcast %cst_54 : f32 to vector<64x1xf32>
    %230 = arith.divf %228, %229 : vector<64x1xf32>
    %231 = vector.broadcast %230 : vector<64x1xf32> to vector<64x32xf32>
    %232 = arith.subf %210, %231 : vector<64x32xf32>
    %233 = arith.mulf %232, %232 : vector<64x32xf32>
    %cst_55 = arith.constant dense<0.000000e+00> : vector<64xf32>
    %234 = vector.multi_reduction <add>, %233, %cst_55 [1] : vector<64x32xf32> to vector<64xf32>
    %235 = vector.shape_cast %234 : vector<64xf32> to vector<64x1xf32>
    %cst_56 = arith.constant 3.200000e+01 : f32
    %236 = vector.broadcast %cst_56 : f32 to vector<64x1xf32>
    %237 = arith.divf %235, %236 : vector<64x1xf32>
    %238 = vector.broadcast %230 : vector<64x1xf32> to vector<64x32xf32>
    %239 = arith.subf %210, %238 : vector<64x32xf32>
    %cst_57 = arith.constant 9.99999974E-6 : f32
    %240 = vector.broadcast %cst_57 : f32 to vector<64x1xf32>
    %241 = arith.addf %237, %240 : vector<64x1xf32>
    %242 = math.rsqrt %241 : vector<64x1xf32>
    %243 = vector.broadcast %242 : vector<64x1xf32> to vector<64x32xf32>
    %244 = arith.mulf %239, %243 : vector<64x32xf32>
    %245 = vector.broadcast %215 : vector<1x32xf32> to vector<64x32xf32>
    %246 = arith.mulf %244, %245 : vector<64x32xf32>
    %247 = vector.broadcast %216 : vector<1x32xf32> to vector<64x32xf32>
    %248 = arith.addf %246, %247 : vector<64x32xf32>
    %249 = arith.truncf %248 : vector<64x32xf32> to vector<64x32xbf16>
    %250 = arith.extf %249 : vector<64x32xbf16> to vector<64x32xf32>
    %251 = arith.subf %248, %250 : vector<64x32xf32>
    %252 = arith.truncf %251 : vector<64x32xf32> to vector<64x32xbf16>
    %253 = arith.truncf %222 : vector<32x96xf32> to vector<32x96xbf16>
    %254 = arith.extf %253 : vector<32x96xbf16> to vector<32x96xf32>
    %255 = arith.subf %222, %254 : vector<32x96xf32>
    %256 = arith.truncf %255 : vector<32x96xf32> to vector<32x96xbf16>
    %cst_58 = arith.constant dense<0.000000e+00> : vector<64x96xf32>
    %257 = tpu.matmul %249, %253, %cst_58 {dimension_numbers = #tpu.dot_dimension_numbers<[1], [0], [0], [1], [0, 0, 1, 1], [], []>} : vector<64x32xbf16>, vector<32x96xbf16>, vector<64x96xf32> -> vector<64x96xf32>
    %cst_59 = arith.constant dense<0.000000e+00> : vector<64x96xf32>
    %258 = tpu.matmul %249, %256, %cst_59 {dimension_numbers = #tpu.dot_dimension_numbers<[1], [0], [0], [1], [0, 0, 1, 1], [], []>} : vector<64x32xbf16>, vector<32x96xbf16>, vector<64x96xf32> -> vector<64x96xf32>
    %259 = arith.addf %257, %258 : vector<64x96xf32>
    %cst_60 = arith.constant dense<0.000000e+00> : vector<64x96xf32>
    %260 = tpu.matmul %252, %253, %cst_60 {dimension_numbers = #tpu.dot_dimension_numbers<[1], [0], [0], [1], [0, 0, 1, 1], [], []>} : vector<64x32xbf16>, vector<32x96xbf16>, vector<64x96xf32> -> vector<64x96xf32>
    %261 = arith.addf %259, %260 : vector<64x96xf32>
    %262 = vector.extract_strided_slice %261 {offsets = [0, 0], sizes = [64, 32], strides = [1, 1]} : vector<64x96xf32> to vector<64x32xf32>
    %263 = vector.extract_strided_slice %262 {offsets = [0, 0], sizes = [64, 8], strides = [1, 1]} : vector<64x32xf32> to vector<64x8xf32>
    %264 = vector.shape_cast %263 : vector<64x8xf32> to vector<2x32x8xf32>
    %265 = vector.extract_strided_slice %262 {offsets = [0, 8], sizes = [64, 8], strides = [1, 1]} : vector<64x32xf32> to vector<64x8xf32>
    %266 = vector.shape_cast %265 : vector<64x8xf32> to vector<2x32x8xf32>
    %267 = vector.extract_strided_slice %262 {offsets = [0, 16], sizes = [64, 8], strides = [1, 1]} : vector<64x32xf32> to vector<64x8xf32>
    %268 = vector.shape_cast %267 : vector<64x8xf32> to vector<2x32x8xf32>
    %269 = vector.extract_strided_slice %262 {offsets = [0, 24], sizes = [64, 8], strides = [1, 1]} : vector<64x32xf32> to vector<64x8xf32>
    %270 = vector.shape_cast %269 : vector<64x8xf32> to vector<2x32x8xf32>
    %271 = tpu.concatenate %264, %266, %268, %270 in 0 : vector<2x32x8xf32>, vector<2x32x8xf32>, vector<2x32x8xf32>, vector<2x32x8xf32> -> vector<8x32x8xf32>
    %cst_61 = arith.constant 0.353553385 : f32
    %272 = vector.broadcast %cst_61 : f32 to vector<8x32x8xf32>
    %273 = arith.mulf %271, %272 : vector<8x32x8xf32>
    %274 = vector.extract_strided_slice %261 {offsets = [0, 32], sizes = [64, 32], strides = [1, 1]} : vector<64x96xf32> to vector<64x32xf32>
    %275 = vector.extract_strided_slice %274 {offsets = [0, 0], sizes = [64, 8], strides = [1, 1]} : vector<64x32xf32> to vector<64x8xf32>
    %276 = vector.shape_cast %275 : vector<64x8xf32> to vector<2x32x8xf32>
    %277 = vector.extract_strided_slice %274 {offsets = [0, 8], sizes = [64, 8], strides = [1, 1]} : vector<64x32xf32> to vector<64x8xf32>
    %278 = vector.shape_cast %277 : vector<64x8xf32> to vector<2x32x8xf32>
    %279 = vector.extract_strided_slice %274 {offsets = [0, 16], sizes = [64, 8], strides = [1, 1]} : vector<64x32xf32> to vector<64x8xf32>
    %280 = vector.shape_cast %279 : vector<64x8xf32> to vector<2x32x8xf32>
    %281 = vector.extract_strided_slice %274 {offsets = [0, 24], sizes = [64, 8], strides = [1, 1]} : vector<64x32xf32> to vector<64x8xf32>
    %282 = vector.shape_cast %281 : vector<64x8xf32> to vector<2x32x8xf32>
    %283 = tpu.concatenate %276, %278, %280, %282 in 0 : vector<2x32x8xf32>, vector<2x32x8xf32>, vector<2x32x8xf32>, vector<2x32x8xf32> -> vector<8x32x8xf32>
    %284 = vector.extract_strided_slice %261 {offsets = [0, 64], sizes = [64, 32], strides = [1, 1]} : vector<64x96xf32> to vector<64x32xf32>
    %285 = vector.extract_strided_slice %284 {offsets = [0, 0], sizes = [64, 8], strides = [1, 1]} : vector<64x32xf32> to vector<64x8xf32>
    %286 = vector.shape_cast %285 : vector<64x8xf32> to vector<2x32x8xf32>
    %287 = vector.extract_strided_slice %284 {offsets = [0, 8], sizes = [64, 8], strides = [1, 1]} : vector<64x32xf32> to vector<64x8xf32>
    %288 = vector.shape_cast %287 : vector<64x8xf32> to vector<2x32x8xf32>
    %289 = vector.extract_strided_slice %284 {offsets = [0, 16], sizes = [64, 8], strides = [1, 1]} : vector<64x32xf32> to vector<64x8xf32>
    %290 = vector.shape_cast %289 : vector<64x8xf32> to vector<2x32x8xf32>
    %291 = vector.extract_strided_slice %284 {offsets = [0, 24], sizes = [64, 8], strides = [1, 1]} : vector<64x32xf32> to vector<64x8xf32>
    %292 = vector.shape_cast %291 : vector<64x8xf32> to vector<2x32x8xf32>
    %293 = tpu.concatenate %286, %288, %290, %292 in 0 : vector<2x32x8xf32>, vector<2x32x8xf32>, vector<2x32x8xf32>, vector<2x32x8xf32> -> vector<8x32x8xf32>
    %294 = arith.truncf %273 : vector<8x32x8xf32> to vector<8x32x8xbf16>
    %295 = arith.extf %294 : vector<8x32x8xbf16> to vector<8x32x8xf32>
    %296 = arith.subf %273, %295 : vector<8x32x8xf32>
    %297 = arith.truncf %296 : vector<8x32x8xf32> to vector<8x32x8xbf16>
    %298 = arith.truncf %283 : vector<8x32x8xf32> to vector<8x32x8xbf16>
    %299 = arith.extf %298 : vector<8x32x8xbf16> to vector<8x32x8xf32>
    %300 = arith.subf %283, %299 : vector<8x32x8xf32>
    %301 = arith.truncf %300 : vector<8x32x8xf32> to vector<8x32x8xbf16>
    "tpu.trace_start"() <{level = 10 : i32, message = "bqd,bkd->bqk"}> : () -> ()
    %cst_62 = arith.constant dense<0.000000e+00> : vector<8x32x32xf32>
    %302 = tpu.matmul %294, %298, %cst_62 {dimension_numbers = #tpu.dot_dimension_numbers<[2], [2], [1], [1], [0, 0, 0, 1, 1, 1], [0], [0]>} : vector<8x32x8xbf16>, vector<8x32x8xbf16>, vector<8x32x32xf32> -> vector<8x32x32xf32>
    %cst_63 = arith.constant dense<0.000000e+00> : vector<8x32x32xf32>
    %303 = tpu.matmul %294, %301, %cst_63 {dimension_numbers = #tpu.dot_dimension_numbers<[2], [2], [1], [1], [0, 0, 0, 1, 1, 1], [0], [0]>} : vector<8x32x8xbf16>, vector<8x32x8xbf16>, vector<8x32x32xf32> -> vector<8x32x32xf32>
    "tpu.trace_stop"() : () -> ()
    %304 = arith.addf %302, %303 : vector<8x32x32xf32>
    "tpu.trace_start"() <{level = 10 : i32, message = "bqd,bkd->bqk"}> : () -> ()
    %cst_64 = arith.constant dense<0.000000e+00> : vector<8x32x32xf32>
    %305 = tpu.matmul %297, %298, %cst_64 {dimension_numbers = #tpu.dot_dimension_numbers<[2], [2], [1], [1], [0, 0, 0, 1, 1, 1], [0], [0]>} : vector<8x32x8xbf16>, vector<8x32x8xbf16>, vector<8x32x32xf32> -> vector<8x32x32xf32>
    "tpu.trace_stop"() : () -> ()
    %306 = arith.addf %304, %305 : vector<8x32x32xf32>
    %cst_65 = arith.constant dense<0xFF800000> : vector<8x32xf32>
    %307 = vector.multi_reduction <maximumf>, %306, %cst_65 [2] : vector<8x32x32xf32> to vector<8x32xf32>
    %308 = vector.shape_cast %307 : vector<8x32xf32> to vector<8x32x1xf32>
    %309 = vector.broadcast %308 : vector<8x32x1xf32> to vector<8x32x32xf32>
    %310 = arith.subf %306, %309 : vector<8x32x32xf32>
    %311 = math.exp %310 : vector<8x32x32xf32>
    %cst_66 = arith.constant dense<0.000000e+00> : vector<8x32xf32>
    %312 = vector.multi_reduction <add>, %311, %cst_66 [2] : vector<8x32x32xf32> to vector<8x32xf32>
    %313 = vector.shape_cast %312 : vector<8x32xf32> to vector<8x32x1xf32>
    %314 = tpu.reciprocal %313 {approx = true} : vector<8x32x1xf32> -> vector<8x32x1xf32>
    %315 = arith.mulf %313, %314 : vector<8x32x1xf32>
    %cst_67 = arith.constant 2.000000e+00 : f32
    %316 = vector.broadcast %cst_67 : f32 to vector<8x32x1xf32>
    %317 = arith.subf %316, %315 : vector<8x32x1xf32>
    %318 = arith.mulf %314, %317 : vector<8x32x1xf32>
    %319 = vector.broadcast %318 : vector<8x32x1xf32> to vector<8x32x32xf32>
    %320 = arith.mulf %311, %319 : vector<8x32x32xf32>
    %321 = arith.truncf %320 : vector<8x32x32xf32> to vector<8x32x32xbf16>
    %322 = arith.extf %321 : vector<8x32x32xbf16> to vector<8x32x32xf32>
    %323 = arith.subf %320, %322 : vector<8x32x32xf32>
    %324 = arith.truncf %323 : vector<8x32x32xf32> to vector<8x32x32xbf16>
    %325 = arith.truncf %293 : vector<8x32x8xf32> to vector<8x32x8xbf16>
    %326 = arith.extf %325 : vector<8x32x8xbf16> to vector<8x32x8xf32>
    %327 = arith.subf %293, %326 : vector<8x32x8xf32>
    %328 = arith.truncf %327 : vector<8x32x8xf32> to vector<8x32x8xbf16>
    "tpu.trace_start"() <{level = 10 : i32, message = "bqk,bkd->bqd"}> : () -> ()
    %cst_68 = arith.constant dense<0.000000e+00> : vector<8x32x8xf32>
    %329 = tpu.matmul %321, %325, %cst_68 {dimension_numbers = #tpu.dot_dimension_numbers<[2], [1], [1], [2], [0, 0, 0, 1, 1, 2], [0], [0]>} : vector<8x32x32xbf16>, vector<8x32x8xbf16>, vector<8x32x8xf32> -> vector<8x32x8xf32>
    %cst_69 = arith.constant dense<0.000000e+00> : vector<8x32x8xf32>
    %330 = tpu.matmul %321, %328, %cst_69 {dimension_numbers = #tpu.dot_dimension_numbers<[2], [1], [1], [2], [0, 0, 0, 1, 1, 2], [0], [0]>} : vector<8x32x32xbf16>, vector<8x32x8xbf16>, vector<8x32x8xf32> -> vector<8x32x8xf32>
    "tpu.trace_stop"() : () -> ()
    %331 = arith.addf %329, %330 : vector<8x32x8xf32>
    "tpu.trace_start"() <{level = 10 : i32, message = "bqk,bkd->bqd"}> : () -> ()
    %cst_70 = arith.constant dense<0.000000e+00> : vector<8x32x8xf32>
    %332 = tpu.matmul %324, %325, %cst_70 {dimension_numbers = #tpu.dot_dimension_numbers<[2], [1], [1], [2], [0, 0, 0, 1, 1, 2], [0], [0]>} : vector<8x32x32xbf16>, vector<8x32x8xbf16>, vector<8x32x8xf32> -> vector<8x32x8xf32>
    "tpu.trace_stop"() : () -> ()
    %333 = arith.addf %331, %332 : vector<8x32x8xf32>
    %334 = vector.extract_strided_slice %333 {offsets = [0, 0, 0], sizes = [2, 32, 8], strides = [1, 1, 1]} : vector<8x32x8xf32> to vector<2x32x8xf32>
    %335 = vector.shape_cast %334 : vector<2x32x8xf32> to vector<64x8xf32>
    %336 = vector.extract_strided_slice %333 {offsets = [2, 0, 0], sizes = [2, 32, 8], strides = [1, 1, 1]} : vector<8x32x8xf32> to vector<2x32x8xf32>
    %337 = vector.shape_cast %336 : vector<2x32x8xf32> to vector<64x8xf32>
    %338 = vector.extract_strided_slice %333 {offsets = [4, 0, 0], sizes = [2, 32, 8], strides = [1, 1, 1]} : vector<8x32x8xf32> to vector<2x32x8xf32>
    %339 = vector.shape_cast %338 : vector<2x32x8xf32> to vector<64x8xf32>
    %340 = vector.extract_strided_slice %333 {offsets = [6, 0, 0], sizes = [2, 32, 8], strides = [1, 1, 1]} : vector<8x32x8xf32> to vector<2x32x8xf32>
    %341 = vector.shape_cast %340 : vector<2x32x8xf32> to vector<64x8xf32>
    %342 = tpu.concatenate %335, %337, %339, %341 in 1 : vector<64x8xf32>, vector<64x8xf32>, vector<64x8xf32>, vector<64x8xf32> -> vector<64x32xf32>
    %343 = arith.truncf %342 : vector<64x32xf32> to vector<64x32xbf16>
    %344 = arith.extf %343 : vector<64x32xbf16> to vector<64x32xf32>
    %345 = arith.subf %342, %344 : vector<64x32xf32>
    %346 = arith.truncf %345 : vector<64x32xf32> to vector<64x32xbf16>
    %347 = arith.truncf %223 : vector<32x32xf32> to vector<32x32xbf16>
    %348 = arith.extf %347 : vector<32x32xbf16> to vector<32x32xf32>
    %349 = arith.subf %223, %348 : vector<32x32xf32>
    %350 = arith.truncf %349 : vector<32x32xf32> to vector<32x32xbf16>
    %cst_71 = arith.constant dense<0.000000e+00> : vector<64x32xf32>
    %351 = tpu.matmul %343, %347, %cst_71 {dimension_numbers = #tpu.dot_dimension_numbers<[1], [0], [0], [1], [0, 0, 1, 1], [], []>} : vector<64x32xbf16>, vector<32x32xbf16>, vector<64x32xf32> -> vector<64x32xf32>
    %cst_72 = arith.constant dense<0.000000e+00> : vector<64x32xf32>
    %352 = tpu.matmul %343, %350, %cst_72 {dimension_numbers = #tpu.dot_dimension_numbers<[1], [0], [0], [1], [0, 0, 1, 1], [], []>} : vector<64x32xbf16>, vector<32x32xbf16>, vector<64x32xf32> -> vector<64x32xf32>
    %353 = arith.addf %351, %352 : vector<64x32xf32>
    %cst_73 = arith.constant dense<0.000000e+00> : vector<64x32xf32>
    %354 = tpu.matmul %346, %347, %cst_73 {dimension_numbers = #tpu.dot_dimension_numbers<[1], [0], [0], [1], [0, 0, 1, 1], [], []>} : vector<64x32xbf16>, vector<32x32xbf16>, vector<64x32xf32> -> vector<64x32xf32>
    %355 = arith.addf %353, %354 : vector<64x32xf32>
    %356 = arith.addf %210, %355 : vector<64x32xf32>
    %357 = vector.broadcast %217 : vector<1x32xf32> to vector<64x32xf32>
    %358 = arith.addf %356, %357 : vector<64x32xf32>
    %cst_74 = arith.constant dense<0.000000e+00> : vector<64xf32>
    %359 = vector.multi_reduction <add>, %358, %cst_74 [1] : vector<64x32xf32> to vector<64xf32>
    %360 = vector.shape_cast %359 : vector<64xf32> to vector<64x1xf32>
    %cst_75 = arith.constant 3.200000e+01 : f32
    %361 = vector.broadcast %cst_75 : f32 to vector<64x1xf32>
    %362 = arith.divf %360, %361 : vector<64x1xf32>
    %363 = vector.broadcast %362 : vector<64x1xf32> to vector<64x32xf32>
    %364 = arith.subf %358, %363 : vector<64x32xf32>
    %365 = arith.mulf %364, %364 : vector<64x32xf32>
    %cst_76 = arith.constant dense<0.000000e+00> : vector<64xf32>
    %366 = vector.multi_reduction <add>, %365, %cst_76 [1] : vector<64x32xf32> to vector<64xf32>
    %367 = vector.shape_cast %366 : vector<64xf32> to vector<64x1xf32>
    %cst_77 = arith.constant 3.200000e+01 : f32
    %368 = vector.broadcast %cst_77 : f32 to vector<64x1xf32>
    %369 = arith.divf %367, %368 : vector<64x1xf32>
    %370 = vector.broadcast %362 : vector<64x1xf32> to vector<64x32xf32>
    %371 = arith.subf %358, %370 : vector<64x32xf32>
    %cst_78 = arith.constant 9.99999974E-6 : f32
    %372 = vector.broadcast %cst_78 : f32 to vector<64x1xf32>
    %373 = arith.addf %369, %372 : vector<64x1xf32>
    %374 = math.rsqrt %373 : vector<64x1xf32>
    %375 = vector.broadcast %374 : vector<64x1xf32> to vector<64x32xf32>
    %376 = arith.mulf %371, %375 : vector<64x32xf32>
    %377 = vector.broadcast %218 : vector<1x32xf32> to vector<64x32xf32>
    %378 = arith.mulf %376, %377 : vector<64x32xf32>
    %379 = vector.broadcast %219 : vector<1x32xf32> to vector<64x32xf32>
    %380 = arith.addf %378, %379 : vector<64x32xf32>
    %381 = arith.truncf %380 : vector<64x32xf32> to vector<64x32xbf16>
    %382 = arith.extf %381 : vector<64x32xbf16> to vector<64x32xf32>
    %383 = arith.subf %380, %382 : vector<64x32xf32>
    %384 = arith.truncf %383 : vector<64x32xf32> to vector<64x32xbf16>
    %385 = arith.truncf %224 : vector<32x128xf32> to vector<32x128xbf16>
    %386 = arith.extf %385 : vector<32x128xbf16> to vector<32x128xf32>
    %387 = arith.subf %224, %386 : vector<32x128xf32>
    %388 = arith.truncf %387 : vector<32x128xf32> to vector<32x128xbf16>
    %cst_79 = arith.constant dense<0.000000e+00> : vector<64x128xf32>
    %389 = tpu.matmul %381, %385, %cst_79 {dimension_numbers = #tpu.dot_dimension_numbers<[1], [0], [0], [1], [0, 0, 1, 1], [], []>} : vector<64x32xbf16>, vector<32x128xbf16>, vector<64x128xf32> -> vector<64x128xf32>
    %cst_80 = arith.constant dense<0.000000e+00> : vector<64x128xf32>
    %390 = tpu.matmul %381, %388, %cst_80 {dimension_numbers = #tpu.dot_dimension_numbers<[1], [0], [0], [1], [0, 0, 1, 1], [], []>} : vector<64x32xbf16>, vector<32x128xbf16>, vector<64x128xf32> -> vector<64x128xf32>
    %391 = arith.addf %389, %390 : vector<64x128xf32>
    %cst_81 = arith.constant dense<0.000000e+00> : vector<64x128xf32>
    %392 = tpu.matmul %384, %385, %cst_81 {dimension_numbers = #tpu.dot_dimension_numbers<[1], [0], [0], [1], [0, 0, 1, 1], [], []>} : vector<64x32xbf16>, vector<32x128xbf16>, vector<64x128xf32> -> vector<64x128xf32>
    %393 = arith.addf %391, %392 : vector<64x128xf32>
    %394 = vector.broadcast %221 : vector<1x128xf32> to vector<64x128xf32>
    %395 = arith.addf %393, %394 : vector<64x128xf32>
    %cst_82 = arith.constant 5.000000e-01 : f32
    %396 = vector.broadcast %cst_82 : f32 to vector<64x128xf32>
    %397 = arith.mulf %396, %395 : vector<64x128xf32>
    %cst_83 = arith.constant 0.707106769 : f32
    %398 = vector.broadcast %cst_83 : f32 to vector<64x128xf32>
    %399 = arith.mulf %395, %398 : vector<64x128xf32>
    %400 = math.erf %399 : vector<64x128xf32>
    %cst_84 = arith.constant 1.000000e+00 : f32
    %401 = vector.broadcast %cst_84 : f32 to vector<64x128xf32>
    %402 = arith.addf %401, %400 : vector<64x128xf32>
    %403 = arith.mulf %397, %402 : vector<64x128xf32>
    %404 = arith.truncf %403 : vector<64x128xf32> to vector<64x128xbf16>
    %405 = arith.extf %404 : vector<64x128xbf16> to vector<64x128xf32>
    %406 = arith.subf %403, %405 : vector<64x128xf32>
    %407 = arith.truncf %406 : vector<64x128xf32> to vector<64x128xbf16>
    %408 = arith.truncf %226 : vector<128x32xf32> to vector<128x32xbf16>
    %409 = arith.extf %408 : vector<128x32xbf16> to vector<128x32xf32>
    %410 = arith.subf %226, %409 : vector<128x32xf32>
    %411 = arith.truncf %410 : vector<128x32xf32> to vector<128x32xbf16>
    %cst_85 = arith.constant dense<0.000000e+00> : vector<64x32xf32>
    %412 = tpu.matmul %404, %408, %cst_85 {dimension_numbers = #tpu.dot_dimension_numbers<[1], [0], [0], [1], [0, 0, 1, 1], [], []>} : vector<64x128xbf16>, vector<128x32xbf16>, vector<64x32xf32> -> vector<64x32xf32>
    %cst_86 = arith.constant dense<0.000000e+00> : vector<64x32xf32>
    %413 = tpu.matmul %404, %411, %cst_86 {dimension_numbers = #tpu.dot_dimension_numbers<[1], [0], [0], [1], [0, 0, 1, 1], [], []>} : vector<64x128xbf16>, vector<128x32xbf16>, vector<64x32xf32> -> vector<64x32xf32>
    %414 = arith.addf %412, %413 : vector<64x32xf32>
    %cst_87 = arith.constant dense<0.000000e+00> : vector<64x32xf32>
    %415 = tpu.matmul %407, %408, %cst_87 {dimension_numbers = #tpu.dot_dimension_numbers<[1], [0], [0], [1], [0, 0, 1, 1], [], []>} : vector<64x128xbf16>, vector<128x32xbf16>, vector<64x32xf32> -> vector<64x32xf32>
    %416 = arith.addf %414, %415 : vector<64x32xf32>
    %417 = arith.addf %358, %416 : vector<64x32xf32>
    %418 = vector.broadcast %220 : vector<1x32xf32> to vector<64x32xf32>
    %419 = arith.addf %417, %418 : vector<64x32xf32>
    %c0_88 = arith.constant 0 : index
    %c0_89 = arith.constant 0 : index
    %420 = vector.load %arg4[%c0_88, %c0_89] : memref<35x128xf32, #tpu.memory_space<vmem>>, vector<35x128xf32>
    %421 = vector.extract_strided_slice %420 {offsets = [0, 0], sizes = [32, 128], strides = [1, 1]} : vector<35x128xf32> to vector<32x128xf32>
    %422 = vector.extract_strided_slice %420 {offsets = [32, 0], sizes = [1, 32], strides = [1, 1]} : vector<35x128xf32> to vector<1x32xf32>
    %423 = vector.extract_strided_slice %420 {offsets = [33, 0], sizes = [1, 32], strides = [1, 1]} : vector<35x128xf32> to vector<1x32xf32>
    %424 = vector.extract_strided_slice %420 {offsets = [34, 0], sizes = [1, 128], strides = [1, 1]} : vector<35x128xf32> to vector<1x128xf32>
    %425 = vector.shape_cast %419 : vector<64x32xf32> to vector<2x32x32xf32>
    %426 = vector.extract_strided_slice %425 {offsets = [0, 16, 0], sizes = [2, 16, 32], strides = [1, 1, 1]} : vector<2x32x32xf32> to vector<2x16x32xf32>
    %427 = vector.shape_cast %426 : vector<2x16x32xf32> to vector<32x32xf32>
    %cst_90 = arith.constant dense<0.000000e+00> : vector<32xf32>
    %428 = vector.multi_reduction <add>, %427, %cst_90 [1] : vector<32x32xf32> to vector<32xf32>
    %429 = vector.shape_cast %428 : vector<32xf32> to vector<32x1xf32>
    %cst_91 = arith.constant 3.200000e+01 : f32
    %430 = vector.broadcast %cst_91 : f32 to vector<32x1xf32>
    %431 = arith.divf %429, %430 : vector<32x1xf32>
    %432 = vector.broadcast %431 : vector<32x1xf32> to vector<32x32xf32>
    %433 = arith.subf %427, %432 : vector<32x32xf32>
    %434 = arith.mulf %433, %433 : vector<32x32xf32>
    %cst_92 = arith.constant dense<0.000000e+00> : vector<32xf32>
    %435 = vector.multi_reduction <add>, %434, %cst_92 [1] : vector<32x32xf32> to vector<32xf32>
    %436 = vector.shape_cast %435 : vector<32xf32> to vector<32x1xf32>
    %cst_93 = arith.constant 3.200000e+01 : f32
    %437 = vector.broadcast %cst_93 : f32 to vector<32x1xf32>
    %438 = arith.divf %436, %437 : vector<32x1xf32>
    %439 = vector.broadcast %431 : vector<32x1xf32> to vector<32x32xf32>
    %440 = arith.subf %427, %439 : vector<32x32xf32>
    %cst_94 = arith.constant 9.99999974E-6 : f32
    %441 = vector.broadcast %cst_94 : f32 to vector<32x1xf32>
    %442 = arith.addf %438, %441 : vector<32x1xf32>
    %443 = math.rsqrt %442 : vector<32x1xf32>
    %444 = vector.broadcast %443 : vector<32x1xf32> to vector<32x32xf32>
    %445 = arith.mulf %440, %444 : vector<32x32xf32>
    %446 = vector.broadcast %422 : vector<1x32xf32> to vector<32x32xf32>
    %447 = arith.mulf %445, %446 : vector<32x32xf32>
    %448 = vector.broadcast %423 : vector<1x32xf32> to vector<32x32xf32>
    %449 = arith.addf %447, %448 : vector<32x32xf32>
    %450 = arith.truncf %449 : vector<32x32xf32> to vector<32x32xbf16>
    %451 = arith.extf %450 : vector<32x32xbf16> to vector<32x32xf32>
    %452 = arith.subf %449, %451 : vector<32x32xf32>
    %453 = arith.truncf %452 : vector<32x32xf32> to vector<32x32xbf16>
    %454 = arith.truncf %421 : vector<32x128xf32> to vector<32x128xbf16>
    %455 = arith.extf %454 : vector<32x128xbf16> to vector<32x128xf32>
    %456 = arith.subf %421, %455 : vector<32x128xf32>
    %457 = arith.truncf %456 : vector<32x128xf32> to vector<32x128xbf16>
    %cst_95 = arith.constant dense<0.000000e+00> : vector<32x128xf32>
    %458 = tpu.matmul %450, %454, %cst_95 {dimension_numbers = #tpu.dot_dimension_numbers<[1], [0], [0], [1], [0, 0, 1, 1], [], []>} : vector<32x32xbf16>, vector<32x128xbf16>, vector<32x128xf32> -> vector<32x128xf32>
    %cst_96 = arith.constant dense<0.000000e+00> : vector<32x128xf32>
    %459 = tpu.matmul %450, %457, %cst_96 {dimension_numbers = #tpu.dot_dimension_numbers<[1], [0], [0], [1], [0, 0, 1, 1], [], []>} : vector<32x32xbf16>, vector<32x128xbf16>, vector<32x128xf32> -> vector<32x128xf32>
    %460 = arith.addf %458, %459 : vector<32x128xf32>
    %cst_97 = arith.constant dense<0.000000e+00> : vector<32x128xf32>
    %461 = tpu.matmul %453, %454, %cst_97 {dimension_numbers = #tpu.dot_dimension_numbers<[1], [0], [0], [1], [0, 0, 1, 1], [], []>} : vector<32x32xbf16>, vector<32x128xbf16>, vector<32x128xf32> -> vector<32x128xf32>
    %462 = arith.addf %460, %461 : vector<32x128xf32>
    %463 = vector.broadcast %424 : vector<1x128xf32> to vector<32x128xf32>
    %464 = arith.addf %462, %463 : vector<32x128xf32>
    %465 = vector.shape_cast %464 : vector<32x128xf32> to vector<2x16x128xf32>
    %c0_98 = arith.constant 0 : index
    %c0_99 = arith.constant 0 : index
    %c0_100 = arith.constant 0 : index
    %466 = vector.load %arg5[%c0_98, %c0_99, %c0_100] : memref<2x16x128xf32, #tpu.memory_space<vmem>>, vector<2x16x128xf32>
    tpu.vector_store %arg5[%c0_98, %c0_99, %c0_100], %465 {strides = array<i32>} : memref<2x16x128xf32, #tpu.memory_space<vmem>>, vector<2x16x128xf32>,
    return
  }
}

</mosaic_0001>

<bundles_post_ra>
// kernel: decoder_forward.1
= control target key start
LH: loop header
LB: loop body
LE: loop exit
PB: predicated region body
PF: predicated region fallthrough
CT: control target
= control target key end

     0   :  { %vm55_vm0 = vcmask 261120   ;;  %s15568_s0 = inlined_call_operand.vmem [shape: f32[2,32,32], index: 0, kind: input, shape index: {}]   ;;  %s15569_s1 = inlined_call_operand.vmem [shape: f32[2,7,128], index: 1, kind: input, shape index: {}]   ;;  %s15570_s2 = inlined_call_operand.vmem [shape: f32[2,32,256], index: 2, kind: input, shape index: {}]   ;;  %s15571_s3 = inlined_call_operand.vmem [shape: f32[2,128,32], index: 3, kind: input, shape index: {}]   ;;  %s15572_s4 = inlined_call_operand.vmem [shape: f32[35,128], index: 4, kind: input, shape index: {}]   ;;  %s15573_s5 = inlined_call_operand.hbm [shape: f32[2,16,128], index: 5, kind: output, shape index: {}]  }
   0x1   :  { %v26_v0 = vld [vmem:[%s15568_s0 + $0x20] sm:$0xff]  ;;  %v24_v1 = vld [vmem:[%s15568_s0 + $0x10] sm:$0xff] }
   0x2   :  { %v22_v2 = vld [vmem:[%s15568_s0] sm:$0xff]  ;;  %v68_v3 = vsel %vm55_vm0, %v26_v0, 0.0  ;;  %v62_v4 = vsel %vm55_vm0, %v24_v1, 0.0 }
   0x3   :  { %v56_v5 = vsel %vm55_vm0, %v22_v2, 0.0  ;;  %69 = vadd.xlane.f32.xlu2 %v68_v3  ;;  %63 = vadd.xlane.f32.xlu1 %v62_v4 }
   0x4   :  { %10 = vsyncpa [#allocation3], 0  ;;  %57 = vadd.xlane.f32.xlu0 %v56_v5  ;;  %v27_v6 = vld [vmem:[%s15568_s0 + $0x28] sm:$0xff]  ;;  %v25_v7 = vld [vmem:[%s15568_s0 + $0x18] sm:$0xff]  ;;  %v10186_v14 = vmov 32.0   ;;  %s10187_s19 = smov 112  }
   0x5   :  { %v23_v8 = vld [vmem:[%s15568_s0 + $0x8] sm:$0xff]  ;;  %v71_v9 = vsel %vm55_vm0, %v27_v6, 0.0  ;;  %v65_v10 = vsel %vm55_vm0, %v25_v7, 0.0  ;;  %v28_v12 = vld [vmem:[%s15568_s0 + $0x30] sm:$0xff]  ;;  %9786 = vrcp.f32 %v10186_v14  ;;  %v10273_v36 = vld [vmem:[%s15568_s0 + $0x38] sm:$0xff]  ;;  %s10188_s20 = smov 120  }
   0x6   :  { %v59_v11 = vsel %vm55_vm0, %v23_v8, 0.0  ;;  %v74_v13 = vsel %vm55_vm0, %v28_v12, 0.0  ;;  %v77_v41 = vsel %vm55_vm0, %v10273_v36, 0.0  ;;  %v35_v58 = vld [vmem:[%s15570_s2 + $0x20] sm:$0xff]  ;;  %v37_v59 = vld [vmem:[%s15570_s2 + $0x30] sm:$0xff]  ;;  %s10189_s21 = smov 96  }
   0x7   :  { %v287_v60 = vpack.c.bf16 %v35_v58, %v35_v58  ;;  %v288_v61 = vpack.c.bf16 %v37_v59, %v37_v59  ;;  %s10190_s22 = smov 104   ;;  %s10191_s23 = smov 64  }
   0x8   :  { %s10192_s24 = smov 32   ;;  %s10193_s25 = smov 16  }
   0x9   :  { %v291_v62 = vunpack.c.l.bf16 %v287_v60  ;;  %v292_v63 = vunpack.c.l.bf16 %v288_v61  ;;  %s10194_s26 = smov 8   ;;  %s10195_s27 = smov 24  }
   0xb   :  { %72 = vadd.xlane.f32.xlu2 %v71_v9  ;;  %66 = vadd.xlane.f32.xlu1 %v65_v10  ;;  %v9787_v15 = vpop.eup %9786  ;;  %v295_v4 = vsub.f32 %v35_v58, %v291_v62  ;;  %v296_v5 = vsub.f32 %v37_v59, %v292_v63 }
   0xc   :  { %60 = vadd.xlane.f32.xlu0 %v59_v11  ;;  %v81_v16 = vmul.f32 32.0, %v9787_v15  ;;  %vm85_vm1 = vweird.f32 %v9787_v15 }
   0xd   :  { %v10320_v11 = vpack.c.bf16 %v296_v5, %v295_v4 }
   0xe   :  { %v82_v17 = vsub.f32 1.0, %v81_v16 }
   0xf   :  { %15738 = vst [vmem:[#allocation6_spill] sm:$0xff] %v10320_v11  ;;  %337 = vmatpush.bf16.msra.mxu0 %v10320_v11 }
  0x10   :  { %v83_v18 = vmul.f32 %v9787_v15, %v82_v17 }
  0x12   :  { %v84_v19 = vadd.f32 %v9787_v15, %v83_v18 }
  0x13   :  { %75 = vadd.xlane.f32.xlu2 %v74_v13 }
  0x14   :  { %v10256_v20 = vsel %vm85_vm1, %v9787_v15, %v84_v19 }
  0x15   :  { %15737 = vst [vmem:[#allocation5_spill] sm:$0xff] %v10256_v20 }
  0x76   :  { %v70_v21 = vpop.xlane.xlu2 %69  ;;  %v64_v22 = vpop.xlane.xlu1 %63 }
  0x77   :  { %v58_v23 = vpop.xlane.xlu0 %57  ;;  %v91_v32 = vmul.f32 %v10256_v20, %v70_v21  ;;  %v89_v33 = vmul.f32 %v10256_v20, %v64_v22 }
  0x78   :  { %v87_v24 = vmul.f32 %v10256_v20, %v58_v23 }
  0x79   :  { %v10279_v39 = vsub.f32 %v26_v0, %v91_v32  ;;  %v10281_v40 = vsub.f32 %v24_v1, %v89_v33  ;;  %v31_v1 = vld [vmem:[%s15570_s2] sm:$0xff] }
  0x7a   :  { %v10259_v25 = vsub.f32 %v22_v2, %v87_v24  ;;  %v33_v2 = vld [vmem:[%s15570_s2 + $0x10] sm:$0xff] }
  0x7b   :  { %v107_v48 = vmul.f32 %v10279_v39, %v10279_v39  ;;  %v105_v49 = vmul.f32 %v10281_v40, %v10281_v40  ;;  %v286_v9 = vpack.c.bf16 %v33_v2, %v33_v2 }
  0x7c   :  { %v103_v26 = vmul.f32 %v10259_v25, %v10259_v25 }
  0x7d   :  { %v123_v53 = vsel %vm55_vm0, %v107_v48, 0.0  ;;  %v117_v54 = vsel %vm55_vm0, %v105_v49, 0.0  ;;  %v290_v14 = vunpack.c.l.bf16 %v286_v9  ;;  %v365_v16 = vunpack.c.l.b16 %v286_v9 }
  0x7e   :  { %v73_v27 = vpop.xlane.xlu2 %72  ;;  %v67_v28 = vpop.xlane.xlu1 %66  ;;  %v111_v29 = vsel %vm55_vm0, %v103_v26, 0.0 }
  0x7f   :  { %v90_v30 = vmul.f32 %v10256_v20, %v67_v28  ;;  %112 = vadd.xlane.f32.xlu0 %v111_v29  ;;  %v61_v31 = vpop.xlane.xlu0 %60  ;;  %v92_v47 = vmul.f32 %v10256_v20, %v73_v27  ;;  %v294_v18 = vsub.f32 %v33_v2, %v290_v14 }
  0x80   :  { %v88_v34 = vmul.f32 %v10256_v20, %v61_v31 }
  0x81   :  { %v10268_v35 = vsub.f32 %v25_v7, %v90_v30  ;;  %v10299_v52 = vsub.f32 %v27_v6, %v92_v47  ;;  %v366_v6 = vunpack.c.l.b16 %v287_v60  ;;  %v367_v7 = vunpack.c.l.b16 %v288_v61 }
  0x82   :  { %v10275_v37 = vsub.f32 %v23_v8, %v88_v34  ;;  %v285_v8 = vpack.c.bf16 %v31_v1, %v31_v1 }
  0x83   :  { %v106_v38 = vmul.f32 %v10268_v35, %v10268_v35  ;;  %v108_v56 = vmul.f32 %v10299_v52, %v10299_v52 }
  0x84   :  { %v104_v42 = vmul.f32 %v10275_v37, %v10275_v37  ;;  %v289_v13 = vunpack.c.l.bf16 %v285_v8  ;;  %v364_v15 = vunpack.c.l.b16 %v285_v8 }
  0x85   :  { %v120_v43 = vsel %vm55_vm0, %v106_v38, 0.0  ;;  %v126_v57 = vsel %vm55_vm0, %v108_v56, 0.0 }
  0x86   :  { %v76_v44 = vpop.xlane.xlu2 %75  ;;  %121 = vadd.xlane.f32.xlu2 %v120_v43  ;;  %v114_v45 = vsel %vm55_vm0, %v104_v42, 0.0  ;;  %v293_v17 = vsub.f32 %v31_v1, %v289_v13  ;;  %v10327_v21 = vpack.c.b16 %v365_v16, %v364_v15 }
  0x87   :  { %v93_v46 = vmul.f32 %v10256_v20, %v76_v44  ;;  %78 = vadd.xlane.f32.xlu0 %v77_v41  ;;  %115 = vadd.xlane.f32.xlu1 %v114_v45 }
  0x88   :  { %15740 = vst [vmem:[#allocation8_spill] sm:$0xff] %v10327_v21  ;;  %v10330_v26 = vpack.c.bf16 %v294_v18, %v293_v17 }
  0x89   :  { %v10295_v50 = vsub.f32 %v28_v12, %v93_v46  ;;  %v10322_v12 = vpack.c.b16 %v367_v7, %v366_v6 }
  0x8a   :  { %15741 = vst [vmem:[#allocation9_spill] sm:$0xff] %v10330_v26  ;;  %338 = vmatpush.bf16.msra.mxu0 %v10330_v26 }
  0x8b   :  { %v109_v51 = vmul.f32 %v10295_v50, %v10295_v50  ;;  %15739 = vst [vmem:[#allocation7_spill] sm:$0xff] %v10322_v12  ;;  %378 = vmatpush.bf16.msra.mxu1 %v10322_v12  ;;  %419 = vmatpush.bf16.msra.mxu2 %v10322_v12 }
  0x8d   :  { %v129_v55 = vsel %vm55_vm0, %v109_v51, 0.0 }
  0x8e   :  { %130 = vadd.xlane.f32.xlu2 %v129_v55 }
  0x8f   :  { %124 = vadd.xlane.f32.xlu0 %v123_v53  ;;  %118 = vadd.xlane.f32.xlu1 %v117_v54  ;;  %v30_v54 = vld [vmem:[%s15569_s1] sm:$0x7f] }
  0x90   :  { %379 = vmatpush.bf16.msra.mxu1 %v10327_v21  ;;  %420 = vmatpush.bf16.msra.mxu2 %v10327_v21  ;;  %v10355_v60 = vperm.slane %v30_v54, 0  ;;  %v10360_v4 = vperm.slane %v30_v54, 1 }
  0x97   :  { %127 = vadd.xlane.f32.xlu1 %v126_v57 }
  0xf2   :  { %v113_v0 = vpop.xlane.xlu0 %112 }
  0xf3   :  { %v135_v3 = vmul.f32 %v113_v0, %v10256_v20 }
  0xf5   :  { %v143_v10 = vadd.f32 1e-05, %v135_v3 }
  0xf7   :  { %9788 = vrsqrt.f32 %v143_v10  ;;  %vm157_vm3 = vweird.f32 %v143_v10 }
  0xf9   :  { %v122_v19 = vpop.xlane.xlu2 %121 }
  0xfa   :  { %v138_v22 = vmul.f32 %v122_v19, %v10256_v20  ;;  %v116_v23 = vpop.xlane.xlu1 %115  ;;  %v79_v24 = vpop.xlane.xlu0 %78 }
  0xfb   :  { %v136_v27 = vmul.f32 %v116_v23, %v10256_v20  ;;  %v94_v28 = vmul.f32 %v10256_v20, %v79_v24 }
  0xfc   :  { %v10334_v29 = vadd.f32 1e-05, %v138_v22 }
  0xfd   :  { %v9789_v30 = vpop.eup %9788  ;;  %v144_v31 = vadd.f32 1e-05, %v136_v27  ;;  %v10339_v32 = vsub.f32 %v10273_v36, %v94_v28 }
  0xfe   :  { %v152_v33 = vmul.f32 %v9789_v30, %v143_v10  ;;  %9790 = vrsqrt.f32 %v10334_v29  ;;  %vm158_vm2 = vweird.f32 %v9789_v30  ;;  %vm187_vm8 = vweird.f32 %v10334_v29 }
  0xff   :  { %9792 = vrsqrt.f32 %v144_v31  ;;  %v110_v34 = vmul.f32 %v10339_v32, %v10339_v32  ;;  %vm159_vm4 = vmor %vm157_vm3, %vm158_vm2  ;;  %vm167_vm5 = vweird.f32 %v144_v31 }
 0x100   :  { %v153_v38 = vmul.f32 %v9789_v30, %v152_v33 }
 0x101   :  { %v132_v41 = vsel %vm55_vm0, %v110_v34, 0.0 }
 0x102   :  { %v154_v42 = vmul.f32 0.5, %v153_v38  ;;  %v119_v43 = vpop.xlane.xlu1 %118  ;;  %133 = vadd.xlane.f32.xlu0 %v132_v41  ;;  %v125_v44 = vpop.xlane.xlu0 %124 }
 0x103   :  { %v137_v45 = vmul.f32 %v119_v43, %v10256_v20  ;;  %v139_v36 = vmul.f32 %v125_v44, %v10256_v20 }
 0x104   :  { %v9791_v46 = vpop.eup %9790  ;;  %v155_v47 = vsub.f32 1.5, %v154_v42 }
 0x105   :  { %v9793_v48 = vpop.eup %9792  ;;  %v182_v49 = vmul.f32 %v9791_v46, %v10334_v29  ;;  %v145_v51 = vadd.f32 1e-05, %v137_v45  ;;  %v10349_v53 = vadd.f32 1e-05, %v139_v36  ;;  %vm188_vm9 = vweird.f32 %v9791_v46 }
 0x106   :  { %v156_v55 = vmul.f32 %v9789_v30, %v155_v47  ;;  %v162_v56 = vmul.f32 %v9793_v48, %v144_v31  ;;  %vm168_vm6 = vweird.f32 %v9793_v48  ;;  %vm189_vm10 = vmor %vm187_vm8, %vm188_vm9 }
 0x107   :  { %v183_v57 = vmul.f32 %v9791_v46, %v182_v49  ;;  %9794 = vrsqrt.f32 %v145_v51  ;;  %vm169_vm7 = vmor %vm167_vm5, %vm168_vm6  ;;  %vm177_vm11 = vweird.f32 %v145_v51  ;;  %vm197_vm1 = vweird.f32 %v10349_v53 }
 0x108   :  { %v160_v58 = vsel %vm159_vm4, %v9789_v30, %v156_v55  ;;  %v163_v59 = vmul.f32 %v9793_v48, %v162_v56  ;;  %9796 = vrsqrt.f32 %v10349_v53 }
 0x109   :  { %v231_v61 = vmul.f32 %v160_v58, %v10259_v25  ;;  %v184_v62 = vmul.f32 0.5, %v183_v57 }
 0x10a   :  { %v164_v63 = vmul.f32 0.5, %v163_v59  ;;  %v128_v0 = vpop.xlane.xlu1 %127 }
 0x10b   :  { %v140_v1 = vmul.f32 %v128_v0, %v10256_v20  ;;  %v240_v3 = vmul.f32 %v10355_v60, %v231_v61  ;;  %v185_v6 = vsub.f32 1.5, %v184_v62 }
 0x10c   :  { %v165_v2 = vsub.f32 1.5, %v164_v63 }
 0x10d   :  { %v9795_v5 = vpop.eup %9794  ;;  %v148_v7 = vadd.f32 1e-05, %v140_v1  ;;  %v249_v14 = vadd.f32 %v10360_v4, %v240_v3  ;;  %v186_v15 = vmul.f32 %v9791_v46, %v185_v6 }
 0x10e   :  { %v10362_v8 = vpop.eup %9796  ;;  %v166_v9 = vmul.f32 %v9793_v48, %v165_v2  ;;  %v172_v25 = vmul.f32 %v9795_v5, %v145_v51  ;;  %vm178_vm12 = vweird.f32 %v9795_v5 }
 0x10f   :  { %9798 = vrsqrt.f32 %v148_v7  ;;  %v192_v17 = vmul.f32 %v10362_v8, %v10349_v53  ;;  %v257_v23 = vpack.c.bf16 %v249_v14, %v249_v14  ;;  %v190_v24 = vsel %vm189_vm10, %v9791_v46, %v186_v15  ;;  %vm179_vm13 = vmor %vm177_vm11, %vm178_vm12 }
 0x110   :  { %v170_v10 = vsel %vm169_vm7, %v9793_v48, %v166_v9  ;;  %v173_v13 = vmul.f32 %v9795_v5, %v172_v25  ;;  %v234_v31 = vmul.f32 %v190_v24, %v10268_v35  ;;  %vm207_vm14 = vweird.f32 %v148_v7 }
 0x111   :  { %v232_v16 = vmul.f32 %v170_v10, %v10275_v37  ;;  %v193_v27 = vmul.f32 %v10362_v8, %v192_v17  ;;  %v265_v38 = vunpack.c.l.bf16 %v257_v23  ;;  %v307_v44 = vunpack.c.l.b16 %v257_v23 }
 0x112   :  { %v174_v18 = vmul.f32 0.5, %v173_v13  ;;  %v243_v54 = vmul.f32 %v10355_v60, %v234_v31  ;;  %vm198_vm2 = vweird.f32 %v10362_v8  ;;  %vm842_vm11 = vcmask 64512  }
 0x113   :  { %v241_v19 = vmul.f32 %v10355_v60, %v232_v16  ;;  %v194_v42 = vmul.f32 0.5, %v193_v27  ;;  %v273_v49 = vsub.f32 %v249_v14, %v265_v38  ;;  %vm199_vm4 = vmor %vm197_vm1, %vm198_vm2  ;;  %vm3412_vm12 = vcmask 195584  }
 0x114   :  { %v175_v22 = vsub.f32 1.5, %v174_v18  ;;  %v252_v58 = vadd.f32 %v10360_v4, %v243_v54 }
 0x115   :  { %v250_v28 = vadd.f32 %v10360_v4, %v241_v19  ;;  %v9799_v29 = vpop.eup %9798  ;;  %v195_v55 = vsub.f32 1.5, %v194_v42 }
 0x116   :  { %v176_v30 = vmul.f32 %v9795_v5, %v175_v22  ;;  %v202_v37 = vmul.f32 %v9799_v29, %v148_v7  ;;  %vm208_vm15 = vweird.f32 %v9799_v29  ;;  %v260_v63 = vpack.c.bf16 %v252_v58, %v252_v58 }
 0x117   :  { %v258_v34 = vpack.c.bf16 %v250_v28, %v250_v28  ;;  %vm209_vm3 = vmor %vm207_vm14, %vm208_vm15  ;;  %v196_v59 = vmul.f32 %v10362_v8, %v195_v55 }
 0x118   :  { %v180_v33 = vsel %vm179_vm13, %v9795_v5, %v176_v30  ;;  %v203_v43 = vmul.f32 %v9799_v29, %v202_v37  ;;  %v268_v5 = vunpack.c.l.bf16 %v260_v63  ;;  %v310_v6 = vunpack.c.l.b16 %v260_v63 }
 0x119   :  { %v233_v41 = vmul.f32 %v180_v33, %v10281_v40  ;;  %v308_v45 = vunpack.c.l.b16 %v258_v34  ;;  %v266_v36 = vunpack.c.l.bf16 %v258_v34  ;;  %v200_v0 = vsel %vm199_vm4, %v10362_v8, %v196_v59 }
 0x11a   :  { %v204_v46 = vmul.f32 0.5, %v203_v43  ;;  %v235_v53 = vmul.f32 %v200_v0, %v10279_v39  ;;  %v276_v10 = vsub.f32 %v252_v58, %v268_v5  ;;  %vm3403_vm13 = vcmask 130048  }
 0x11b   :  { %v242_v47 = vmul.f32 %v10355_v60, %v233_v41  ;;  %v315_v48 = vpack.c.b16 %v308_v45, %v307_v44  ;;  %v274_v51 = vsub.f32 %v250_v28, %v266_v36  ;;  %v131_v28 = vpop.xlane.xlu2 %130 }
 0x11c   :  { %v205_v35 = vsub.f32 1.5, %v204_v46  ;;  %v244_v13 = vmul.f32 %v10355_v60, %v235_v53 }
 0x11d   :  { %9461 = vmatmul.msk.bf16.vlgmr.msra.gmra.mxu0 %vm55_vm0, %v315_v48  ;;  %9465 = vmatmul.msk.bf16.vlgmr.msra.gmra.mxu1 %vm55_vm0, %v315_v48  ;;  %v281_v40 = vpack.c.bf16 %v274_v51, %v273_v49  ;;  %v251_v56 = vadd.f32 %v10360_v4, %v242_v47 }
 0x11e   :  { %v206_v57 = vmul.f32 %v9799_v29, %v205_v35  ;;  %v253_v39 = vadd.f32 %v10360_v4, %v244_v13 }
 0x11f   :  { %9469 = vmatmul.msk.bf16.vlgmr.msra.gmra.mxu2 %vm55_vm0, %v281_v40  ;;  %v259_v61 = vpack.c.bf16 %v251_v56, %v251_v56 }
 0x120   :  { %v210_v62 = vsel %vm209_vm3, %v9799_v29, %v206_v57  ;;  %v261_v15 = vpack.c.bf16 %v253_v39, %v253_v39  ;;  %v141_v29 = vmul.f32 %v131_v28, %v10256_v20 }
 0x121   :  { %v236_v1 = vmul.f32 %v210_v62, %v10299_v52  ;;  %v267_v2 = vunpack.c.l.bf16 %v259_v61  ;;  %v309_v3 = vunpack.c.l.b16 %v259_v61 }
 0x122   :  { %v269_v18 = vunpack.c.l.bf16 %v261_v15  ;;  %v311_v19 = vunpack.c.l.b16 %v261_v15  ;;  %v149_v30 = vadd.f32 1e-05, %v141_v29 }
 0x123   :  { %v275_v7 = vsub.f32 %v251_v56, %v267_v2  ;;  %v245_v9 = vmul.f32 %v10355_v60, %v236_v1  ;;  %v316_v25 = vpack.c.b16 %v310_v6, %v309_v3 }
 0x124   :  { %v277_v24 = vsub.f32 %v253_v39, %v269_v18  ;;  %9800 = vrsqrt.f32 %v149_v30  ;;  %vm217_vm5 = vweird.f32 %v149_v30 }
 0x125   :  { %v282_v8 = vpack.c.bf16 %v276_v10, %v275_v7  ;;  %v254_v52 = vadd.f32 %v10360_v4, %v245_v9 }
 0x127   :  { %v262_v14 = vpack.c.bf16 %v254_v52, %v254_v52 }
 0x129   :  { %v270_v16 = vunpack.c.l.bf16 %v262_v14  ;;  %v312_v17 = vunpack.c.l.b16 %v262_v14 }
 0x12a   :  { %v9801_v37 = vpop.eup %9800 }
 0x12b   :  { %v278_v22 = vsub.f32 %v254_v52, %v270_v16  ;;  %v317_v23 = vpack.c.b16 %v312_v17, %v311_v19  ;;  %v212_v31 = vmul.f32 %v9801_v37, %v149_v30  ;;  %vm218_vm6 = vweird.f32 %v9801_v37 }
 0x12c   :  { %vm219_vm7 = vmor %vm217_vm5, %vm218_vm6 }
 0x12d   :  { %9462 = vmatmul.msk.bf16.gmra.mxu0 %vm55_vm0, %v316_v25  ;;  %9466 = vmatmul.msk.bf16.gmra.mxu1 %vm55_vm0, %v316_v25  ;;  %v283_v27 = vpack.c.bf16 %v278_v22, %v277_v24  ;;  %v213_v33 = vmul.f32 %v9801_v37, %v212_v31 }
 0x12f   :  { %9470 = vmatmul.msk.bf16.gmra.mxu2 %vm55_vm0, %v282_v8  ;;  %v214_v34 = vmul.f32 0.5, %v213_v33 }
 0x131   :  { %v215_v42 = vsub.f32 1.5, %v214_v34 }
 0x133   :  { %v216_v44 = vmul.f32 %v9801_v37, %v215_v42 }
 0x135   :  { %v220_v45 = vsel %vm219_vm7, %v9801_v37, %v216_v44 }
 0x136   :  { %v237_v47 = vmul.f32 %v220_v45, %v10295_v50 }
 0x138   :  { %v246_v51 = vmul.f32 %v10355_v60, %v237_v47 }
 0x13a   :  { %v255_v35 = vadd.f32 %v10360_v4, %v246_v51 }
 0x13c   :  { %v263_v58 = vpack.c.bf16 %v255_v35, %v255_v35 }
 0x13d   :  { %9463 = vmatmul.msk.bf16.gmra.mxu0 %vm55_vm0, %v317_v23  ;;  %9467 = vmatmul.msk.bf16.gmra.mxu1 %vm55_vm0, %v317_v23 }
 0x13e   :  { %v271_v61 = vunpack.c.l.bf16 %v263_v58  ;;  %v313_v62 = vunpack.c.l.b16 %v263_v58 }
 0x13f   :  { %9471 = vmatmul.msk.bf16.gmra.mxu2 %vm55_vm0, %v283_v27 }
 0x140   :  { %v279_v2 = vsub.f32 %v255_v35, %v271_v61 }
 0x175   :  { %v134_v38 = vpop.xlane.xlu0 %133 }
 0x176   :  { %v142_v41 = vmul.f32 %v134_v38, %v10256_v20 }
 0x178   :  { %v150_v43 = vadd.f32 1e-05, %v142_v41 }
 0x17a   :  { %9802 = vrsqrt.f32 %v150_v43  ;;  %vm227_vm9 = vweird.f32 %v150_v43 }
 0x180   :  { %v9803_v36 = vpop.eup %9802 }
 0x181   :  { %v222_v46 = vmul.f32 %v9803_v36, %v150_v43  ;;  %vm228_vm8 = vweird.f32 %v9803_v36 }
 0x182   :  { %vm229_vm10 = vmor %vm227_vm9, %vm228_vm8 }
 0x183   :  { %v223_v48 = vmul.f32 %v9803_v36, %v222_v46 }
 0x185   :  { %v224_v49 = vmul.f32 0.5, %v223_v48 }
 0x187   :  { %v225_v54 = vsub.f32 1.5, %v224_v49 }
 0x189   :  { %v226_v55 = vmul.f32 %v9803_v36, %v225_v54 }
 0x18b   :  { %v230_v40 = vsel %vm229_vm10, %v9803_v36, %v226_v55 }
 0x18c   :  { %v238_v56 = vmul.f32 %v230_v40, %v10339_v32 }
 0x18e   :  { %v247_v57 = vmul.f32 %v10355_v60, %v238_v56 }
 0x190   :  { %v256_v59 = vadd.f32 %v10360_v4, %v247_v57 }
 0x192   :  { %v264_v50 = vpack.c.bf16 %v256_v59, %v256_v59 }
 0x194   :  { %v314_v63 = vunpack.c.l.b16 %v264_v50  ;;  %v272_v0 = vunpack.c.l.bf16 %v264_v50 }
 0x196   :  { %v318_v1 = vpack.c.b16 %v314_v63, %v313_v62  ;;  %v280_v53 = vsub.f32 %v256_v59, %v272_v0 }
 0x198   :  { %9464 = vmatmul.msk.bf16.gmra.mxu0 %vm55_vm0, %v318_v1  ;;  %9468 = vmatmul.msk.bf16.gmra.mxu1 %vm55_vm0, %v318_v1  ;;  %v284_v3 = vpack.c.bf16 %v280_v53, %v279_v2 }
 0x19a   :  { %9472 = vmatmul.msk.bf16.gmra.mxu2 %vm55_vm0, %v284_v3  ;;  %v340_v32 = vpop.f32.mrf.mxu0  ;;  %v381_v60 = vpop.f32.mrf.mxu1 }
 0x19b   :  { %v382_v5 = vadd.f32 %v381_v60, %v340_v32 }
 0x1a2   :  { %v342_v6 = vpop.f32.mrf.mxu0  ;;  %v383_v4 = vpop.f32.mrf.mxu1 }
 0x1a3   :  { %v422_v7 = vpop.f32.mrf.mxu2  ;;  %v384_v8 = vadd.f32 %v383_v4, %v342_v6 }
 0x1a4   :  { %v10408_v9 = vadd.f32 %v422_v7, %v382_v5 }
 0x1a6   :  { %482 = vrot.lane.b32.xlu1 %v10408_v9, %s10187_s19  ;;  %458 = vrot.lane.b32.xlu0 %v10408_v9, %s10188_s20  ;;  %v690_v25 = vpack.c.bf16 %v10408_v9, %v10408_v9  ;;  %v530_v10 = vmul.f32 0.35355338, %v10408_v9 }
 0x1a8   :  { %v10417_v13 = vpack.c.bf16 %v530_v10, %v530_v10  ;;  %v722_v14 = vunpack.c.l.bf16 %v690_v25  ;;  %v1263_v28 = vunpack.c.l.b16 %v690_v25 }
 0x1aa   :  { %v345_v52 = vpop.f32.mrf.mxu0  ;;  %v386_v39 = vpop.f32.mrf.mxu1  ;;  %v594_v15 = vunpack.c.l.bf16 %v10417_v13  ;;  %v754_v22 = vsub.f32 %v10408_v9, %v722_v14 }
 0x1ab   :  { %v424_v16 = vpop.f32.mrf.mxu2  ;;  %v387_v30 = vadd.f32 %v386_v39, %v345_v52 }
 0x1ac   :  { %v10420_v17 = vadd.f32 %v424_v16, %v384_v8  ;;  %v626_v18 = vsub.f32 %v530_v10, %v594_v15  ;;  %v786_v33 = vpack.c.bf16 %v754_v22, %v754_v22 }
 0x1ae   :  { %460 = vrot.lane.b32.xlu2 %v10420_v17, %s10188_s20  ;;  %484 = vrot.lane.b32.xlu0 %v10420_v17, %s10187_s19  ;;  %v691_v19 = vpack.c.bf16 %v10420_v17, %v10420_v17  ;;  %v531_v23 = vmul.f32 0.35355338, %v10420_v17  ;;  %v832_v36 = vunpack.c.l.b16 %v786_v33  ;;  %v658_v40 = vpack.c.bf16 %v626_v18, %v626_v18 }
 0x1b0   :  { %v723_v24 = vunpack.c.l.bf16 %v691_v19  ;;  %v10430_v27 = vpack.c.bf16 %v531_v23, %v531_v23  ;;  %v1264_v29 = vunpack.c.l.b16 %v691_v19  ;;  %v10453_v0 = vunpack.c.l.b16 %v658_v40 }
 0x1b2   :  { %v347_v37 = vpop.f32.mrf.mxu0  ;;  %v755_v31 = vsub.f32 %v10420_v17, %v723_v24  ;;  %v595_v34 = vunpack.c.l.bf16 %v10430_v27  ;;  %v10434_v38 = vpack.c.b16 %v1264_v29, %v1263_v28  ;;  %v388_v41 = vpop.f32.mrf.mxu1  ;;  %15744 = vst [vmem:[#allocation12_spill] sm:$0xff] %v10453_v0 }
 0x1b3   :  { %v427_v42 = vpop.f32.mrf.mxu2  ;;  %v389_v54 = vadd.f32 %v388_v41, %v347_v37 }
 0x1b4   :  { %v10436_v43 = vadd.f32 %v427_v42, %v387_v30  ;;  %v787_v44 = vpack.c.bf16 %v755_v31, %v755_v31  ;;  %v627_v45 = vsub.f32 %v531_v23, %v595_v34 }
 0x1b6   :  { %462 = vrot.lane.b32.xlu1 %v10436_v43, %s10188_s20  ;;  %486 = vrot.lane.b32.xlu0 %v10436_v43, %s10187_s19  ;;  %v833_v46 = vunpack.c.l.b16 %v787_v44  ;;  %v692_v47 = vpack.c.bf16 %v10436_v43, %v10436_v43  ;;  %v532_v51 = vmul.f32 0.35355338, %v10436_v43  ;;  %v659_v55 = vpack.c.bf16 %v627_v45, %v627_v45 }
 0x1b8   :  { %v10444_v48 = vpack.c.b16 %v833_v46, %v832_v36  ;;  %v724_v49 = vunpack.c.l.bf16 %v692_v47  ;;  %v564_v50 = vpack.c.bf16 %v532_v51, %v532_v51  ;;  %v10451_v62 = vunpack.c.l.b16 %v659_v55 }
 0x1b9   :  { %v1265_v53 = vunpack.c.l.b16 %v692_v47 }
 0x1ba   :  { %15742 = vst [vmem:[#allocation10_spill] sm:$0xff] %v10444_v48  ;;  %838 = vrot.lane.b32.xlu2 %v10444_v48, %s10189_s21  ;;  %v350_v57 = vpop.f32.mrf.mxu0  ;;  %v391_v58 = vpop.f32.mrf.mxu1  ;;  %v756_v59 = vsub.f32 %v10436_v43, %v724_v49  ;;  %v824_v5 = vunpack.c.l.b16 %v564_v50  ;;  %v596_v8 = vunpack.c.l.bf16 %v564_v50 }
 0x1bb   :  { %v429_v35 = vpop.f32.mrf.mxu2  ;;  %15743 = vst [vmem:[#allocation11_spill] sm:$0xff] %v10451_v62  ;;  %v392_v32 = vadd.f32 %v391_v58, %v350_v57 }
 0x1bc   :  { %v445_v56 = vadd.f32 %v429_v35, %v389_v54  ;;  %v788_v60 = vpack.c.bf16 %v756_v59, %v756_v59  ;;  %v628_v15 = vsub.f32 %v532_v51, %v596_v8 }
 0x1be   :  { %512 = vrot.lane.b32.xlu1 %v445_v56, %s10190_s22  ;;  %v693_v61 = vpack.c.bf16 %v445_v56, %v445_v56  ;;  %v533_v63 = vmul.f32 0.35355338, %v445_v56  ;;  %v834_v16 = vunpack.c.l.b16 %v788_v60  ;;  %v660_v37 = vpack.c.bf16 %v628_v15, %v628_v15 }
 0x1c0   :  { %v725_v1 = vunpack.c.l.bf16 %v693_v61  ;;  %v565_v2 = vpack.c.bf16 %v533_v63, %v533_v63  ;;  %v1266_v3 = vunpack.c.l.b16 %v693_v61  ;;  %v10478_v44 = vunpack.c.l.b16 %v660_v37 }
 0x1c2   :  { %464 = vrot.lane.b32.xlu2 %v445_v56, %s10188_s20  ;;  %v757_v6 = vsub.f32 %v445_v56, %v725_v1  ;;  %v825_v4 = vunpack.c.l.b16 %v565_v2  ;;  %v10456_v7 = vpack.c.b16 %v1266_v3, %v1265_v53  ;;  %v352_v19 = vpop.f32.mrf.mxu0  ;;  %v393_v22 = vpop.f32.mrf.mxu1  ;;  %v597_v29 = vunpack.c.l.bf16 %v565_v2  ;;  %15747 = vst [vmem:[#allocation15_spill] sm:$0xff] %v10478_v44 }
 0x1c3   :  { %v432_v10 = vpop.f32.mrf.mxu2  ;;  %v394_v28 = vadd.f32 %v393_v22, %v352_v19 }
 0x1c4   :  { %v10460_v52 = vadd.f32 %v432_v10, %v392_v32  ;;  %v789_v39 = vpack.c.bf16 %v757_v6, %v757_v6  ;;  %v10462_v14 = vpack.c.b16 %v825_v4, %v824_v5  ;;  %v629_v34 = vsub.f32 %v533_v63, %v597_v29 }
 0x1c6   :  { %15745 = vst [vmem:[#allocation13_spill] sm:$0xff] %v10462_v14  ;;  %466 = vrot.lane.b32.xlu0 %v10460_v52, %s10188_s20  ;;  %v835_v18 = vunpack.c.l.b16 %v789_v39  ;;  %v534_v24 = vmul.f32 0.35355338, %v10460_v52  ;;  %v661_v41 = vpack.c.bf16 %v629_v34, %v629_v34  ;;  %v694_v42 = vpack.c.bf16 %v10460_v52, %v10460_v52 }
 0x1c8   :  { %v10466_v23 = vpack.c.b16 %v835_v18, %v834_v16  ;;  %v10474_v33 = vpack.c.bf16 %v534_v24, %v534_v24  ;;  %v10484_v47 = vunpack.c.l.b16 %v661_v41  ;;  %v1302_v54 = vunpack.c.l.b16 %v694_v42 }
 0x1c9   :  { %v726_v5 = vunpack.c.l.bf16 %v694_v42 }
 0x1ca   :  { %15746 = vst [vmem:[#allocation14_spill] sm:$0xff] %v10466_v23  ;;  %488 = vrot.lane.b32.xlu2 %v445_v56, %s10187_s19  ;;  %840 = vrot.lane.b32.xlu1 %v10466_v23, %s10189_s21  ;;  %v598_v46 = vunpack.c.l.bf16 %v10474_v33 }
 0x1cb   :  { %v434_v30 = vpop.f32.mrf.mxu2  ;;  %15748 = vst [vmem:[#allocation16_spill] sm:$0xff] %v10484_v47  ;;  %v758_v16 = vsub.f32 %v10460_v52, %v726_v5 }
 0x1cc   :  { %v10472_v31 = vadd.f32 %v434_v30, %v394_v28  ;;  %v630_v35 = vsub.f32 %v534_v24, %v598_v46 }
 0x1cd   :  { %v790_v34 = vpack.c.bf16 %v758_v16, %v758_v16 }
 0x1ce   :  { %v695_v45 = vpack.c.bf16 %v10472_v31, %v10472_v31  ;;  %v535_v36 = vmul.f32 0.35355338, %v10472_v31  ;;  %v662_v58 = vpack.c.bf16 %v630_v35, %v630_v35 }
 0x1d0   :  { %v10490_v51 = vpack.c.bf16 %v535_v36, %v535_v36  ;;  %v1303_v55 = vunpack.c.l.b16 %v695_v45  ;;  %v10497_v50 = vunpack.c.l.b16 %v662_v58  ;;  %v727_v32 = vunpack.c.l.bf16 %v695_v45 }
 0x1d2   :  { %510 = vrot.lane.b32.xlu2 %v10436_v43, %s10190_s22  ;;  %v10492_v40 = vpack.c.b16 %v1303_v55, %v1302_v54  ;;  %v599_v56 = vunpack.c.l.bf16 %v10490_v51  ;;  %15750 = vst [vmem:[#allocation18_spill] sm:$0xff] %v10497_v50  ;;  %v759_v4 = vsub.f32 %v10472_v31, %v727_v32 }
 0x1d4   :  { %15749 = vst [vmem:[#allocation17_spill] sm:$0xff] %v10492_v40  ;;  %v631_v57 = vsub.f32 %v535_v36, %v599_v56  ;;  %v791_v24 = vpack.c.bf16 %v759_v4, %v759_v4 }
 0x1d6   :  { %v663_v59 = vpack.c.bf16 %v631_v57, %v631_v57  ;;  %v889_v55 = vunpack.c.l.b16 %v791_v24 }
 0x1d8   :  { %v10499_v43 = vunpack.c.l.b16 %v663_v59 }
 0x1da   :  { %468 = vrot.lane.b32.xlu2 %v10472_v31, %s10188_s20  ;;  %15751 = vst [vmem:[#allocation19_spill] sm:$0xff] %v10499_v43 }
 0x208   :  { %v461_v63 = vpop.permute.xlu2 %460 }
 0x209   :  { %v539_v1 = vmul.f32 0.35355338, %v461_v63  ;;  %v10508_v6 = vpack.c.bf16 %v461_v63, %v461_v63 }
 0x20b   :  { %v10503_v2 = vpack.c.bf16 %v539_v1, %v539_v1  ;;  %v731_v22 = vunpack.c.l.bf16 %v10508_v6 }
 0x20d   :  { %15752 = vst [vmem:[#allocation20_spill] sm:$0xff] %v10503_v2  ;;  %v603_v53 = vunpack.c.l.bf16 %v10503_v2  ;;  %v763_v36 = vsub.f32 %v461_v63, %v731_v22  ;;  %v888_v63 = vunpack.c.l.b16 %v790_v34 }
 0x20f   :  { %v635_v3 = vsub.f32 %v539_v1, %v603_v53  ;;  %v795_v4 = vpack.c.bf16 %v763_v36, %v763_v36 }
 0x211   :  { %v667_v35 = vpack.c.bf16 %v635_v3, %v635_v3 }
 0x214   :  { %v10506_v60 = vpop.permute.xlu2 %838 }
 0x215   :  { %v355_v10 = vpop.f32.mrf.mxu0  ;;  %v396_v8 = vpop.f32.mrf.mxu1 }
 0x216   :  { %v397_v30 = vadd.f32 %v396_v8, %v355_v10  ;;  %v10539_v8 = vpack.c.b16 %v889_v55, %v888_v63 }
 0x218   :  { %v10511_v39 = vpop.permute.xlu1 %482  ;;  %v459_v15 = vpop.permute.xlu0 %458 }
 0x219   :  { %v546_v18 = vmul.f32 0.35355338, %v10511_v39  ;;  %v538_v19 = vmul.f32 0.35355338, %v459_v15  ;;  %v10527_v58 = vpack.c.bf16 %v459_v15, %v459_v15 }
 0x21b   :  { %v10516_v28 = vpack.c.bf16 %v546_v18, %v546_v18  ;;  %v10518_v29 = vpack.c.bf16 %v538_v19, %v538_v19  ;;  %v730_v24 = vunpack.c.l.bf16 %v10527_v58 }
 0x21c   :  { %v10520_v37 = vpop.permute.xlu2 %464 }
 0x21d   :  { %15753 = vst [vmem:[#allocation21_spill] sm:$0xff] %v10516_v28  ;;  %v610_v41 = vunpack.c.l.bf16 %v10516_v28  ;;  %v602_v42 = vunpack.c.l.bf16 %v10518_v29  ;;  %v437_v45 = vpop.f32.mrf.mxu2  ;;  %v541_v46 = vmul.f32 0.35355338, %v10520_v37  ;;  %v357_v32 = vpop.f32.mrf.mxu0  ;;  %v10575_v49 = vsub.f32 %v459_v15, %v730_v24 }
 0x21e   :  { %v10525_v54 = vadd.f32 %v437_v45, %v397_v30  ;;  %v398_v5 = vpop.f32.mrf.mxu1  ;;  %v10573_v45 = vsel %vm842_vm11, %v10506_v60, 0 }
 0x21f   :  { %v642_v56 = vsub.f32 %v546_v18, %v610_v41  ;;  %v634_v57 = vsub.f32 %v538_v19, %v602_v42  ;;  %v10529_v59 = vpack.c.bf16 %v541_v46, %v541_v46  ;;  %v10542_v18 = vunpack.c.l.b16 %v667_v35 }
 0x220   :  { %v10531_v1 = vpop.permute.xlu0 %484  ;;  %494 = vrot.lane.b32.xlu2 %v10525_v54, %s10187_s19  ;;  %470 = vrot.lane.b32.xlu1 %v10525_v54, %s10188_s20  ;;  %v399_v34 = vadd.f32 %v398_v5, %v357_v32  ;;  %v10563_v32 = vunpack.c.l.b16 %v795_v4  ;;  %v10567_v5 = vpack.c.bf16 %v10511_v39, %v10511_v39  ;;  %v794_v47 = vpack.c.bf16 %v10575_v49, %v10575_v49 }
 0x221   :  { %15754 = vst [vmem:[#allocation22_spill] sm:$0xff] %v10529_v59  ;;  %v666_v53 = vpack.c.bf16 %v634_v57, %v634_v57  ;;  %v547_v3 = vmul.f32 0.35355338, %v10531_v1  ;;  %v605_v10 = vunpack.c.l.bf16 %v10529_v59  ;;  %v10557_v57 = vpack.c.bf16 %v10525_v54, %v10525_v54 }
 0x222   :  { %15755 = vst [vmem:[#allocation23_spill] sm:$0xff] %v10542_v18  ;;  %v674_v63 = vpack.c.bf16 %v642_v56, %v642_v56  ;;  %v10579_v56 = vpack.c.bf16 %v10520_v37, %v10520_v37  ;;  %v738_v26 = vunpack.c.l.bf16 %v10567_v5  ;;  %v10608_v11 = vpack.c.bf16 %v10531_v1, %v10531_v1 }
 0x223   :  { %v10544_v19 = vunpack.c.l.b16 %v666_v53  ;;  %v10546_v22 = vpack.c.bf16 %v547_v3, %v547_v3  ;;  %v10549_v30 = vsub.f32 %v541_v46, %v605_v10 }
 0x224   :  { %v489_v41 = vpop.permute.xlu2 %488  ;;  %v10594_v25 = vunpack.c.l.b16 %v674_v63  ;;  %v733_v0 = vunpack.c.l.bf16 %v10579_v56 }
 0x225   :  { %15756 = vst [vmem:[#allocation24_spill] sm:$0xff] %v10544_v19  ;;  %v611_v36 = vunpack.c.l.bf16 %v10546_v22  ;;  %v549_v55 = vmul.f32 0.35355338, %v489_v41  ;;  %v439_v35 = vpop.f32.mrf.mxu2  ;;  %v10559_v53 = vpack.c.bf16 %v489_v41, %v489_v41 }
 0x226   :  { %15757 = vst [vmem:[#allocation25_spill] sm:$0xff] %v10546_v22  ;;  %v10561_v46 = vadd.f32 %v439_v35, %v399_v34 }
 0x227   :  { %v643_v10 = vsub.f32 %v547_v3, %v611_v36  ;;  %v10569_v61 = vpack.c.bf16 %v549_v55, %v549_v55  ;;  %v741_v4 = vunpack.c.l.bf16 %v10559_v53  ;;  %v728_v36 = vunpack.c.l.bf16 %v10557_v57  ;;  %15759 = vst [vmem:[#allocation27_spill] sm:$0xff] %v10594_v25 }
 0x228   :  { %v463_v34 = vpop.permute.xlu1 %462  ;;  %v487_v35 = vpop.permute.xlu0 %486  ;;  %490 = vrot.lane.b32.xlu2 %v10460_v52, %s10187_s19  ;;  %506 = vrot.lane.b32.xlu1 %v10408_v9, %s10190_s22  ;;  %v10588_v60 = vpack.c.bf16 %v10561_v46, %v10561_v46 }
 0x229   :  { %15758 = vst [vmem:[#allocation26_spill] sm:$0xff] %v10569_v61  ;;  %v675_v15 = vpack.c.bf16 %v643_v10, %v643_v10  ;;  %v613_v3 = vunpack.c.l.bf16 %v10569_v61  ;;  %v540_v24 = vmul.f32 0.35355338, %v463_v34  ;;  %472 = vrot.lane.b32.xlu0 %v10561_v46, %s10188_s20  ;;  %v548_v16 = vmul.f32 0.35355338, %v487_v35 }
 0x22a   :  { %v10596_v42 = vpack.c.bf16 %v487_v35, %v487_v35  ;;  %v729_v9 = vunpack.c.l.bf16 %v10588_v60  ;;  %v773_v10 = vsub.f32 %v489_v41, %v741_v4  ;;  %v760_v41 = vsub.f32 %v10525_v54, %v728_v36 }
 0x22b   :  { %v10599_v20 = vunpack.c.l.b16 %v675_v15  ;;  %v10601_v21 = vsub.f32 %v549_v55, %v613_v3  ;;  %v10603_v12 = vpack.c.bf16 %v540_v24, %v540_v24  ;;  %v10610_v63 = vpack.c.bf16 %v548_v16, %v548_v16 }
 0x22c   :  { %v740_v50 = vunpack.c.l.bf16 %v10596_v42  ;;  %v511_v43 = vpop.permute.xlu2 %510  ;;  %v10616_v3 = vpack.c.bf16 %v463_v34, %v463_v34  ;;  %v761_v44 = vsub.f32 %v10561_v46, %v729_v9  ;;  %v805_v62 = vpack.c.bf16 %v773_v10, %v773_v10 }
 0x22d   :  { %15760 = vst [vmem:[#allocation28_spill] sm:$0xff] %v10599_v20  ;;  %v604_v55 = vunpack.c.l.bf16 %v10603_v12  ;;  %v612_v4 = vunpack.c.l.bf16 %v10610_v63  ;;  %v556_v18 = vmul.f32 0.35355338, %v511_v43  ;;  %v10626_v23 = vpack.c.bf16 %v511_v43, %v511_v43 }
 0x22e   :  { %15761 = vst [vmem:[#allocation29_spill] sm:$0xff] %v10603_v12  ;;  %v772_v19 = vsub.f32 %v487_v35, %v740_v50  ;;  %v732_v50 = vunpack.c.l.bf16 %v10616_v3  ;;  %v792_v49 = vpack.c.bf16 %v760_v41, %v760_v41  ;;  %v1341_v61 = vunpack.c.l.b16 %v10527_v58 }
 0x22f   :  { %15762 = vst [vmem:[#allocation30_spill] sm:$0xff] %v10610_v63  ;;  %v636_v48 = vsub.f32 %v540_v24, %v604_v55  ;;  %v644_v15 = vsub.f32 %v548_v16, %v612_v4  ;;  %v10624_v20 = vpack.c.bf16 %v556_v18, %v556_v18  ;;  %v739_v16 = vunpack.c.l.bf16 %v10608_v11 }
 0x230   :  { %v804_v25 = vpack.c.bf16 %v772_v19, %v772_v19  ;;  %v513_v36 = vpop.permute.xlu1 %512  ;;  %518 = vrot.lane.b32.xlu2 %v10525_v54, %s10190_s22  ;;  %496 = vrot.lane.b32.xlu1 %v10561_v46, %s10187_s19  ;;  %v793_v24 = vpack.c.bf16 %v761_v44, %v761_v44  ;;  %v765_v55 = vsub.f32 %v10520_v37, %v733_v0  ;;  %v748_v63 = vunpack.c.l.bf16 %v10626_v23 }
 0x231   :  { %15763 = vst [vmem:[#allocation31_spill] sm:$0xff] %v10624_v20  ;;  %v557_v35 = vmul.f32 0.35355338, %v513_v36  ;;  %v10631_v9 = vpack.c.bf16 %v513_v36, %v513_v36  ;;  %508 = vrot.lane.b32.xlu0 %v10420_v17, %s10190_s22  ;;  %v620_v19 = vunpack.c.l.bf16 %v10624_v20  ;;  %v1056_v40 = vunpack.c.l.b16 %v805_v62 }
 0x232   :  { %v1055_v10 = vunpack.c.l.b16 %v804_v25  ;;  %v891_v41 = vunpack.c.l.b16 %v793_v24  ;;  %v764_v28 = vsub.f32 %v463_v34, %v732_v50  ;;  %v890_v0 = vunpack.c.l.b16 %v792_v49 }
 0x233   :  { %v10640_v4 = vpack.c.bf16 %v557_v35, %v557_v35  ;;  %v749_v59 = vunpack.c.l.bf16 %v10631_v9  ;;  %v10644_v12 = vsub.f32 %v556_v18, %v620_v19  ;;  %v669_v37 = vpack.c.bf16 %v10549_v30, %v10549_v30 }
 0x234   :  { %v10647_v17 = vpop.permute.xlu2 %468  ;;  %v10654_v20 = vsub.f32 %v10531_v1, %v739_v16  ;;  %v10656_v58 = vpack.c.b16 %v1056_v40, %v1055_v10  ;;  %v943_v18 = vunpack.c.l.b16 %v794_v47  ;;  %v10660_v62 = vpack.c.b16 %v891_v41, %v890_v0 }
 0x235   :  { %15764 = vst [vmem:[#allocation32_spill] sm:$0xff] %v10640_v4  ;;  %v621_v44 = vunpack.c.l.bf16 %v10640_v4  ;;  %v543_v25 = vmul.f32 0.35355338, %v10647_v17  ;;  %v781_v2 = vsub.f32 %v513_v36, %v749_v59  ;;  %v10663_v34 = vsub.f32 %v10511_v39, %v738_v26 }
 0x236   :  { %v668_v50 = vpack.c.bf16 %v636_v48, %v636_v48  ;;  %v676_v49 = vpack.c.bf16 %v644_v15, %v644_v15  ;;  %v780_v24 = vsub.f32 %v511_v43, %v748_v63  ;;  %v796_v40 = vpack.c.bf16 %v764_v28, %v764_v28 }
 0x237   :  { %v653_v19 = vsub.f32 %v557_v35, %v621_v44  ;;  %v10658_v22 = vpack.c.bf16 %v543_v25, %v543_v25  ;;  %v1344_v26 = vunpack.c.l.b16 %v10579_v56  ;;  %v797_v48 = vpack.c.bf16 %v765_v55, %v765_v55 }
 0x238   :  { %v10665_v4 = vpop.permute.xlu0 %466  ;;  %1061 = vrot.lane.b32.xlu2 %v10656_v58, %s10189_s21  ;;  %492 = vrot.lane.b32.xlu1 %v10472_v31, %s10187_s19  ;;  %v10676_v43 = vunpack.c.l.b16 %v669_v37  ;;  %v803_v39 = vpack.c.bf16 %v10654_v20, %v10654_v20  ;;  %v10681_v28 = vpack.c.b16 %v10563_v32, %v943_v18  ;;  %v677_v1 = vpack.c.bf16 %v10601_v21, %v10601_v21 }
 0x239   :  { %15765 = vst [vmem:[#allocation33_spill] sm:$0xff] %v10658_v22  ;;  %v607_v47 = vunpack.c.l.bf16 %v10658_v22  ;;  %v542_v59 = vmul.f32 0.35355338, %v10665_v4  ;;  %896 = vrot.lane.b32.xlu0 %v10660_v62, %s10189_s21  ;;  %v813_v30 = vpack.c.bf16 %v781_v2, %v781_v2  ;;  %v10687_v36 = vunpack.c.l.b16 %v668_v50 }
 0x23a   :  { %15766 = vst [vmem:[#allocation34_spill] sm:$0xff] %v10676_v43  ;;  %v10689_v35 = vunpack.c.l.b16 %v676_v49  ;;  %v812_v56 = vpack.c.bf16 %v780_v24, %v780_v24  ;;  %v1343_v10 = vunpack.c.l.b16 %v10616_v3  ;;  %v684_v55 = vpack.c.bf16 %v10644_v12, %v10644_v12 }
 0x23b   :  { %v639_v63 = vsub.f32 %v543_v25, %v607_v47  ;;  %v10685_v15 = vpack.c.bf16 %v542_v59, %v542_v59  ;;  %15767 = vst [vmem:[#allocation35_spill] sm:$0xff] %v10687_v36  ;;  %v945_v21 = vunpack.c.l.b16 %v796_v40  ;;  %v685_v2 = vpack.c.bf16 %v653_v19, %v653_v19 }
 0x23c   :  { %15768 = vst [vmem:[#allocation36_spill] sm:$0xff] %v10689_v35  ;;  %v841_v16 = vpop.permute.xlu1 %840  ;;  %v946_v44 = vunpack.c.l.b16 %v797_v48  ;;  %v10696_v25 = vpack.c.b16 %v1344_v26, %v1343_v10  ;;  %v15770_v0 = vunpack.c.l.b16 %v10508_v6  ;;  %v702_v3 = vpack.c.bf16 %v10665_v4, %v10665_v4 }
 0x23d   :  { %v606_v32 = vunpack.c.l.bf16 %v10685_v15  ;;  %v853_v41 = vsel %vm842_vm11, %v841_v16, 0  ;;  %v671_v18 = vpack.c.bf16 %v639_v63, %v639_v63  ;;  %v1166_v12 = vunpack.c.l.b16 %v813_v30 }
 0x23e   :  { %861 = vmatpush.bf16.xpose.msra.mxu3 %v853_v41  ;;  %15769 = vst [vmem:[#allocation37_spill] sm:$0xff] %v10696_v25  ;;  %v10700_v37 = vpack.c.b16 %v15770_v0, %v1341_v61  ;;  %v1304_v49 = vunpack.c.l.b16 %v10557_v57  ;;  %v1305_v19 = vunpack.c.l.b16 %v10588_v60  ;;  %v536_v24 = vmul.f32 0.35355338, %v10525_v54 }
 0x23f   :  { %v638_v50 = vsub.f32 %v542_v59, %v606_v32  ;;  %v537_v40 = vmul.f32 0.35355338, %v10561_v46  ;;  %v703_v61 = vpack.c.bf16 %v10647_v17, %v10647_v17  ;;  %v10716_v47 = vpack.c.b16 %v946_v44, %v945_v21 }
 0x240   :  { %949 = vrot.lane.b32.xlu2 %v10681_v28, %s10189_s21  ;;  %520 = vrot.lane.b32.xlu1 %v10561_v46, %s10190_s22  ;;  %v1165_v59 = vunpack.c.l.b16 %v812_v56  ;;  %v10718_v57 = vunpack.c.l.b16 %v685_v2  ;;  %v10720_v60 = vpack.c.b16 %v1305_v19, %v1304_v49  ;;  %v568_v54 = vpack.c.bf16 %v536_v24, %v536_v24 }
 0x241   :  { %v670_v6 = vpack.c.bf16 %v638_v50, %v638_v50  ;;  %894 = vrot.lane.b32.xlu0 %v10539_v8, %s10189_s21  ;;  %v569_v26 = vpack.c.bf16 %v537_v40, %v537_v40  ;;  %v10722_v48 = vunpack.c.l.b16 %v671_v18  ;;  %v734_v30 = vunpack.c.l.bf16 %v702_v3 }
 0x242   :  { %15771 = vst [vmem:[#allocation38_spill] sm:$0xff] %v10718_v57  ;;  %v10726_v16 = vpack.c.b16 %v1166_v12, %v1165_v59  ;;  %v600_v46 = vunpack.c.l.bf16 %v568_v54  ;;  %v880_v10 = vunpack.c.l.b16 %v568_v54  ;;  %v1419_v41 = vunpack.c.l.b16 %v10567_v5 }
 0x243   :  { %15772 = vst [vmem:[#allocation39_spill] sm:$0xff] %v10720_v60  ;;  %v10724_v63 = vunpack.c.l.b16 %v670_v6  ;;  %v881_v32 = vunpack.c.l.b16 %v569_v26  ;;  %v1420_v21 = vunpack.c.l.b16 %v10608_v11  ;;  %v1499_v2 = vunpack.c.l.b16 %v10626_v23 }
 0x244   :  { %15773 = vst [vmem:[#allocation40_spill] sm:$0xff] %v10722_v48  ;;  %v1500_v44 = vunpack.c.l.b16 %v10631_v9  ;;  %v1380_v18 = vunpack.c.l.b16 %v702_v3  ;;  %v1381_v50 = vunpack.c.l.b16 %v703_v61  ;;  %v1421_v12 = vunpack.c.l.b16 %v10596_v42 }
 0x245   :  { %15774 = vst [vmem:[#allocation41_spill] sm:$0xff] %v10724_v63  ;;  %v10735_v0 = vpack.c.b16 %v881_v32, %v880_v10  ;;  %v601_v49 = vunpack.c.l.bf16 %v569_v26  ;;  %v10738_v19 = vpack.c.b16 %v1420_v21, %v1419_v41  ;;  %v1422_v6 = vunpack.c.l.b16 %v10559_v53 }
 0x246   :  { %862 = vmatpush.bf16.xpose.msra.mxu3 %v10573_v45  ;;  %v10740_v5 = vpack.c.b16 %v1500_v44, %v1499_v2  ;;  %v802_v11 = vpack.c.bf16 %v10663_v34, %v10663_v34  ;;  %v10745_v23 = vunpack.c.l.b16 %v677_v1  ;;  %v822_v45 = vunpack.c.l.b16 %v10417_v13 }
 0x247   :  { %15775 = vst [vmem:[#allocation42_spill] sm:$0xff] %v10738_v19  ;;  %v10750_v9 = vpack.c.b16 %v1381_v50, %v1380_v18  ;;  %v10752_v42 = vunpack.c.l.b16 %v684_v55  ;;  %v735_v3 = vunpack.c.l.bf16 %v703_v61  ;;  %v10758_v53 = vpack.c.b16 %v1422_v6, %v1421_v12 }
 0x248   :  { %15776 = vst [vmem:[#allocation43_spill] sm:$0xff] %v10740_v5  ;;  %1171 = vrot.lane.b32.xlu2 %v10726_v16, %s10189_s21  ;;  %514 = vrot.lane.b32.xlu1 %v10460_v52, %s10190_s22  ;;  %v15781_v1 = vunpack.c.l.b16 %v10430_v27  ;;  %v632_v55 = vsub.f32 %v536_v24, %v600_v46  ;;  %v766_v61 = vsub.f32 %v10665_v4, %v734_v30  ;;  %v1054_v52 = vunpack.c.l.b16 %v803_v39 }
 0x249   :  { %15777 = vst [vmem:[#allocation44_spill] sm:$0xff] %v10745_v23  ;;  %951 = vrot.lane.b32.xlu0 %v10716_v47, %s10189_s21  ;;  %v633_v54 = vsub.f32 %v537_v40, %v601_v49  ;;  %v767_v32 = vsub.f32 %v10647_v17, %v735_v3  ;;  %v1053_v27 = vunpack.c.l.b16 %v802_v11 }
 0x24a   :  { %15778 = vst [vmem:[#allocation45_spill] sm:$0xff] %v10750_v9  ;;  %v10764_v59 = vpack.c.b16 %v15781_v1, %v822_v45  ;;  %v664_v10 = vpack.c.bf16 %v632_v55, %v632_v55  ;;  %v798_v21 = vpack.c.bf16 %v766_v61, %v766_v61 }
 0x24b   :  { %15779 = vst [vmem:[#allocation46_spill] sm:$0xff] %v10752_v42  ;;  %v665_v41 = vpack.c.bf16 %v633_v54, %v633_v54  ;;  %v10777_v24 = vpack.c.b16 %v1054_v52, %v1053_v27  ;;  %v799_v20 = vpack.c.bf16 %v767_v32, %v767_v32 }
 0x24c   :  { %15780 = vst [vmem:[#allocation47_spill] sm:$0xff] %v10758_v53  ;;  %v10779_v4 = vunpack.c.l.b16 %v664_v10  ;;  %v998_v39 = vunpack.c.l.b16 %v798_v21 }
 0x24d   :  { %9473 = vmatmul.msk.bf16.vlgmr.msra.gmra.mxu3 %vm842_vm11, %v10764_v59  ;;  %v10781_v30 = vunpack.c.l.b16 %v665_v41  ;;  %v999_v40 = vunpack.c.l.b16 %v799_v20 }
 0x24e   :  { %15782 = vst [vmem:[#allocation48_spill] sm:$0xff] %v10779_v4 }
 0x24f   :  { %15783 = vst [vmem:[#allocation49_spill] sm:$0xff] %v10781_v30  ;;  %v10789_v46 = vpack.c.b16 %v999_v40, %v998_v39 }
 0x250   :  { %1059 = vrot.lane.b32.xlu1 %v10777_v24, %s10189_s21 }
 0x251   :  { %516 = vrot.lane.b32.xlu0 %v10472_v31, %s10190_s22 }
 0x258   :  { %1004 = vrot.lane.b32.xlu1 %v10789_v46, %s10189_s21 }
 0x25d   :  { %9474 = vmatmul.msk.bf16.gmra.mxu3 %vm842_vm11, %v10462_v14 }
 0x260   :  { %1271 = vrot.lane.b32.xlu1 %v10456_v7, %s10189_s21 }
 0x27a   :  { %v495_v31 = vpop.permute.xlu2 %494 }
 0x27b   :  { %v552_v2 = vmul.f32 0.35355338, %v495_v31  ;;  %v10824_v39 = vpack.c.bf16 %v495_v31, %v495_v31 }
 0x27d   :  { %v10797_v44 = vpack.c.bf16 %v552_v2, %v552_v2 }
 0x27f   :  { %15784 = vst [vmem:[#allocation50_spill] sm:$0xff] %v10797_v44  ;;  %v616_v18 = vunpack.c.l.bf16 %v10797_v44 }
 0x281   :  { %v10800_v50 = vsub.f32 %v552_v2, %v616_v18 }
 0x282   :  { %v10802_v12 = vpop.permute.xlu2 %490 }
 0x283   :  { %v550_v49 = vmul.f32 0.35355338, %v10802_v12 }
 0x285   :  { %v10805_v6 = vpack.c.bf16 %v550_v49, %v550_v49 }
 0x287   :  { %15785 = vst [vmem:[#allocation51_spill] sm:$0xff] %v10805_v6  ;;  %v614_v11 = vunpack.c.l.bf16 %v10805_v6 }
 0x289   :  { %v10808_v45 = vsub.f32 %v550_v49, %v614_v11 }
 0x28a   :  { %v10810_v3 = vpop.permute.xlu2 %518 }
 0x28b   :  { %v560_v1 = vmul.f32 0.35355338, %v10810_v3 }
 0x28d   :  { %v10813_v55 = vpack.c.bf16 %v560_v1, %v560_v1 }
 0x28f   :  { %15786 = vst [vmem:[#allocation52_spill] sm:$0xff] %v10813_v55  ;;  %v624_v61 = vunpack.c.l.bf16 %v10813_v55 }
 0x291   :  { %v10816_v52 = vsub.f32 %v560_v1, %v624_v61 }
 0x292   :  { %v471_v54 = vpop.permute.xlu1 %470  ;;  %v1062_v10 = vpop.permute.xlu2 %1061 }
 0x293   :  { %v544_v32 = vmul.f32 0.35355338, %v471_v54  ;;  %v1073_v27 = vsel %vm842_vm11, %v1062_v10, 0  ;;  %v10821_v21 = vpack.c.bf16 %v471_v54, %v471_v54 }
 0x294   :  { %1081 = vmatpush.bf16.xpose.msrb.mxu2 %v1073_v27  ;;  %v744_v27 = vunpack.c.l.bf16 %v10824_v39 }
 0x295   :  { %v10819_v41 = vpack.c.bf16 %v544_v32, %v544_v32  ;;  %v736_v2 = vunpack.c.l.bf16 %v10821_v21 }
 0x296   :  { %v776_v57 = vsub.f32 %v495_v31, %v744_v27 }
 0x297   :  { %15787 = vst [vmem:[#allocation53_spill] sm:$0xff] %v10819_v41  ;;  %v608_v20 = vunpack.c.l.bf16 %v10819_v41  ;;  %v768_v26 = vsub.f32 %v471_v54, %v736_v2  ;;  %v10844_v54 = vpack.c.bf16 %v10802_v12, %v10802_v12 }
 0x298   :  { %v808_v44 = vpack.c.bf16 %v776_v57, %v776_v57 }
 0x299   :  { %v10826_v40 = vsub.f32 %v544_v32, %v608_v20  ;;  %v800_v63 = vpack.c.bf16 %v768_v26, %v768_v26 }
 0x29a   :  { %v507_v18 = vpop.permute.xlu1 %506 }
 0x29b   :  { %v554_v49 = vmul.f32 0.35355338, %v507_v18  ;;  %v473_v11 = vpop.permute.xlu0 %472  ;;  %v10829_v1 = vpack.c.bf16 %v507_v18, %v507_v18 }
 0x29c   :  { %v545_v61 = vmul.f32 0.35355338, %v473_v11  ;;  %v10831_v10 = vpack.c.bf16 %v473_v11, %v473_v11 }
 0x29d   :  { %v10834_v56 = vpack.c.bf16 %v554_v49, %v554_v49  ;;  %v746_v13 = vunpack.c.l.bf16 %v10829_v1 }
 0x29e   :  { %v10836_v17 = vpack.c.bf16 %v545_v61, %v545_v61  ;;  %v737_v32 = vunpack.c.l.bf16 %v10831_v10 }
 0x29f   :  { %15788 = vst [vmem:[#allocation54_spill] sm:$0xff] %v10834_v56  ;;  %v618_v20 = vunpack.c.l.bf16 %v10834_v56  ;;  %v778_v23 = vsub.f32 %v507_v18, %v746_v13 }
 0x2a0   :  { %15789 = vst [vmem:[#allocation55_spill] sm:$0xff] %v10836_v17  ;;  %v609_v34 = vunpack.c.l.bf16 %v10836_v17  ;;  %v769_v42 = vsub.f32 %v473_v11, %v737_v32  ;;  %v1000_v11 = vunpack.c.l.b16 %v800_v63 }
 0x2a1   :  { %v650_v48 = vsub.f32 %v554_v49, %v618_v20  ;;  %v742_v49 = vunpack.c.l.bf16 %v10844_v54  ;;  %v810_v18 = vpack.c.bf16 %v778_v23, %v778_v23  ;;  %v1110_v20 = vunpack.c.l.b16 %v808_v44 }
 0x2a2   :  { %v641_v4 = vsub.f32 %v545_v61, %v609_v34  ;;  %v801_v30 = vpack.c.bf16 %v769_v42, %v769_v42  ;;  %v497_v2 = vpop.permute.xlu1 %496  ;;  %v10866_v23 = vpack.c.bf16 %v10810_v3, %v10810_v3 }
 0x2a3   :  { %v509_v35 = vpop.permute.xlu0 %508  ;;  %v553_v36 = vmul.f32 0.35355338, %v497_v2  ;;  %v10846_v43 = vpack.c.bf16 %v497_v2, %v497_v2  ;;  %v682_v17 = vpack.c.bf16 %v650_v48, %v650_v48  ;;  %v774_v56 = vsub.f32 %v10802_v12, %v742_v49 }
 0x2a4   :  { %v555_v55 = vmul.f32 0.35355338, %v509_v35  ;;  %v10848_v41 = vpack.c.bf16 %v509_v35, %v509_v35  ;;  %v1001_v31 = vunpack.c.l.b16 %v801_v30  ;;  %v673_v63 = vpack.c.bf16 %v641_v4, %v641_v4 }
 0x2a5   :  { %v10850_v26 = vpack.c.bf16 %v553_v36, %v553_v36  ;;  %v745_v42 = vunpack.c.l.bf16 %v10846_v43  ;;  %v1163_v48 = vunpack.c.l.b16 %v810_v18  ;;  %v10875_v49 = vunpack.c.l.b16 %v682_v17 }
 0x2a6   :  { %v10853_v34 = vpack.c.bf16 %v555_v55, %v555_v55  ;;  %v747_v61 = vunpack.c.l.bf16 %v10848_v41  ;;  %v10857_v13 = vpack.c.b16 %v1001_v31, %v1000_v11 }
 0x2a7   :  { %v617_v27 = vunpack.c.l.bf16 %v10850_v26  ;;  %v777_v57 = vsub.f32 %v497_v2, %v745_v42  ;;  %v672_v2 = vpack.c.bf16 %v10826_v40, %v10826_v40  ;;  %15791 = vst [vmem:[#allocation57_spill] sm:$0xff] %v10875_v49 }
 0x2a8   :  { %v619_v32 = vunpack.c.l.bf16 %v10853_v34  ;;  %v779_v30 = vsub.f32 %v509_v35, %v747_v61  ;;  %1006 = vrot.lane.b32.xlu0 %v10857_v13, %s10189_s21 }
 0x2a9   :  { %v649_v6 = vsub.f32 %v553_v36, %v617_v27  ;;  %v809_v14 = vpack.c.bf16 %v777_v57, %v777_v57  ;;  %v10872_v36 = vunpack.c.l.b16 %v673_v63 }
 0x2aa   :  { %v651_v22 = vsub.f32 %v555_v55, %v619_v32  ;;  %v811_v11 = vpack.c.bf16 %v779_v30, %v779_v30  ;;  %v493_v4 = vpop.permute.xlu1 %492  ;;  %v806_v30 = vpack.c.bf16 %v774_v56, %v774_v56  ;;  %v680_v56 = vpack.c.bf16 %v10800_v50, %v10800_v50 }
 0x2ab   :  { %v897_v35 = vpop.permute.xlu0 %896  ;;  %v551_v42 = vmul.f32 0.35355338, %v493_v4  ;;  %v10870_v61 = vpack.c.bf16 %v493_v4, %v493_v4  ;;  %15790 = vst [vmem:[#allocation56_spill] sm:$0xff] %v10872_v36  ;;  %v1111_v12 = vunpack.c.l.b16 %v809_v14 }
 0x2ac   :  { %v683_v31 = vpack.c.bf16 %v651_v22, %v651_v22  ;;  %v908_v44 = vsel %vm842_vm11, %v897_v35, 0  ;;  %v1164_v55 = vunpack.c.l.b16 %v811_v11  ;;  %v10882_v22 = vunpack.c.l.b16 %v672_v2 }
 0x2ad   :  { %v10879_v57 = vpack.c.bf16 %v551_v42, %v551_v42  ;;  %v743_v40 = vunpack.c.l.bf16 %v10870_v61  ;;  %916 = vmatpush.bf16.xpose.msrb.mxu3 %v908_v44  ;;  %v10884_v32 = vpack.c.b16 %v1111_v12, %v1110_v20  ;;  %v752_v11 = vunpack.c.l.bf16 %v10866_v23 }
 0x2ae   :  { %v10877_v27 = vunpack.c.l.b16 %v683_v31  ;;  %15793 = vst [vmem:[#allocation59_spill] sm:$0xff] %v10882_v22  ;;  %v10886_v18 = vpack.c.b16 %v1164_v55, %v1163_v48  ;;  %v681_v35 = vpack.c.bf16 %v649_v6, %v649_v6  ;;  %v678_v2 = vpack.c.bf16 %v10808_v45, %v10808_v45 }
 0x2af   :  { %v615_v14 = vunpack.c.l.bf16 %v10879_v57  ;;  %v775_v17 = vsub.f32 %v493_v4, %v743_v40  ;;  %1116 = vrot.lane.b32.xlu2 %v10884_v32, %s10189_s21  ;;  %v784_v63 = vsub.f32 %v10810_v3, %v752_v11  ;;  %v1108_v20 = vunpack.c.l.b16 %v806_v30  ;;  %v950_v3 = vpop.permute.xlu2 %949 }
 0x2b0   :  { %15792 = vst [vmem:[#allocation58_spill] sm:$0xff] %v10877_v27  ;;  %1169 = vrot.lane.b32.xlu0 %v10886_v18, %s10189_s21  ;;  %v10906_v49 = vunpack.c.l.b16 %v681_v35  ;;  %v10908_v45 = vunpack.c.l.b16 %v678_v2 }
 0x2b1   :  { %v647_v31 = vsub.f32 %v551_v42, %v615_v14  ;;  %v807_v48 = vpack.c.bf16 %v775_v17, %v775_v17  ;;  %v10915_v17 = vunpack.c.l.b16 %v680_v56  ;;  %v816_v2 = vpack.c.bf16 %v784_v63, %v784_v63 }
 0x2b2   :  { %v521_v4 = vpop.permute.xlu1 %520  ;;  %15794 = vst [vmem:[#allocation60_spill] sm:$0xff] %v10906_v49 }
 0x2b3   :  { %v895_v44 = vpop.permute.xlu0 %894  ;;  %v679_v6 = vpack.c.bf16 %v647_v31, %v647_v31  ;;  %v561_v12 = vmul.f32 0.35355338, %v521_v4  ;;  %v10902_v55 = vpack.c.bf16 %v521_v4, %v521_v4  ;;  %v1109_v22 = vunpack.c.l.b16 %v807_v48  ;;  %15795 = vst [vmem:[#allocation61_spill] sm:$0xff] %v10908_v45 }
 0x2b4   :  { %v905_v40 = vsel %vm842_vm11, %v895_v44, 0  ;;  %15797 = vst [vmem:[#allocation63_spill] sm:$0xff] %v10915_v17  ;;  %v879_v44 = vunpack.c.l.b16 %v10490_v51  ;;  %v878_v48 = vunpack.c.l.b16 %v10474_v33 }
 0x2b5   :  { %v10910_v42 = vunpack.c.l.b16 %v679_v6  ;;  %v10912_v14 = vpack.c.bf16 %v561_v12, %v561_v12  ;;  %v753_v50 = vunpack.c.l.bf16 %v10902_v55  ;;  %917 = vmatpush.bf16.xpose.msrb.mxu3 %v905_v40  ;;  %v10917_v31 = vpack.c.b16 %v1109_v22, %v1108_v20 }
 0x2b6   :  { %v10930_v40 = vpack.c.b16 %v879_v44, %v878_v48 }
 0x2b7   :  { %15796 = vst [vmem:[#allocation62_spill] sm:$0xff] %v10910_v42  ;;  %v625_v11 = vunpack.c.l.bf16 %v10912_v14  ;;  %v785_v35 = vsub.f32 %v521_v4, %v753_v50  ;;  %1269 = vrot.lane.b32.xlu2 %v10434_v38, %s10189_s21  ;;  %v1220_v50 = vunpack.c.l.b16 %v816_v2  ;;  %v688_v2 = vpack.c.bf16 %v10816_v52, %v10816_v52  ;;  %v1172_v48 = vpop.permute.xlu2 %1171  ;;  %v15800_v42 = vld [vmem:[#allocation21_spill] sm:$0xff] }
 0x2b8   :  { %1114 = vrot.lane.b32.xlu0 %v10917_v31, %s10189_s21  ;;  %v1183_v45 = vsel %vm842_vm11, %v1172_v48, 0  ;;  %v933_v52 = vunpack.c.l.b16 %v10518_v29  ;;  %v1383_v29 = vunpack.c.l.b16 %v10831_v10 }
 0x2b9   :  { %v657_v51 = vsub.f32 %v561_v12, %v625_v11  ;;  %v817_v20 = vpack.c.bf16 %v785_v35, %v785_v35 }
 0x2ba   :  { %v515_v56 = vpop.permute.xlu1 %514 }
 0x2bb   :  { %v952_v6 = vpop.permute.xlu0 %951  ;;  %v558_v30 = vmul.f32 0.35355338, %v515_v56  ;;  %v10932_v4 = vpack.c.bf16 %v515_v56, %v515_v56  ;;  %v1221_v33 = vunpack.c.l.b16 %v817_v20  ;;  %v689_v12 = vpack.c.bf16 %v657_v51, %v657_v51 }
 0x2bc   :  { %v963_v63 = vsel %vm842_vm11, %v952_v6, 0  ;;  %9475 = vmatmul.msk.bf16.vlgmr.msrb.gmra.mxu3 %vm842_vm11, %v10930_v40 }
 0x2bd   :  { %971 = vmatpush.bf16.xpose.msrb.mxu0 %v963_v63  ;;  %v10937_v36 = vpack.c.bf16 %v558_v30, %v558_v30  ;;  %9772 = vmatpush.bf16.xpose.msra.mxu3 %v963_v63  ;;  %v10939_v11 = vpack.c.b16 %v1221_v33, %v1220_v50  ;;  %v750_v35 = vunpack.c.l.bf16 %v10932_v4  ;;  %v10949_v6 = vunpack.c.l.b16 %v689_v12 }
 0x2be   :  { %v960_v50 = vsel %vm842_vm11, %v950_v3, 0  ;;  %v15798_v3 = vld [vmem:[#allocation25_spill] sm:$0xff] }
 0x2bf   :  { %v622_v44 = vunpack.c.l.bf16 %v10937_v36  ;;  %1226 = vrot.lane.b32.xlu1 %v10939_v11, %s10189_s21  ;;  %v782_v33 = vsub.f32 %v515_v56, %v750_v35  ;;  %v1044_v56 = vunpack.c.l.b16 %v15798_v3 }
 0x2c0   :  { %1349 = vrot.lane.b32.xlu0 %v10696_v25, %s10189_s21  ;;  %v10957_v25 = vunpack.c.l.b16 %v688_v2 }
 0x2c1   :  { %v654_v20 = vsub.f32 %v558_v30, %v622_v44  ;;  %v15799_v44 = vld [vmem:[#allocation20_spill] sm:$0xff]  ;;  %v814_v27 = vpack.c.bf16 %v782_v33, %v782_v33 }
 0x2c2   :  { %v1060_v51 = vpop.permute.xlu1 %1059  ;;  %v934_v35 = vunpack.c.l.b16 %v15799_v44 }
 0x2c3   :  { %v517_v63 = vpop.permute.xlu0 %516  ;;  %v1070_v49 = vsel %vm842_vm11, %v1060_v51, 0  ;;  %v1043_v51 = vunpack.c.l.b16 %v15800_v42  ;;  %v686_v2 = vpack.c.bf16 %v654_v20, %v654_v20 }
 0x2c4   :  { %v559_v22 = vmul.f32 0.35355338, %v517_v63  ;;  %v10952_v17 = vpack.c.bf16 %v517_v63, %v517_v63  ;;  %1082 = vmatpush.bf16.xpose.msrb.mxu2 %v1070_v49 }
 0x2c5   :  { %972 = vmatpush.bf16.xpose.msrb.mxu0 %v960_v50  ;;  %9773 = vmatpush.bf16.xpose.msra.mxu3 %v960_v50  ;;  %v10974_v44 = vpack.c.b16 %v1044_v56, %v1043_v51  ;;  %v1459_v56 = vunpack.c.l.b16 %v10870_v61 }
 0x2c6   :  { %v10959_v30 = vpack.c.bf16 %v559_v22, %v559_v22  ;;  %v751_v12 = vunpack.c.l.bf16 %v10952_v17 }
 0x2c7   :  { %1347 = vrot.lane.b32.xlu1 %v10700_v37, %s10189_s21 }
 0x2c8   :  { %v623_v48 = vunpack.c.l.bf16 %v10959_v30  ;;  %v783_v49 = vsub.f32 %v517_v63, %v751_v12  ;;  %1310 = vrot.lane.b32.xlu0 %v10720_v60, %s10189_s21  ;;  %v1218_v63 = vunpack.c.l.b16 %v814_v27 }
 0x2ca   :  { %v655_v50 = vsub.f32 %v559_v22, %v623_v48  ;;  %v815_v3 = vpack.c.bf16 %v783_v49, %v783_v49  ;;  %v10976_v42 = vpop.permute.xlu1 %1004  ;;  %v15803_v48 = vld [vmem:[#allocation30_spill] sm:$0xff] }
 0x2cb   :  { %9481 = vmatmul.msk.bf16.vlgmr.msrb.gmra.mxu2 %vm842_vm11, %v10974_v44  ;;  %v1045_v49 = vunpack.c.l.b16 %v15803_v48 }
 0x2cc   :  { %v687_v33 = vpack.c.bf16 %v655_v50, %v655_v50  ;;  %v1219_v12 = vunpack.c.l.b16 %v815_v3  ;;  %9476 = vmatmul.msk.bf16.gmra.mxu3 %vm842_vm11, %v10735_v0  ;;  %v15805_v3 = vld [vmem:[#allocation26_spill] sm:$0xff] }
 0x2cd   :  { %1191 = vmatpush.bf16.xpose.msra.mxu0 %v1183_v45  ;;  %v10972_v45 = vpack.c.b16 %v934_v35, %v933_v52  ;;  %v10984_v52 = vunpack.c.l.b16 %v686_v2  ;;  %v15802_v35 = vld [vmem:[#allocation17_spill] sm:$0xff] }
 0x2ce   :  { %v10986_v22 = vunpack.c.l.b16 %v687_v33  ;;  %v10988_v20 = vpack.c.b16 %v1219_v12, %v1218_v63  ;;  %v15804_v2 = vld [vmem:[#allocation29_spill] sm:$0xff]  ;;  %v1046_v33 = vunpack.c.l.b16 %v15805_v3  ;;  %v15806_v63 = vld [vmem:[#allocation22_spill] sm:$0xff]  ;;  %v1382_v3 = vunpack.c.l.b16 %v10821_v21 }
 0x2cf   :  { %9477 = vmatmul.msk.bf16.vlgmr.msrb.gmra.mxu0 %vm842_vm11, %v10972_v45  ;;  %1308 = vrot.lane.b32.xlu1 %v15802_v35, %s10189_s21  ;;  %v935_v50 = vunpack.c.l.b16 %v15804_v2  ;;  %v936_v12 = vunpack.c.l.b16 %v15806_v63  ;;  %v1461_v2 = vunpack.c.l.b16 %v10846_v43  ;;  %v1460_v63 = vunpack.c.l.b16 %v10824_v39 }
 0x2d0   :  { %15801 = vst [vmem:[#allocation25_spill] sm:$0xff] %v10988_v20  ;;  %1224 = vrot.lane.b32.xlu2 %v10988_v20, %s10189_s21  ;;  %1425 = vrot.lane.b32.xlu0 %v10738_v19, %s10189_s21  ;;  %v1498_v43 = vunpack.c.l.b16 %v10848_v41  ;;  %v1537_v21 = vunpack.c.l.b16 %v10952_v17  ;;  %v1497_v39 = vunpack.c.l.b16 %v10829_v1  ;;  %v1539_v41 = vunpack.c.l.b16 %v10902_v55  ;;  %v15816_v55 = vld [vmem:[#allocation33_spill] sm:$0xff] }
 0x2d1   :  { %v11015_v48 = vpack.c.b16 %v936_v12, %v935_v50  ;;  %v11028_v10 = vpack.c.b16 %v1461_v2, %v1460_v63  ;;  %v1538_v1 = vunpack.c.l.b16 %v10866_v23  ;;  %v988_v23 = vunpack.c.l.b16 %v10685_v15  ;;  %v15818_v2 = vld [vmem:[#allocation51_spill] sm:$0xff] }
 0x2d2   :  { %v1272_v27 = vpop.permute.xlu1 %1271  ;;  %v11042_v61 = vpack.c.b16 %v1498_v43, %v1497_v39 }
 0x2d3   :  { %v10999_v51 = vsel %vm842_vm11, %v1272_v27, 0  ;;  %v11012_v27 = vpack.c.b16 %v1046_v33, %v1045_v49  ;;  %v1458_v49 = vunpack.c.l.b16 %v10844_v54  ;;  %v11026_v33 = vpack.c.b16 %v1383_v29, %v1382_v3  ;;  %15808 = vst [vmem:[#allocation21_spill] sm:$0xff] %v11028_v10 }
 0x2d4   :  { %1285 = vmatpush.bf16.xpose.msra.mxu2 %v10999_v51  ;;  %v1536_v54 = vunpack.c.l.b16 %v10932_v4  ;;  %15810 = vst [vmem:[#allocation29_spill] sm:$0xff] %v11042_v61  ;;  %v11054_v17 = vpack.c.b16 %v1539_v41, %v1538_v1  ;;  %v15814_v4 = vld [vmem:[#allocation10_spill] sm:$0xff]  ;;  %v1098_v3 = vunpack.c.l.b16 %v15818_v2  ;;  %v15820_v1 = vld [vmem:[#allocation32_spill] sm:$0xff] }
 0x2d5   :  { %15807 = vst [vmem:[#allocation20_spill] sm:$0xff] %v11026_v33  ;;  %v11030_v50 = vpack.c.b16 %v1459_v56, %v1458_v49  ;;  %v15812_v56 = vld [vmem:[#allocation14_spill] sm:$0xff] }
 0x2d6   :  { %v11044_v29 = vpack.c.b16 %v1537_v21, %v1536_v54  ;;  %15813 = vst [vmem:[#allocation22_spill] sm:$0xff] %v11054_v17 }
 0x2d7   :  { %1505 = vrot.lane.b32.xlu1 %v10740_v5, %s10189_s21  ;;  %15809 = vst [vmem:[#allocation30_spill] sm:$0xff] %v11030_v50 }
 0x2d8   :  { %1427 = vrot.lane.b32.xlu2 %v10758_v53, %s10189_s21  ;;  %1386 = vrot.lane.b32.xlu0 %v10750_v9, %s10189_s21  ;;  %15811 = vst [vmem:[#allocation26_spill] sm:$0xff] %v11044_v29 }
 0x2db   :  { %9482 = vmatmul.msk.bf16.gmra.mxu2 %vm842_vm11, %v11012_v27 }
 0x2dc   :  { %9478 = vmatmul.msk.bf16.vlgmr.msra.gmra.mxu3 %vm842_vm11, %v11015_v48 }
 0x2df   :  { %1466 = vrot.lane.b32.xlu1 %v11028_v10, %s10189_s21 }
 0x2e0   :  { %1388 = vrot.lane.b32.xlu2 %v11026_v33, %s10189_s21  ;;  %1464 = vrot.lane.b32.xlu0 %v11030_v50, %s10189_s21 }
 0x2e7   :  { %1542 = vrot.lane.b32.xlu1 %v11044_v29, %s10189_s21 }
 0x2e8   :  { %1503 = vrot.lane.b32.xlu2 %v11042_v61, %s10189_s21  ;;  %2471 = vrot.lane.b32.xlu0 %v15812_v56, %s10191_s23 }
 0x2ef   :  { %2551 = vrot.lane.b32.xlu1 %v10681_v28, %s10191_s23 }
 0x2f0   :  { %1544 = vrot.lane.b32.xlu2 %v11054_v17, %s10189_s21  ;;  %2553 = vrot.lane.b32.xlu0 %v10716_v47, %s10191_s23 }
 0x2f7   :  { %2633 = vrot.lane.b32.xlu1 %v10777_v24, %s10191_s23 }
 0x2f8   :  { %2469 = vrot.lane.b32.xlu2 %v15814_v4, %s10191_s23  ;;  %2635 = vrot.lane.b32.xlu0 %v10656_v58, %s10191_s23  ;;  %v1156_v4 = vunpack.c.l.b16 %v15820_v1 }
 0x2ff   :  { %2789 = vrot.lane.b32.xlu1 %v10456_v7, %s10191_s23 }
 0x300   :  { %2512 = vrot.lane.b32.xlu2 %v10660_v62, %s10191_s23  ;;  %2592 = vrot.lane.b32.xlu0 %v10789_v46, %s10191_s23  ;;  %v1154_v46 = vunpack.c.l.b16 %v10853_v34  ;;  %v15817_v34 = vld [vmem:[#allocation13_spill] sm:$0xff] }
 0x307   :  { %2674 = vrot.lane.b32.xlu1 %v10917_v31, %s10191_s23  ;;  %v989_v31 = vunpack.c.l.b16 %v15816_v55 }
 0x308   :  { %2510 = vrot.lane.b32.xlu2 %v10539_v8, %s10191_s23  ;;  %2787 = vrot.lane.b32.xlu0 %v10434_v38, %s10191_s23 }
 0x309   :  { %v1117_v58 = vpop.permute.xlu2 %1116  ;;  %v11107_v12 = vpack.c.b16 %v989_v31, %v988_v23  ;;  %v1101_v31 = vunpack.c.l.b16 %v10850_v26  ;;  %v1208_v26 = vunpack.c.l.b16 %v10937_v36 }
 0x30a   :  { %v1128_v28 = vsel %vm842_vm11, %v1117_v58, 0  ;;  %v15821_v58 = vld [vmem:[#allocation53_spill] sm:$0xff] }
 0x30b   :  { %1136 = vmatpush.bf16.xpose.msrb.mxu3 %v1128_v28  ;;  %v990_v28 = vunpack.c.l.b16 %v15821_v58  ;;  %v1211_v58 = vunpack.c.l.b16 %v10912_v14 }
 0x30f   :  { %2758 = vrot.lane.b32.xlu1 %v10939_v11, %s10191_s23 }
 0x310   :  { %2717 = vrot.lane.b32.xlu2 %v10726_v16, %s10191_s23  ;;  %v1015_v16 = vsel %vm842_vm11, %v10976_v42, 0 }
 0x311   :  { %v1270_v7 = vpop.permute.xlu2 %1269 }
 0x312   :  { %v11086_v62 = vsel %vm842_vm11, %v1270_v7, 0  ;;  %v15822_v7 = vld [vmem:[#allocation31_spill] sm:$0xff] }
 0x313   :  { %1286 = vmatpush.bf16.xpose.msra.mxu2 %v11086_v62 }
 0x318   :  { %2715 = vrot.lane.b32.xlu2 %v10886_v18, %s10191_s23  ;;  %v15815_v18 = vld [vmem:[#allocation54_spill] sm:$0xff] }
 0x31a   :  { %v1007_v38 = vpop.permute.xlu0 %1006  ;;  %9489 = vmatmul.msk.bf16.vlgmr.msra.gmra.mxu2 %vm842_vm11, %v10764_v59  ;;  %v1153_v59 = vunpack.c.l.b16 %v15815_v18 }
 0x31b   :  { %v1018_v8 = vsel %vm842_vm11, %v1007_v38, 0  ;;  %v1155_v38 = vunpack.c.l.b16 %v15822_v7 }
 0x31c   :  { %1026 = vmatpush.bf16.xpose.msrb.mxu1 %v1018_v8 }
 0x320   :  { %2594 = vrot.lane.b32.xlu2 %v10857_v13, %s10191_s23  ;;  %v11105_v13 = vpack.c.b16 %v1154_v46, %v1153_v59 }
 0x322   :  { %v1170_v47 = vpop.permute.xlu0 %1169 }
 0x323   :  { %v1180_v24 = vsel %vm842_vm11, %v1170_v47, 0 }
 0x324   :  { %1027 = vmatpush.bf16.xpose.msrb.mxu1 %v1015_v16  ;;  %1192 = vmatpush.bf16.xpose.msra.mxu0 %v1180_v24  ;;  %v11131_v16 = vpack.c.b16 %v1156_v4, %v1155_v38 }
 0x328   :  { %2676 = vrot.lane.b32.xlu2 %v10884_v32, %s10191_s23  ;;  %v1099_v32 = vunpack.c.l.b16 %v10879_v57  ;;  %v15819_v57 = vld [vmem:[#allocation55_spill] sm:$0xff] }
 0x329   :  { %v991_v41 = vunpack.c.l.b16 %v15819_v57 }
 0x32a   :  { %v1225_v11 = vpop.permute.xlu2 %1224  ;;  %v1115_v42 = vpop.permute.xlu0 %1114  ;;  %9490 = vmatmul.msk.bf16.gmra.mxu2 %vm842_vm11, %v15817_v34  ;;  %v11118_v63 = vpack.c.b16 %v1099_v32, %v1098_v3 }
 0x32b   :  { %9479 = vmatmul.msk.bf16.vlgmr.msrb.gmra.mxu1 %vm842_vm11, %v11107_v12  ;;  %9485 = vmatmul.msk.bf16.vlgmr.msra.gmra.mxu0 %vm842_vm11, %v11105_v13  ;;  %v1125_v15 = vsel %vm842_vm11, %v1115_v42, 0  ;;  %v11129_v47 = vpack.c.b16 %v991_v41, %v990_v28  ;;  %v1235_v59 = vsel %vm842_vm11, %v1225_v11, 0  ;;  %v15823_v42 = vld [vmem:[#allocation50_spill] sm:$0xff]  ;;  %v15824_v28 = vld [vmem:[#allocation52_spill] sm:$0xff] }
 0x32c   :  { %1137 = vmatpush.bf16.xpose.msrb.mxu3 %v1125_v15  ;;  %v1100_v15 = vunpack.c.l.b16 %v15823_v42  ;;  %v1210_v7 = vunpack.c.l.b16 %v15824_v28  ;;  %v15843_v28 = vld [vmem:[#allocation44_spill] sm:$0xff] }
 0x32e   :  { %v11146_v32 = vpack.c.b16 %v1101_v31, %v1100_v15 }
 0x331   :  { %v1227_v43 = vpop.permute.xlu1 %1226 }
 0x332   :  { %v1428_v49 = vpop.permute.xlu2 %1427  ;;  %v1350_v39 = vpop.permute.xlu0 %1349  ;;  %v1238_v54 = vsel %vm842_vm11, %v1227_v43, 0  ;;  %v1209_v43 = vunpack.c.l.b16 %v10959_v30 }
 0x333   :  { %v1433_v21 = vsel %vm842_vm11, %v1428_v49, 0  ;;  %v1355_v56 = vsel %vm842_vm11, %v1350_v39, 0  ;;  %9483 = vmatmul.msk.bf16.vlgmr.msrb.gmra.mxu3 %vm842_vm11, %v11118_v63  ;;  %1246 = vmatpush.bf16.xpose.msra.mxu1 %v1238_v54 }
 0x334   :  { %1441 = vmatpush.bf16.xpose.msrb.mxu2 %v1433_v21  ;;  %1363 = vmatpush.bf16.xpose.msrb.mxu0 %v1355_v56  ;;  %v11155_v39 = vpack.c.b16 %v1209_v43, %v1208_v26 }
 0x339   :  { %v1348_v24 = vpop.permute.xlu1 %1347 }
 0x33a   :  { %v1389_v8 = vpop.permute.xlu2 %1388  ;;  %v1311_v23 = vpop.permute.xlu0 %1310  ;;  %v1352_v55 = vsel %vm842_vm11, %v1348_v24, 0  ;;  %v15826_v24 = vld [vmem:[#allocation12_spill] sm:$0xff] }
 0x33b   :  { %v11134_v46 = vsel %vm842_vm11, %v1389_v8, 0  ;;  %v1316_v18 = vsel %vm842_vm11, %v1311_v23, 0  ;;  %9480 = vmatmul.msk.bf16.gmra.mxu1 %vm842_vm11, %v11129_v47  ;;  %9486 = vmatmul.msk.bf16.gmra.mxu0 %vm842_vm11, %v11131_v16 }
 0x33c   :  { %1247 = vmatpush.bf16.xpose.msra.mxu1 %v1235_v59  ;;  %1324 = vmatpush.bf16.xpose.msra.mxu3 %v1316_v18 }
 0x33d   :  { %1364 = vmatpush.bf16.xpose.msrb.mxu0 %v1352_v55 }
 0x341   :  { %v1309_v2 = vpop.permute.xlu1 %1308 }
 0x342   :  { %v1504_v34 = vpop.permute.xlu2 %1503  ;;  %v1426_v3 = vpop.permute.xlu0 %1425  ;;  %v1313_v11 = vsel %vm842_vm11, %v1309_v2, 0 }
 0x343   :  { %9484 = vmatmul.msk.bf16.gmra.mxu3 %vm842_vm11, %v11146_v32  ;;  %v1430_v49 = vsel %vm842_vm11, %v1426_v3, 0 }
 0x344   :  { %1402 = vmatpush.bf16.xpose.msrb.mxu1 %v11134_v46  ;;  %1325 = vmatpush.bf16.xpose.msra.mxu3 %v1313_v11 }
 0x345   :  { %1442 = vmatpush.bf16.xpose.msrb.mxu2 %v1430_v49 }
 0x349   :  { %v1506_v57 = vpop.permute.xlu1 %1505 }
 0x34a   :  { %v1545_v54 = vpop.permute.xlu2 %1544  ;;  %v1387_v1 = vpop.permute.xlu0 %1386  ;;  %v1511_v4 = vsel %vm842_vm11, %v1506_v57, 0  ;;  %v15838_v57 = vld [vmem:[#allocation18_spill] sm:$0xff] }
 0x34b   :  { %v11158_v41 = vsel %vm842_vm11, %v1545_v54, 0  ;;  %9487 = vmatmul.msk.bf16.vlgmr.msra.gmra.mxu1 %vm842_vm11, %v11155_v39  ;;  %9493 = vmatmul.msk.bf16.vlgmr.msrb.gmra.mxu0 %vm842_vm11, %v10972_v45  ;;  %v1391_v30 = vsel %vm842_vm11, %v1387_v1, 0  ;;  %v1508_v45 = vsel %vm842_vm11, %v1504_v34, 0  ;;  %v15832_v34 = vld [vmem:[#allocation24_spill] sm:$0xff]  ;;  %v15837_v54 = vld [vmem:[#allocation19_spill] sm:$0xff] }
 0x34c   :  { %9497 = vmatmul.msk.bf16.vlgmr.msrb.gmra.mxu2 %vm842_vm11, %v10974_v44  ;;  %1403 = vmatpush.bf16.xpose.msrb.mxu1 %v1391_v30  ;;  %v11175_v44 = vpop.f32.mrf.mxu3  ;;  %v15839_v1 = vpack.c.b16 %v15837_v54, %v15838_v57  ;;  %v15856_v54 = vld [vmem:[#allocation62_spill] sm:$0xff]  ;;  %v15857_v57 = vld [vmem:[#allocation61_spill] sm:$0xff] }
 0x34d   :  { %1593 = vmatpush.bf16.xpose.msra.mxu2 %v10999_v51  ;;  %1519 = vmatpush.bf16.xpose.msra.mxu0 %v1511_v4 }
 0x34e   :  { %v11214_v31 = vpop.f32.mrf.mxu2 }
 0x351   :  { %v1467_v36 = vpop.permute.xlu1 %1466 }
 0x352   :  { %v1472_v51 = vsel %vm842_vm11, %v1467_v36, 0 }
 0x353   :  { %9491 = vmatmul.msk.bf16.vlgmr.msra.gmra.mxu3 %vm842_vm11, %v10930_v40 }
 0x354   :  { %1558 = vmatpush.bf16.xpose.msra.mxu1 %v11158_v41  ;;  %1480 = vmatpush.bf16.xpose.msrb.mxu3 %v1472_v51  ;;  %v11185_v14 = vpop.f32.mrf.mxu3 }
 0x355   :  { %1594 = vmatpush.bf16.xpose.msra.mxu2 %v11086_v62  ;;  %1520 = vmatpush.bf16.xpose.msra.mxu0 %v1508_v45  ;;  %v1465_v62 = vpop.permute.xlu0 %1464 }
 0x356   :  { %v1469_v40 = vsel %vm842_vm11, %v1465_v62, 0 }
 0x359   :  { %v1543_v38 = vpop.permute.xlu1 %1542 }
 0x35a   :  { %v1547_v8 = vsel %vm842_vm11, %v1543_v38, 0 }
 0x35b   :  { %9494 = vmatmul.msk.bf16.gmra.mxu0 %vm842_vm11, %v11015_v48 }
 0x35c   :  { %9498 = vmatmul.msk.bf16.gmra.mxu2 %vm842_vm11, %v11012_v27  ;;  %1481 = vmatpush.bf16.xpose.msrb.mxu3 %v1469_v40  ;;  %v15825_v27 = vld [vmem:[#allocation11_spill] sm:$0xff] }
 0x35d   :  { %1733 = vmatpush.bf16.xpose.msrb.mxu2 %v1433_v21  ;;  %1663 = vmatpush.bf16.xpose.msrb.mxu0 %v1355_v56  ;;  %v1213_v21 = vpack.c.b16 %v1211_v58, %v1210_v7  ;;  %v11189_v56 = vpop.f32.mrf.mxu3  ;;  %v2472_v48 = vpop.permute.xlu0 %2471  ;;  %v15827_v23 = vpack.c.b16 %v15825_v27, %v15826_v24  ;;  %v15844_v7 = vld [vmem:[#allocation36_spill] sm:$0xff] }
 0x35e   :  { %1559 = vmatpush.bf16.xpose.msra.mxu1 %v1547_v8  ;;  %v15845_v62 = vpack.c.b16 %v15843_v28, %v15844_v7  ;;  %v15847_v27 = vld [vmem:[#allocation48_spill] sm:$0xff]  ;;  %v15860_v7 = vld [vmem:[#allocation59_spill] sm:$0xff] }
 0x35f   :  { %9488 = vmatmul.msk.bf16.gmra.mxu1 %vm842_vm11, %v1213_v21  ;;  %v15859_v28 = vld [vmem:[#allocation56_spill] sm:$0xff] }
 0x363   :  { %9492 = vmatmul.msk.bf16.gmra.mxu3 %vm842_vm11, %v10735_v0  ;;  %v2470_v0 = vpop.permute.xlu2 %2469 }
 0x364   :  { %1628 = vmatpush.bf16.xpose.msra.mxu3 %v1316_v18 }
 0x365   :  { %1734 = vmatpush.bf16.xpose.msrb.mxu2 %v1430_v49  ;;  %1664 = vmatpush.bf16.xpose.msrb.mxu0 %v1352_v55  ;;  %v11202_v18 = vpop.f32.mrf.mxu3  ;;  %v2554_v55 = vpop.permute.xlu0 %2553  ;;  %v15835_v49 = vld [vmem:[#allocation27_spill] sm:$0xff] }
 0x36b   :  { %9501 = vmatmul.msk.bf16.vlgmr.msra.gmra.mxu0 %vm842_vm11, %v11105_v13 }
 0x36c   :  { %1629 = vmatpush.bf16.xpose.msra.mxu3 %v1313_v11  ;;  %9505 = vmatmul.msk.bf16.vlgmr.msra.gmra.mxu2 %vm842_vm11, %v15827_v23  ;;  %v15834_v11 = vld [vmem:[#allocation28_spill] sm:$0xff] }
 0x36d   :  { %1803 = vmatpush.bf16.xpose.msra.mxu0 %v1511_v4  ;;  %2487 = vmatpush.bf16.msra.mxu2 %v2472_v48  ;;  %v11208_v13 = vpop.f32.mrf.mxu3  ;;  %v2636_v3 = vpop.permute.xlu0 %2635  ;;  %v15836_v43 = vpack.c.b16 %v15834_v11, %v15835_v49  ;;  %v15846_v48 = vld [vmem:[#allocation49_spill] sm:$0xff] }
 0x36e   :  { %v15848_v24 = vpack.c.b16 %v15846_v48, %v15847_v27  ;;  %v15863_v48 = vld [vmem:[#allocation46_spill] sm:$0xff] }
 0x36f   :  { %9495 = vmatmul.msk.bf16.vlgmr.msrb.gmra.mxu1 %vm842_vm11, %v11107_v12  ;;  %v15828_v12 = vld [vmem:[#allocation16_spill] sm:$0xff] }
 0x370   :  { %1698 = vmatpush.bf16.xpose.msrb.mxu1 %v11134_v46  ;;  %v15829_v46 = vld [vmem:[#allocation15_spill] sm:$0xff] }
 0x371   :  { %2488 = vmatpush.bf16.msra.mxu2 %v2470_v0  ;;  %v15830_v59 = vpack.c.b16 %v15828_v12, %v15829_v46 }
 0x373   :  { %9499 = vmatmul.msk.bf16.vlgmr.msrb.gmra.mxu3 %vm842_vm11, %v11118_v63  ;;  %v2513_v63 = vpop.permute.xlu2 %2512 }
 0x374   :  { %1768 = vmatpush.bf16.xpose.msrb.mxu3 %v1472_v51  ;;  %v15840_v51 = vld [vmem:[#allocation34_spill] sm:$0xff] }
 0x375   :  { %1804 = vmatpush.bf16.xpose.msra.mxu0 %v1508_v45  ;;  %v11218_v42 = vpop.f32.mrf.mxu3  ;;  %v15841_v45 = vld [vmem:[#allocation35_spill] sm:$0xff] }
 0x376   :  { %v15842_v58 = vpack.c.b16 %v15840_v51, %v15841_v45 }
 0x378   :  { %1699 = vmatpush.bf16.xpose.msrb.mxu1 %v1391_v30  ;;  %v11239_v30 = vpop.f32.mrf.mxu0 }
 0x37b   :  { %9502 = vmatmul.msk.bf16.gmra.mxu0 %vm842_vm11, %v11131_v16  ;;  %v2511_v15 = vpop.permute.xlu2 %2510  ;;  %v15831_v16 = vld [vmem:[#allocation23_spill] sm:$0xff] }
 0x37c   :  { %9506 = vmatmul.msk.bf16.gmra.mxu2 %vm842_vm11, %v15830_v59  ;;  %1769 = vmatpush.bf16.xpose.msrb.mxu3 %v1469_v40  ;;  %v15833_v2 = vpack.c.b16 %v15831_v16, %v15832_v34  ;;  %v15849_v59 = vld [vmem:[#allocation40_spill] sm:$0xff] }
 0x37d   :  { %v11233_v26 = vpop.f32.mrf.mxu3 }
 0x37f   :  { %9496 = vmatmul.msk.bf16.gmra.mxu1 %vm842_vm11, %v11129_v47  ;;  %v2552_v47 = vpop.permute.xlu1 %2551 }
 0x380   :  { %v11254_v40 = vpop.f32.mrf.mxu0 }
 0x383   :  { %9500 = vmatmul.msk.bf16.gmra.mxu3 %vm842_vm11, %v11146_v32  ;;  %v11231_v32 = vpop.f32.mrf.mxu2  ;;  %v2718_v4 = vpop.permute.xlu2 %2717 }
 0x385   :  { %v11243_v36 = vpop.f32.mrf.mxu3 }
 0x38b   :  { %9509 = vmatmul.msk.bf16.vlgmr.msrb.gmra.mxu0 %vm842_vm11, %v15833_v2  ;;  %v2716_v38 = vpop.permute.xlu2 %2715 }
 0x38c   :  { %9513 = vmatmul.msk.bf16.vlgmr.msrb.gmra.mxu2 %vm842_vm11, %v15836_v43  ;;  %2569 = vmatpush.bf16.msrb.mxu0 %v2554_v55 }
 0x38d   :  { %2651 = vmatpush.bf16.msrb.mxu2 %v2636_v3  ;;  %v2593_v3 = vpop.permute.xlu0 %2592 }
 0x38f   :  { %9503 = vmatmul.msk.bf16.vlgmr.msra.gmra.mxu1 %vm842_vm11, %v11155_v39  ;;  %v2634_v39 = vpop.permute.xlu1 %2633 }
 0x390   :  { %1838 = vmatpush.bf16.xpose.msra.mxu1 %v11158_v41  ;;  %2570 = vmatpush.bf16.msrb.mxu0 %v2552_v47  ;;  %v11241_v41 = vpop.f32.mrf.mxu2  ;;  %v15852_v47 = vld [vmem:[#allocation58_spill] sm:$0xff] }
 0x391   :  { %2652 = vmatpush.bf16.msrb.mxu2 %v2634_v39 }
 0x393   :  { %9507 = vmatmul.msk.bf16.vlgmr.msra.gmra.mxu3 %vm842_vm11, %v15839_v1  ;;  %v2595_v12 = vpop.permute.xlu2 %2594  ;;  %v15858_v1 = vpack.c.b16 %v15856_v54, %v15857_v57 }
 0x394   :  { %2528 = vmatpush.bf16.msra.mxu3 %v2513_v63  ;;  %v15850_v63 = vld [vmem:[#allocation41_spill] sm:$0xff] }
 0x395   :  { %v15851_v55 = vpack.c.b16 %v15849_v59, %v15850_v63 }
 0x397   :  { %v11274_v34 = vpop.permute.xlu1 %2789 }
 0x398   :  { %1839 = vmatpush.bf16.xpose.msra.mxu1 %v1547_v8  ;;  %2529 = vmatpush.bf16.msra.mxu3 %v2511_v15  ;;  %v11256_v8 = vpop.f32.mrf.mxu2  ;;  %v15853_v15 = vld [vmem:[#allocation57_spill] sm:$0xff]  ;;  %15855 = vst [vmem:[#allocation14_spill] sm:$0xff] %v11274_v34 }
 0x399   :  { %v15854_v16 = vpack.c.b16 %v15852_v47, %v15853_v15  ;;  %v15866_v47 = vld [vmem:[#allocation63_spill] sm:$0xff] }
 0x39b   :  { %9510 = vmatmul.msk.bf16.gmra.mxu0 %vm842_vm11, %v15842_v58  ;;  %v2677_v43 = vpop.permute.xlu2 %2676 }
 0x39c   :  { %9514 = vmatmul.msk.bf16.gmra.mxu2 %vm842_vm11, %v15845_v62  ;;  %v15861_v62 = vpack.c.b16 %v15859_v28, %v15860_v7 }
 0x39f   :  { %9504 = vmatmul.msk.bf16.gmra.mxu1 %vm842_vm11, %v1213_v21  ;;  %v11262_v21 = vpop.f32.mrf.mxu3  ;;  %v2675_v51 = vpop.permute.xlu1 %2674 }
 0x3a0   :  { %v1288_v46 = vpop.f32.mrf.mxu2 }
 0x3a3   :  { %9508 = vmatmul.msk.bf16.gmra.mxu3 %vm842_vm11, %v15848_v24 }
 0x3a7   :  { %v11276_v2 = vpop.f32.mrf.mxu3  ;;  %v2759_v57 = vpop.permute.xlu1 %2758 }
 0x3a8   :  { %v1029_v23 = vpop.f32.mrf.mxu1  ;;  %v11264_v0 = vpop.f32.mrf.mxu0 }
 0x3a9   :  { %v1290_v39 = vpop.f32.mrf.mxu2 }
 0x3aa   :  { %v1291_v35 = vadd.f32 %v1290_v39, %v11185_v14 }
 0x3ab   :  { %9517 = vmatmul.msk.bf16.vlgmr.msra.gmra.mxu0 %vm842_vm11, %v15854_v16 }
 0x3ac   :  { %2733 = vmatpush.bf16.msra.mxu0 %v2718_v4 }
 0x3af   :  { %9511 = vmatmul.msk.bf16.vlgmr.msrb.gmra.mxu1 %vm842_vm11, %v15851_v55  ;;  %v15865_v55 = vld [vmem:[#allocation60_spill] sm:$0xff] }
 0x3b0   :  { %2610 = vmatpush.bf16.msrb.mxu1 %v2595_v12  ;;  %2734 = vmatpush.bf16.msra.mxu0 %v2716_v38  ;;  %v11278_v11 = vpop.f32.mrf.mxu1  ;;  %v11280_v49 = vpop.f32.mrf.mxu0  ;;  %v15862_v38 = vld [vmem:[#allocation38_spill] sm:$0xff]  ;;  %v15867_v15 = vpack.c.b16 %v15865_v55, %v15866_v47 }
 0x3b1   :  { %v15864_v27 = vpack.c.b16 %v15862_v38, %v15863_v48  ;;  %v1293_v24 = vpop.f32.mrf.mxu2 }
 0x3b3   :  { %9515 = vmatmul.msk.bf16.vlgmr.msrb.gmra.mxu3 %vm842_vm11, %v15858_v1  ;;  %v15868_v1 = vpack.c.b16 %v10986_v22, %v10984_v52  ;;  %v15869_v52 = vpack.c.b16 %v10949_v6, %v10957_v25  ;;  %v1289_v25 = vadd.f32 %v1288_v46, %v11175_v44 }
 0x3b4   :  { %2611 = vmatpush.bf16.msrb.mxu1 %v2593_v3  ;;  %2692 = vmatpush.bf16.msrb.mxu3 %v2677_v43 }
 0x3b6   :  { %v1139_v4 = vpop.f32.mrf.mxu3 }
 0x3b8   :  { %2693 = vmatpush.bf16.msrb.mxu3 %v2675_v51  ;;  %v1034_v45 = vpop.f32.mrf.mxu1  ;;  %v1199_v58 = vpop.f32.mrf.mxu0 }
 0x3b9   :  { %v1295_v3 = vpop.f32.mrf.mxu2 }
 0x3bb   :  { %9518 = vmatmul.msk.bf16.gmra.mxu0 %vm842_vm11, %v15864_v27 }
 0x3be   :  { %v11294_v12 = vpop.f32.mrf.mxu3 }
 0x3bf   :  { %9512 = vmatmul.msk.bf16.gmra.mxu1 %vm842_vm11, %v15861_v62 }
 0x3c0   :  { %v11296_v59 = vpop.f32.mrf.mxu1  ;;  %v11298_v63 = vpop.f32.mrf.mxu0 }
 0x3c3   :  { %9516 = vmatmul.msk.bf16.gmra.mxu3 %vm842_vm11, %v15867_v15 }
 0x3c6   :  { %v1144_v16 = vpop.f32.mrf.mxu3 }
 0x3c8   :  { %v1249_v43 = vpop.f32.mrf.mxu1  ;;  %v1366_v54 = vpop.f32.mrf.mxu0 }
 0x3ce   :  { %v11308_v51 = vpop.f32.mrf.mxu3 }
 0x3cf   :  { %9519 = vmatmul.msk.bf16.vlgmr.msra.gmra.mxu1 %vm842_vm11, %v15868_v1  ;;  %v1444_v28 = vpop.f32.mrf.mxu2 }
 0x3d0   :  { %2774 = vmatpush.bf16.msra.mxu1 %v2759_v57  ;;  %v11310_v7 = vpop.f32.mrf.mxu1  ;;  %v1368_v62 = vpop.f32.mrf.mxu0 }
 0x3d6   :  { %v11312_v38 = vpop.f32.mrf.mxu3 }
 0x3d7   :  { %v11314_v48 = vpop.f32.mrf.mxu2 }
 0x3d8   :  { %v11318_v55 = vpop.f32.mrf.mxu0 }
 0x3dc   :  { %v11316_v27 = vpop.f32.mrf.mxu1 }
 0x3de   :  { %v11324_v22 = vpop.f32.mrf.mxu3 }
 0x3df   :  { %9520 = vmatmul.msk.bf16.gmra.mxu1 %vm842_vm11, %v15869_v52  ;;  %v11326_v47 = vpop.f32.mrf.mxu2 }
 0x3e0   :  { %v11330_v57 = vpop.f32.mrf.mxu0 }
 0x3e4   :  { %v11328_v15 = vpop.f32.mrf.mxu1 }
 0x3e6   :  { %v11332_v1 = vpop.f32.mrf.mxu3 }
 0x3e7   :  { %v11334_v17 = vpop.f32.mrf.mxu2 }
 0x3e8   :  { %v11336_v10 = vpop.f32.mrf.mxu0 }
 0x3ec   :  { %v1405_v61 = vpop.f32.mrf.mxu1 }
 0x3ed   :  { %v11338_v5 = vadd.f32 %v1405_v61, %v1029_v23 }
 0x3ee   :  { %v11341_v6 = vpop.f32.mrf.mxu3 }
 0x3ef   :  { %v1596_v52 = vpop.f32.mrf.mxu2 }
 0x3f0   :  { %v11343_v29 = vadd.f32 %v1596_v52, %v1289_v25  ;;  %v11347_v9 = vpop.f32.mrf.mxu0 }
 0x3f2   :  { %v1883_v33 = vsel %vm55_vm0, %v11343_v29, -inf }
 0x3f3   :  { %1884 = vmax.xlane.f32.xlu0 %v1883_v33  ;;  %v1294_v33 = vadd.f32 %v1293_v24, %v11189_v56 }
 0x3f4   :  { %v11345_v50 = vpop.f32.mrf.mxu1 }
 0x3f6   :  { %v1483_v53 = vpop.f32.mrf.mxu3 }
 0x3f7   :  { %v11352_v61 = vadd.f32 %v1483_v53, %v1139_v4  ;;  %v1598_v23 = vpop.f32.mrf.mxu2 }
 0x3f8   :  { %v11354_v44 = vadd.f32 %v1598_v23, %v1291_v35  ;;  %v1527_v34 = vpop.f32.mrf.mxu0 }
 0x3f9   :  { %v11358_v52 = vadd.f32 %v1527_v34, %v1199_v58 }
 0x3fa   :  { %v1886_v60 = vsel %vm55_vm0, %v11354_v44, -inf }
 0x3fb   :  { %1887 = vmax.xlane.f32.xlu2 %v1886_v60 }
 0x3fc   :  { %v1410_v46 = vpop.f32.mrf.mxu1 }
 0x3fd   :  { %v11356_v25 = vadd.f32 %v1410_v46, %v1034_v45  ;;  %v1367_v45 = vadd.f32 %v1366_v54, %v11239_v30  ;;  %v1369_v30 = vadd.f32 %v1368_v62, %v11254_v40  ;;  %v1328_v40 = vadd.f32 %v11312_v38, %v11208_v13 }
 0x3fe   :  { %v11363_v19 = vpop.f32.mrf.mxu3  ;;  %v1330_v38 = vadd.f32 %v11324_v22, %v11218_v42  ;;  %v1450_v22 = vadd.f32 %v11326_v47, %v11241_v41 }
 0x3ff   :  { %v1601_v14 = vpop.f32.mrf.mxu2 }
 0x400   :  { %v11365_v53 = vadd.f32 %v1601_v14, %v1294_v33  ;;  %v11369_v35 = vpop.f32.mrf.mxu0  ;;  %v1296_v14 = vadd.f32 %v1295_v3, %v11202_v18 }
 0x402   :  { %v1889_v4 = vsel %vm55_vm0, %v11365_v53, -inf }
 0x403   :  { %1890 = vmax.xlane.f32.xlu2 %v1889_v4  ;;  %v1445_v4 = vadd.f32 %v1444_v28, %v11214_v31  ;;  %v1372_v28 = vadd.f32 %v11318_v55, %v11262_v21  ;;  %v1447_v21 = vadd.f32 %v11314_v48, %v11231_v32  ;;  %v1333_v48 = vadd.f32 %v11332_v1, %v11233_v26 }
 0x404   :  { %v11367_v39 = vpop.f32.mrf.mxu1 }
 0x406   :  { %v1488_v34 = vpop.f32.mrf.mxu3 }
 0x407   :  { %v11374_v58 = vadd.f32 %v1488_v34, %v1144_v16  ;;  %v1603_v60 = vpop.f32.mrf.mxu2 }
 0x408   :  { %v1666_v24 = vpop.f32.mrf.mxu0  ;;  %v11387_v16 = vadd.f32 %v1603_v60, %v1296_v14 }
 0x409   :  { %v11378_v46 = vadd.f32 %v1666_v24, %v1367_v45 }
 0x40a   :  { %v1892_v31 = vsel %vm55_vm0, %v11387_v16, -inf }
 0x40b   :  { %v1907_v33 = vsel %vm55_vm0, %v11378_v46, -inf }
 0x40c   :  { %v1561_v56 = vpop.f32.mrf.mxu1  ;;  %1908 = vmax.xlane.f32.xlu1 %v1907_v33 }
 0x40d   :  { %v11376_v23 = vadd.f32 %v1561_v56, %v1249_v43 }
 0x40e   :  { %v11384_v20 = vpop.f32.mrf.mxu3 }
 0x40f   :  { %v1736_v54 = vpop.f32.mrf.mxu2 }
 0x410   :  { %v11389_v34 = vadd.f32 %v1736_v54, %v1445_v4  ;;  %v1668_v45 = vpop.f32.mrf.mxu0 }
 0x411   :  { %v11393_v56 = vadd.f32 %v1668_v45, %v1369_v30 }
 0x412   :  { %v1931_v24 = vsel %vm55_vm0, %v11389_v34, -inf }
 0x413   :  { %1932 = vmax.xlane.f32.xlu2 %v1931_v24  ;;  %v1910_v18 = vsel %vm55_vm0, %v11393_v56, -inf }
 0x414   :  { %v11391_v43 = vpop.f32.mrf.mxu1  ;;  %1911 = vmax.xlane.f32.xlu0 %v1910_v18  ;;  %1893 = vmax.xlane.f32.xlu1 %v1892_v31 }
 0x416   :  { %v1631_v3 = vpop.f32.mrf.mxu3 }
 0x417   :  { %v11405_v62 = vadd.f32 %v1631_v3, %v1328_v40  ;;  %v1738_v60 = vpop.f32.mrf.mxu2 }
 0x418   :  { %v1671_v14 = vpop.f32.mrf.mxu0  ;;  %v11422_v45 = vadd.f32 %v1738_v60, %v1447_v21 }
 0x419   :  { %v11410_v30 = vadd.f32 %v1671_v14, %v1372_v28  ;;  %v1895_v13 = vsel %vm55_vm0, %v11405_v62, -inf  ;;  %v1523_v28 = vadd.f32 %v11336_v10, %v11264_v0  ;;  %v1452_v10 = vadd.f32 %v11334_v17, %v11256_v8 }
 0x41a   :  { %v1934_v42 = vsel %vm55_vm0, %v11422_v45, -inf  ;;  %v1335_v0 = vadd.f32 %v11341_v6, %v11243_v36 }
 0x41b   :  { %v1913_v54 = vsel %vm55_vm0, %v11410_v30, -inf }
 0x41c   :  { %v1566_v33 = vpop.f32.mrf.mxu1  ;;  %1914 = vmax.xlane.f32.xlu0 %v1913_v54  ;;  %1896 = vmax.xlane.f32.xlu1 %v1895_v13 }
 0x41d   :  { %v11408_v4 = vadd.f32 %v1566_v33, %v11316_v27  ;;  %v1374_v27 = vadd.f32 %v11330_v57, %v11276_v2 }
 0x41e   :  { %v1633_v55 = vpop.f32.mrf.mxu3 }
 0x41f   :  { %v11424_v24 = vadd.f32 %v1633_v55, %v1330_v38  ;;  %v1741_v3 = vpop.f32.mrf.mxu2  ;;  %v1525_v38 = vadd.f32 %v11347_v9, %v11280_v49 }
 0x420   :  { %v1673_v31 = vpop.f32.mrf.mxu0  ;;  %v11444_v33 = vadd.f32 %v1741_v3, %v1450_v22 }
 0x421   :  { %v11428_v40 = vadd.f32 %v1673_v31, %v1374_v27  ;;  %v1898_v2 = vsel %vm55_vm0, %v11424_v24, -inf }
 0x422   :  { %v1937_v41 = vsel %vm55_vm0, %v11444_v33, -inf }
 0x423   :  { %v1916_v32 = vsel %vm55_vm0, %v11428_v40, -inf }
 0x424   :  { %v11426_v18 = vpop.f32.mrf.mxu1  ;;  %1917 = vmax.xlane.f32.xlu2 %v1916_v32  ;;  %1935 = vmax.xlane.f32.xlu1 %v1934_v42 }
 0x425   :  { %1899 = vmax.xlane.f32.xlu0 %v1898_v2 }
 0x426   :  { %v1636_v57 = vpop.f32.mrf.mxu3 }
 0x427   :  { %v11442_v60 = vadd.f32 %v1636_v57, %v1333_v48  ;;  %v1743_v1 = vpop.f32.mrf.mxu2  ;;  %v1408_v57 = vadd.f32 %v11345_v50, %v11278_v11  ;;  %v1413_v50 = vadd.f32 %v11367_v39, %v11296_v59 }
 0x428   :  { %v1806_v54 = vpop.f32.mrf.mxu0  ;;  %v11460_v55 = vadd.f32 %v1743_v1, %v1452_v10 }
 0x429   :  { %v11446_v13 = vadd.f32 %v1806_v54, %v1523_v28  ;;  %v1901_v26 = vsel %vm55_vm0, %v11442_v60, -inf  ;;  %v1486_v28 = vadd.f32 %v11363_v19, %v11294_v12 }
 0x42a   :  { %v1940_v17 = vsel %vm55_vm0, %v11460_v55, -inf }
 0x42b   :  { %v1955_v21 = vsel %vm55_vm0, %v11446_v13, -inf }
 0x42c   :  { %v1701_v14 = vpop.f32.mrf.mxu1  ;;  %1956 = vmax.xlane.f32.xlu1 %v1955_v21  ;;  %1902 = vmax.xlane.f32.xlu2 %v1901_v26 }
 0x42d   :  { %1938 = vmax.xlane.f32.xlu0 %v1937_v41  ;;  %v11476_v49 = vadd.f32 %v1701_v14, %v11338_v5 }
 0x42e   :  { %v1638_v47 = vpop.f32.mrf.mxu3 }
 0x42f   :  { %v11462_v27 = vadd.f32 %v1638_v47, %v1335_v0  ;;  %v1919_v22 = vsel %vm55_vm0, %v11476_v49, -inf  ;;  %v1491_v47 = vadd.f32 %v11384_v20, %v11308_v51 }
 0x430   :  { %v1808_v3 = vpop.f32.mrf.mxu0 }
 0x431   :  { %v11464_v32 = vadd.f32 %v1808_v3, %v1525_v38  ;;  %v1904_v36 = vsel %vm55_vm0, %v11462_v27, -inf }
 0x433   :  { %v1958_v42 = vsel %vm55_vm0, %v11464_v32, -inf }
 0x434   :  { %v1703_v31 = vpop.f32.mrf.mxu1  ;;  %1941 = vmax.xlane.f32.xlu2 %v1940_v17  ;;  %1905 = vmax.xlane.f32.xlu1 %v1904_v36 }
 0x435   :  { %1959 = vmax.xlane.f32.xlu0 %v1958_v42  ;;  %v11486_v54 = vadd.f32 %v1703_v31, %v1408_v57  ;;  %v1564_v42 = vadd.f32 %v11391_v43, %v11310_v7  ;;  %v1569_v7 = vadd.f32 %v11426_v18, %v11328_v15 }
 0x436   :  { %v1771_v9 = vpop.f32.mrf.mxu3 }
 0x437   :  { %v11473_v8 = vadd.f32 %v1771_v9, %v11352_v61  ;;  %v1922_v19 = vsel %vm55_vm0, %v11486_v54, -inf }
 0x438   :  { %v1811_v2 = vpop.f32.mrf.mxu0 }
 0x439   :  { %v1943_v48 = vsel %vm55_vm0, %v11473_v8, -inf  ;;  %v11491_v14 = vadd.f32 %v1811_v2, %v11358_v52  ;;  %v1530_v52 = vadd.f32 %v11369_v35, %v11298_v63 }
 0x43b   :  { %v1961_v12 = vsel %vm55_vm0, %v11491_v14, -inf }
 0x43c   :  { %v1706_v6 = vpop.f32.mrf.mxu1  ;;  %1944 = vmax.xlane.f32.xlu2 %v1943_v48 }
 0x43d   :  { %1920 = vmax.xlane.f32.xlu0 %v1919_v22  ;;  %v11514_v63 = vadd.f32 %v1706_v6, %v11356_v25  ;;  %v11533_v6 = vpop.permute.xlu0 %2787 }
 0x43e   :  { %v1773_v61 = vpop.f32.mrf.mxu3 }
 0x43f   :  { %v11488_v5 = vadd.f32 %v1773_v61, %v1486_v28  ;;  %v1925_v17 = vsel %vm55_vm0, %v11514_v63, -inf }
 0x440   :  { %v1813_v11 = vpop.f32.mrf.mxu0 }
 0x441   :  { %v1946_v26 = vsel %vm55_vm0, %v11488_v5, -inf  ;;  %v11505_v10 = vadd.f32 %v1813_v11, %v1530_v52 }
 0x442   :  { %1947 = vmax.xlane.f32.xlu1 %v1946_v26 }
 0x443   :  { %v1964_v39 = vsel %vm55_vm0, %v11505_v10, -inf }
 0x444   :  { %v1708_v21 = vpop.f32.mrf.mxu1  ;;  %1923 = vmax.xlane.f32.xlu2 %v1922_v19 }
 0x445   :  { %v11503_v1 = vadd.f32 %v1708_v21, %v1413_v50  ;;  %1962 = vmax.xlane.f32.xlu0 %v1961_v12 }
 0x446   :  { %v1776_v41 = vpop.f32.mrf.mxu3 }
 0x447   :  { %v1928_v59 = vsel %vm55_vm0, %v11503_v1, -inf  ;;  %v11527_v20 = vadd.f32 %v1776_v41, %v11374_v58 }
 0x449   :  { %v1949_v9 = vsel %vm55_vm0, %v11527_v20, -inf }
 0x44a   :  { %1929 = vmax.xlane.f32.xlu1 %v1928_v59 }
 0x44c   :  { %v1841_v0 = vpop.f32.mrf.mxu1  ;;  %1965 = vmax.xlane.f32.xlu2 %v1964_v39 }
 0x44d   :  { %v11538_v43 = vadd.f32 %v1841_v0, %v11376_v23 }
 0x44e   :  { %v1778_v38 = vpop.f32.mrf.mxu3 }
 0x44f   :  { %v11516_v35 = vadd.f32 %v1778_v38, %v1491_v47  ;;  %v1967_v22 = vsel %vm55_vm0, %v11538_v43, -inf }
 0x451   :  { %v1952_v3 = vsel %vm55_vm0, %v11516_v35, -inf }
 0x452   :  { %1953 = vmax.xlane.f32.xlu1 %v1952_v3 }
 0x454   :  { %v1843_v31 = vpop.f32.mrf.mxu1  ;;  %1926 = vmax.xlane.f32.xlu2 %v1925_v17 }
 0x455   :  { %v11524_v36 = vadd.f32 %v1843_v31, %v1564_v42 }
 0x457   :  { %v1970_v25 = vsel %vm55_vm0, %v11524_v36, -inf }
 0x45a   :  { %1971 = vmax.xlane.f32.xlu1 %v1970_v25 }
 0x45c   :  { %v1846_v51 = vpop.f32.mrf.mxu1  ;;  %1950 = vmax.xlane.f32.xlu2 %v1949_v9 }
 0x45d   :  { %v11547_v28 = vadd.f32 %v1846_v51, %v11408_v4 }
 0x45f   :  { %v1973_v23 = vsel %vm55_vm0, %v11547_v28, -inf }
 0x464   :  { %v1848_v2 = vpop.f32.mrf.mxu1  ;;  %1968 = vmax.xlane.f32.xlu2 %v1967_v22 }
 0x465   :  { %v11540_v58 = vadd.f32 %v1848_v2, %v1569_v7 }
 0x466   :  { %v1885_v57 = vpop.xlane.xlu0 %1884 }
 0x467   :  { %v1976_v48 = vsel %vm55_vm0, %v11540_v58, -inf  ;;  %v1979_v15 = vsub.f32 %v11343_v29, %v1885_v57 }
 0x468   :  { %1977 = vmax.xlane.f32.xlu0 %v1976_v48 }
 0x469   :  { %v2011_v18 = vmul.f32 1.442695, %v1979_v15 }
 0x46b   :  { %9804 = vpow2.f32 %v2011_v18 }
 0x46c   :  { %1974 = vmax.xlane.f32.xlu2 %v1973_v23 }
 0x46e   :  { %v1888_v61 = vpop.xlane.xlu2 %1887 }
 0x46f   :  { %v1980_v21 = vsub.f32 %v11354_v44, %v1888_v61 }
 0x471   :  { %v11553_v26 = vpop.eup %9804  ;;  %v2013_v50 = vmul.f32 1.442695, %v1980_v21 }
 0x472   :  { %v2075_v19 = vsel %vm55_vm0, %v11553_v26, 0.0 }
 0x473   :  { %9806 = vpow2.f32 %v2013_v50  ;;  %2076 = vadd.xlane.f32.xlu1 %v2075_v19 }
 0x476   :  { %v1891_v4 = vpop.xlane.xlu2 %1890 }
 0x477   :  { %v1981_v29 = vsub.f32 %v11365_v53, %v1891_v4 }
 0x479   :  { %v11558_v11 = vpop.eup %9806  ;;  %v2015_v12 = vmul.f32 1.442695, %v1981_v29 }
 0x47a   :  { %v2078_v52 = vsel %vm55_vm0, %v11558_v11, 0.0 }
 0x47b   :  { %9808 = vpow2.f32 %v2015_v12  ;;  %2079 = vadd.xlane.f32.xlu0 %v2078_v52 }
 0x47f   :  { %v1909_v44 = vpop.xlane.xlu1 %1908 }
 0x480   :  { %v1987_v41 = vsub.f32 %v11378_v46, %v1909_v44 }
 0x481   :  { %v11563_v0 = vpop.eup %9808 }
 0x482   :  { %v2027_v59 = vmul.f32 1.442695, %v1987_v41  ;;  %v2081_v39 = vsel %vm55_vm0, %v11563_v0, 0.0 }
 0x483   :  { %2082 = vadd.xlane.f32.xlu2 %v2081_v39 }
 0x484   :  { %9810 = vpow2.f32 %v2027_v59 }
 0x486   :  { %v1933_v53 = vpop.xlane.xlu2 %1932 }
 0x487   :  { %v1995_v47 = vsub.f32 %v11389_v34, %v1933_v53  ;;  %v1894_v38 = vpop.xlane.xlu1 %1893  ;;  %v1912_v31 = vpop.xlane.xlu0 %1911 }
 0x488   :  { %v1982_v3 = vsub.f32 %v11387_v16, %v1894_v38  ;;  %v1988_v42 = vsub.f32 %v11393_v56, %v1912_v31 }
 0x489   :  { %v2043_v17 = vmul.f32 1.442695, %v1995_v47 }
 0x48a   :  { %v11570_v51 = vpop.eup %9810  ;;  %v2017_v46 = vmul.f32 1.442695, %v1982_v3  ;;  %v2029_v25 = vmul.f32 1.442695, %v1988_v42 }
 0x48b   :  { %9812 = vpow2.f32 %v2043_v17  ;;  %v2099_v9 = vsel %vm55_vm0, %v11570_v51, 0.0 }
 0x48c   :  { %9814 = vpow2.f32 %v2017_v46  ;;  %2100 = vadd.xlane.f32.xlu1 %v2099_v9 }
 0x48d   :  { %9816 = vpow2.f32 %v2029_v25 }
 0x48f   :  { %v1897_v7 = vpop.xlane.xlu1 %1896  ;;  %v1915_v34 = vpop.xlane.xlu0 %1914 }
 0x490   :  { %v1983_v2 = vsub.f32 %v11405_v62, %v1897_v7  ;;  %v1989_v16 = vsub.f32 %v11410_v30, %v1915_v34 }
 0x491   :  { %v11576_v48 = vpop.eup %9812 }
 0x492   :  { %v11578_v56 = vpop.eup %9814  ;;  %v2019_v22 = vmul.f32 1.442695, %v1983_v2  ;;  %v2031_v57 = vmul.f32 1.442695, %v1989_v16  ;;  %v2123_v15 = vsel %vm55_vm0, %v11576_v48, 0.0 }
 0x493   :  { %v11582_v18 = vpop.eup %9816  ;;  %2124 = vadd.xlane.f32.xlu2 %v2123_v15  ;;  %v2084_v23 = vsel %vm55_vm0, %v11578_v56, 0.0 }
 0x494   :  { %9818 = vpow2.f32 %v2019_v22  ;;  %2085 = vadd.xlane.f32.xlu1 %v2084_v23  ;;  %v2102_v62 = vsel %vm55_vm0, %v11582_v18, 0.0 }
 0x495   :  { %9820 = vpow2.f32 %v2031_v57  ;;  %2103 = vadd.xlane.f32.xlu0 %v2102_v62 }
 0x497   :  { %v1918_v30 = vpop.xlane.xlu2 %1917  ;;  %v1936_v52 = vpop.xlane.xlu1 %1935 }
 0x498   :  { %v1990_v61 = vsub.f32 %v11428_v40, %v1918_v30  ;;  %v1900_v21 = vpop.xlane.xlu0 %1899  ;;  %v1996_v47 = vsub.f32 %v11422_v45, %v1936_v52 }
 0x499   :  { %v1984_v29 = vsub.f32 %v11424_v24, %v1900_v21 }
 0x49a   :  { %v11589_v50 = vpop.eup %9818  ;;  %v2033_v19 = vmul.f32 1.442695, %v1990_v61  ;;  %v2045_v3 = vmul.f32 1.442695, %v1996_v47 }
 0x49b   :  { %v11591_v4 = vpop.eup %9820  ;;  %v2087_v12 = vsel %vm55_vm0, %v11589_v50, 0.0  ;;  %v2021_v41 = vmul.f32 1.442695, %v1984_v29 }
 0x49c   :  { %9822 = vpow2.f32 %v2033_v19  ;;  %v2105_v44 = vsel %vm55_vm0, %v11591_v4, 0.0 }
 0x49d   :  { %2088 = vadd.xlane.f32.xlu0 %v2087_v12  ;;  %2106 = vadd.xlane.f32.xlu1 %v2105_v44  ;;  %9824 = vpow2.f32 %v2021_v41 }
 0x49f   :  { %v1903_v40 = vpop.xlane.xlu2 %1902  ;;  %v1957_v42 = vpop.xlane.xlu1 %1956 }
 0x4a0   :  { %v1985_v59 = vsub.f32 %v11442_v60, %v1903_v40  ;;  %v1939_v39 = vpop.xlane.xlu0 %1938  ;;  %v2003_v9 = vsub.f32 %v11446_v13, %v1957_v42 }
 0x4a1   :  { %v1997_v38 = vsub.f32 %v11444_v33, %v1939_v39 }
 0x4a2   :  { %v11599_v53 = vpop.eup %9822  ;;  %v2023_v24 = vmul.f32 1.442695, %v1985_v59  ;;  %v2059_v2 = vmul.f32 1.442695, %v2003_v9 }
 0x4a3   :  { %v2108_v31 = vsel %vm55_vm0, %v11599_v53, 0.0  ;;  %v2047_v17 = vmul.f32 1.442695, %v1997_v38  ;;  %v11605_v60 = vpop.eup %9824 }
 0x4a4   :  { %9826 = vpow2.f32 %v2023_v24  ;;  %v2090_v34 = vsel %vm55_vm0, %v11605_v60, 0.0 }
 0x4a5   :  { %2109 = vadd.xlane.f32.xlu0 %v2108_v31  ;;  %9828 = vpow2.f32 %v2045_v3 }
 0x4a6   :  { %9830 = vpow2.f32 %v2047_v17 }
 0x4a7   :  { %v1942_v46 = vpop.xlane.xlu2 %1941  ;;  %v1906_v15 = vpop.xlane.xlu1 %1905  ;;  %9832 = vpow2.f32 %v2059_v2 }
 0x4a8   :  { %v1960_v25 = vpop.xlane.xlu0 %1959  ;;  %v1986_v62 = vsub.f32 %v11462_v27, %v1906_v15 }
 0x4a9   :  { %v2004_v33 = vsub.f32 %v11464_v32, %v1960_v25  ;;  %v1998_v32 = vsub.f32 %v11460_v55, %v1942_v46 }
 0x4aa   :  { %v11608_v45 = vpop.eup %9826  ;;  %v2025_v19 = vmul.f32 1.442695, %v1986_v62 }
 0x4ab   :  { %v2093_v7 = vsel %vm55_vm0, %v11608_v45, 0.0  ;;  %v2061_v16 = vmul.f32 1.442695, %v2004_v33  ;;  %v11615_v57 = vpop.eup %9828  ;;  %v2049_v21 = vmul.f32 1.442695, %v1998_v32 }
 0x4ac   :  { %2094 = vadd.xlane.f32.xlu1 %v2093_v7  ;;  %v11617_v23 = vpop.eup %9830  ;;  %v2126_v30 = vsel %vm55_vm0, %v11615_v57, 0.0 }
 0x4ad   :  { %2091 = vadd.xlane.f32.xlu0 %v2090_v34  ;;  %9834 = vpow2.f32 %v2061_v16  ;;  %v2129_v61 = vsel %vm55_vm0, %v11617_v23, 0.0  ;;  %v11625_v12 = vpop.eup %9832 }
 0x4ae   :  { %9836 = vpow2.f32 %v2049_v21  ;;  %v2147_v39 = vsel %vm55_vm0, %v11625_v12, 0.0 }
 0x4af   :  { %v1945_v22 = vpop.xlane.xlu2 %1944  ;;  %9838 = vpow2.f32 %v2025_v19 }
 0x4b0   :  { %v1921_v13 = vpop.xlane.xlu0 %1920 }
 0x4b1   :  { %v1991_v27 = vsub.f32 %v11476_v49, %v1921_v13 }
 0x4b3   :  { %v11628_v55 = vpop.eup %9834 }
 0x4b4   :  { %2130 = vadd.xlane.f32.xlu1 %v2129_v61  ;;  %v2150_v47 = vsel %vm55_vm0, %v11628_v55, 0.0  ;;  %v11636_v31 = vpop.eup %9836 }
 0x4b5   :  { %2127 = vadd.xlane.f32.xlu0 %v2126_v30  ;;  %v1948_v41 = vpop.xlane.xlu1 %1947  ;;  %v11638_v49 = vpop.eup %9838  ;;  %v2132_v25 = vsel %vm55_vm0, %v11636_v31, 0.0 }
 0x4b6   :  { %v2096_v9 = vsel %vm55_vm0, %v11638_v49, 0.0  ;;  %v2000_v16 = vsub.f32 %v11488_v5, %v1948_v41 }
 0x4b7   :  { %v1924_v29 = vpop.xlane.xlu2 %1923 }
 0x4b8   :  { %v1992_v52 = vsub.f32 %v11486_v54, %v1924_v29  ;;  %v1963_v44 = vpop.xlane.xlu0 %1962  ;;  %v2035_v54 = vmul.f32 1.442695, %v1991_v27  ;;  %v2053_v62 = vmul.f32 1.442695, %v2000_v16 }
 0x4b9   :  { %v2005_v59 = vsub.f32 %v11491_v14, %v1963_v44  ;;  %v1999_v14 = vsub.f32 %v11473_v8, %v1945_v22 }
 0x4ba   :  { %v2037_v40 = vmul.f32 1.442695, %v1992_v52 }
 0x4bb   :  { %v2063_v24 = vmul.f32 1.442695, %v2005_v59  ;;  %v2051_v33 = vmul.f32 1.442695, %v1999_v14 }
 0x4bc   :  { %9840 = vpow2.f32 %v2037_v40  ;;  %2151 = vadd.xlane.f32.xlu1 %v2150_v47 }
 0x4bd   :  { %2148 = vadd.xlane.f32.xlu0 %v2147_v39  ;;  %9842 = vpow2.f32 %v2035_v54  ;;  %v1930_v46 = vpop.xlane.xlu1 %1929 }
 0x4be   :  { %9844 = vpow2.f32 %v2063_v24  ;;  %v1994_v15 = vsub.f32 %v11503_v1, %v1930_v46 }
 0x4bf   :  { %v1966_v38 = vpop.xlane.xlu2 %1965  ;;  %9846 = vpow2.f32 %v2051_v33 }
 0x4c0   :  { %v2006_v42 = vsub.f32 %v11505_v10, %v1966_v38  ;;  %v2041_v30 = vmul.f32 1.442695, %v1994_v15 }
 0x4c2   :  { %v11640_v3 = vpop.eup %9840  ;;  %v2065_v7 = vmul.f32 1.442695, %v2006_v42 }
 0x4c3   :  { %v2114_v17 = vsel %vm55_vm0, %v11640_v3, 0.0  ;;  %v11650_v34 = vpop.eup %9842 }
 0x4c4   :  { %2115 = vadd.xlane.f32.xlu2 %v2114_v17  ;;  %2097 = vadd.xlane.f32.xlu1 %v2096_v9  ;;  %v11653_v2 = vpop.eup %9844  ;;  %9848 = vpow2.f32 %v2065_v7  ;;  %v2111_v13 = vsel %vm55_vm0, %v11650_v34, 0.0 }
 0x4c5   :  { %2133 = vadd.xlane.f32.xlu0 %v2132_v25  ;;  %v2153_v32 = vsel %vm55_vm0, %v11653_v2, 0.0  ;;  %v11661_v21 = vpop.eup %9846 }
 0x4c6   :  { %v2135_v27 = vsel %vm55_vm0, %v11661_v21, 0.0 }
 0x4c7   :  { %v1927_v8 = vpop.xlane.xlu2 %1926 }
 0x4c8   :  { %v1993_v10 = vsub.f32 %v11514_v63, %v1927_v8  ;;  %v1954_v63 = vpop.xlane.xlu1 %1953 }
 0x4c9   :  { %v2002_v52 = vsub.f32 %v11516_v35, %v1954_v63 }
 0x4ca   :  { %v2039_v22 = vmul.f32 1.442695, %v1993_v10  ;;  %v11664_v19 = vpop.eup %9848 }
 0x4cb   :  { %v2057_v41 = vmul.f32 1.442695, %v2002_v52 }
 0x4cc   :  { %9850 = vpow2.f32 %v2039_v22  ;;  %2112 = vadd.xlane.f32.xlu1 %v2111_v13 }
 0x4cd   :  { %2154 = vadd.xlane.f32.xlu0 %v2153_v32  ;;  %9852 = vpow2.f32 %v2053_v62 }
 0x4ce   :  { %9854 = vpow2.f32 %v2041_v30 }
 0x4cf   :  { %v1951_v61 = vpop.xlane.xlu2 %1950 }
 0x4d0   :  { %v2001_v5 = vsub.f32 %v11527_v20, %v1951_v61  ;;  %v2156_v20 = vsel %vm55_vm0, %v11664_v19, 0.0  ;;  %v1972_v39 = vpop.xlane.xlu1 %1971 }
 0x4d1   :  { %v2008_v38 = vsub.f32 %v11524_v36, %v1972_v39  ;;  %v15871_v39 = vld [vmem:[#allocation42_spill] sm:$0xff] }
 0x4d2   :  { %v11666_v1 = vpop.eup %9850  ;;  %v2055_v29 = vmul.f32 1.442695, %v2001_v5 }
 0x4d3   :  { %v2117_v44 = vsel %vm55_vm0, %v11666_v1, 0.0  ;;  %v11675_v59 = vpop.eup %9852 }
 0x4d4   :  { %9856 = vpow2.f32 %v2055_v29  ;;  %2118 = vadd.xlane.f32.xlu2 %v2117_v44  ;;  %2136 = vadd.xlane.f32.xlu1 %v2135_v27  ;;  %v11678_v47 = vpop.eup %9854  ;;  %v2138_v17 = vsel %vm55_vm0, %v11675_v59, 0.0  ;;  %v15870_v27 = vld [vmem:[#allocation25_spill] sm:$0xff] }
 0x4d5   :  { %2157 = vadd.xlane.f32.xlu0 %v2156_v20  ;;  %9858 = vpow2.f32 %v2057_v41  ;;  %v2120_v42 = vsel %vm55_vm0, %v11678_v47, 0.0 }
 0x4d7   :  { %v1969_v40 = vpop.xlane.xlu2 %1968 }
 0x4d8   :  { %v2007_v35 = vsub.f32 %v11538_v43, %v1969_v40  ;;  %v2069_v43 = vmul.f32 1.442695, %v2008_v38 }
 0x4da   :  { %v11680_v54 = vpop.eup %9856  ;;  %v2067_v24 = vmul.f32 1.442695, %v2007_v35 }
 0x4db   :  { %v2141_v14 = vsel %vm55_vm0, %v11680_v54, 0.0  ;;  %v11689_v46 = vpop.eup %9858  ;;  %v11697_v33 = vpop.xlane.xlu0 %1977 }
 0x4dc   :  { %9860 = vpow2.f32 %v2067_v24  ;;  %2142 = vadd.xlane.f32.xlu2 %v2141_v14  ;;  %2121 = vadd.xlane.f32.xlu1 %v2120_v42  ;;  %v2144_v9 = vsel %vm55_vm0, %v11689_v46, 0.0 }
 0x4dd   :  { %2139 = vadd.xlane.f32.xlu0 %v2138_v17  ;;  %9862 = vpow2.f32 %v2069_v43  ;;  %v15872_v43 = vld [vmem:[#allocation39_spill] sm:$0xff] }
 0x4df   :  { %v11703_v22 = vpop.xlane.xlu2 %1974 }
 0x4e2   :  { %v11691_v25 = vpop.eup %9860 }
 0x4e3   :  { %v2159_v36 = vsel %vm55_vm0, %v11691_v25, 0.0  ;;  %v11699_v8 = vpop.eup %9862 }
 0x4e4   :  { %2160 = vadd.xlane.f32.xlu1 %v2159_v36  ;;  %v2162_v10 = vsel %vm55_vm0, %v11699_v8, 0.0 }
 0x4e5   :  { %2145 = vadd.xlane.f32.xlu0 %v2144_v9 }
 0x4e6   :  { %v2077_v7 = vpop.xlane.xlu1 %2076 }
 0x4e7   :  { %9864 = vrcp.f32 %v2077_v7 }
 0x4ec   :  { %2163 = vadd.xlane.f32.xlu1 %v2162_v10 }
 0x4ed   :  { %v9865_v16 = vpop.eup %9864 }
 0x4ee   :  { %v2203_v15 = vmul.f32 %v9865_v16, %v2077_v7  ;;  %v2080_v13 = vpop.xlane.xlu0 %2079 }
 0x4ef   :  { %9866 = vrcp.f32 %v2080_v13 }
 0x4f0   :  { %v2235_v32 = vsub.f32 2.0, %v2203_v15  ;;  %v15873_v15 = vld [vmem:[#allocation14_spill] sm:$0xff] }
 0x4f2   :  { %v2267_v62 = vmul.f32 %v9865_v16, %v2235_v32 }
 0x4f4   :  { %v2299_v63 = vmul.f32 %v11553_v26, %v2267_v62  ;;  %2837 = vrot.lane.b32.xlu2 %v10700_v37, %s10191_s23 }
 0x4f5   :  { %v9867_v30 = vpop.eup %9866 }
 0x4f6   :  { %v2331_v61 = vpack.c.bf16 %v2299_v63, %v2299_v63  ;;  %v2204_v5 = vmul.f32 %v9867_v30, %v2080_v13  ;;  %v2083_v29 = vpop.xlane.xlu2 %2082 }
 0x4f7   :  { %9868 = vrcp.f32 %v2083_v29 }
 0x4f8   :  { %v2363_v52 = vunpack.c.l.bf16 %v2331_v61  ;;  %v2236_v44 = vsub.f32 2.0, %v2204_v5  ;;  %v2463_v24 = vunpack.c.l.b16 %v2331_v61  ;;  %v15874_v61 = vld [vmem:[#allocation37_spill] sm:$0xff] }
 0x4f9   :  { %2756 = vrot.lane.b32.xlu0 %v15870_v27, %s10191_s23 }
 0x4fa   :  { %v2395_v20 = vsub.f32 %v2299_v63, %v2363_v52  ;;  %v2268_v41 = vmul.f32 %v9867_v30, %v2236_v44 }
 0x4fc   :  { %v2300_v40 = vmul.f32 %v11558_v11, %v2268_v41  ;;  %2887 = vrot.lane.b32.xlu2 %v15871_v39, %s10191_s23  ;;  %v2427_v36 = vpack.c.bf16 %v2395_v20, %v2395_v20  ;;  %v15875_v20 = vld [vmem:[#allocation47_spill] sm:$0xff] }
 0x4fd   :  { %v9869_v26 = vpop.eup %9868 }
 0x4fe   :  { %v2332_v35 = vpack.c.bf16 %v2300_v40, %v2300_v40  ;;  %v2205_v37 = vmul.f32 %v9869_v26, %v2083_v29  ;;  %v11721_v32 = vunpack.c.l.b16 %v2427_v36 }
 0x4ff   :  { %v2101_v38 = vpop.xlane.xlu1 %2100 }
 0x500   :  { %v2364_v14 = vunpack.c.l.bf16 %v2332_v35  ;;  %v2464_v42 = vunpack.c.l.b16 %v2332_v35  ;;  %v2237_v17 = vsub.f32 2.0, %v2205_v37  ;;  %9870 = vrcp.f32 %v2101_v38 }
 0x501   :  { %2814 = vrot.lane.b32.xlu0 %v15872_v43, %s10191_s23 }
 0x502   :  { %v2396_v9 = vsub.f32 %v2300_v40, %v2364_v14  ;;  %v11715_v7 = vpack.c.b16 %v2464_v42, %v2463_v24  ;;  %v2269_v11 = vmul.f32 %v9869_v26, %v2237_v17 }
 0x504   :  { %v2428_v10 = vpack.c.bf16 %v2396_v9, %v2396_v9  ;;  %v2301_v16 = vmul.f32 %v11563_v0, %v2269_v11  ;;  %9521 = vmatmul.msk.bf16.vlgmr.msra.gmra.mxu2 %vm55_vm0, %v11715_v7 }
 0x505   :  { %2799 = vmatpush.bf16.msra.mxu2 %v15873_v15  ;;  %2839 = vrot.lane.b32.xlu1 %v15874_v61, %s10191_s23 }
 0x506   :  { %v9871_v13 = vpop.eup %9870  ;;  %v11723_v62 = vunpack.c.l.b16 %v2428_v10  ;;  %v11725_v63 = vpack.c.bf16 %v2301_v16, %v2301_v16  ;;  %v2125_v30 = vpop.xlane.xlu2 %2124  ;;  %v15876_v10 = vld [vmem:[#allocation17_spill] sm:$0xff] }
 0x507   :  { %v2211_v5 = vmul.f32 %v9871_v13, %v2101_v38  ;;  %9872 = vrcp.f32 %v2125_v30  ;;  %v2086_v29 = vpop.xlane.xlu1 %2085 }
 0x508   :  { %v2365_v52 = vunpack.c.l.bf16 %v11725_v63  ;;  %9874 = vrcp.f32 %v2086_v29  ;;  %v2104_v44 = vpop.xlane.xlu0 %2103 }
 0x509   :  { %v2243_v27 = vsub.f32 2.0, %v2211_v5  ;;  %2800 = vmatpush.bf16.msra.mxu2 %v11533_v6  ;;  %9876 = vrcp.f32 %v2104_v44  ;;  %2889 = vrot.lane.b32.xlu0 %v15875_v20, %s10191_s23 }
 0x50a   :  { %v11735_v41 = vsub.f32 %v2301_v16, %v2365_v52 }
 0x50b   :  { %v2275_v40 = vmul.f32 %v9871_v13, %v2243_v27 }
 0x50d   :  { %v9873_v39 = vpop.eup %9872  ;;  %v2307_v26 = vmul.f32 %v11570_v51, %v2275_v40  ;;  %v2009_v51 = vsub.f32 %v11547_v28, %v11703_v22 }
 0x50e   :  { %v9875_v35 = vpop.eup %9874  ;;  %v2219_v37 = vmul.f32 %v9873_v39, %v2125_v30 }
 0x50f   :  { %v9877_v24 = vpop.eup %9876  ;;  %v2339_v38 = vpack.c.bf16 %v2307_v26, %v2307_v26  ;;  %v2206_v14 = vmul.f32 %v9875_v35, %v2086_v29  ;;  %v2071_v40 = vmul.f32 1.442695, %v2009_v51 }
 0x510   :  { %v2251_v42 = vsub.f32 2.0, %v2219_v37  ;;  %v2212_v17 = vmul.f32 %v9877_v24, %v2104_v44  ;;  %v2107_v43 = vpop.xlane.xlu1 %2106  ;;  %v2089_v36 = vpop.xlane.xlu0 %2088 }
 0x511   :  { %v2371_v9 = vunpack.c.l.bf16 %v2339_v38  ;;  %v2238_v11 = vsub.f32 2.0, %v2206_v14  ;;  %9878 = vrcp.f32 %v2107_v43  ;;  %2812 = vrot.lane.b32.xlu0 %v15876_v10, %s10191_s23 }
 0x512   :  { %v2283_v16 = vmul.f32 %v9873_v39, %v2251_v42  ;;  %v2244_v13 = vsub.f32 2.0, %v2212_v17  ;;  %9880 = vrcp.f32 %v2089_v36  ;;  %v2465_v39 = vunpack.c.l.b16 %v11725_v63 }
 0x513   :  { %v2403_v30 = vsub.f32 %v2307_v26, %v2371_v9  ;;  %v2270_v61 = vmul.f32 %v9875_v35, %v2238_v11  ;;  %v2545_v42 = vunpack.c.l.b16 %v2339_v38 }
 0x514   :  { %v2315_v5 = vmul.f32 %v11576_v48, %v2283_v16  ;;  %v2276_v29 = vmul.f32 %v9877_v24, %v2244_v13 }
 0x515   :  { %v2302_v52 = vmul.f32 %v11578_v56, %v2270_v61  ;;  %v15877_v56 = vld [vmem:[#allocation20_spill] sm:$0xff]  ;;  %v2435_v13 = vpack.c.bf16 %v2403_v30, %v2403_v30  ;;  %v2010_v61 = vsub.f32 %v11540_v58, %v11697_v33 }
 0x516   :  { %v11744_v44 = vpack.c.bf16 %v2315_v5, %v2315_v5  ;;  %v2308_v27 = vmul.f32 %v11582_v18, %v2276_v29 }
 0x517   :  { %v9879_v20 = vpop.eup %9878  ;;  %v2334_v37 = vpack.c.bf16 %v2302_v52, %v2302_v52 }
 0x518   :  { %v9881_v14 = vpop.eup %9880  ;;  %v2379_v28 = vunpack.c.l.bf16 %v11744_v44  ;;  %v2340_v22 = vpack.c.bf16 %v2308_v27, %v2308_v27  ;;  %v2213_v26 = vmul.f32 %v9879_v20, %v2107_v43  ;;  %v2110_v35 = vpop.xlane.xlu0 %2109 }
 0x519   :  { %v2366_v48 = vunpack.c.l.bf16 %v2334_v37  ;;  %v2207_v24 = vmul.f32 %v9881_v14, %v2089_v36  ;;  %9882 = vrcp.f32 %v2110_v35  ;;  %2864 = vrot.lane.b32.xlu0 %v15877_v56, %s10191_s23  ;;  %v2466_v17 = vunpack.c.l.b16 %v2334_v37 }
 0x51a   :  { %v11751_v18 = vsub.f32 %v2315_v5, %v2379_v28  ;;  %v2372_v9 = vunpack.c.l.bf16 %v2340_v22  ;;  %v2546_v11 = vunpack.c.l.b16 %v2340_v22  ;;  %v2245_v10 = vsub.f32 2.0, %v2213_v26 }
 0x51b   :  { %9884 = vpow2.f32 %v2071_v40  ;;  %v2398_v63 = vsub.f32 %v2302_v52, %v2366_v48  ;;  %v2239_v38 = vsub.f32 2.0, %v2207_v24  ;;  %v11753_v16 = vpack.c.b16 %v2466_v17, %v2465_v39 }
 0x51c   :  { %v2404_v43 = vsub.f32 %v2308_v27, %v2372_v9  ;;  %v11755_v51 = vpack.c.b16 %v2546_v11, %v2545_v42  ;;  %v2277_v36 = vmul.f32 %v9879_v20, %v2245_v10  ;;  %v11765_v27 = vunpack.c.l.b16 %v2435_v13 }
 0x51d   :  { %v2271_v29 = vmul.f32 %v9881_v14, %v2239_v38  ;;  %9522 = vmatmul.msk.bf16.gmra.mxu2 %vm55_vm0, %v11753_v16  ;;  %v2073_v42 = vmul.f32 1.442695, %v2010_v61  ;;  %v2430_v9 = vpack.c.bf16 %v2398_v63, %v2398_v63  ;;  %v15881_v63 = vld [vmem:[#allocation30_spill] sm:$0xff] }
 0x51e   :  { %v2436_v5 = vpack.c.bf16 %v2404_v43, %v2404_v43  ;;  %v2309_v37 = vmul.f32 %v11591_v4, %v2277_v36  ;;  %9525 = vmatmul.msk.bf16.vlgmr.msrb.gmra.mxu0 %vm55_vm0, %v11755_v51  ;;  %15878 = vst [vmem:[#allocation10_spill] sm:$0xff] %v11765_v27  ;;  %v15880_v4 = vld [vmem:[#allocation45_spill] sm:$0xff] }
 0x51f   :  { %v9883_v52 = vpop.eup %9882  ;;  %v2303_v30 = vmul.f32 %v11589_v50, %v2271_v29  ;;  %v2095_v58 = vpop.xlane.xlu1 %2094  ;;  %v2429_v50 = vpack.c.bf16 %v11735_v41, %v11735_v41  ;;  %v11787_v38 = vunpack.c.l.b16 %v2430_v9 }
 0x520   :  { %v11767_v40 = vunpack.c.l.b16 %v2436_v5  ;;  %v2341_v20 = vpack.c.bf16 %v2309_v37, %v2309_v37  ;;  %v2214_v39 = vmul.f32 %v9883_v52, %v2110_v35  ;;  %v2092_v33 = vpop.xlane.xlu0 %2091  ;;  %9886 = vrcp.f32 %v2095_v58 }
 0x521   :  { %v11769_v14 = vpop.eup %9884  ;;  %v11771_v28 = vpack.c.bf16 %v2303_v30, %v2303_v30  ;;  %2862 = vrot.lane.b32.xlu0 %v15880_v4, %s10191_s23  ;;  %9888 = vrcp.f32 %v2092_v33  ;;  %v11785_v10 = vunpack.c.l.b16 %v2429_v50 }
 0x522   :  { %15879 = vst [vmem:[#allocation54_spill] sm:$0xff] %v11767_v40  ;;  %v2373_v26 = vunpack.c.l.bf16 %v2341_v20  ;;  %v2246_v48 = vsub.f32 2.0, %v2214_v39  ;;  %v2165_v17 = vsel %vm55_vm0, %v11769_v14, 0.0  ;;  %9890 = vpow2.f32 %v2073_v42 }
 0x523   :  { %v2367_v35 = vunpack.c.l.bf16 %v11771_v28 }
 0x524   :  { %v11780_v24 = vsub.f32 %v2309_v37, %v2373_v26  ;;  %v2278_v56 = vmul.f32 %v9883_v52, %v2246_v48 }
 0x525   :  { %v2399_v11 = vsub.f32 %v2303_v30, %v2367_v35  ;;  %2166 = vadd.xlane.f32.xlu2 %v2165_v17  ;;  %v2547_v30 = vunpack.c.l.b16 %v2341_v20 }
 0x526   :  { %v2310_v41 = vmul.f32 %v11599_v53, %v2278_v56  ;;  %v9887_v13 = vpop.eup %9886 }
 0x527   :  { %v9889_v43 = vpop.eup %9888  ;;  %v2209_v61 = vmul.f32 %v9887_v13, %v2095_v58  ;;  %v2131_v29 = vpop.xlane.xlu1 %2130 }
 0x528   :  { %v2342_v36 = vpack.c.bf16 %v2310_v41, %v2310_v41  ;;  %v2128_v5 = vpop.xlane.xlu0 %2127  ;;  %v2208_v52 = vmul.f32 %v9889_v43, %v2092_v33  ;;  %9892 = vrcp.f32 %v2131_v29  ;;  %v11793_v50 = vpop.eup %9890 }
 0x529   :  { %2912 = vrot.lane.b32.xlu0 %v15881_v63, %s10191_s23  ;;  %v2241_v39 = vsub.f32 2.0, %v2209_v61  ;;  %9894 = vrcp.f32 %v2128_v5  ;;  %v2168_v17 = vsel %vm55_vm0, %v11793_v50, 0.0  ;;  %v2504_v63 = vunpack.c.l.b16 %v11771_v28 }
 0x52a   :  { %v2374_v53 = vunpack.c.l.bf16 %v2342_v36  ;;  %v2548_v42 = vunpack.c.l.b16 %v2342_v36  ;;  %v2240_v4 = vsub.f32 2.0, %v2208_v52 }
 0x52b   :  { %v2273_v58 = vmul.f32 %v9887_v13, %v2241_v39 }
 0x52c   :  { %v2406_v26 = vsub.f32 %v2310_v41, %v2374_v53  ;;  %v11795_v48 = vpack.c.b16 %v2548_v42, %v2547_v30  ;;  %v2272_v35 = vmul.f32 %v9889_v43, %v2240_v4  ;;  %v2431_v53 = vpack.c.bf16 %v2399_v11, %v2399_v11 }
 0x52d   :  { %v2305_v56 = vmul.f32 %v11608_v45, %v2273_v58  ;;  %v15882_v45 = vld [vmem:[#allocation26_spill] sm:$0xff]  ;;  %v2627_v11 = vunpack.c.l.b16 %v11744_v44 }
 0x52e   :  { %9526 = vmatmul.msk.bf16.gmra.mxu0 %vm55_vm0, %v11795_v48  ;;  %v9893_v33 = vpop.eup %9892  ;;  %v2304_v20 = vmul.f32 %v11605_v60, %v2272_v35  ;;  %v2438_v35 = vpack.c.bf16 %v2406_v26, %v2406_v26 }
 0x52f   :  { %v9895_v9 = vpop.eup %9894  ;;  %v11803_v36 = vpack.c.bf16 %v2305_v56, %v2305_v56  ;;  %v2221_v61 = vmul.f32 %v9893_v33, %v2131_v29  ;;  %v2152_v41 = vpop.xlane.xlu1 %2151  ;;  %2169 = vadd.xlane.f32.xlu1 %v2168_v17 }
 0x530   :  { %v2149_v13 = vpop.xlane.xlu0 %2148  ;;  %v2336_v52 = vpack.c.bf16 %v2304_v20, %v2304_v20  ;;  %v2220_v43 = vmul.f32 %v9895_v9, %v2128_v5  ;;  %9896 = vrcp.f32 %v2152_v41  ;;  %v2437_v5 = vpack.c.bf16 %v11780_v24, %v11780_v24 }
 0x531   :  { %2962 = vrot.lane.b32.xlu0 %v15882_v45, %s10191_s23  ;;  %v2369_v60 = vunpack.c.l.bf16 %v11803_v36  ;;  %v2253_v30 = vsub.f32 2.0, %v2221_v61  ;;  %9898 = vrcp.f32 %v2149_v13  ;;  %v11816_v37 = vunpack.c.l.b16 %v2438_v35 }
 0x532   :  { %v2368_v39 = vunpack.c.l.bf16 %v2336_v52  ;;  %v2505_v42 = vunpack.c.l.b16 %v2336_v52  ;;  %v2252_v4 = vsub.f32 2.0, %v2220_v43  ;;  %v11819_v52 = vunpack.c.l.b16 %v2431_v53 }
 0x533   :  { %v11809_v29 = vsub.f32 %v2305_v56, %v2369_v60  ;;  %v2285_v58 = vmul.f32 %v9893_v33, %v2253_v30  ;;  %15883 = vst [vmem:[#allocation33_spill] sm:$0xff] %v11816_v37 }
 0x534   :  { %v2400_v17 = vsub.f32 %v2304_v20, %v2368_v39  ;;  %v11813_v22 = vpack.c.b16 %v2505_v42, %v2504_v63  ;;  %v2284_v45 = vmul.f32 %v9895_v9, %v2252_v4  ;;  %15884 = vst [vmem:[#allocation13_spill] sm:$0xff] %v11819_v52  ;;  %v11826_v63 = vunpack.c.l.b16 %v2437_v5 }
 0x535   :  { %v2317_v28 = vmul.f32 %v11617_v23, %v2285_v58  ;;  %v2443_v5 = vpack.c.bf16 %v11751_v18, %v11751_v18 }
 0x536   :  { %v9897_v61 = vpop.eup %9896  ;;  %v2432_v56 = vpack.c.bf16 %v2400_v17, %v2400_v17  ;;  %v2316_v33 = vmul.f32 %v11615_v57, %v2284_v45  ;;  %9523 = vmatmul.msk.bf16.vlgmr.msra.gmra.mxu3 %vm55_vm0, %v11813_v22  ;;  %15885 = vst [vmem:[#allocation51_spill] sm:$0xff] %v11826_v63 }
 0x537   :  { %v2116_v24 = vpop.xlane.xlu2 %2115  ;;  %v9899_v26 = vpop.eup %9898  ;;  %v11824_v20 = vpack.c.bf16 %v2317_v28, %v2317_v28  ;;  %v2228_v9 = vmul.f32 %v9897_v61, %v2152_v41 }
 0x538   :  { %9900 = vrcp.f32 %v2116_v24  ;;  %v2098_v23 = vpop.xlane.xlu1 %2097  ;;  %v2134_v43 = vpop.xlane.xlu0 %2133  ;;  %v11828_v60 = vunpack.c.l.b16 %v2432_v56  ;;  %v2348_v44 = vpack.c.bf16 %v2316_v33, %v2316_v33  ;;  %v2227_v30 = vmul.f32 %v9899_v26, %v2149_v13 }
 0x539   :  { %9902 = vrcp.f32 %v2098_v23  ;;  %v2381_v57 = vunpack.c.l.bf16 %v11824_v20  ;;  %v2260_v53 = vsub.f32 2.0, %v2228_v9  ;;  %v15886_v9 = vld [vmem:[#allocation43_spill] sm:$0xff] }
 0x53a   :  { %9904 = vrcp.f32 %v2134_v43  ;;  %v2380_v42 = vunpack.c.l.bf16 %v2348_v44  ;;  %v2628_v4 = vunpack.c.l.b16 %v2348_v44  ;;  %v2259_v58 = vsub.f32 2.0, %v2227_v30 }
 0x53b   :  { %v11837_v35 = vsub.f32 %v2317_v28, %v2381_v57  ;;  %v2292_v13 = vmul.f32 %v9897_v61, %v2260_v53  ;;  %v11847_v28 = vunpack.c.l.b16 %v2443_v5 }
 0x53c   :  { %v2412_v17 = vsub.f32 %v2316_v33, %v2380_v42  ;;  %v11839_v45 = vpack.c.b16 %v2628_v4, %v2627_v11  ;;  %v2291_v56 = vmul.f32 %v9899_v26, %v2259_v58 }
 0x53d   :  { %2939 = vrot.lane.b32.xlu2 %v15886_v9, %s10191_s23  ;;  %v2324_v0 = vmul.f32 %v11628_v55, %v2292_v13 }
 0x53e   :  { %v9901_v39 = vpop.eup %9900  ;;  %v2444_v63 = vpack.c.bf16 %v2412_v17, %v2412_v17  ;;  %v2323_v44 = vmul.f32 %v11625_v12, %v2291_v56  ;;  %9529 = vmatmul.msk.bf16.vlgmr.msrb.gmra.mxu2 %vm55_vm0, %v11839_v45 }
 0x53f   :  { %v9903_v41 = vpop.eup %9902  ;;  %v2216_v30 = vmul.f32 %v9901_v39, %v2116_v24  ;;  %v2356_v61 = vpack.c.bf16 %v2324_v0, %v2324_v0 }
 0x540   :  { %v9905_v18 = vpop.eup %9904  ;;  %v2210_v11 = vmul.f32 %v9903_v41, %v2098_v23  ;;  %v2113_v33 = vpop.xlane.xlu1 %2112  ;;  %v11849_v57 = vunpack.c.l.b16 %v2444_v63  ;;  %v2355_v53 = vpack.c.bf16 %v2323_v44, %v2323_v44 }
 0x541   :  { %v2155_v26 = vpop.xlane.xlu0 %2154  ;;  %v2248_v42 = vsub.f32 2.0, %v2216_v30  ;;  %v2222_v55 = vmul.f32 %v9905_v18, %v2134_v43  ;;  %v2388_v4 = vunpack.c.l.bf16 %v2356_v61  ;;  %v2710_v58 = vunpack.c.l.b16 %v2356_v61  ;;  %v15887_v43 = vld [vmem:[#allocation21_spill] sm:$0xff] }
 0x542   :  { %v2242_v13 = vsub.f32 2.0, %v2210_v11  ;;  %9906 = vrcp.f32 %v2113_v33  ;;  %v2387_v24 = vunpack.c.l.bf16 %v2355_v53  ;;  %v2709_v17 = vunpack.c.l.b16 %v2355_v53 }
 0x543   :  { %v2280_v5 = vmul.f32 %v9901_v39, %v2248_v42  ;;  %v2420_v56 = vsub.f32 %v2324_v0, %v2388_v4  ;;  %v2254_v23 = vsub.f32 2.0, %v2222_v55  ;;  %9908 = vrcp.f32 %v2155_v26 }
 0x544   :  { %v2274_v9 = vmul.f32 %v9903_v41, %v2242_v13  ;;  %v2419_v37 = vsub.f32 %v2323_v44, %v2387_v24  ;;  %v11853_v63 = vpack.c.b16 %v2710_v58, %v2709_v17  ;;  %v2506_v4 = vunpack.c.l.b16 %v11803_v36  ;;  %v15891_v36 = vld [vmem:[#allocation22_spill] sm:$0xff] }
 0x545   :  { %v2312_v30 = vmul.f32 %v11640_v3, %v2280_v5  ;;  %2914 = vrot.lane.b32.xlu2 %v15887_v43, %s10191_s23  ;;  %v2452_v61 = vpack.c.bf16 %v2420_v56, %v2420_v56  ;;  %v2286_v27 = vmul.f32 %v9905_v18, %v2254_v23  ;;  %v15890_v18 = vld [vmem:[#allocation29_spill] sm:$0xff] }
 0x546   :  { %v2306_v11 = vmul.f32 %v11638_v49, %v2274_v9  ;;  %v2451_v12 = vpack.c.bf16 %v2419_v37, %v2419_v37  ;;  %9533 = vmatmul.msk.bf16.vlgmr.msra.gmra.mxu0 %vm55_vm0, %v11853_v63 }
 0x547   :  { %v11859_v40 = vpack.c.bf16 %v2312_v30, %v2312_v30  ;;  %v2119_v0 = vpop.xlane.xlu2 %2118  ;;  %v11863_v41 = vunpack.c.l.b16 %v2452_v61  ;;  %v2318_v3 = vmul.f32 %v11636_v31, %v2286_v27 }
 0x548   :  { %v9907_v39 = vpop.eup %9906  ;;  %v2338_v44 = vpack.c.bf16 %v2306_v11, %v2306_v11  ;;  %9910 = vrcp.f32 %v2119_v0  ;;  %v2137_v53 = vpop.xlane.xlu1 %2136  ;;  %v11866_v55 = vunpack.c.l.b16 %v2451_v12  ;;  %2937 = vrot.lane.b32.xlu1 %v15890_v18, %s10191_s23 }
 0x549   :  { %15888 = vst [vmem:[#allocation55_spill] sm:$0xff] %v11863_v41  ;;  %v2158_v42 = vpop.xlane.xlu0 %2157  ;;  %v2376_v49 = vunpack.c.l.bf16 %v11859_v40  ;;  %v2215_v37 = vmul.f32 %v9907_v39, %v2113_v33  ;;  %v9909_v58 = vpop.eup %9908  ;;  %v2350_v24 = vpack.c.bf16 %v2318_v3, %v2318_v3  ;;  %9912 = vrcp.f32 %v2137_v53 }
 0x54a   :  { %15889 = vst [vmem:[#allocation32_spill] sm:$0xff] %v11866_v55  ;;  %v2370_v13 = vunpack.c.l.bf16 %v2338_v44  ;;  %v2507_v17 = vunpack.c.l.b16 %v2338_v44  ;;  %v2229_v12 = vmul.f32 %v9909_v58, %v2155_v26  ;;  %9914 = vrcp.f32 %v2158_v42 }
 0x54b   :  { %v2408_v27 = vsub.f32 %v2312_v30, %v2376_v49  ;;  %v2247_v5 = vsub.f32 2.0, %v2215_v37  ;;  %v2382_v9 = vunpack.c.l.bf16 %v2350_v24  ;;  %v2630_v61 = vunpack.c.l.b16 %v2350_v24 }
 0x54c   :  { %v11874_v56 = vsub.f32 %v2306_v11, %v2370_v13  ;;  %v11876_v33 = vpack.c.b16 %v2507_v17, %v2506_v4  ;;  %v2261_v43 = vsub.f32 2.0, %v2229_v12  ;;  %v2629_v30 = vunpack.c.l.b16 %v11824_v20 }
 0x54d   :  { %v2279_v23 = vmul.f32 %v9907_v39, %v2247_v5  ;;  %2964 = vrot.lane.b32.xlu2 %v15891_v36, %s10191_s23  ;;  %v2414_v44 = vsub.f32 %v2318_v3, %v2382_v9  ;;  %v2445_v26 = vpack.c.bf16 %v11837_v35, %v11837_v35  ;;  %v2433_v3 = vpack.c.bf16 %v11809_v29, %v11809_v29 }
 0x54e   :  { %v9911_v18 = vpop.eup %9910  ;;  %9524 = vmatmul.msk.bf16.gmra.mxu3 %vm55_vm0, %v11876_v33  ;;  %v2293_v49 = vmul.f32 %v9909_v58, %v2261_v43  ;;  %v11886_v13 = vpack.c.b16 %v2630_v61, %v2629_v30  ;;  %v2440_v36 = vpack.c.bf16 %v2408_v27, %v2408_v27 }
 0x54f   :  { %v2311_v11 = vmul.f32 %v11650_v34, %v2279_v23  ;;  %v2217_v37 = vmul.f32 %v9911_v18, %v2119_v0  ;;  %v2143_v39 = vpop.xlane.xlu2 %2142  ;;  %v9913_v4 = vpop.eup %9912  ;;  %v2587_v34 = vunpack.c.l.b16 %v11859_v40  ;;  %v11894_v0 = vunpack.c.l.b16 %v2445_v26 }
 0x550   :  { %9916 = vrcp.f32 %v2143_v39  ;;  %v2122_v24 = vpop.xlane.xlu1 %2121  ;;  %v2325_v20 = vmul.f32 %v11653_v2, %v2293_v49  ;;  %v2223_v9 = vmul.f32 %v9913_v4, %v2137_v53  ;;  %v9915_v35 = vpop.eup %9914  ;;  %9530 = vmatmul.msk.bf16.gmra.mxu2 %vm55_vm0, %v11886_v13  ;;  %v2446_v2 = vpack.c.bf16 %v2414_v44, %v2414_v44 }
 0x551   :  { %v2140_v17 = vpop.xlane.xlu0 %2139  ;;  %v2343_v5 = vpack.c.bf16 %v2311_v11, %v2311_v11  ;;  %v2249_v12 = vsub.f32 2.0, %v2217_v37  ;;  %9918 = vrcp.f32 %v2122_v24  ;;  %15892 = vst [vmem:[#allocation53_spill] sm:$0xff] %v11894_v0  ;;  %v2230_v30 = vmul.f32 %v9915_v35, %v2158_v42 }
 0x552   :  { %v2357_v43 = vpack.c.bf16 %v2325_v20, %v2325_v20  ;;  %v2255_v29 = vsub.f32 2.0, %v2223_v9  ;;  %9920 = vrcp.f32 %v2140_v17  ;;  %v11899_v31 = vunpack.c.l.b16 %v2440_v36 }
 0x553   :  { %v2375_v58 = vunpack.c.l.bf16 %v2343_v5  ;;  %v2586_v23 = vunpack.c.l.b16 %v2343_v5  ;;  %v2281_v61 = vmul.f32 %v9911_v18, %v2249_v12  ;;  %v2262_v26 = vsub.f32 2.0, %v2230_v30 }
 0x554   :  { %v2389_v27 = vunpack.c.l.bf16 %v2357_v43  ;;  %v2287_v55 = vmul.f32 %v9913_v4, %v2255_v29  ;;  %v11901_v41 = vunpack.c.l.b16 %v2446_v2  ;;  %v2434_v9 = vpack.c.bf16 %v11874_v56, %v11874_v56 }
 0x555   :  { %v2407_v49 = vsub.f32 %v2311_v11, %v2375_v58  ;;  %v11896_v53 = vpack.c.b16 %v2587_v34, %v2586_v23  ;;  %v2313_v40 = vmul.f32 %v11666_v1, %v2281_v61  ;;  %v2294_v1 = vmul.f32 %v9915_v35, %v2262_v26 }
 0x556   :  { %v9917_v37 = vpop.eup %9916  ;;  %v11903_v52 = vsub.f32 %v2325_v20, %v2389_v27  ;;  %v2319_v11 = vmul.f32 %v11661_v21, %v2287_v55  ;;  %v11918_v55 = vunpack.c.l.b16 %v2433_v3  ;;  %v2711_v26 = vunpack.c.l.b16 %v2357_v43 }
 0x557   :  { %v2439_v5 = vpack.c.bf16 %v2407_v49, %v2407_v49  ;;  %v11905_v18 = vpack.c.bf16 %v2313_v40, %v2313_v40  ;;  %v2225_v42 = vmul.f32 %v9917_v37, %v2143_v39  ;;  %9527 = vmatmul.msk.bf16.vlgmr.msrb.gmra.mxu1 %vm55_vm0, %v11896_v53  ;;  %v9919_v44 = vpop.eup %9918  ;;  %v2326_v61 = vmul.f32 %v11664_v19, %v2294_v1 }
 0x558   :  { %v2161_v12 = vpop.xlane.xlu1 %2160  ;;  %v2218_v39 = vmul.f32 %v9919_v44, %v2122_v24  ;;  %v9921_v58 = vpop.eup %9920  ;;  %v2351_v23 = vpack.c.bf16 %v2319_v11, %v2319_v11  ;;  %v11925_v19 = vunpack.c.l.b16 %v2434_v9 }
 0x559   :  { %v11914_v36 = vunpack.c.l.b16 %v2439_v5  ;;  %v2377_v20 = vunpack.c.l.bf16 %v11905_v18  ;;  %v2257_v34 = vsub.f32 2.0, %v2225_v42  ;;  %9922 = vrcp.f32 %v2161_v12  ;;  %v2146_v21 = vpop.xlane.xlu0 %2145 }
 0x55a   :  { %v2250_v30 = vsub.f32 2.0, %v2218_v39  ;;  %v2383_v2 = vunpack.c.l.bf16 %v2351_v23  ;;  %v2358_v49 = vpack.c.bf16 %v2326_v61, %v2326_v61  ;;  %v2224_v27 = vmul.f32 %v9921_v58, %v2140_v17 }
 0x55b   :  { %v11922_v29 = vsub.f32 %v2313_v40, %v2377_v20  ;;  %v2289_v56 = vmul.f32 %v9917_v37, %v2257_v34  ;;  %9924 = vrcp.f32 %v2146_v21  ;;  %v3031_v37 = vpack.c.b16 %v11925_v19, %v11918_v55 }
 0x55c   :  { %v2282_v5 = vmul.f32 %v9919_v44, %v2250_v30  ;;  %v2415_v42 = vsub.f32 %v2319_v11, %v2383_v2  ;;  %v2390_v3 = vunpack.c.l.bf16 %v2358_v49  ;;  %v2256_v1 = vsub.f32 2.0, %v2224_v27 }
 0x55d   :  { %v2321_v24 = vmul.f32 %v11680_v54, %v2289_v56  ;;  %v2712_v4 = vunpack.c.l.b16 %v2358_v49  ;;  %v2668_v27 = vunpack.c.l.b16 %v2351_v23 }
 0x55e   :  { %v2314_v40 = vmul.f32 %v11678_v47, %v2282_v5  ;;  %v2422_v17 = vsub.f32 %v2326_v61, %v2390_v3  ;;  %v2288_v43 = vmul.f32 %v9921_v58, %v2256_v1  ;;  %v2588_v47 = vunpack.c.l.b16 %v11905_v18 }
 0x55f   :  { %v11927_v0 = vpack.c.bf16 %v2321_v24, %v2321_v24  ;;  %v9923_v20 = vpop.eup %9922  ;;  %v11932_v34 = vpack.c.b16 %v2712_v4, %v2711_v26  ;;  %v2453_v4 = vpack.c.bf16 %v11903_v52, %v11903_v52  ;;  %v2447_v35 = vpack.c.bf16 %v2415_v42, %v2415_v42 }
 0x560   :  { %v2164_v54 = vpop.xlane.xlu1 %2163  ;;  %v2346_v9 = vpack.c.bf16 %v2314_v40, %v2314_v40  ;;  %v2231_v11 = vmul.f32 %v9923_v20, %v2161_v12  ;;  %v2320_v39 = vmul.f32 %v11675_v59, %v2288_v43  ;;  %9537 = vmatmul.msk.bf16.vlgmr.msra.gmra.mxu2 %vm55_vm0, %v11715_v7  ;;  %v2454_v59 = vpack.c.bf16 %v2422_v17, %v2422_v17 }
 0x561   :  { %v2385_v44 = vunpack.c.l.bf16 %v11927_v0  ;;  %9926 = vrcp.f32 %v2164_v54  ;;  %9534 = vmatmul.msk.bf16.gmra.mxu0 %vm55_vm0, %v11932_v34  ;;  %v9925_v58 = vpop.eup %9924 }
 0x562   :  { %v2378_v56 = vunpack.c.l.bf16 %v2346_v9  ;;  %v2263_v30 = vsub.f32 2.0, %v2231_v11  ;;  %v2589_v12 = vunpack.c.l.b16 %v2346_v9  ;;  %v2352_v2 = vpack.c.bf16 %v2320_v39, %v2320_v39 }
 0x563   :  { %v11943_v61 = vsub.f32 %v2321_v24, %v2385_v44  ;;  %v2226_v49 = vmul.f32 %v9925_v58, %v2146_v21  ;;  %v11947_v43 = vunpack.c.l.b16 %v2454_v59  ;;  %v11952_v44 = vunpack.c.l.b16 %v2453_v4 }
 0x564   :  { %v2410_v26 = vsub.f32 %v2314_v40, %v2378_v56  ;;  %v2295_v5 = vmul.f32 %v9923_v20, %v2263_v30  ;;  %v11945_v3 = vpack.c.b16 %v2589_v12, %v2588_v47  ;;  %v2384_v7 = vunpack.c.l.bf16 %v2352_v2 }
 0x565   :  { %v2669_v1 = vunpack.c.l.b16 %v2352_v2  ;;  %v2258_v18 = vsub.f32 2.0, %v2226_v49  ;;  %v3206_v9 = vpack.c.b16 %v11947_v43, %v11952_v44  ;;  %v11963_v4 = vunpack.c.l.b16 %v2447_v35 }
 0x566   :  { %v2327_v24 = vmul.f32 %v11691_v25, %v2295_v5  ;;  %v2416_v21 = vsub.f32 %v2320_v39, %v2384_v7  ;;  %v2441_v39 = vpack.c.bf16 %v11922_v29, %v11922_v29  ;;  %v2442_v2 = vpack.c.bf16 %v2410_v26, %v2410_v26 }
 0x567   :  { %v9927_v52 = vpop.eup %9926  ;;  %9528 = vmatmul.msk.bf16.gmra.mxu1 %vm55_vm0, %v11945_v3  ;;  %v11954_v23 = vpack.c.b16 %v2669_v1, %v2668_v27  ;;  %v2290_v40 = vmul.f32 %v9925_v58, %v2258_v18  ;;  %v2449_v26 = vpack.c.bf16 %v11943_v61, %v11943_v61 }
 0x568   :  { %v2232_v20 = vmul.f32 %v9927_v52, %v2164_v54  ;;  %v2359_v17 = vpack.c.bf16 %v2327_v24, %v2327_v24  ;;  %v2448_v11 = vpack.c.bf16 %v2416_v21, %v2416_v21  ;;  %v11970_v27 = vunpack.c.l.b16 %v2441_v39 }
 0x569   :  { %v2322_v47 = vmul.f32 %v11689_v46, %v2290_v40  ;;  %9531 = vmatmul.msk.bf16.vlgmr.msrb.gmra.mxu3 %vm55_vm0, %v11954_v23  ;;  %v11972_v5 = vunpack.c.l.b16 %v2442_v2 }
 0x56a   :  { %v2264_v42 = vsub.f32 2.0, %v2232_v20  ;;  %v2391_v25 = vunpack.c.l.bf16 %v2359_v17  ;;  %v11965_v58 = vunpack.c.l.b16 %v2448_v11  ;;  %v2750_v1 = vunpack.c.l.b16 %v2359_v17 }
 0x56b   :  { %v2757_v56 = vpop.permute.xlu0 %2756  ;;  %v2354_v54 = vpack.c.bf16 %v2322_v47, %v2322_v47  ;;  %v3101_v7 = vpack.c.b16 %v11972_v5, %v11970_v27 }
 0x56c   :  { %v2296_v30 = vmul.f32 %v9927_v52, %v2264_v42  ;;  %2775 = vmatpush.bf16.msra.mxu1 %v2757_v56  ;;  %v2423_v12 = vsub.f32 %v2327_v24, %v2391_v25  ;;  %v3170_v46 = vpack.c.b16 %v11965_v58, %v11963_v4  ;;  %v2670_v42 = vunpack.c.l.b16 %v11927_v0 }
 0x56d   :  { %v2386_v49 = vunpack.c.l.bf16 %v2354_v54  ;;  %v11988_v25 = vunpack.c.l.b16 %v2449_v26 }
 0x56e   :  { %v2328_v59 = vmul.f32 %v11699_v8, %v2296_v30  ;;  %v2671_v8 = vunpack.c.l.b16 %v2354_v54  ;;  %v2455_v21 = vpack.c.bf16 %v2423_v12, %v2423_v12 }
 0x56f   :  { %v2418_v29 = vsub.f32 %v2322_v47, %v2386_v49  ;;  %v11985_v47 = vpop.permute.xlu2 %2837 }
 0x570   :  { %v2360_v35 = vpack.c.bf16 %v2328_v59, %v2328_v59  ;;  %9538 = vmatmul.msk.bf16.gmra.mxu2 %vm55_vm0, %v11753_v16  ;;  %v11994_v61 = vunpack.c.l.b16 %v2455_v21  ;;  %v11998_v39 = vpack.c.b16 %v2671_v8, %v2670_v42 }
 0x571   :  { %v2450_v11 = vpack.c.bf16 %v2418_v29, %v2418_v29 }
 0x572   :  { %v2392_v18 = vunpack.c.l.bf16 %v2360_v35  ;;  %v2751_v52 = vunpack.c.l.b16 %v2360_v35 }
 0x573   :  { %v11980_v24 = vpop.permute.xlu0 %2814  ;;  %v11990_v16 = vunpack.c.l.b16 %v2450_v11 }
 0x574   :  { %v2424_v40 = vsub.f32 %v2328_v59, %v2392_v18  ;;  %v11982_v20 = vpack.c.b16 %v2751_v52, %v2750_v1  ;;  %2824 = vmatpush.bf16.msra.mxu3 %v11980_v24 }
 0x575   :  { %v3171_v30 = vpack.c.b16 %v11990_v16, %v11988_v25 }
 0x576   :  { %v2456_v17 = vpack.c.bf16 %v2424_v40, %v2424_v40 }
 0x577   :  { %9535 = vmatmul.msk.bf16.vlgmr.msra.gmra.mxu1 %vm55_vm0, %v11982_v20  ;;  %v12000_v54 = vpop.permute.xlu1 %2839  ;;  %v2888_v2 = vpop.permute.xlu2 %2887 }
 0x578   :  { %v11996_v56 = vunpack.c.l.b16 %v2456_v17  ;;  %2849 = vmatpush.bf16.msrb.mxu0 %v12000_v54 }
 0x579   :  { %9532 = vmatmul.msk.bf16.gmra.mxu3 %vm55_vm0, %v11998_v39 }
 0x57a   :  { %v3240_v0 = vpack.c.b16 %v11996_v56, %v11994_v61 }
 0x57b   :  { %v2890_v12 = vpop.permute.xlu0 %2889 }
 0x57c   :  { %2899 = vmatpush.bf16.msrb.mxu2 %v2890_v12  ;;  %2850 = vmatpush.bf16.msrb.mxu0 %v11985_v47 }
 0x57f   :  { %9541 = vmatmul.msk.bf16.vlgmr.msrb.gmra.mxu0 %vm55_vm0, %v11755_v51 }
 0x580   :  { %2900 = vmatpush.bf16.msrb.mxu2 %v2888_v2 }
 0x583   :  { %9545 = vmatmul.msk.bf16.vlgmr.msrb.gmra.mxu2 %vm55_vm0, %v11839_v45  ;;  %v2813_v49 = vpop.permute.xlu0 %2812 }
 0x584   :  { %3009 = vmatpush.bf16.msra.mxu2 %v15873_v15  ;;  %2825 = vmatpush.bf16.msra.mxu3 %v2813_v49 }
 0x587   :  { %v12030_v51 = vpop.f32.mrf.mxu2 }
 0x588   :  { %3010 = vmatpush.bf16.msra.mxu2 %v11533_v6 }
 0x589   :  { %9539 = vmatmul.msk.bf16.vlgmr.msra.gmra.mxu3 %vm55_vm0, %v11813_v22 }
 0x58b   :  { %v12018_v59 = vpop.permute.xlu0 %2864 }
 0x58c   :  { %3149 = vmatpush.bf16.msrb.mxu2 %v2890_v12  ;;  %2874 = vmatpush.bf16.msrb.mxu1 %v12018_v59 }
 0x58f   :  { %9542 = vmatmul.msk.bf16.gmra.mxu0 %vm55_vm0, %v11795_v48  ;;  %v12037_v52 = vpop.f32.mrf.mxu2 }
 0x590   :  { %3150 = vmatpush.bf16.msrb.mxu2 %v2888_v2 }
 0x593   :  { %9546 = vmatmul.msk.bf16.gmra.mxu2 %vm55_vm0, %v11886_v13  ;;  %v12025_v15 = vpop.permute.xlu0 %2862  ;;  %v15893_v13 = vpack.c.b16 %v11723_v62, %v11721_v32 }
 0x594   :  { %2875 = vmatpush.bf16.msrb.mxu1 %v12025_v15 }
 0x598   :  { %v2167_v6 = vpop.xlane.xlu2 %2166 }
 0x599   :  { %9928 = vrcp.f32 %v2167_v6  ;;  %9540 = vmatmul.msk.bf16.gmra.mxu3 %vm55_vm0, %v11876_v33 }
 0x59b   :  { %v2913_v40 = vpop.permute.xlu0 %2912 }
 0x59f   :  { %v9929_v22 = vpop.eup %9928 }
 0x5a0   :  { %v2233_v45 = vmul.f32 %v9929_v22, %v2167_v6  ;;  %v2940_v29 = vpop.permute.xlu2 %2939  ;;  %v12040_v62 = vpop.f32.mrf.mxu2  ;;  %v15894_v6 = vpack.c.b16 %v11787_v38, %v11785_v10 }
 0x5a1   :  { %2949 = vmatpush.bf16.msra.mxu0 %v2940_v29 }
 0x5a2   :  { %v2265_v35 = vsub.f32 2.0, %v2233_v45  ;;  %v2170_v48 = vpop.xlane.xlu1 %2169 }
 0x5a3   :  { %9553 = vmatmul.msk.bf16.vlgmr.msra.gmra.mxu2 %vm55_vm0, %v15893_v13  ;;  %9930 = vrcp.f32 %v2170_v48 }
 0x5a4   :  { %v2297_v1 = vmul.f32 %v9929_v22, %v2265_v35  ;;  %v2963_v22 = vpop.permute.xlu0 %2962 }
 0x5a6   :  { %v2329_v18 = vmul.f32 %v11769_v14, %v2297_v1 }
 0x5a8   :  { %v2361_v33 = vpack.c.bf16 %v2329_v18, %v2329_v18  ;;  %v2915_v26 = vpop.permute.xlu2 %2914 }
 0x5a9   :  { %2924 = vmatpush.bf16.msrb.mxu3 %v2915_v26  ;;  %v9931_v8 = vpop.eup %9930 }
 0x5aa   :  { %v2393_v21 = vunpack.c.l.bf16 %v2361_v33  ;;  %v2234_v11 = vmul.f32 %v9931_v8, %v2170_v48  ;;  %v2752_v45 = vunpack.c.l.b16 %v2361_v33  ;;  %v15895_v33 = vpack.c.b16 %v11849_v57, %v11847_v28  ;;  %v15898_v28 = vld [vmem:[#allocation7_spill] sm:$0xff] }
 0x5ab   :  { %3520 = vrot.lane.b32.xlu0 %v15898_v28, %s10192_s24 }
 0x5ac   :  { %v2425_v17 = vsub.f32 %v2329_v18, %v2393_v21  ;;  %v2266_v42 = vsub.f32 2.0, %v2234_v11  ;;  %v15901_v21 = vld [vmem:[#allocation53_spill] sm:$0xff] }
 0x5ad   :  { %2925 = vmatpush.bf16.msrb.mxu3 %v2913_v40 }
 0x5ae   :  { %v2298_v32 = vmul.f32 %v9931_v8, %v2266_v42  ;;  %v2457_v10 = vpack.c.bf16 %v2425_v17, %v2425_v17  ;;  %v15904_v17 = vld [vmem:[#allocation10_spill] sm:$0xff] }
 0x5b0   :  { %v2965_v12 = vpop.permute.xlu2 %2964  ;;  %9547 = vmatmul.msk.bf16.vlgmr.msrb.gmra.mxu3 %vm55_vm0, %v11954_v23  ;;  %v2330_v14 = vmul.f32 %v11793_v50, %v2298_v32  ;;  %v12050_v50 = vpop.f32.mrf.mxu2 }
 0x5b1   :  { %3044 = vmatpush.bf16.msra.mxu3 %v11980_v24  ;;  %2974 = vmatpush.bf16.msra.mxu1 %v2965_v12 }
 0x5b2   :  { %v2362_v2 = vpack.c.bf16 %v2330_v14, %v2330_v14 }
 0x5b3   :  { %9554 = vmatmul.msk.bf16.gmra.mxu2 %vm55_vm0, %v15894_v6 }
 0x5b4   :  { %v2394_v24 = vunpack.c.l.bf16 %v2362_v2  ;;  %v2753_v35 = vunpack.c.l.b16 %v2362_v2 }
 0x5b5   :  { %3045 = vmatpush.bf16.msra.mxu3 %v2813_v49  ;;  %2975 = vmatpush.bf16.msra.mxu1 %v2963_v22  ;;  %v12058_v49 = vunpack.c.l.b16 %v2457_v10  ;;  %v15910_v10 = vld [vmem:[#allocation32_spill] sm:$0xff] }
 0x5b6   :  { %v2426_v48 = vsub.f32 %v2330_v14, %v2394_v24  ;;  %v2755_v13 = vpack.c.b16 %v2753_v35, %v2752_v45  ;;  %v15906_v24 = vld [vmem:[#allocation33_spill] sm:$0xff]  ;;  %v15907_v45 = vld [vmem:[#allocation51_spill] sm:$0xff] }
 0x5b7   :  { %v15908_v35 = vpack.c.b16 %v15906_v24, %v15907_v45 }
 0x5b8   :  { %9536 = vmatmul.msk.bf16.gmra.mxu1 %vm55_vm0, %v2755_v13  ;;  %v2458_v38 = vpack.c.bf16 %v2426_v48, %v2426_v48 }
 0x5b9   :  { %3184 = vmatpush.bf16.msrb.mxu3 %v2915_v26  ;;  %v15899_v26 = vld [vmem:[#allocation13_spill] sm:$0xff] }
 0x5ba   :  { %v2938_v23 = vpop.permute.xlu1 %2937  ;;  %v12060_v1 = vunpack.c.l.b16 %v2458_v38  ;;  %v15900_v8 = vpack.c.b16 %v11828_v60, %v15899_v26  ;;  %v15903_v60 = vld [vmem:[#allocation54_spill] sm:$0xff] }
 0x5bb   :  { %2950 = vmatpush.bf16.msra.mxu0 %v2938_v23  ;;  %v15905_v42 = vpack.c.b16 %v15903_v60, %v15904_v17 }
 0x5bd   :  { %3185 = vmatpush.bf16.msrb.mxu3 %v2913_v40  ;;  %v15902_v40 = vpack.c.b16 %v11901_v41, %v15901_v21 }
 0x5be   :  { %9549 = vmatmul.msk.bf16.vlgmr.msra.gmra.mxu0 %vm55_vm0, %v11853_v63  ;;  %v3241_v63 = vpack.c.b16 %v12060_v1, %v12058_v49 }
 0x5bf   :  { %3079 = vmatpush.bf16.msrb.mxu0 %v12000_v54  ;;  %v12072_v54 = vpop.f32.mrf.mxu3 }
 0x5c0   :  { %9548 = vmatmul.msk.bf16.gmra.mxu3 %vm55_vm0, %v11998_v39  ;;  %v15896_v39 = vld [vmem:[#allocation6_spill] sm:$0xff] }
 0x5c1   :  { %v2654_v18 = vpop.f32.mrf.mxu2  ;;  %3473 = vrot.lane.b32.xlu1 %v15896_v39, %s10192_s24  ;;  %v15912_v39 = vpack.c.b16 %v11899_v31, %v11914_v36 }
 0x5c3   :  { %3080 = vmatpush.bf16.msrb.mxu0 %v11985_v47  ;;  %9561 = vmatmul.msk.bf16.vlgmr.msrb.gmra.mxu2 %vm55_vm0, %v15895_v33  ;;  %v15897_v47 = vld [vmem:[#allocation9_spill] sm:$0xff] }
 0x5c4   :  { %3471 = vrot.lane.b32.xlu2 %v15897_v47, %s10192_s24 }
 0x5c7   :  { %3219 = vmatpush.bf16.msra.mxu0 %v2940_v29  ;;  %v12081_v29 = vpop.f32.mrf.mxu0 }
 0x5c8   :  { %9543 = vmatmul.msk.bf16.vlgmr.msrb.gmra.mxu1 %vm55_vm0, %v11896_v53  ;;  %v12090_v53 = vpop.f32.mrf.mxu3 }
 0x5c9   :  { %3114 = vmatpush.bf16.msrb.mxu1 %v12018_v59  ;;  %v12079_v57 = vpop.f32.mrf.mxu2 }
 0x5cb   :  { %3220 = vmatpush.bf16.msra.mxu0 %v2938_v23  ;;  %v15909_v23 = vld [vmem:[#allocation55_spill] sm:$0xff] }
 0x5cc   :  { %v15911_v38 = vpack.c.b16 %v15909_v23, %v15910_v10 }
 0x5cd   :  { %3115 = vmatpush.bf16.msrb.mxu1 %v12025_v15 }
 0x5ce   :  { %9550 = vmatmul.msk.bf16.gmra.mxu0 %vm55_vm0, %v11932_v34 }
 0x5cf   :  { %v12096_v11 = vpop.f32.mrf.mxu0 }
 0x5d0   :  { %9555 = vmatmul.msk.bf16.vlgmr.msra.gmra.mxu3 %vm55_vm0, %v15900_v8 }
 0x5d1   :  { %v12100_v15 = vpop.f32.mrf.mxu3 }
 0x5d3   :  { %9562 = vmatmul.msk.bf16.gmra.mxu2 %vm55_vm0, %v15902_v40  ;;  %v2659_v59 = vpop.f32.mrf.mxu2 }
 0x5d7   :  { %v12108_v32 = vpop.f32.mrf.mxu0 }
 0x5d8   :  { %9544 = vmatmul.msk.bf16.gmra.mxu1 %vm55_vm0, %v11945_v3 }
 0x5d9   :  { %v12114_v41 = vpop.f32.mrf.mxu3 }
 0x5db   :  { %v12102_v34 = vpop.f32.mrf.mxu2 }
 0x5de   :  { %9557 = vmatmul.msk.bf16.vlgmr.msrb.gmra.mxu0 %vm55_vm0, %v15905_v42 }
 0x5df   :  { %v12118_v3 = vpop.f32.mrf.mxu0 }
 0x5e0   :  { %9556 = vmatmul.msk.bf16.gmra.mxu3 %vm55_vm0, %v3031_v37 }
 0x5e3   :  { %v2802_v14 = vpop.f32.mrf.mxu2 }
 0x5e7   :  { %v12130_v55 = vpop.f32.mrf.mxu0 }
 0x5e8   :  { %9551 = vmatmul.msk.bf16.vlgmr.msra.gmra.mxu1 %vm55_vm0, %v11982_v20 }
 0x5e9   :  { %3254 = vmatpush.bf16.msra.mxu1 %v2965_v12  ;;  %v12137_v12 = vpop.f32.mrf.mxu1 }
 0x5eb   :  { %v12120_v6 = vpop.f32.mrf.mxu2 }
 0x5ec   :  { %v2695_v2 = vpop.f32.mrf.mxu3 }
 0x5ed   :  { %3255 = vmatpush.bf16.msra.mxu1 %v2963_v22 }
 0x5ee   :  { %9558 = vmatmul.msk.bf16.gmra.mxu0 %vm55_vm0, %v15908_v35 }
 0x5ef   :  { %v12135_v20 = vpop.f32.mrf.mxu0 }
 0x5f0   :  { %9563 = vmatmul.msk.bf16.vlgmr.msrb.gmra.mxu3 %vm55_vm0, %v3170_v46 }
 0x5f1   :  { %v12153_v46 = vpop.f32.mrf.mxu1 }
 0x5f3   :  { %v2807_v37 = vpop.f32.mrf.mxu2 }
 0x5f4   :  { %v12132_v19 = vpop.f32.mrf.mxu3 }
 0x5f7   :  { %v12149_v4 = vpop.f32.mrf.mxu0 }
 0x5f8   :  { %9552 = vmatmul.msk.bf16.gmra.mxu1 %vm55_vm0, %v2755_v13 }
 0x5f9   :  { %v12167_v16 = vpop.f32.mrf.mxu1 }
 0x5fb   :  { %v12139_v48 = vpop.f32.mrf.mxu2 }
 0x5fc   :  { %v2700_v22 = vpop.f32.mrf.mxu3 }
 0x5fe   :  { %9565 = vmatmul.msk.bf16.vlgmr.msra.gmra.mxu0 %vm55_vm0, %v15911_v38 }
 0x5ff   :  { %v12161_v28 = vpop.f32.mrf.mxu0 }
 0x600   :  { %9564 = vmatmul.msk.bf16.gmra.mxu3 %vm55_vm0, %v3171_v30 }
 0x601   :  { %v12175_v31 = vpop.f32.mrf.mxu1 }
 0x604   :  { %v12151_v58 = vpop.f32.mrf.mxu3 }
 0x606   :  { %v2902_v13 = vpop.f32.mrf.mxu2 }
 0x607   :  { %v12155_v33 = vadd.f32 %v2902_v13, %v2654_v18  ;;  %v2852_v30 = vpop.f32.mrf.mxu0 }
 0x608   :  { %9559 = vmatmul.msk.bf16.vlgmr.msrb.gmra.mxu1 %vm55_vm0, %v15912_v39 }
 0x609   :  { %v12179_v44 = vpop.f32.mrf.mxu1 }
 0x60c   :  { %v2827_v47 = vpop.f32.mrf.mxu3 }
 0x60e   :  { %v2904_v25 = vpop.f32.mrf.mxu2  ;;  %9566 = vmatmul.msk.bf16.gmra.mxu0 %vm55_vm0, %v3206_v9  ;;  %v2803_v9 = vadd.f32 %v2802_v14, %v12030_v51  ;;  %v2808_v14 = vadd.f32 %v2807_v37, %v12040_v62 }
 0x60f   :  { %v2854_v21 = vpop.f32.mrf.mxu0  ;;  %v2905_v49 = vadd.f32 %v2904_v25, %v12079_v57  ;;  %v2853_v57 = vadd.f32 %v2852_v30, %v12081_v29 }
 0x614   :  { %v12169_v18 = vpop.f32.mrf.mxu3 }
 0x616   :  { %v2907_v26 = vpop.f32.mrf.mxu2 }
 0x617   :  { %v2908_v8 = vadd.f32 %v2907_v26, %v2659_v59  ;;  %v12188_v27 = vpop.f32.mrf.mxu0 }
 0x618   :  { %9560 = vmatmul.msk.bf16.gmra.mxu1 %vm55_vm0, %v3101_v7  ;;  %v12192_v7 = vpop.f32.mrf.mxu1 }
 0x61c   :  { %v2832_v43 = vpop.f32.mrf.mxu3 }
 0x61e   :  { %v12177_v36 = vpop.f32.mrf.mxu2 }
 0x61f   :  { %v12196_v42 = vpop.f32.mrf.mxu0 }
 0x624   :  { %v12190_v5 = vpop.f32.mrf.mxu3 }
 0x625   :  { %15913 = vst [vmem:[#allocation31_spill] sm:$0xff] %v12190_v5 }
 0x626   :  { %v3012_v40 = vpop.f32.mrf.mxu2 }
 0x627   :  { %v12182_v60 = vadd.f32 %v3012_v40, %v2803_v9  ;;  %v2828_v9 = vadd.f32 %v2827_v47, %v12072_v54  ;;  %v2833_v54 = vadd.f32 %v2832_v43, %v12100_v15  ;;  %v2855_v47 = vadd.f32 %v2854_v21, %v12096_v11 }
 0x628   :  { %9567 = vmatmul.msk.bf16.vlgmr.msra.gmra.mxu1 %vm55_vm0, %v3240_v0 }
 0x62e   :  { %v12194_v59 = vpop.f32.mrf.mxu2 }
 0x633   :  { %v2927_v17 = vpop.f32.mrf.mxu3 }
 0x634   :  { %v12198_v51 = vadd.f32 %v2927_v17, %v2695_v2 }
 0x635   :  { %v12201_v24 = vpop.f32.mrf.mxu1 }
 0x636   :  { %v3017_v61 = vpop.f32.mrf.mxu2 }
 0x637   :  { %v12203_v56 = vadd.f32 %v3017_v61, %v2808_v14  ;;  %v15914_v61 = vld [vmem:[#allocation8_spill] sm:$0xff] }
 0x638   :  { %9568 = vmatmul.msk.bf16.gmra.mxu1 %vm55_vm0, %v3241_v63 }
 0x63b   :  { %v12209_v0 = vpop.f32.mrf.mxu3  ;;  %v2952_v45 = vpop.f32.mrf.mxu0 }
 0x63c   :  { %v2953_v11 = vadd.f32 %v2952_v45, %v12130_v55  ;;  %v2860_v45 = vadd.f32 %v12196_v42, %v12118_v3 }
 0x63d   :  { %v12211_v35 = vpop.f32.mrf.mxu1 }
 0x63e   :  { %v12213_v23 = vpop.f32.mrf.mxu2 }
 0x643   :  { %v2932_v2 = vpop.f32.mrf.mxu3  ;;  %v2954_v62 = vpop.f32.mrf.mxu0 }
 0x644   :  { %v12215_v10 = vadd.f32 %v2932_v2, %v2700_v22 }
 0x645   :  { %v12217_v37 = vpop.f32.mrf.mxu1 }
 0x646   :  { %v3152_v38 = vpop.f32.mrf.mxu2 }
 0x647   :  { %v3283_v30 = vadd.f32 %v3152_v38, %v12155_v33  ;;  %v2858_v33 = vadd.f32 %v12188_v27, %v12108_v32  ;;  %v2955_v38 = vadd.f32 %v2954_v62, %v12135_v20 }
 0x64b   :  { %v12219_v13 = vpop.f32.mrf.mxu3  ;;  %v2957_v39 = vpop.f32.mrf.mxu0 }
 0x64d   :  { %v12222_v1 = vpop.f32.mrf.mxu1 }
 0x64e   :  { %v3154_v63 = vpop.f32.mrf.mxu2 }
 0x64f   :  { %v3284_v26 = vadd.f32 %v3154_v63, %v2905_v49 }
 0x651   :  { %3341 = vrot.lane.b32.xlu1 %v3284_v26, %s10193_s25 }
 0x653   :  { %v3047_v22 = vpop.f32.mrf.mxu3  ;;  %v2959_v40 = vpop.f32.mrf.mxu0 }
 0x654   :  { %v12226_v17 = vadd.f32 %v3047_v22, %v2828_v9 }
 0x655   :  { %v12228_v14 = vpop.f32.mrf.mxu1 }
 0x656   :  { %v3157_v2 = vpop.f32.mrf.mxu2 }
 0x657   :  { %v3285_v26 = vadd.f32 %v3157_v2, %v2908_v8 }
 0x659   :  { %3518 = vrot.lane.b32.xlu1 %v15914_v61, %s10192_s24 }
 0x65b   :  { %v12233_v25 = vpop.f32.mrf.mxu3  ;;  %v3082_v49 = vpop.f32.mrf.mxu0 }
 0x65c   :  { %v3275_v63 = vadd.f32 %v3082_v49, %v2853_v57 }
 0x65d   :  { %v12235_v5 = vpop.f32.mrf.mxu1 }
 0x65e   :  { %3307 = vrot.lane.b32.xlu2 %v3275_v63, %s10194_s26  ;;  %v3159_v55 = vpop.f32.mrf.mxu2 }
 0x661   :  { %3343 = vrot.lane.b32.xlu1 %v3285_v26, %s10193_s25 }
 0x663   :  { %v3052_v9 = vpop.f32.mrf.mxu3  ;;  %v3084_v29 = vpop.f32.mrf.mxu0 }
 0x664   :  { %v12241_v22 = vadd.f32 %v3052_v9, %v2833_v54  ;;  %v3276_v61 = vadd.f32 %v3084_v29, %v2855_v47 }
 0x665   :  { %v2977_v57 = vpop.f32.mrf.mxu1 }
 0x666   :  { %3309 = vrot.lane.b32.xlu0 %v3276_v61, %s10194_s26  ;;  %3339 = vrot.lane.b32.xlu2 %v3283_v30, %s10193_s25  ;;  %v2910_v30 = vadd.f32 %v12177_v36, %v12102_v34 }
 0x668   :  { %v3286_v27 = vadd.f32 %v3159_v55, %v2910_v30  ;;  %v2885_v55 = vadd.f32 %v12235_v5, %v12175_v31 }
 0x66b   :  { %v3087_v8 = vpop.f32.mrf.mxu0  ;;  %v12257_v26 = vpop.f32.mrf.mxu3 }
 0x66c   :  { %v3277_v47 = vadd.f32 %v3087_v8, %v2858_v33  ;;  %v2958_v8 = vadd.f32 %v2957_v39, %v12149_v4  ;;  %v2880_v4 = vadd.f32 %v12222_v1, %v12153_v46  ;;  %v2883_v46 = vadd.f32 %v12228_v14, %v12167_v16 }
 0x66d   :  { %v12246_v2 = vpop.f32.mrf.mxu1  ;;  %v2978_v1 = vadd.f32 %v2977_v57, %v12179_v44 }
 0x66e   :  { %v2980_v16 = vadd.f32 %v12246_v2, %v12192_v7 }
 0x673   :  { %v3089_v49 = vpop.f32.mrf.mxu0  ;;  %v3187_v62 = vpop.f32.mrf.mxu3 }
 0x674   :  { %v3278_v20 = vadd.f32 %v3089_v49, %v2860_v45  ;;  %v3474_v49 = vpop.permute.xlu1 %3473 }
 0x675   :  { %v12248_v63 = vpop.f32.mrf.mxu1  ;;  %3495 = vmatpush.bf16.msra.mxu2 %v3474_v49 }
 0x67b   :  { %v3222_v15 = vpop.f32.mrf.mxu0  ;;  %v3189_v33 = vpop.f32.mrf.mxu3 }
 0x67c   :  { %v3291_v21 = vadd.f32 %v3222_v15, %v2953_v11  ;;  %v2960_v11 = vadd.f32 %v2959_v40, %v12161_v28  ;;  %v2878_v15 = vadd.f32 %v12217_v37, %v12137_v12  ;;  %v2930_v12 = vadd.f32 %v12209_v0, %v12132_v19 }
 0x67d   :  { %v12251_v43 = vpop.f32.mrf.mxu1  ;;  %v3287_v28 = vadd.f32 %v3187_v62, %v12198_v51 }
 0x67e   :  { %3371 = vrot.lane.b32.xlu0 %v3291_v21, %s10195_s27  ;;  %v3288_v39 = vadd.f32 %v3189_v33, %v2930_v12  ;;  %v2985_v5 = vadd.f32 %v12251_v43, %v12211_v35 }
 0x683   :  { %v3224_v54 = vpop.f32.mrf.mxu0 }
 0x684   :  { %v3292_v9 = vadd.f32 %v3224_v54, %v2955_v38  ;;  %v3472_v38 = vpop.permute.xlu2 %3471  ;;  %v3192_v54 = vpop.f32.mrf.mxu3 }
 0x685   :  { %v3117_v29 = vpop.f32.mrf.mxu1  ;;  %3496 = vmatpush.bf16.msra.mxu2 %v3472_v38  ;;  %v3289_v30 = vadd.f32 %v3192_v54, %v12215_v10  ;;  %v2805_v10 = vadd.f32 %v12120_v6, %v12037_v52  ;;  %v2810_v54 = vadd.f32 %v12139_v48, %v12050_v50 }
 0x686   :  { %3311 = vrot.lane.b32.xlu0 %v3277_v47, %s10194_s26  ;;  %3373 = vrot.lane.b32.xlu2 %v3292_v9, %s10195_s27  ;;  %v3279_v34 = vadd.f32 %v3117_v29, %v2878_v15  ;;  %v3521_v9 = vpop.permute.xlu0 %3520  ;;  %v2935_v29 = vadd.f32 %v12219_v13, %v12151_v58  ;;  %v2983_v58 = vadd.f32 %v12248_v63, %v12201_v24 }
 0x687   :  { %3530 = vmatpush.bf16.msra.mxu3 %v3521_v9  ;;  %3571 = vmatpush.bf16.msrb.mxu0 %v3521_v9  ;;  %v3268_v62 = vadd.f32 %v12194_v59, %v2805_v10 }
 0x68b   :  { %v3227_v32 = vpop.f32.mrf.mxu0 }
 0x68c   :  { %v3293_v42 = vadd.f32 %v3227_v32, %v2958_v8  ;;  %v3194_v47 = vpop.f32.mrf.mxu3 }
 0x68d   :  { %v3119_v61 = vpop.f32.mrf.mxu1  ;;  %v3290_v44 = vadd.f32 %v3194_v47, %v2935_v29 }
 0x68e   :  { %3345 = vrot.lane.b32.xlu0 %v3286_v27, %s10193_s25  ;;  %3313 = vrot.lane.b32.xlu2 %v3278_v20, %s10194_s26  ;;  %v3280_v37 = vadd.f32 %v3119_v61, %v2880_v4 }
 0x693   :  { %v3229_v3 = vpop.f32.mrf.mxu0 }
 0x694   :  { %v3294_v21 = vadd.f32 %v3229_v3, %v2960_v11 }
 0x695   :  { %v3122_v36 = vpop.f32.mrf.mxu1 }
 0x696   :  { %3377 = vrot.lane.b32.xlu1 %v3294_v21, %s10195_s27  ;;  %3375 = vrot.lane.b32.xlu2 %v3293_v42, %s10195_s27  ;;  %v3281_v19 = vadd.f32 %v3122_v36, %v2883_v46 }
 0x697   :  { %3315 = vrot.lane.b32.xlu0 %v3279_v34, %s10194_s26 }
 0x69d   :  { %v3124_v40 = vpop.f32.mrf.mxu1 }
 0x69e   :  { %3347 = vrot.lane.b32.xlu1 %v3287_v28, %s10193_s25  ;;  %3317 = vrot.lane.b32.xlu2 %v3280_v37, %s10194_s26  ;;  %v3282_v57 = vadd.f32 %v3124_v40, %v2885_v55 }
 0x69f   :  { %3349 = vrot.lane.b32.xlu0 %v3288_v39, %s10193_s25 }
 0x6a5   :  { %v3257_v0 = vpop.f32.mrf.mxu1 }
 0x6a6   :  { %v3295_v51 = vadd.f32 %v3257_v0, %v2978_v1  ;;  %v3270_v1 = vadd.f32 %v12213_v23, %v2810_v54 }
 0x6a7   :  { %3319 = vrot.lane.b32.xlu0 %v3281_v19, %s10194_s26 }
 0x6a8   :  { %3379 = vrot.lane.b32.xlu2 %v3295_v51, %s10195_s27 }
 0x6ad   :  { %v3259_v14 = vpop.f32.mrf.mxu1 }
 0x6ae   :  { %v3296_v45 = vadd.f32 %v3259_v14, %v2980_v16 }
 0x6af   :  { %3353 = vrot.lane.b32.xlu0 %v3290_v44, %s10193_s25 }
 0x6b0   :  { %3381 = vrot.lane.b32.xlu1 %v3296_v45, %s10195_s27  ;;  %3321 = vrot.lane.b32.xlu2 %v3282_v57, %s10194_s26 }
 0x6b5   :  { %v3262_v13 = vpop.f32.mrf.mxu1 }
 0x6b6   :  { %v3297_v31 = vadd.f32 %v3262_v13, %v2983_v58 }
 0x6b8   :  { %3351 = vrot.lane.b32.xlu1 %v3289_v30, %s10193_s25  ;;  %3383 = vrot.lane.b32.xlu2 %v3297_v31, %s10195_s27  ;;  %v3308_v24 = vpop.permute.xlu2 %3307 }
 0x6b9   :  { %v3395_v15 = vsel %vm842_vm11, %v12182_v60, %v3308_v24 }
 0x6bd   :  { %v3264_v7 = vpop.f32.mrf.mxu1 }
 0x6be   :  { %v3298_v2 = vadd.f32 %v3264_v7, %v2985_v5 }
 0x6c0   :  { %3385 = vrot.lane.b32.xlu1 %v3298_v2, %s10195_s27  ;;  %v3340_v63 = vpop.permute.xlu2 %3339  ;;  %v2830_v2 = vadd.f32 %v12169_v18, %v12090_v53 }
 0x6c1   :  { %v3404_v3 = vsel %vm3403_vm13, %v3395_v15, %v3340_v63 }
 0x6c3   :  { %v3342_v32 = vpop.permute.xlu1 %3341 }
 0x6cb   :  { %v3519_v27 = vpop.permute.xlu1 %3518 }
 0x6cc   :  { %3531 = vmatpush.bf16.msra.mxu3 %v3519_v27  ;;  %3572 = vmatpush.bf16.msrb.mxu0 %v3519_v27  ;;  %v3272_v27 = vadd.f32 %v12233_v25, %v2830_v2 }
 0x6d3   :  { %v3344_v39 = vpop.permute.xlu1 %3343 }
 0x6d8   :  { %v3310_v20 = vpop.permute.xlu0 %3309 }
 0x6d9   :  { %v3396_v61 = vsel %vm842_vm11, %v3268_v62, %v3310_v20 }
 0x6da   :  { %v3405_v43 = vsel %vm3403_vm13, %v3396_v61, %v3342_v32 }
 0x6e0   :  { %v3374_v35 = vpop.permute.xlu2 %3373 }
 0x6e1   :  { %v3414_v8 = vsel %vm3412_vm12, %v3405_v43, %v3374_v35 }
 0x6e2   :  { %v3422_v11 = vpack.c.bf16 %v3414_v8, %v3414_v8 }
 0x6e4   :  { %v3430_v6 = vunpack.c.l.bf16 %v3422_v11  ;;  %v3458_v21 = vunpack.c.l.b16 %v3422_v11 }
 0x6e6   :  { %v3438_v33 = vsub.f32 %v3414_v8, %v3430_v6 }
 0x6e8   :  { %v3314_v12 = vpop.permute.xlu2 %3313 }
 0x6e9   :  { %v3398_v51 = vsel %vm842_vm11, %v3270_v1, %v3314_v12 }
 0x6f0   :  { %v3372_v42 = vpop.permute.xlu0 %3371  ;;  %v3376_v38 = vpop.permute.xlu2 %3375 }
 0x6f1   :  { %v3413_v52 = vsel %vm3412_vm12, %v3404_v3, %v3372_v42 }
 0x6f2   :  { %v3421_v59 = vpack.c.bf16 %v3413_v52, %v3413_v52 }
 0x6f4   :  { %v3429_v34 = vunpack.c.l.bf16 %v3421_v59  ;;  %v3457_v36 = vunpack.c.l.b16 %v3421_v59 }
 0x6f6   :  { %v3437_v49 = vsub.f32 %v3413_v52, %v3429_v34  ;;  %v3465_v4 = vpack.c.b16 %v3458_v21, %v3457_v36  ;;  %v15915_v21 = vld [vmem:[#allocation31_spill] sm:$0xff] }
 0x6f7   :  { %v2835_v34 = vadd.f32 %v15915_v21, %v12114_v41 }
 0x6f8   :  { %v3445_v28 = vpack.c.bf16 %v3438_v33, %v3437_v49  ;;  %9569 = vmatmul.msk.bf16.vlgmr.msra.gmra.mxu2 %vm55_vm0, %v3465_v4  ;;  %9573 = vmatmul.msk.bf16.vlgmr.msra.gmra.mxu3 %vm55_vm0, %v3465_v4  ;;  %v3312_v60 = vpop.permute.xlu0 %3311  ;;  %v3318_v45 = vpop.permute.xlu2 %3317 }
 0x6f9   :  { %v3397_v37 = vsel %vm842_vm11, %v12203_v56, %v3312_v60  ;;  %v3400_v63 = vsel %vm842_vm11, %v3272_v27, %v3318_v45  ;;  %v3274_v33 = vadd.f32 %v12257_v26, %v2835_v34 }
 0x6fa   :  { %9577 = vmatmul.msk.bf16.vlgmr.msrb.gmra.mxu0 %vm55_vm0, %v3445_v28  ;;  %v3406_v40 = vsel %vm3403_vm13, %v3397_v37, %v3344_v39 }
 0x6fb   :  { %v3415_v46 = vsel %vm3412_vm12, %v3406_v40, %v3376_v38 }
 0x6fc   :  { %v3423_v0 = vpack.c.bf16 %v3415_v46, %v3415_v46 }
 0x6fe   :  { %v3431_v55 = vunpack.c.l.bf16 %v3423_v0  ;;  %v3459_v44 = vunpack.c.l.b16 %v3423_v0 }
 0x700   :  { %v3346_v19 = vpop.permute.xlu0 %3345  ;;  %v3439_v57 = vsub.f32 %v3415_v46, %v3431_v55  ;;  %v10149_v55 = vld [vmem:[%s15568_s0] sm:$0xff] }
 0x701   :  { %v3407_v47 = vsel %vm3403_vm13, %v3398_v51, %v3346_v19 }
 0x702   :  { %v3380_v30 = vpop.permute.xlu2 %3379 }
 0x708   :  { %v3378_v9 = vpop.permute.xlu1 %3377 }
 0x709   :  { %v3416_v56 = vsel %vm3412_vm12, %v3407_v47, %v3378_v9  ;;  %v3316_v23 = vpop.permute.xlu0 %3315 }
 0x70a   :  { %v3424_v29 = vpack.c.bf16 %v3416_v56, %v3416_v56  ;;  %v3399_v31 = vsel %vm842_vm11, %v12226_v17, %v3316_v23  ;;  %v3322_v10 = vpop.permute.xlu2 %3321  ;;  %v10150_v23 = vld [vmem:[%s15568_s0 + $0x8] sm:$0xff] }
 0x70b   :  { %v3402_v4 = vsel %vm842_vm11, %v3274_v33, %v3322_v10 }
 0x70c   :  { %v3432_v16 = vunpack.c.l.bf16 %v3424_v29  ;;  %v3460_v14 = vunpack.c.l.b16 %v3424_v29 }
 0x70e   :  { %v3440_v50 = vsub.f32 %v3416_v56, %v3432_v16  ;;  %v3466_v48 = vpack.c.b16 %v3460_v14, %v3459_v44  ;;  %v12359_v56 = vld [vmem:[%s15569_s1] sm:$0x7f] }
 0x70f   :  { %v12362_v29 = vperm.slane %v12359_v56, 2 }
 0x710   :  { %v3446_v58 = vpack.c.bf16 %v3440_v50, %v3439_v57  ;;  %9570 = vmatmul.msk.bf16.gmra.mxu2 %vm55_vm0, %v3466_v48  ;;  %9574 = vmatmul.msk.bf16.gmra.mxu3 %vm55_vm0, %v3466_v48  ;;  %v3348_v13 = vpop.permute.xlu1 %3347 }
 0x711   :  { %v3408_v5 = vsel %vm3403_vm13, %v3399_v31, %v3348_v13  ;;  %v3350_v7 = vpop.permute.xlu0 %3349 }
 0x712   :  { %9578 = vmatmul.msk.bf16.gmra.mxu0 %vm55_vm0, %v3446_v58  ;;  %v3417_v32 = vsel %vm3412_vm12, %v3408_v5, %v3380_v30  ;;  %v3409_v20 = vsel %vm3403_vm13, %v3400_v63, %v3350_v7  ;;  %v3384_v59 = vpop.permute.xlu2 %3383 }
 0x713   :  { %v3425_v24 = vpack.c.bf16 %v3417_v32, %v3417_v32 }
 0x715   :  { %v3433_v17 = vunpack.c.l.bf16 %v3425_v24  ;;  %v3461_v8 = vunpack.c.l.b16 %v3425_v24  ;;  %v10151_v24 = vld [vmem:[%s15568_s0 + $0x10] sm:$0xff] }
 0x717   :  { %v3441_v53 = vsub.f32 %v3417_v32, %v3433_v17 }
 0x719   :  { %v3320_v43 = vpop.permute.xlu0 %3319 }
 0x71a   :  { %v3401_v25 = vsel %vm842_vm11, %v12241_v22, %v3320_v43 }
 0x721   :  { %v3354_v49 = vpop.permute.xlu0 %3353 }
 0x722   :  { %v3382_v62 = vpop.permute.xlu1 %3381  ;;  %v3411_v12 = vsel %vm3403_vm13, %v3402_v4, %v3354_v49 }
 0x723   :  { %v3418_v61 = vsel %vm3412_vm12, %v3409_v20, %v3382_v62 }
 0x724   :  { %v3426_v35 = vpack.c.bf16 %v3418_v61, %v3418_v61 }
 0x726   :  { %v3434_v11 = vunpack.c.l.bf16 %v3426_v35  ;;  %v3462_v15 = vunpack.c.l.b16 %v3426_v35 }
 0x728   :  { %v3442_v18 = vsub.f32 %v3418_v61, %v3434_v11  ;;  %v3467_v3 = vpack.c.b16 %v3462_v15, %v3461_v8  ;;  %v10152_v8 = vld [vmem:[%s15568_s0 + $0x18] sm:$0xff] }
 0x72a   :  { %v3447_v42 = vpack.c.bf16 %v3442_v18, %v3441_v53  ;;  %v3352_v52 = vpop.permute.xlu1 %3351  ;;  %9571 = vmatmul.msk.bf16.gmra.mxu2 %vm55_vm0, %v3467_v3  ;;  %9575 = vmatmul.msk.bf16.gmra.mxu3 %vm55_vm0, %v3467_v3 }
 0x72b   :  { %v3410_v6 = vsel %vm3403_vm13, %v3401_v25, %v3352_v52 }
 0x72c   :  { %9579 = vmatmul.msk.bf16.gmra.mxu0 %vm55_vm0, %v3447_v42  ;;  %v3419_v36 = vsel %vm3412_vm12, %v3410_v6, %v3384_v59  ;;  %v10153_v6 = vld [vmem:[%s15568_s0 + $0x20] sm:$0xff] }
 0x72d   :  { %v3427_v22 = vpack.c.bf16 %v3419_v36, %v3419_v36 }
 0x72f   :  { %v3435_v37 = vunpack.c.l.bf16 %v3427_v22  ;;  %v3463_v40 = vunpack.c.l.b16 %v3427_v22 }
 0x731   :  { %v3443_v46 = vsub.f32 %v3419_v36, %v3435_v37 }
 0x732   :  { %v3386_v28 = vpop.permute.xlu1 %3385 }
 0x733   :  { %v3420_v60 = vsel %vm3412_vm12, %v3411_v12, %v3386_v28  ;;  %v10154_v12 = vld [vmem:[%s15568_s0 + $0x28] sm:$0xff] }
 0x734   :  { %v3428_v39 = vpack.c.bf16 %v3420_v60, %v3420_v60 }
 0x736   :  { %v3436_v38 = vunpack.c.l.bf16 %v3428_v39  ;;  %v3464_v54 = vunpack.c.l.b16 %v3428_v39 }
 0x738   :  { %v3444_v41 = vsub.f32 %v3420_v60, %v3436_v38  ;;  %v3468_v1 = vpack.c.b16 %v3464_v54, %v3463_v40 }
 0x73a   :  { %v3448_v19 = vpack.c.bf16 %v3444_v41, %v3443_v46  ;;  %9572 = vmatmul.msk.bf16.gmra.mxu2 %vm55_vm0, %v3468_v1  ;;  %9576 = vmatmul.msk.bf16.gmra.mxu3 %vm55_vm0, %v3468_v1  ;;  %v10155_v41 = vld [vmem:[%s15568_s0 + $0x30] sm:$0xff] }
 0x73c   :  { %9580 = vmatmul.msk.bf16.gmra.mxu0 %vm55_vm0, %v3448_v19 }
 0x777   :  { %v3574_v26 = vpop.f32.mrf.mxu0 }
 0x77b   :  { %v3498_v0 = vpop.f32.mrf.mxu2  ;;  %v3533_v51 = vpop.f32.mrf.mxu3 }
 0x77c   :  { %v3534_v47 = vadd.f32 %v3533_v51, %v3498_v0 }
 0x77e   :  { %v3594_v9 = vadd.f32 %v3574_v26, %v3534_v47 }
 0x77f   :  { %v3576_v45 = vpop.f32.mrf.mxu0 }
 0x780   :  { %v3602_v16 = vadd.f32 %v10149_v55, %v3594_v9  ;;  %v15916_v55 = vld [vmem:[#allocation5_spill] sm:$0xff] }
 0x782   :  { %v12368_v44 = vadd.f32 %v12362_v29, %v3602_v16 }
 0x783   :  { %v3500_v14 = vpop.f32.mrf.mxu2  ;;  %v3535_v57 = vpop.f32.mrf.mxu3 }
 0x784   :  { %v3536_v50 = vadd.f32 %v3535_v57, %v3500_v14  ;;  %v3619_v48 = vsel %vm55_vm0, %v12368_v44, 0.0 }
 0x785   :  { %3620 = vadd.xlane.f32.xlu0 %v3619_v48 }
 0x786   :  { %v3595_v58 = vadd.f32 %v3576_v45, %v3536_v50  ;;  %v10156_v45 = vld [vmem:[%s15568_s0 + $0x38] sm:$0xff] }
 0x788   :  { %v3603_v13 = vadd.f32 %v10150_v23, %v3595_v58 }
 0x78a   :  { %v12376_v30 = vadd.f32 %v12362_v29, %v3603_v13 }
 0x78c   :  { %v3622_v31 = vsel %vm55_vm0, %v12376_v30, 0.0 }
 0x78d   :  { %3623 = vadd.xlane.f32.xlu2 %v3622_v31 }
 0x78f   :  { %v3579_v5 = vpop.f32.mrf.mxu0 }
 0x793   :  { %v3503_v7 = vpop.f32.mrf.mxu2  ;;  %v3538_v2 = vpop.f32.mrf.mxu3 }
 0x794   :  { %v3539_v32 = vadd.f32 %v3538_v2, %v3503_v7 }
 0x796   :  { %v3596_v27 = vadd.f32 %v3579_v5, %v3539_v32 }
 0x797   :  { %v3581_v35 = vpop.f32.mrf.mxu0 }
 0x798   :  { %v3604_v63 = vadd.f32 %v10151_v24, %v3596_v27 }
 0x79a   :  { %v12384_v10 = vadd.f32 %v12362_v29, %v3604_v63 }
 0x79b   :  { %v3505_v20 = vpop.f32.mrf.mxu2  ;;  %v3540_v62 = vpop.f32.mrf.mxu3 }
 0x79c   :  { %v3541_v61 = vadd.f32 %v3540_v62, %v3505_v20  ;;  %v3625_v17 = vsel %vm55_vm0, %v12384_v10, 0.0 }
 0x79d   :  { %3626 = vadd.xlane.f32.xlu1 %v3625_v17 }
 0x79e   :  { %v3597_v43 = vadd.f32 %v3581_v35, %v3541_v61 }
 0x7a0   :  { %v3605_v11 = vadd.f32 %v10152_v8, %v3597_v43 }
 0x7a2   :  { %v12392_v15 = vadd.f32 %v12362_v29, %v3605_v11 }
 0x7a4   :  { %v3628_v53 = vsel %vm55_vm0, %v12392_v15, 0.0 }
 0x7a5   :  { %3629 = vadd.xlane.f32.xlu2 %v3628_v53 }
 0x7a9   :  { %v3584_v18 = vpop.f32.mrf.mxu0 }
 0x7ad   :  { %v3508_v3 = vpop.f32.mrf.mxu2  ;;  %v3543_v25 = vpop.f32.mrf.mxu3 }
 0x7ae   :  { %v3544_v42 = vadd.f32 %v3543_v25, %v3508_v3 }
 0x7b0   :  { %v3598_v52 = vadd.f32 %v3584_v18, %v3544_v42 }
 0x7b1   :  { %v3586_v21 = vpop.f32.mrf.mxu0 }
 0x7b2   :  { %v3606_v59 = vadd.f32 %v10153_v6, %v3598_v52 }
 0x7b4   :  { %v12400_v34 = vadd.f32 %v12362_v29, %v3606_v59 }
 0x7b5   :  { %v3510_v36 = vpop.f32.mrf.mxu2  ;;  %v3545_v33 = vpop.f32.mrf.mxu3 }
 0x7b6   :  { %v3546_v49 = vadd.f32 %v3545_v33, %v3510_v36  ;;  %v3631_v22 = vsel %vm55_vm0, %v12400_v34, 0.0 }
 0x7b7   :  { %3632 = vadd.xlane.f32.xlu0 %v3631_v22 }
 0x7b8   :  { %v3599_v4 = vadd.f32 %v3586_v21, %v3546_v49 }
 0x7b9   :  { %v3589_v54 = vpop.f32.mrf.mxu0 }
 0x7ba   :  { %v3607_v28 = vadd.f32 %v10154_v12, %v3599_v4 }
 0x7bc   :  { %v12408_v60 = vadd.f32 %v12362_v29, %v3607_v28 }
 0x7bd   :  { %v3513_v37 = vpop.f32.mrf.mxu2  ;;  %v3548_v39 = vpop.f32.mrf.mxu3 }
 0x7be   :  { %v3549_v40 = vadd.f32 %v3548_v39, %v3513_v37  ;;  %v3634_v38 = vsel %vm55_vm0, %v12408_v60, 0.0 }
 0x7bf   :  { %3635 = vadd.xlane.f32.xlu1 %v3634_v38 }
 0x7c0   :  { %v3600_v46 = vadd.f32 %v3589_v54, %v3549_v40 }
 0x7c1   :  { %v3591_v14 = vpop.f32.mrf.mxu0 }
 0x7c2   :  { %v3608_v1 = vadd.f32 %v10155_v41, %v3600_v46  ;;  %v36_v46 = vld [vmem:[%s15570_s2 + $0x28] sm:$0xff]  ;;  %v38_v41 = vld [vmem:[%s15570_s2 + $0x38] sm:$0xff] }
 0x7c4   :  { %v12416_v19 = vadd.f32 %v12362_v29, %v3608_v1  ;;  %v3843_v1 = vpack.c.bf16 %v36_v46, %v36_v46 }
 0x7c5   :  { %v3515_v0 = vpop.f32.mrf.mxu2  ;;  %v3550_v51 = vpop.f32.mrf.mxu3 }
 0x7c6   :  { %v3637_v26 = vsel %vm55_vm0, %v12416_v19, 0.0  ;;  %v3551_v47 = vadd.f32 %v3550_v51, %v3515_v0 }
 0x7c7   :  { %3638 = vadd.xlane.f32.xlu1 %v3637_v26  ;;  %v3844_v26 = vpack.c.bf16 %v38_v41, %v38_v41 }
 0x7c8   :  { %v3601_v57 = vadd.f32 %v3591_v14, %v3551_v47 }
 0x7c9   :  { %v3923_v14 = vunpack.c.l.b16 %v3844_v26 }
 0x7ca   :  { %v3609_v58 = vadd.f32 %v10156_v45, %v3601_v57 }
 0x7cc   :  { %v12435_v7 = vadd.f32 %v12362_v29, %v3609_v58 }
 0x7ce   :  { %v3640_v27 = vsel %vm55_vm0, %v12435_v7, 0.0 }
 0x7f8   :  { %v3621_v9 = vpop.xlane.xlu0 %3620 }
 0x7f9   :  { %v3643_v16 = vmul.f32 %v3621_v9, %v15916_v55 }
 0x7fb   :  { %v12422_v50 = vsub.f32 %v12368_v44, %v3643_v16  ;;  %v3922_v16 = vunpack.c.l.b16 %v3843_v1 }
 0x7fd   :  { %v3659_v48 = vmul.f32 %v12422_v50, %v12422_v50  ;;  %v3925_v45 = vpack.c.b16 %v3923_v14, %v3922_v16 }
 0x7ff   :  { %v3667_v23 = vsel %vm55_vm0, %v3659_v48, 0.0  ;;  %3934 = vmatpush.bf16.msrb.mxu2 %v3925_v45  ;;  %3975 = vmatpush.bf16.msrb.mxu3 %v3925_v45 }
 0x800   :  { %v3624_v13 = vpop.xlane.xlu2 %3623  ;;  %3668 = vadd.xlane.f32.xlu2 %v3667_v23 }
 0x801   :  { %v3644_v31 = vmul.f32 %v3624_v13, %v15916_v55 }
 0x803   :  { %v12432_v5 = vsub.f32 %v12376_v30, %v3644_v31 }
 0x805   :  { %v3660_v2 = vmul.f32 %v12432_v5, %v12432_v5 }
 0x807   :  { %v3670_v32 = vsel %vm55_vm0, %v3660_v2, 0.0 }
 0x808   :  { %3671 = vadd.xlane.f32.xlu0 %v3670_v32  ;;  %3641 = vadd.xlane.f32.xlu2 %v3640_v27  ;;  %v12493_v27 = vperm.slane %v12359_v56, 3 }
 0x810   :  { %v3627_v24 = vpop.xlane.xlu1 %3626 }
 0x811   :  { %v3645_v63 = vmul.f32 %v3627_v24, %v15916_v55 }
 0x813   :  { %v12444_v20 = vsub.f32 %v12384_v10, %v3645_v63 }
 0x815   :  { %v3661_v29 = vmul.f32 %v12444_v20, %v12444_v20 }
 0x817   :  { %v3673_v62 = vsel %vm55_vm0, %v3661_v29, 0.0 }
 0x818   :  { %v3630_v61 = vpop.xlane.xlu2 %3629  ;;  %3674 = vadd.xlane.f32.xlu0 %v3673_v62  ;;  %v12497_v62 = vperm.slane %v12359_v56, 4 }
 0x819   :  { %v3646_v17 = vmul.f32 %v3630_v61, %v15916_v55 }
 0x81b   :  { %v12451_v35 = vsub.f32 %v12392_v15, %v3646_v17 }
 0x81d   :  { %v3662_v43 = vmul.f32 %v12451_v35, %v12451_v35 }
 0x81f   :  { %v3676_v8 = vsel %vm55_vm0, %v3662_v43, 0.0 }
 0x820   :  { %3677 = vadd.xlane.f32.xlu1 %v3676_v8 }
 0x82a   :  { %v3633_v11 = vpop.xlane.xlu0 %3632 }
 0x82b   :  { %v3647_v53 = vmul.f32 %v3633_v11, %v15916_v55  ;;  %v3847_v11 = vunpack.c.l.bf16 %v3843_v1 }
 0x82d   :  { %v12458_v18 = vsub.f32 %v12400_v34, %v3647_v53  ;;  %v3848_v53 = vunpack.c.l.bf16 %v3844_v26 }
 0x82f   :  { %v3663_v3 = vmul.f32 %v12458_v18, %v12458_v18 }
 0x831   :  { %v3679_v25 = vsel %vm55_vm0, %v3663_v3, 0.0  ;;  %v32_v3 = vld [vmem:[%s15570_s2 + $0x8] sm:$0xff] }
 0x832   :  { %v3636_v42 = vpop.xlane.xlu1 %3635  ;;  %3680 = vadd.xlane.f32.xlu2 %v3679_v25  ;;  %v34_v25 = vld [vmem:[%s15570_s2 + $0x18] sm:$0xff] }
 0x833   :  { %v3648_v52 = vmul.f32 %v3636_v42, %v15916_v55  ;;  %v3841_v42 = vpack.c.bf16 %v32_v3, %v32_v3 }
 0x835   :  { %v12465_v6 = vsub.f32 %v12408_v60, %v3648_v52  ;;  %v3842_v52 = vpack.c.bf16 %v34_v25, %v34_v25 }
 0x837   :  { %v3664_v59 = vmul.f32 %v12465_v6, %v12465_v6 }
 0x839   :  { %v3682_v21 = vsel %vm55_vm0, %v3664_v59, 0.0 }
 0x83a   :  { %3683 = vadd.xlane.f32.xlu0 %v3682_v21  ;;  %v3639_v36 = vpop.xlane.xlu1 %3638  ;;  %v3851_v21 = vsub.f32 %v36_v46, %v3847_v11 }
 0x83b   :  { %v3649_v33 = vmul.f32 %v3639_v36, %v15916_v55  ;;  %v3852_v36 = vsub.f32 %v38_v41, %v3848_v53 }
 0x83d   :  { %v12472_v49 = vsub.f32 %v12416_v19, %v3649_v33 }
 0x83f   :  { %v3665_v22 = vmul.f32 %v12472_v49, %v12472_v49 }
 0x841   :  { %v3685_v4 = vsel %vm55_vm0, %v3665_v22, 0.0  ;;  %v3845_v22 = vunpack.c.l.bf16 %v3841_v42 }
 0x842   :  { %3686 = vadd.xlane.f32.xlu1 %v3685_v4  ;;  %v3846_v4 = vunpack.c.l.bf16 %v3842_v52 }
 0x873   :  { %v3669_v12 = vpop.xlane.xlu2 %3668 }
 0x874   :  { %v3691_v28 = vmul.f32 %v3669_v12, %v15916_v55  ;;  %v3920_v12 = vunpack.c.l.b16 %v3841_v42 }
 0x876   :  { %v3699_v37 = vadd.f32 1e-05, %v3691_v28 }
 0x878   :  { %9932 = vrsqrt.f32 %v3699_v37  ;;  %vm3713_vm15 = vweird.f32 %v3699_v37 }
 0x87b   :  { %v3642_v39 = vpop.xlane.xlu2 %3641  ;;  %v3672_v40 = vpop.xlane.xlu0 %3671 }
 0x87c   :  { %v3650_v38 = vmul.f32 %v3642_v39, %v15916_v55  ;;  %v3692_v54 = vmul.f32 %v3672_v40, %v15916_v55  ;;  %v3849_v40 = vsub.f32 %v32_v3, %v3845_v22 }
 0x87e   :  { %v9933_v0 = vpop.eup %9932  ;;  %v12487_v51 = vsub.f32 %v12435_v7, %v3650_v38  ;;  %v3700_v47 = vadd.f32 1e-05, %v3692_v54  ;;  %v3850_v38 = vsub.f32 %v34_v25, %v3846_v4  ;;  %v3921_v54 = vunpack.c.l.b16 %v3842_v52 }
 0x87f   :  { %v3708_v9 = vmul.f32 %v9933_v0, %v3699_v37  ;;  %vm3714_vm14 = vweird.f32 %v9933_v0  ;;  %v3854_v37 = vpack.c.bf16 %v3852_v36, %v3851_v21 }
 0x880   :  { %9934 = vrsqrt.f32 %v3700_v47  ;;  %v3666_v57 = vmul.f32 %v12487_v51, %v12487_v51  ;;  %vm3715_vm1 = vmor %vm3713_vm15, %vm3714_vm14  ;;  %vm3723_vm3 = vweird.f32 %v3700_v47  ;;  %v3924_v46 = vpack.c.b16 %v3921_v54, %v3920_v12 }
 0x881   :  { %v3709_v48 = vmul.f32 %v9933_v0, %v3708_v9  ;;  %3893 = vmatpush.bf16.msrb.mxu1 %v3854_v37 }
 0x882   :  { %v3688_v58 = vsel %vm55_vm0, %v3666_v57, 0.0  ;;  %3935 = vmatpush.bf16.msrb.mxu2 %v3924_v46  ;;  %3976 = vmatpush.bf16.msrb.mxu3 %v3924_v46 }
 0x883   :  { %v3710_v23 = vmul.f32 0.5, %v3709_v48  ;;  %3689 = vadd.xlane.f32.xlu2 %v3688_v58 }
 0x885   :  { %v3711_v13 = vsub.f32 1.5, %v3710_v23 }
 0x886   :  { %v9935_v31 = vpop.eup %9934 }
 0x887   :  { %v3712_v2 = vmul.f32 %v9933_v0, %v3711_v13  ;;  %v3718_v32 = vmul.f32 %v9935_v31, %v3700_v47  ;;  %vm3724_vm2 = vweird.f32 %v9935_v31 }
 0x888   :  { %vm3725_vm4 = vmor %vm3723_vm3, %vm3724_vm2 }
 0x889   :  { %v3716_v24 = vsel %vm3715_vm1, %v9933_v0, %v3712_v2  ;;  %v3719_v63 = vmul.f32 %v9935_v31, %v3718_v32  ;;  %v3853_v0 = vpack.c.bf16 %v3850_v38, %v3849_v40 }
 0x88a   :  { %v3787_v29 = vmul.f32 %v3716_v24, %v12422_v50 }
 0x88b   :  { %v3720_v61 = vmul.f32 0.5, %v3719_v63  ;;  %v3675_v17 = vpop.xlane.xlu0 %3674  ;;  %3894 = vmatpush.bf16.msrb.mxu1 %v3853_v0 }
 0x88c   :  { %v3796_v43 = vmul.f32 %v12493_v27, %v3787_v29  ;;  %v3693_v8 = vmul.f32 %v3675_v17, %v15916_v55 }
 0x88d   :  { %v3721_v50 = vsub.f32 1.5, %v3720_v61 }
 0x88e   :  { %v3701_v59 = vadd.f32 1e-05, %v3693_v8  ;;  %v3805_v28 = vadd.f32 %v12497_v62, %v3796_v43 }
 0x88f   :  { %v3722_v33 = vmul.f32 %v9935_v31, %v3721_v50 }
 0x890   :  { %9936 = vrsqrt.f32 %v3701_v59  ;;  %v3813_v41 = vpack.c.bf16 %v3805_v28, %v3805_v28  ;;  %vm3733_vm6 = vweird.f32 %v3701_v59 }
 0x891   :  { %v3726_v39 = vsel %vm3725_vm4, %v9935_v31, %v3722_v33 }
 0x892   :  { %v3788_v1 = vmul.f32 %v3726_v39, %v12432_v5  ;;  %v3821_v45 = vunpack.c.l.bf16 %v3813_v41  ;;  %v3863_v23 = vunpack.c.l.b16 %v3813_v41 }
 0x893   :  { %v3678_v26 = vpop.xlane.xlu1 %3677 }
 0x894   :  { %v3797_v47 = vmul.f32 %v12493_v27, %v3788_v1  ;;  %v3694_v9 = vmul.f32 %v3678_v26, %v15916_v55  ;;  %v3829_v32 = vsub.f32 %v3805_v28, %v3821_v45 }
 0x896   :  { %v9937_v16 = vpop.eup %9936  ;;  %v3806_v14 = vadd.f32 %v12497_v62, %v3797_v47  ;;  %v3702_v57 = vadd.f32 1e-05, %v3694_v9 }
 0x897   :  { %v3728_v48 = vmul.f32 %v9937_v16, %v3701_v59  ;;  %vm3734_vm5 = vweird.f32 %v9937_v16 }
 0x898   :  { %v3814_v58 = vpack.c.bf16 %v3806_v14, %v3806_v14  ;;  %9938 = vrsqrt.f32 %v3702_v57  ;;  %vm3735_vm7 = vmor %vm3733_vm6, %vm3734_vm5  ;;  %vm3743_vm9 = vweird.f32 %v3702_v57 }
 0x899   :  { %v3729_v5 = vmul.f32 %v9937_v16, %v3728_v48 }
 0x89a   :  { %v3822_v13 = vunpack.c.l.bf16 %v3814_v58  ;;  %v3864_v31 = vunpack.c.l.b16 %v3814_v58 }
 0x89b   :  { %v3730_v2 = vmul.f32 0.5, %v3729_v5 }
 0x89c   :  { %v3830_v24 = vsub.f32 %v3806_v14, %v3822_v13  ;;  %v3871_v63 = vpack.c.b16 %v3864_v31, %v3863_v23 }
 0x89d   :  { %v3731_v29 = vsub.f32 1.5, %v3730_v2 }
 0x89e   :  { %v9939_v61 = vpop.eup %9938  ;;  %9581 = vmatmul.msk.bf16.vlgmr.msrb.gmra.mxu1 %vm55_vm0, %v3871_v63  ;;  %9585 = vmatmul.msk.bf16.vlgmr.msrb.gmra.mxu2 %vm55_vm0, %v3871_v63  ;;  %v3837_v17 = vpack.c.bf16 %v3830_v24, %v3829_v32 }
 0x89f   :  { %v3732_v43 = vmul.f32 %v9937_v16, %v3731_v29  ;;  %v3738_v8 = vmul.f32 %v9939_v61, %v3702_v57  ;;  %vm3744_vm8 = vweird.f32 %v9939_v61 }
 0x8a0   :  { %9589 = vmatmul.msk.bf16.vlgmr.msrb.gmra.mxu3 %vm55_vm0, %v3837_v17  ;;  %vm3745_vm10 = vmor %vm3743_vm9, %vm3744_vm8 }
 0x8a1   :  { %v3736_v11 = vsel %vm3735_vm7, %v9937_v16, %v3732_v43  ;;  %v3739_v53 = vmul.f32 %v9939_v61, %v3738_v8 }
 0x8a2   :  { %v3789_v25 = vmul.f32 %v3736_v11, %v12444_v20 }
 0x8a3   :  { %v3740_v3 = vmul.f32 0.5, %v3739_v53 }
 0x8a4   :  { %v3798_v36 = vmul.f32 %v12493_v27, %v3789_v25 }
 0x8a5   :  { %v3741_v50 = vsub.f32 1.5, %v3740_v3  ;;  %v3681_v42 = vpop.xlane.xlu2 %3680 }
 0x8a6   :  { %v3695_v52 = vmul.f32 %v3681_v42, %v15916_v55  ;;  %v3807_v12 = vadd.f32 %v12497_v62, %v3798_v36 }
 0x8a7   :  { %v3742_v21 = vmul.f32 %v9939_v61, %v3741_v50 }
 0x8a8   :  { %v3703_v59 = vadd.f32 1e-05, %v3695_v52  ;;  %v3815_v39 = vpack.c.bf16 %v3807_v12, %v3807_v12 }
 0x8a9   :  { %v3746_v33 = vsel %vm3745_vm10, %v9939_v61, %v3742_v21 }
 0x8aa   :  { %v3790_v22 = vmul.f32 %v3746_v33, %v12451_v35  ;;  %9940 = vrsqrt.f32 %v3703_v59  ;;  %v3823_v1 = vunpack.c.l.bf16 %v3815_v39  ;;  %v3865_v0 = vunpack.c.l.b16 %v3815_v39 }
 0x8ab   :  { %vm3753_vm15 = vweird.f32 %v3703_v59 }
 0x8ac   :  { %v3799_v4 = vmul.f32 %v12493_v27, %v3790_v22  ;;  %v3831_v9 = vsub.f32 %v3807_v12, %v3823_v1 }
 0x8ad   :  { %v3684_v20 = vpop.xlane.xlu0 %3683 }
 0x8ae   :  { %v3696_v28 = vmul.f32 %v3684_v20, %v15916_v55  ;;  %v3808_v37 = vadd.f32 %v12497_v62, %v3799_v4 }
 0x8b0   :  { %v9941_v40 = vpop.eup %9940  ;;  %v3704_v38 = vadd.f32 1e-05, %v3696_v28  ;;  %v3816_v54 = vpack.c.bf16 %v3808_v37, %v3808_v37 }
 0x8b1   :  { %v3748_v26 = vmul.f32 %v9941_v40, %v3703_v59  ;;  %vm3754_vm14 = vweird.f32 %v9941_v40 }
 0x8b2   :  { %9942 = vrsqrt.f32 %v3704_v38  ;;  %v3866_v46 = vunpack.c.l.b16 %v3816_v54  ;;  %v3824_v35 = vunpack.c.l.bf16 %v3816_v54  ;;  %vm3755_vm1 = vmor %vm3753_vm15, %vm3754_vm14  ;;  %vm3763_vm3 = vweird.f32 %v3704_v38 }
 0x8b3   :  { %v3749_v41 = vmul.f32 %v9941_v40, %v3748_v26 }
 0x8b4   :  { %v3872_v47 = vpack.c.b16 %v3866_v46, %v3865_v0  ;;  %v3832_v16 = vsub.f32 %v3808_v37, %v3824_v35 }
 0x8b5   :  { %v3750_v14 = vmul.f32 0.5, %v3749_v41 }
 0x8b6   :  { %9582 = vmatmul.msk.bf16.gmra.mxu1 %vm55_vm0, %v3872_v47  ;;  %9586 = vmatmul.msk.bf16.gmra.mxu2 %vm55_vm0, %v3872_v47  ;;  %v3838_v57 = vpack.c.bf16 %v3832_v16, %v3831_v9 }
 0x8b7   :  { %v3751_v48 = vsub.f32 1.5, %v3750_v14 }
 0x8b8   :  { %v9943_v45 = vpop.eup %9942  ;;  %9590 = vmatmul.msk.bf16.gmra.mxu3 %vm55_vm0, %v3838_v57 }
 0x8b9   :  { %v3752_v58 = vmul.f32 %v9941_v40, %v3751_v48  ;;  %v3758_v5 = vmul.f32 %v9943_v45, %v3704_v38  ;;  %vm3764_vm2 = vweird.f32 %v9943_v45 }
 0x8ba   :  { %vm3765_vm4 = vmor %vm3763_vm3, %vm3764_vm2 }
 0x8bb   :  { %v3756_v23 = vsel %vm3755_vm1, %v9941_v40, %v3752_v58  ;;  %v3759_v13 = vmul.f32 %v9943_v45, %v3758_v5 }
 0x8bc   :  { %v3791_v31 = vmul.f32 %v3756_v23, %v12458_v18 }
 0x8bd   :  { %v3760_v2 = vmul.f32 0.5, %v3759_v13 }
 0x8be   :  { %v3800_v32 = vmul.f32 %v12493_v27, %v3791_v31 }
 0x8bf   :  { %v3761_v24 = vsub.f32 1.5, %v3760_v2 }
 0x8c0   :  { %v3809_v29 = vadd.f32 %v12497_v62, %v3800_v32 }
 0x8c1   :  { %v3762_v63 = vmul.f32 %v9943_v45, %v3761_v24 }
 0x8c2   :  { %v3817_v8 = vpack.c.bf16 %v3809_v29, %v3809_v29 }
 0x8c3   :  { %v3766_v61 = vsel %vm3765_vm4, %v9943_v45, %v3762_v63 }
 0x8c4   :  { %v3792_v17 = vmul.f32 %v3766_v61, %v12465_v6  ;;  %v3825_v18 = vunpack.c.l.bf16 %v3817_v8  ;;  %v3867_v3 = vunpack.c.l.b16 %v3817_v8  ;;  %v3687_v6 = vpop.xlane.xlu1 %3686 }
 0x8c5   :  { %v3697_v59 = vmul.f32 %v3687_v6, %v15916_v55 }
 0x8c6   :  { %v3801_v43 = vmul.f32 %v12493_v27, %v3792_v17  ;;  %v3833_v52 = vsub.f32 %v3809_v29, %v3825_v18 }
 0x8c7   :  { %v3705_v33 = vadd.f32 1e-05, %v3697_v59 }
 0x8c8   :  { %v3810_v11 = vadd.f32 %v12497_v62, %v3801_v43 }
 0x8c9   :  { %9944 = vrsqrt.f32 %v3705_v33  ;;  %vm3773_vm6 = vweird.f32 %v3705_v33 }
 0x8ca   :  { %v3818_v53 = vpack.c.bf16 %v3810_v11, %v3810_v11 }
 0x8cc   :  { %v3868_v25 = vunpack.c.l.b16 %v3818_v53  ;;  %v3826_v50 = vunpack.c.l.bf16 %v3818_v53 }
 0x8ce   :  { %v3873_v42 = vpack.c.b16 %v3868_v25, %v3867_v3  ;;  %v3834_v21 = vsub.f32 %v3810_v11, %v3826_v50 }
 0x8cf   :  { %v9945_v22 = vpop.eup %9944 }
 0x8d0   :  { %9583 = vmatmul.msk.bf16.gmra.mxu1 %vm55_vm0, %v3873_v42  ;;  %9587 = vmatmul.msk.bf16.gmra.mxu2 %vm55_vm0, %v3873_v42  ;;  %v3839_v36 = vpack.c.bf16 %v3834_v21, %v3833_v52  ;;  %v3768_v4 = vmul.f32 %v9945_v22, %v3705_v33  ;;  %vm3774_vm5 = vweird.f32 %v9945_v22 }
 0x8d1   :  { %vm3775_vm7 = vmor %vm3773_vm6, %vm3774_vm5 }
 0x8d2   :  { %9591 = vmatmul.msk.bf16.gmra.mxu3 %vm55_vm0, %v3839_v36  ;;  %v3769_v12 = vmul.f32 %v9945_v22, %v3768_v4 }
 0x8d4   :  { %v3770_v20 = vmul.f32 0.5, %v3769_v12 }
 0x8d6   :  { %v3771_v39 = vsub.f32 1.5, %v3770_v20 }
 0x8d8   :  { %v3772_v38 = vmul.f32 %v9945_v22, %v3771_v39 }
 0x8da   :  { %v3776_v54 = vsel %vm3775_vm7, %v9945_v22, %v3772_v38 }
 0x8db   :  { %v3793_v0 = vmul.f32 %v3776_v54, %v12472_v49 }
 0x8dd   :  { %v3802_v41 = vmul.f32 %v12493_v27, %v3793_v0 }
 0x8df   :  { %v3811_v16 = vadd.f32 %v12497_v62, %v3802_v41 }
 0x8e1   :  { %v3819_v45 = vpack.c.bf16 %v3811_v16, %v3811_v16 }
 0x8e3   :  { %v3827_v5 = vunpack.c.l.bf16 %v3819_v45  ;;  %v3869_v23 = vunpack.c.l.b16 %v3819_v45 }
 0x8e5   :  { %v3835_v32 = vsub.f32 %v3811_v16, %v3827_v5 }
 0x8f6   :  { %v3690_v28 = vpop.xlane.xlu2 %3689 }
 0x8f7   :  { %v3698_v37 = vmul.f32 %v3690_v28, %v15916_v55 }
 0x8f9   :  { %v3706_v40 = vadd.f32 1e-05, %v3698_v37 }
 0x8fb   :  { %9946 = vrsqrt.f32 %v3706_v40  ;;  %vm3783_vm9 = vweird.f32 %v3706_v40 }
 0x901   :  { %v9947_v1 = vpop.eup %9946 }
 0x902   :  { %v3778_v26 = vmul.f32 %v9947_v1, %v3706_v40  ;;  %vm3784_vm8 = vweird.f32 %v9947_v1 }
 0x903   :  { %vm3785_vm10 = vmor %vm3783_vm9, %vm3784_vm8 }
 0x904   :  { %v3779_v46 = vmul.f32 %v9947_v1, %v3778_v26 }
 0x906   :  { %v3780_v35 = vmul.f32 0.5, %v3779_v46 }
 0x908   :  { %v3781_v47 = vsub.f32 1.5, %v3780_v35 }
 0x90a   :  { %v3782_v9 = vmul.f32 %v9947_v1, %v3781_v47 }
 0x90c   :  { %v3786_v14 = vsel %vm3785_vm10, %v9947_v1, %v3782_v9 }
 0x90d   :  { %v3794_v57 = vmul.f32 %v3786_v14, %v12487_v51 }
 0x90f   :  { %v3803_v48 = vmul.f32 %v12493_v27, %v3794_v57 }
 0x911   :  { %v3812_v58 = vadd.f32 %v12497_v62, %v3803_v48  ;;  %v12547_v62 = vperm.slane %v12359_v56, 6 }
 0x913   :  { %v3820_v49 = vpack.c.bf16 %v3812_v58, %v3812_v58 }
 0x915   :  { %v3870_v13 = vunpack.c.l.b16 %v3820_v49  ;;  %v3828_v31 = vunpack.c.l.bf16 %v3820_v49 }
 0x917   :  { %v3874_v2 = vpack.c.b16 %v3870_v13, %v3869_v23  ;;  %v3836_v24 = vsub.f32 %v3812_v58, %v3828_v31 }
 0x919   :  { %9584 = vmatmul.msk.bf16.gmra.mxu1 %vm55_vm0, %v3874_v2  ;;  %9588 = vmatmul.msk.bf16.gmra.mxu2 %vm55_vm0, %v3874_v2  ;;  %v3840_v63 = vpack.c.bf16 %v3836_v24, %v3835_v32 }
 0x91b   :  { %9592 = vmatmul.msk.bf16.gmra.mxu3 %vm55_vm0, %v3840_v63  ;;  %v3896_v51 = vpop.f32.mrf.mxu1 }
 0x921   :  { %v3937_v27 = vpop.f32.mrf.mxu2 }
 0x922   :  { %v3938_v29 = vadd.f32 %v3937_v27, %v3896_v51 }
 0x923   :  { %v3978_v61 = vpop.f32.mrf.mxu3  ;;  %v3898_v25 = vpop.f32.mrf.mxu1 }
 0x924   :  { %v3998_v17 = vadd.f32 %v3978_v61, %v3938_v29  ;;  %v53_v61 = vld [vmem:[%s15571_s3 + $0x70] sm:$0xff] }
 0x926   :  { %v12550_v43 = vadd.f32 %v12547_v62, %v3998_v17 }
 0x928   :  { %v12553_v8 = vmul.f32 0.70710677, %v12550_v43 }
 0x929   :  { %v3939_v50 = vpop.f32.mrf.mxu2 }
 0x92a   :  { %v4031_v11 = vmul.f32 %v12553_v8, %v12553_v8  ;;  %v3940_v56 = vadd.f32 %v3939_v50, %v3898_v25  ;;  %v4409_v25 = vpack.c.bf16 %v53_v61, %v53_v61 }
 0x92b   :  { %v3980_v21 = vpop.f32.mrf.mxu3 }
 0x92c   :  { %v4032_v53 = vmin.f32 %v4031_v11, 16.0  ;;  %v3999_v59 = vadd.f32 %v3980_v21, %v3940_v56 }
 0x92e   :  { %v4033_v18 = vmul.f32 2.1237322e-06, %v4032_v53  ;;  %v4044_v3 = vmul.f32 3.8918573e-05, %v4032_v53  ;;  %v12558_v4 = vadd.f32 %v12547_v62, %v3999_v59 }
 0x930   :  { %v4034_v42 = vadd.f32 0.00028619796, %v4033_v18  ;;  %v4045_v52 = vadd.f32 0.001143296, %v4044_v3  ;;  %v12561_v28 = vmul.f32 0.70710677, %v12558_v4 }
 0x931   :  { %v54_v3 = vld [vmem:[%s15571_s3 + $0x78] sm:$0xff] }
 0x932   :  { %v4035_v36 = vmul.f32 %v4034_v42, %v4032_v53  ;;  %v4046_v6 = vmul.f32 %v4045_v52, %v4032_v53  ;;  %v4071_v40 = vmul.f32 %v12561_v28, %v12561_v28  ;;  %v4410_v59 = vpack.c.bf16 %v54_v3, %v54_v3 }
 0x933   :  { %v3901_v35 = vpop.f32.mrf.mxu1 }
 0x934   :  { %v4036_v33 = vadd.f32 0.0036580483, %v4035_v36  ;;  %v4047_v22 = vadd.f32 0.014752088, %v4046_v6  ;;  %v12565_v54 = vmin.f32 %v4071_v40, 16.0  ;;  %v4426_v40 = vunpack.c.l.bf16 %v4410_v59 }
 0x936   :  { %v4037_v12 = vmul.f32 %v4036_v33, %v4032_v53  ;;  %v4048_v20 = vmul.f32 %v4047_v22, %v4032_v53  ;;  %v4073_v0 = vmul.f32 2.1237322e-06, %v12565_v54  ;;  %v4084_v46 = vmul.f32 3.8918573e-05, %v12565_v54 }
 0x937   :  { %v4425_v33 = vunpack.c.l.bf16 %v4409_v25 }
 0x938   :  { %v4038_v37 = vadd.f32 0.05243302, %v4037_v12  ;;  %v4049_v39 = vadd.f32 0.112945676, %v4048_v20  ;;  %v4074_v47 = vadd.f32 0.00028619796, %v4073_v0 }
 0x939   :  { %v4085_v9 = vadd.f32 0.001143296, %v4084_v46  ;;  %v3942_v16 = vpop.f32.mrf.mxu2 }
 0x93a   :  { %v4050_v38 = vmul.f32 %v4049_v39, %v4032_v53  ;;  %v4039_v1 = vmul.f32 %v4038_v37, %v4032_v53  ;;  %v4075_v48 = vmul.f32 %v4074_v47, %v12565_v54  ;;  %v3943_v45 = vadd.f32 %v3942_v16, %v3901_v35 }
 0x93b   :  { %v4086_v58 = vmul.f32 %v4085_v9, %v12565_v54  ;;  %v3983_v49 = vpop.f32.mrf.mxu3  ;;  %v3903_v27 = vpop.f32.mrf.mxu1  ;;  %v4442_v47 = vsub.f32 %v54_v3, %v4426_v40 }
 0x93c   :  { %v4051_v26 = vadd.f32 0.4994258, %v4050_v38  ;;  %v4040_v14 = vadd.f32 0.18741608, %v4039_v1  ;;  %v4076_v5 = vadd.f32 0.0036580483, %v4075_v48  ;;  %v4000_v13 = vadd.f32 %v3983_v49, %v3943_v45 }
 0x93d   :  { %v4087_v23 = vadd.f32 0.014752088, %v4086_v58  ;;  %v4441_v38 = vsub.f32 %v53_v61, %v4425_v33  ;;  %v4534_v48 = vunpack.c.l.b16 %v4409_v25 }
 0x93e   :  { %v4052_v41 = vmul.f32 %v4051_v26, %v4032_v53  ;;  %v4041_v31 = vmul.f32 %v4040_v14, %v4032_v53  ;;  %v4077_v2 = vmul.f32 %v4076_v5, %v12565_v54  ;;  %v12574_v24 = vadd.f32 %v12547_v62, %v4000_v13  ;;  %v51_v13 = vld [vmem:[%s15571_s3 + $0x60] sm:$0xff] }
 0x93f   :  { %v4088_v32 = vmul.f32 %v4087_v23, %v12565_v54  ;;  %v4450_v49 = vpack.c.bf16 %v4442_v47, %v4441_v38  ;;  %v4535_v5 = vunpack.c.l.b16 %v4410_v59 }
 0x940   :  { %v4053_v57 = vadd.f32 1.0, %v4052_v41  ;;  %v4078_v63 = vadd.f32 0.05243302, %v4077_v2  ;;  %v4042_v11 = vadd.f32 1.1283791, %v4041_v31 }
 0x941   :  { %v4089_v51 = vadd.f32 0.112945676, %v4088_v32  ;;  %v3944_v29 = vpop.f32.mrf.mxu2  ;;  %v12580_v18 = vmul.f32 0.70710677, %v12574_v24  ;;  %4475 = vmatpush.bf16.msra.mxu0 %v4450_v49 }
 0x942   :  { %9948 = vrcp.f32 %v4053_v57  ;;  %v3945_v53 = vadd.f32 %v3944_v29, %v3903_v27  ;;  %v4065_v42 = vand.u32 2147483648, %v4053_v57  ;;  %v4079_v52 = vmul.f32 %v4078_v63, %v12565_v54  ;;  %v52_v63 = vld [vmem:[%s15571_s3 + $0x68] sm:$0xff] }
 0x943   :  { %v4090_v56 = vmul.f32 %v4089_v51, %v12565_v54  ;;  %v3985_v21 = vpop.f32.mrf.mxu3  ;;  %v4111_v36 = vmul.f32 %v12580_v18, %v12580_v18  ;;  %vm4059_vm14 = vweird.f32 %v4053_v57  ;;  %v4063_v12 = vand.u32 2147483647, %v4053_v57 }
 0x944   :  { %v4001_v6 = vadd.f32 %v3985_v21, %v3945_v53  ;;  %v4066_v26 = vor.u32 1.1754944e-38, %v4065_v42  ;;  %v4080_v46 = vadd.f32 0.18741608, %v4079_v52  ;;  %v4043_v31 = vmul.f32 %v4042_v11, %v12553_v8 }
 0x945   :  { %v4091_v20 = vadd.f32 0.4994258, %v4090_v56  ;;  %v12589_v37 = vmin.f32 %v4111_v36, 16.0  ;;  %vm4064_vm2 = vcmp.eq.f32.partialorder %v4063_v12, 8.507059e+37  ;;  %v4543_v29 = vpack.c.b16 %v4535_v5, %v4534_v48  ;;  %v49_v12 = vld [vmem:[%s15571_s3 + $0x50] sm:$0xff]  ;;  %v50_v5 = vld [vmem:[%s15571_s3 + $0x58] sm:$0xff] }
 0x946   :  { %v12592_v39 = vadd.f32 %v12547_v62, %v4001_v6  ;;  %v4081_v32 = vmul.f32 %v4080_v46, %v12565_v54  ;;  %v4407_v53 = vpack.c.bf16 %v51_v13, %v51_v13  ;;  %v4405_v48 = vpack.c.bf16 %v49_v12, %v49_v12 }
 0x947   :  { %v4092_v0 = vmul.f32 %v4091_v20, %v12565_v54  ;;  %v4113_v35 = vmul.f32 2.1237322e-06, %v12589_v37  ;;  %v4124_v41 = vmul.f32 3.8918573e-05, %v12589_v37  ;;  %4552 = vmatpush.bf16.msra.mxu1 %v4543_v29  ;;  %4581 = vmatpush.bf16.msra.mxu2 %v4543_v29  ;;  %v4408_v54 = vpack.c.bf16 %v52_v63, %v52_v63 }
 0x948   :  { %v9949_v17 = vpop.eup %9948  ;;  %v12600_v14 = vmul.f32 0.70710677, %v12592_v39  ;;  %v4082_v3 = vadd.f32 1.1283791, %v4081_v32 }
 0x949   :  { %v4055_v50 = vmul.f32 %v9949_v17, %v4053_v57  ;;  %vm4060_vm15 = vweird.f32 %v9949_v17  ;;  %v12597_v16 = vadd.f32 1.0, %v4092_v0  ;;  %v4114_v45 = vadd.f32 0.00028619796, %v4113_v35 }
 0x94a   :  { %vm4061_vm1 = vmor %vm4059_vm14, %vm4060_vm15  ;;  %v4125_v58 = vadd.f32 0.001143296, %v4124_v41  ;;  %v4151_v27 = vmul.f32 %v12600_v14, %v12600_v14  ;;  %v4533_v49 = vunpack.c.l.b16 %v4408_v54 }
 0x94b   :  { %v4056_v22 = vsub.f32 1.0, %v4055_v50  ;;  %9950 = vrcp.f32 %v12597_v16  ;;  %v4115_v57 = vmul.f32 %v4114_v45, %v12589_v37  ;;  %v4423_v50 = vunpack.c.l.bf16 %v4407_v53 }
 0x94c   :  { %v4126_v51 = vmul.f32 %v4125_v58, %v12589_v37  ;;  %v12616_v11 = vmin.f32 %v4151_v27, 16.0  ;;  %v4103_v52 = vand.u32 2147483647, %v12597_v16  ;;  %v4105_v33 = vand.u32 2147483648, %v12597_v16 }
 0x94d   :  { %v4057_v1 = vmul.f32 %v9949_v17, %v4056_v22  ;;  %v4424_v22 = vunpack.c.l.bf16 %v4408_v54  ;;  %v4439_v46 = vsub.f32 %v51_v13, %v4423_v50  ;;  %vm4099_vm4 = vweird.f32 %v12597_v16 }
 0x94e   :  { %v4127_v8 = vadd.f32 0.014752088, %v4126_v51  ;;  %v4153_v21 = vmul.f32 2.1237322e-06, %v12616_v11  ;;  %v4164_v36 = vmul.f32 3.8918573e-05, %v12616_v11 }
 0x94f   :  { %v4058_v9 = vadd.f32 %v9949_v17, %v4057_v1  ;;  %v4532_v1 = vunpack.c.l.b16 %v4407_v53  ;;  %v4440_v35 = vsub.f32 %v52_v63, %v4424_v22  ;;  %vm12635_vm5 = vcmp.eq.f32.partialorder %v4103_v52, 8.507059e+37 }
 0x950   :  { %v4128_v56 = vmul.f32 %v4127_v8, %v12589_v37  ;;  %v4154_v40 = vadd.f32 0.00028619796, %v4153_v21  ;;  %v4165_v38 = vadd.f32 0.001143296, %v4164_v36  ;;  %v4106_v51 = vor.u32 1.1754944e-38, %v4105_v33 }
 0x951   :  { %v4062_v23 = vsel %vm4061_vm1, %v9949_v17, %v4058_v9  ;;  %v4116_v17 = vadd.f32 0.0036580483, %v4115_v57  ;;  %v9951_v42 = vpop.eup %9950  ;;  %v4449_v58 = vpack.c.bf16 %v4440_v35, %v4439_v46  ;;  %v4542_v63 = vpack.c.b16 %v4533_v49, %v4532_v1  ;;  %v3906_v46 = vpop.f32.mrf.mxu1 }
 0x952   :  { %v4067_v2 = vsel %vm4064_vm2, %v4066_v26, %v4062_v23  ;;  %v4095_v59 = vmul.f32 %v9951_v42, %v12597_v16  ;;  %v4129_v20 = vadd.f32 0.112945676, %v4128_v56  ;;  %v4155_v47 = vmul.f32 %v4154_v40, %v12616_v11 }
 0x953   :  { %v4068_v61 = vmul.f32 %v4067_v2, %v4043_v31  ;;  %v4117_v25 = vmul.f32 %v4116_v17, %v12589_v37  ;;  %v4166_v9 = vmul.f32 %v4165_v38, %v12616_v11  ;;  %vm4100_vm3 = vweird.f32 %v9951_v42  ;;  %4476 = vmatpush.bf16.msra.mxu0 %v4449_v58  ;;  %4553 = vmatpush.bf16.msra.mxu1 %v4542_v63  ;;  %v3947_v40 = vpop.f32.mrf.mxu2  ;;  %v47_v38 = vld [vmem:[%s15571_s3 + $0x40] sm:$0xff] }
 0x954   :  { %v4096_v26 = vsub.f32 1.0, %v4095_v59  ;;  %v4130_v41 = vmul.f32 %v4129_v20, %v12589_v37  ;;  %v4156_v31 = vadd.f32 0.0036580483, %v4155_v47  ;;  %vm4101_vm6 = vmor %vm4099_vm4, %vm4100_vm3  ;;  %4582 = vmatpush.bf16.msra.mxu2 %v4542_v63  ;;  %v4421_v8 = vunpack.c.l.bf16 %v4405_v48 }
 0x955   :  { %v9593_v6 = vclamps-f32 %v4068_v61, 1.0  ;;  %v4118_v0 = vadd.f32 0.05243302, %v4117_v25  ;;  %v4167_v57 = vadd.f32 0.014752088, %v4166_v9  ;;  %v4406_v61 = vpack.c.bf16 %v50_v5, %v50_v5 }
 0x956   :  { %v4097_v45 = vmul.f32 %v9951_v42, %v4096_v26  ;;  %v4131_v13 = vadd.f32 0.4994258, %v4130_v41  ;;  %v4157_v29 = vmul.f32 %v4156_v31, %v12616_v11  ;;  %v4083_v56 = vmul.f32 %v4082_v3, %v12561_v28  ;;  %v48_v28 = vld [vmem:[%s15571_s3 + $0x48] sm:$0xff]  ;;  %v3988_v41 = vpop.f32.mrf.mxu3 }
 0x957   :  { %v4119_v32 = vmul.f32 %v4118_v0, %v12589_v37  ;;  %v4351_v16 = vadd.f32 1.0, %v9593_v6  ;;  %v4168_v53 = vmul.f32 %v4167_v57, %v12616_v11  ;;  %v4422_v52 = vunpack.c.l.bf16 %v4406_v61 }
 0x958   :  { %v4098_v2 = vadd.f32 %v9951_v42, %v4097_v45  ;;  %v4132_v27 = vmul.f32 %v4131_v13, %v12589_v37  ;;  %v4158_v50 = vadd.f32 0.05243302, %v4157_v29  ;;  %v4437_v59 = vsub.f32 %v49_v12, %v4421_v8 }
 0x959   :  { %v4120_v21 = vadd.f32 0.18741608, %v4119_v32  ;;  %v4169_v36 = vadd.f32 0.112945676, %v4168_v53  ;;  %v4015_v6 = vmul.f32 0.5, %v12550_v43  ;;  %v4438_v20 = vsub.f32 %v50_v5, %v4422_v52  ;;  %v46_v52 = vld [vmem:[%s15571_s3 + $0x38] sm:$0xff] }
 0x95a   :  { %v4102_v17 = vsel %vm4101_vm6, %v9951_v42, %v4098_v2  ;;  %v12645_v25 = vadd.f32 1.0, %v4132_v27  ;;  %v4159_v33 = vmul.f32 %v4158_v50, %v12616_v11  ;;  %v4530_v43 = vunpack.c.l.b16 %v4405_v48 }
 0x95b   :  { %v4107_v54 = vsel %vm12635_vm5, %v4106_v51, %v4102_v17  ;;  %v4170_v22 = vmul.f32 %v4169_v36, %v12616_v11  ;;  %v12658_v3 = vmul.f32 %v4351_v16, %v4015_v6  ;;  %v4531_v12 = vunpack.c.l.b16 %v4406_v61  ;;  %v45_v51 = vld [vmem:[%s15571_s3 + $0x30] sm:$0xff] }
 0x95c   :  { %9952 = vrcp.f32 %v12645_v25  ;;  %v4108_v42 = vmul.f32 %v4107_v54, %v4083_v56  ;;  %v4121_v1 = vmul.f32 %v4120_v21, %v12589_v37  ;;  %v4160_v26 = vadd.f32 0.18741608, %v4159_v33 }
 0x95d   :  { %v4171_v0 = vadd.f32 0.4994258, %v4170_v22  ;;  %v4448_v35 = vpack.c.bf16 %v4438_v20, %v4437_v59  ;;  %v4541_v47 = vpack.c.b16 %v4531_v12, %v4530_v43  ;;  %v3948_v9 = vadd.f32 %v3947_v40, %v3906_v46  ;;  %v3949_v59 = vpop.f32.mrf.mxu2 }
 0x95e   :  { %v4403_v45 = vpack.c.bf16 %v47_v38, %v47_v38  ;;  %v4404_v58 = vpack.c.bf16 %v48_v28, %v48_v28  ;;  %v9594_v49 = vclamps-f32 %v4108_v42, 1.0  ;;  %v4161_v5 = vmul.f32 %v4160_v26, %v12616_v11  ;;  %v3990_v43 = vpop.f32.mrf.mxu3 }
 0x95f   :  { %v4172_v23 = vmul.f32 %v4171_v0, %v12616_v11  ;;  %4477 = vmatpush.bf16.msra.mxu0 %v4448_v35  ;;  %v4016_v48 = vmul.f32 0.5, %v12558_v4  ;;  %4554 = vmatpush.bf16.msra.mxu1 %v4541_v47  ;;  %v4002_v37 = vadd.f32 %v3988_v41, %v3948_v9  ;;  %v12668_v32 = vpack.c.bf16 %v12658_v3, %v12658_v3 }
 0x960   :  { %4583 = vmatpush.bf16.msra.mxu2 %v4541_v47  ;;  %v4419_v31 = vunpack.c.l.bf16 %v4403_v45  ;;  %v4420_v2 = vunpack.c.l.bf16 %v4404_v58  ;;  %v4122_v57 = vadd.f32 1.1283791, %v4121_v1  ;;  %v4145_v11 = vand.u32 2147483648, %v12645_v25 }
 0x961   :  { %v12676_v4 = vadd.f32 1.0, %v4172_v23  ;;  %v12679_v27 = vadd.f32 %v12547_v62, %v4002_v37  ;;  %v4352_v16 = vadd.f32 1.0, %v9594_v49  ;;  %v12682_v53 = vmul.f32 0.5, %v12592_v39 }
 0x962   :  { %v12663_v13 = vpop.eup %9952  ;;  %v4435_v29 = vsub.f32 %v47_v38, %v4419_v31  ;;  %v4436_v61 = vsub.f32 %v48_v28, %v4420_v2  ;;  %v4162_v8 = vadd.f32 1.1283791, %v4161_v5  ;;  %v4143_v54 = vand.u32 2147483647, %v12645_v25  ;;  %v3908_v38 = vpop.f32.mrf.mxu1  ;;  %v43_v5 = vld [vmem:[%s15571_s3 + $0x20] sm:$0xff] }
 0x963   :  { %v4135_v63 = vmul.f32 %v12663_v13, %v12645_v25  ;;  %9954 = vrcp.f32 %v12676_v4  ;;  %v4528_v50 = vunpack.c.l.b16 %v4403_v45  ;;  %v4401_v56 = vpack.c.bf16 %v45_v51, %v45_v51 }
 0x964   :  { %v4375_v21 = vunpack.c.l.bf16 %v12668_v32  ;;  %v12691_v36 = vmul.f32 %v4122_v57, %v12580_v18  ;;  %vm4139_vm7 = vweird.f32 %v12645_v25  ;;  %v12695_v39 = vmul.f32 0.70710677, %v12679_v27 }
 0x965   :  { %v4136_v17 = vsub.f32 1.0, %v4135_v63  ;;  %v4146_v42 = vor.u32 1.1754944e-38, %v4145_v11  ;;  %v4447_v33 = vpack.c.bf16 %v4436_v61, %v4435_v29  ;;  %v4529_v22 = vunpack.c.l.b16 %v4404_v58  ;;  %v44_v11 = vld [vmem:[%s15571_s3 + $0x28] sm:$0xff] }
 0x966   :  { %v12698_v20 = vmul.f32 %v4352_v16, %v4016_v48  ;;  %v12701_v40 = vmul.f32 %v4162_v8, %v12600_v14  ;;  %v4191_v18 = vmul.f32 %v12695_v39, %v12695_v39  ;;  %v4402_v28 = vpack.c.bf16 %v46_v52, %v46_v52 }
 0x967   :  { %v4137_v6 = vmul.f32 %v12663_v13, %v4136_v17  ;;  %vm12705_vm8 = vcmp.eq.f32.partialorder %v4143_v54, 8.507059e+37  ;;  %4478 = vmatpush.bf16.msra.mxu0 %v4447_v33  ;;  %v4540_v1 = vpack.c.b16 %v4529_v22, %v4528_v50  ;;  %v4417_v26 = vunpack.c.l.bf16 %v4401_v56 }
 0x968   :  { %v4526_v0 = vunpack.c.l.b16 %v4401_v56  ;;  %v3950_v46 = vadd.f32 %v3949_v59, %v3908_v38  ;;  %v4183_v35 = vand.u32 2147483647, %v12676_v4  ;;  %v12710_v41 = vmin.f32 %v4191_v18, 16.0  ;;  %v41_v38 = vld [vmem:[%s15571_s3 + $0x10] sm:$0xff] }
 0x969   :  { %v4418_v14 = vunpack.c.l.bf16 %v4402_v28  ;;  %v4527_v47 = vunpack.c.l.b16 %v4402_v28  ;;  %v9955_v9 = vpop.eup %9954  ;;  %v4138_v45 = vadd.f32 %v12663_v13, %v4137_v6  ;;  %vm4140_vm9 = vweird.f32 %v12663_v13  ;;  %4555 = vmatpush.bf16.msra.mxu1 %v4540_v1  ;;  %4584 = vmatpush.bf16.msra.mxu2 %v4540_v1 }
 0x96a   :  { %v4433_v58 = vsub.f32 %v45_v51, %v4417_v26  ;;  %v4003_v49 = vadd.f32 %v3990_v43, %v3950_v46  ;;  %v4175_v23 = vmul.f32 %v9955_v9, %v12676_v4  ;;  %vm4179_vm10 = vweird.f32 %v12676_v4  ;;  %vm12732_vm14 = vmor %vm4139_vm7, %vm4140_vm9 }
 0x96b   :  { %v4185_v48 = vand.u32 2147483648, %v12676_v4  ;;  %v4193_v37 = vmul.f32 2.1237322e-06, %v12710_v41  ;;  %v4204_v31 = vmul.f32 3.8918573e-05, %v12710_v41  ;;  %v4434_v2 = vsub.f32 %v46_v52, %v4418_v14 }
 0x96c   :  { %v4539_v57 = vpack.c.b16 %v4527_v47, %v4526_v0  ;;  %v12723_v63 = vadd.f32 %v12547_v62, %v4003_v49  ;;  %v4176_v29 = vsub.f32 1.0, %v4175_v23  ;;  %vm12736_vm15 = vcmp.eq.f32.partialorder %v4183_v35, 8.507059e+37 }
 0x96d   :  { %v4194_v16 = vadd.f32 0.00028619796, %v4193_v37  ;;  %v4399_v17 = vpack.c.bf16 %v43_v5, %v43_v5  ;;  %v4142_v8 = vsel %vm12732_vm14, %v12663_v13, %v4138_v45  ;;  %v4205_v54 = vadd.f32 0.001143296, %v4204_v31 }
 0x96e   :  { %v4446_v50 = vpack.c.bf16 %v4434_v2, %v4433_v58  ;;  %4556 = vmatpush.bf16.msra.mxu1 %v4539_v57  ;;  %4585 = vmatpush.bf16.msra.mxu2 %v4539_v57  ;;  %v12744_v25 = vmul.f32 0.70710677, %v12723_v63  ;;  %v4177_v52 = vmul.f32 %v9955_v9, %v4176_v29  ;;  %vm4180_vm1 = vweird.f32 %v9955_v9  ;;  %v42_v58 = vld [vmem:[%s15571_s3 + $0x18] sm:$0xff] }
 0x96f   :  { %v4195_v56 = vmul.f32 %v4194_v16, %v12710_v41  ;;  %v4400_v59 = vpack.c.bf16 %v44_v11, %v44_v11  ;;  %v4186_v6 = vor.u32 1.1754944e-38, %v4185_v48  ;;  %v4206_v33 = vmul.f32 %v4205_v54, %v12710_v41  ;;  %vm4181_vm2 = vmor %vm4179_vm10, %vm4180_vm1 }
 0x970   :  { %4479 = vmatpush.bf16.msra.mxu0 %v4446_v50  ;;  %v4231_v22 = vmul.f32 %v12744_v25, %v12744_v25  ;;  %v4415_v13 = vunpack.c.l.bf16 %v4399_v17  ;;  %v4147_v18 = vsel %vm12705_vm8, %v4146_v42, %v4142_v8  ;;  %v4178_v28 = vadd.f32 %v9955_v9, %v4177_v52  ;;  %v39_v50 = vld [vmem:[%s15571_s3] sm:$0xff] }
 0x971   :  { %v4416_v43 = vunpack.c.l.bf16 %v4400_v59  ;;  %v4524_v1 = vunpack.c.l.b16 %v4399_v17  ;;  %v4207_v26 = vadd.f32 0.014752088, %v4206_v33  ;;  %v4525_v35 = vunpack.c.l.b16 %v4400_v59 }
 0x972   :  { %v12757_v0 = vmin.f32 %v4231_v22, 16.0  ;;  %v4431_v46 = vsub.f32 %v43_v5, %v4415_v13  ;;  %v4182_v14 = vsel %vm4181_vm2, %v9955_v9, %v4178_v28  ;;  %v4196_v47 = vadd.f32 0.0036580483, %v4195_v56 }
 0x973   :  { %v4432_v45 = vsub.f32 %v44_v11, %v4416_v43  ;;  %v4397_v12 = vpack.c.bf16 %v41_v38, %v41_v38  ;;  %v4187_v42 = vsel %vm12736_vm15, %v4186_v6, %v4182_v14  ;;  %v4208_v49 = vmul.f32 %v4207_v26, %v12710_v41 }
 0x974   :  { %v4233_v4 = vmul.f32 2.1237322e-06, %v12757_v0  ;;  %v4244_v23 = vmul.f32 3.8918573e-05, %v12757_v0  ;;  %v12769_v5 = vpack.c.bf16 %v12698_v20, %v12698_v20  ;;  %v4188_v9 = vmul.f32 %v4187_v42, %v12701_v40 }
 0x975   :  { %v4445_v48 = vpack.c.bf16 %v4432_v45, %v4431_v46  ;;  %v4538_v37 = vpack.c.b16 %v4525_v35, %v4524_v1  ;;  %v4209_v31 = vadd.f32 0.112945676, %v4208_v49  ;;  %v4398_v11 = vpack.c.bf16 %v42_v58, %v42_v58 }
 0x976   :  { %v4234_v2 = vadd.f32 0.00028619796, %v4233_v4  ;;  %v4245_v57 = vadd.f32 0.001143296, %v4244_v23  ;;  %v4148_v51 = vmul.f32 %v4147_v18, %v12691_v36  ;;  %v4197_v29 = vmul.f32 %v4196_v47, %v12710_v41  ;;  %v40_v18 = vld [vmem:[%s15571_s3 + $0x8] sm:$0xff] }
 0x977   :  { %4480 = vmatpush.bf16.msra.mxu0 %v4445_v48  ;;  %4557 = vmatpush.bf16.msra.mxu1 %v4538_v37  ;;  %v4413_v61 = vunpack.c.l.bf16 %v4397_v12  ;;  %v4522_v16 = vunpack.c.l.b16 %v4397_v12  ;;  %v4210_v17 = vmul.f32 %v4209_v31, %v12710_v41  ;;  %v4414_v54 = vunpack.c.l.bf16 %v4398_v11 }
 0x978   :  { %v4235_v8 = vmul.f32 %v4234_v2, %v12757_v0  ;;  %v4246_v40 = vmul.f32 %v4245_v57, %v12757_v0  ;;  %4586 = vmatpush.bf16.msra.mxu2 %v4538_v37  ;;  %v4459_v36 = vunpack.c.l.b16 %v12668_v32  ;;  %v4376_v52 = vunpack.c.l.bf16 %v12769_v5 }
 0x979   :  { %v4429_v56 = vsub.f32 %v41_v38, %v4413_v61  ;;  %v4523_v59 = vunpack.c.l.b16 %v4398_v11  ;;  %v9596_v6 = vclamps-f32 %v4188_v9, 1.0  ;;  %v4211_v33 = vadd.f32 0.4994258, %v4210_v17 }
 0x97a   :  { %v4247_v22 = vadd.f32 0.014752088, %v4246_v40  ;;  %v4430_v13 = vsub.f32 %v42_v58, %v4414_v54  ;;  %v9595_v28 = vclamps-f32 %v4148_v51, 1.0  ;;  %v4198_v43 = vadd.f32 0.05243302, %v4197_v29 }
 0x97b   :  { %v4537_v1 = vpack.c.b16 %v4523_v59, %v4522_v16  ;;  %v4395_v26 = vpack.c.bf16 %v39_v50, %v39_v50  ;;  %v4212_v46 = vmul.f32 %v4211_v33, %v12710_v41  ;;  %v4236_v35 = vadd.f32 0.0036580483, %v4235_v8 }
 0x97c   :  { %v4248_v14 = vmul.f32 %v4247_v22, %v12757_v0  ;;  %v4444_v47 = vpack.c.bf16 %v4430_v13, %v4429_v56  ;;  %v4460_v38 = vunpack.c.l.b16 %v12769_v5  ;;  %v4396_v45 = vpack.c.bf16 %v40_v18, %v40_v18 }
 0x97d   :  { %4558 = vmatpush.bf16.msra.mxu1 %v4537_v1  ;;  %4587 = vmatpush.bf16.msra.mxu2 %v4537_v1  ;;  %v4411_v58 = vunpack.c.l.bf16 %v4395_v26  ;;  %v4520_v12 = vunpack.c.l.b16 %v4395_v26  ;;  %v4384_v42 = vsub.f32 %v12698_v20, %v4376_v52  ;;  %v4354_v49 = vadd.f32 1.0, %v9596_v6 }
 0x97e   :  { %v4213_v4 = vadd.f32 1.0, %v4212_v46  ;;  %v4249_v23 = vadd.f32 0.112945676, %v4248_v14  ;;  %4481 = vmatpush.bf16.msra.mxu0 %v4444_v47  ;;  %v4199_v9 = vmul.f32 %v4198_v43, %v12710_v41  ;;  %v4412_v48 = vunpack.c.l.bf16 %v4396_v45 }
 0x97f   :  { %v4427_v37 = vsub.f32 %v39_v50, %v4411_v58  ;;  %v4521_v31 = vunpack.c.l.b16 %v4396_v45  ;;  %v4383_v5 = vsub.f32 %v12658_v3, %v4375_v21  ;;  %v4353_v2 = vadd.f32 1.0, %v9595_v28 }
 0x980   :  { %9956 = vrcp.f32 %v4213_v4  ;;  %v4237_v57 = vmul.f32 %v4236_v35, %v12757_v0  ;;  %v4250_v11 = vmul.f32 %v4249_v23, %v12757_v0  ;;  %v4428_v20 = vsub.f32 %v40_v18, %v4412_v48 }
 0x981   :  { %v4536_v51 = vpack.c.b16 %v4521_v31, %v4520_v12  ;;  %v4391_v29 = vpack.c.bf16 %v4384_v42, %v4383_v5  ;;  %v4017_v61 = vmul.f32 0.5, %v12574_v24  ;;  %v4362_v16 = vmul.f32 %v4354_v49, %v12682_v53 }
 0x982   :  { %v4467_v17 = vpack.c.b16 %v4460_v38, %v4459_v36  ;;  %v4200_v8 = vadd.f32 0.18741608, %v4199_v9  ;;  %v4251_v40 = vadd.f32 0.4994258, %v4250_v11  ;;  %v4443_v54 = vpack.c.bf16 %v4428_v20, %v4427_v37 }
 0x983   :  { %4559 = vmatpush.bf16.msra.mxu1 %v4536_v51  ;;  %4588 = vmatpush.bf16.msra.mxu2 %v4536_v51  ;;  %v4361_v3 = vmul.f32 %v4353_v2, %v4017_v61  ;;  %v4238_v32 = vadd.f32 0.05243302, %v4237_v57  ;;  %v4370_v52 = vpack.c.bf16 %v4362_v16, %v4362_v16  ;;  %v4225_v33 = vand.u32 2147483648, %v4213_v4 }
 0x984   :  { %v4252_v21 = vmul.f32 %v4251_v40, %v12757_v0  ;;  %4482 = vmatpush.bf16.msra.mxu0 %v4443_v54  ;;  %v4201_v56 = vmul.f32 %v4200_v8, %v12710_v41  ;;  %v4223_v28 = vand.u32 2147483647, %v4213_v4  ;;  %vm4219_vm4 = vweird.f32 %v4213_v4 }
 0x985   :  { %v4239_v53 = vmul.f32 %v4238_v32, %v12757_v0  ;;  %v4369_v36 = vpack.c.bf16 %v4361_v3, %v4361_v3  ;;  %v4378_v22 = vunpack.c.l.bf16 %v4370_v52  ;;  %v4226_v41 = vor.u32 1.1754944e-38, %v4225_v33 }
 0x986   :  { %v9957_v50 = vpop.eup %9956  ;;  %4560 = vmatmul.bf16.vlgmr.msra.gmra.mxu1 %v4467_v17  ;;  %4589 = vmatmul.bf16.vlgmr.msra.gmra.mxu2 %v4391_v29  ;;  %v4253_v59 = vadd.f32 1.0, %v4252_v21  ;;  %v4202_v13 = vadd.f32 1.1283791, %v4201_v56  ;;  %v4462_v46 = vunpack.c.l.b16 %v4370_v52  ;;  %vm4224_vm6 = vcmp.eq.f32.partialorder %v4223_v28, 8.507059e+37 }
 0x987   :  { %v4215_v24 = vmul.f32 %v9957_v50, %v4213_v4  ;;  %4483 = vmatmul.bf16.vlgmr.msra.gmra.mxu0 %v4467_v17  ;;  %vm4220_vm3 = vweird.f32 %v9957_v50  ;;  %v4240_v43 = vadd.f32 0.18741608, %v4239_v53  ;;  %v4377_v1 = vunpack.c.l.bf16 %v4369_v36 }
 0x988   :  { %9958 = vrcp.f32 %v4253_v59  ;;  %vm4221_vm5 = vmor %vm4219_vm4, %vm4220_vm3  ;;  %v4386_v35 = vsub.f32 %v4362_v16, %v4378_v22  ;;  %v4203_v47 = vmul.f32 %v4202_v13, %v12695_v39  ;;  %v4461_v45 = vunpack.c.l.b16 %v4369_v36 }
 0x989   :  { %v4216_v6 = vsub.f32 1.0, %v4215_v24  ;;  %v4241_v12 = vmul.f32 %v4240_v43, %v12757_v0  ;;  %v4385_v49 = vsub.f32 %v4361_v3, %v4377_v1  ;;  %v4265_v31 = vand.u32 2147483648, %v4253_v59 }
 0x98a   :  { %v4468_v48 = vpack.c.b16 %v4462_v46, %v4461_v45  ;;  %v4263_v57 = vand.u32 2147483647, %v4253_v59  ;;  %vm4259_vm8 = vweird.f32 %v4253_v59  ;;  %v4019_v17 = vmul.f32 0.5, %v12679_v27 }
 0x98b   :  { %v4217_v18 = vmul.f32 %v9957_v50, %v4216_v6  ;;  %v4392_v37 = vpack.c.bf16 %v4386_v35, %v4385_v49  ;;  %v4242_v5 = vadd.f32 1.1283791, %v4241_v12  ;;  %v4266_v61 = vor.u32 1.1754944e-38, %v4265_v31 }
 0x98c   :  { %vm4264_vm10 = vcmp.eq.f32.partialorder %v4263_v57, 8.507059e+37  ;;  %v4020_v27 = vmul.f32 0.5, %v12723_v63 }
 0x98d   :  { %v4218_v26 = vadd.f32 %v9957_v50, %v4217_v18  ;;  %v4243_v8 = vmul.f32 %v4242_v5, %v12744_v25 }
 0x98e   :  { %v9959_v14 = vpop.eup %9958 }
 0x98f   :  { %v4222_v38 = vsel %vm4221_vm5, %v9957_v50, %v4218_v26  ;;  %v4255_v42 = vmul.f32 %v9959_v14, %v4253_v59  ;;  %vm4260_vm7 = vweird.f32 %v9959_v14 }
 0x990   :  { %v4227_v58 = vsel %vm4224_vm6, %v4226_v41, %v4222_v38  ;;  %vm4261_vm9 = vmor %vm4259_vm8, %vm4260_vm7 }
 0x991   :  { %v4228_v23 = vmul.f32 %v4227_v58, %v4203_v47  ;;  %v4256_v9 = vsub.f32 1.0, %v4255_v42 }
 0x993   :  { %v9597_v4 = vclamps-f32 %v4228_v23, 1.0  ;;  %v4257_v2 = vmul.f32 %v9959_v14, %v4256_v9 }
 0x995   :  { %v4355_v51 = vadd.f32 1.0, %v9597_v4  ;;  %v4258_v29 = vadd.f32 %v9959_v14, %v4257_v2 }
 0x996   :  { %v3911_v11 = vpop.f32.mrf.mxu1  ;;  %4565 = vmatmul.bf16.gmra.mxu1 %v4468_v48  ;;  %4594 = vmatmul.bf16.gmra.mxu2 %v4392_v37 }
 0x997   :  { %v4262_v40 = vsel %vm4261_vm9, %v9959_v14, %v4258_v29  ;;  %4488 = vmatmul.bf16.gmra.mxu0 %v4468_v48  ;;  %v4363_v32 = vmul.f32 %v4355_v51, %v4019_v17 }
 0x998   :  { %v4267_v54 = vsel %vm4264_vm10, %v4266_v61, %v4262_v40 }
 0x999   :  { %v4268_v21 = vmul.f32 %v4267_v54, %v4243_v8  ;;  %v4371_v25 = vpack.c.bf16 %v4363_v32, %v4363_v32 }
 0x99b   :  { %v9598_v52 = vclamps-f32 %v4268_v21, 1.0  ;;  %v4379_v22 = vunpack.c.l.bf16 %v4371_v25  ;;  %v4463_v1 = vunpack.c.l.b16 %v4371_v25 }
 0x99c   :  { %v3952_v39 = vpop.f32.mrf.mxu2 }
 0x99d   :  { %v3953_v20 = vadd.f32 %v3952_v39, %v3911_v11  ;;  %v4356_v24 = vadd.f32 1.0, %v9598_v52  ;;  %v4387_v63 = vsub.f32 %v4363_v32, %v4379_v22 }
 0x99e   :  { %v3993_v0 = vpop.f32.mrf.mxu3  ;;  %v3913_v13 = vpop.f32.mrf.mxu1 }
 0x99f   :  { %v4004_v16 = vadd.f32 %v3993_v0, %v3953_v20  ;;  %v4364_v53 = vmul.f32 %v4356_v24, %v4020_v27 }
 0x9a1   :  { %v12805_v3 = vadd.f32 %v12547_v62, %v4004_v16  ;;  %v4372_v33 = vpack.c.bf16 %v4364_v53, %v4364_v53 }
 0x9a3   :  { %v12808_v50 = vmul.f32 0.70710677, %v12805_v3  ;;  %v4464_v26 = vunpack.c.l.b16 %v4372_v33  ;;  %v4380_v41 = vunpack.c.l.bf16 %v4372_v33 }
 0x9a4   :  { %v3954_v43 = vpop.f32.mrf.mxu2 }
 0x9a5   :  { %v4271_v56 = vmul.f32 %v12808_v50, %v12808_v50  ;;  %v3955_v46 = vadd.f32 %v3954_v43, %v3913_v13  ;;  %v4469_v47 = vpack.c.b16 %v4464_v26, %v4463_v1  ;;  %v4388_v38 = vsub.f32 %v4364_v53, %v4380_v41 }
 0x9a6   :  { %v3995_v14 = vpop.f32.mrf.mxu3 }
 0x9a7   :  { %v4272_v59 = vmin.f32 %v4271_v56, 16.0  ;;  %v4005_v45 = vadd.f32 %v3995_v14, %v3955_v46  ;;  %4493 = vmatmul.bf16.gmra.mxu0 %v4469_v47  ;;  %4570 = vmatmul.bf16.gmra.mxu1 %v4469_v47  ;;  %v4393_v42 = vpack.c.bf16 %v4388_v38, %v4387_v63 }
 0x9a9   :  { %v4273_v36 = vmul.f32 2.1237322e-06, %v4272_v59  ;;  %v4284_v6 = vmul.f32 3.8918573e-05, %v4272_v59  ;;  %v12814_v49 = vadd.f32 %v12547_v62, %v4005_v45  ;;  %4599 = vmatmul.bf16.gmra.mxu2 %v4393_v42 }
 0x9ab   :  { %v4274_v18 = vadd.f32 0.00028619796, %v4273_v36  ;;  %v4285_v28 = vadd.f32 0.001143296, %v4284_v6  ;;  %v12817_v9 = vmul.f32 0.70710677, %v12814_v49 }
 0x9ad   :  { %v4286_v35 = vmul.f32 %v4285_v28, %v4272_v59  ;;  %v4275_v58 = vmul.f32 %v4274_v18, %v4272_v59  ;;  %v4311_v4 = vmul.f32 %v12817_v9, %v12817_v9 }
 0x9af   :  { %v4287_v12 = vadd.f32 0.014752088, %v4286_v35  ;;  %v4276_v48 = vadd.f32 0.0036580483, %v4275_v58  ;;  %v4312_v5 = vmin.f32 %v4311_v4, 16.0 }
 0x9b1   :  { %v4288_v23 = vmul.f32 %v4287_v12, %v4272_v59  ;;  %v4277_v2 = vmul.f32 %v4276_v48, %v4272_v59  ;;  %v4313_v11 = vmul.f32 2.1237322e-06, %v4312_v5  ;;  %v4324_v39 = vmul.f32 3.8918573e-05, %v4312_v5 }
 0x9b3   :  { %v4289_v37 = vadd.f32 0.112945676, %v4288_v23  ;;  %v4314_v51 = vadd.f32 0.00028619796, %v4313_v11  ;;  %v4325_v62 = vadd.f32 0.001143296, %v4324_v39 }
 0x9b4   :  { %v4278_v29 = vadd.f32 0.05243302, %v4277_v2 }
 0x9b5   :  { %v4290_v31 = vmul.f32 %v4289_v37, %v4272_v59  ;;  %v4315_v61 = vmul.f32 %v4314_v51, %v4312_v5  ;;  %v4326_v16 = vmul.f32 %v4325_v62, %v4312_v5  ;;  %v4022_v62 = vmul.f32 0.5, %v12814_v49 }
 0x9b6   :  { %v4279_v8 = vmul.f32 %v4278_v29, %v4272_v59 }
 0x9b7   :  { %v4291_v57 = vadd.f32 0.4994258, %v4290_v31  ;;  %v4327_v17 = vadd.f32 0.014752088, %v4326_v16  ;;  %v4316_v40 = vadd.f32 0.0036580483, %v4315_v61 }
 0x9b8   :  { %v4280_v52 = vadd.f32 0.18741608, %v4279_v8 }
 0x9b9   :  { %v4292_v20 = vmul.f32 %v4291_v57, %v4272_v59  ;;  %v4328_v54 = vmul.f32 %v4327_v17, %v4312_v5  ;;  %v4317_v56 = vmul.f32 %v4316_v40, %v4312_v5  ;;  %v4021_v57 = vmul.f32 0.5, %v12805_v3 }
 0x9ba   :  { %v4281_v36 = vmul.f32 %v4280_v52, %v4272_v59 }
 0x9bb   :  { %v4293_v0 = vadd.f32 1.0, %v4292_v20  ;;  %v4329_v32 = vadd.f32 0.112945676, %v4328_v54  ;;  %v4318_v6 = vadd.f32 0.05243302, %v4317_v56 }
 0x9bc   :  { %v4282_v1 = vadd.f32 1.1283791, %v4281_v36 }
 0x9bd   :  { %9960 = vrcp.f32 %v4293_v0  ;;  %v4330_v24 = vmul.f32 %v4329_v32, %v4312_v5  ;;  %v4305_v22 = vand.u32 2147483648, %v4293_v0  ;;  %v4303_v18 = vand.u32 2147483647, %v4293_v0 }
 0x9be   :  { %vm4299_vm15 = vweird.f32 %v4293_v0  ;;  %v4319_v26 = vmul.f32 %v4318_v6, %v4312_v5  ;;  %v4283_v14 = vmul.f32 %v4282_v1, %v12808_v50 }
 0x9bf   :  { %v4331_v53 = vadd.f32 0.4994258, %v4330_v24  ;;  %v4306_v46 = vor.u32 1.1754944e-38, %v4305_v22  ;;  %vm4304_vm2 = vcmp.eq.f32.partialorder %v4303_v18, 8.507059e+37 }
 0x9c0   :  { %v4320_v59 = vadd.f32 0.18741608, %v4319_v26 }
 0x9c1   :  { %v4332_v13 = vmul.f32 %v4331_v53, %v4312_v5 }
 0x9c2   :  { %v4321_v38 = vmul.f32 %v4320_v59, %v4312_v5 }
 0x9c3   :  { %v9961_v21 = vpop.eup %9960  ;;  %v4333_v43 = vadd.f32 1.0, %v4332_v13 }
 0x9c4   :  { %v4295_v27 = vmul.f32 %v9961_v21, %v4293_v0  ;;  %vm4300_vm14 = vweird.f32 %v9961_v21  ;;  %v4322_v23 = vadd.f32 1.1283791, %v4321_v38 }
 0x9c5   :  { %vm4301_vm1 = vmor %vm4299_vm15, %vm4300_vm14  ;;  %9962 = vrcp.f32 %v4333_v43  ;;  %v4345_v42 = vand.u32 2147483648, %v4333_v43  ;;  %v4343_v37 = vand.u32 2147483647, %v4333_v43  ;;  %vm4339_vm4 = vweird.f32 %v4333_v43 }
 0x9c6   :  { %v4296_v25 = vsub.f32 1.0, %v4295_v27  ;;  %v4323_v50 = vmul.f32 %v4322_v23, %v12817_v9 }
 0x9c7   :  { %v4346_v2 = vor.u32 1.1754944e-38, %v4345_v42  ;;  %vm4344_vm6 = vcmp.eq.f32.partialorder %v4343_v37, 8.507059e+37 }
 0x9c8   :  { %v4297_v33 = vmul.f32 %v9961_v21, %v4296_v25  ;;  %v10157_v25 = vld [vmem:[%s15569_s1] sm:$0x7f] }
 0x9c9   :  { %v12828_v53 = vperm.slane %v10157_v25, 5 }
 0x9ca   :  { %v4298_v28 = vadd.f32 %v9961_v21, %v4297_v33 }
 0x9cb   :  { %v9963_v63 = vpop.eup %9962 }
 0x9cc   :  { %v4302_v41 = vsel %vm4301_vm1, %v9961_v21, %v4298_v28  ;;  %v4335_v45 = vmul.f32 %v9963_v63, %v4333_v43  ;;  %vm4340_vm3 = vweird.f32 %v9963_v63 }
 0x9cd   :  { %v4307_v35 = vsel %vm4304_vm2, %v4306_v46, %v4302_v41  ;;  %vm4341_vm5 = vmor %vm4339_vm4, %vm4340_vm3 }
 0x9ce   :  { %v4308_v47 = vmul.f32 %v4307_v35, %v4283_v14  ;;  %v4336_v12 = vsub.f32 1.0, %v4335_v45 }
 0x9d0   :  { %v9599_v58 = vclamps-f32 %v4308_v47, 1.0  ;;  %v4337_v48 = vmul.f32 %v9963_v63, %v4336_v12 }
 0x9d2   :  { %v4357_v4 = vadd.f32 1.0, %v9599_v58  ;;  %v4338_v31 = vadd.f32 %v9963_v63, %v4337_v48 }
 0x9d4   :  { %v4342_v11 = vsel %vm4341_vm5, %v9963_v63, %v4338_v31  ;;  %v4365_v39 = vmul.f32 %v4357_v4, %v4021_v57 }
 0x9d5   :  { %v4347_v5 = vsel %vm4344_vm6, %v4346_v2, %v4342_v11 }
 0x9d6   :  { %v4348_v20 = vmul.f32 %v4347_v5, %v4323_v50  ;;  %v4373_v0 = vpack.c.bf16 %v4365_v39, %v4365_v39 }
 0x9d8   :  { %v9600_v51 = vclamps-f32 %v4348_v20, 1.0  ;;  %v4381_v17 = vunpack.c.l.bf16 %v4373_v0  ;;  %v4465_v8 = vunpack.c.l.b16 %v4373_v0 }
 0x9da   :  { %v4358_v29 = vadd.f32 1.0, %v9600_v51  ;;  %v4389_v3 = vsub.f32 %v4365_v39, %v4381_v17 }
 0x9dc   :  { %v4366_v61 = vmul.f32 %v4358_v29, %v4022_v62 }
 0x9de   :  { %v4374_v16 = vpack.c.bf16 %v4366_v61, %v4366_v61 }
 0x9e0   :  { %v4466_v40 = vunpack.c.l.b16 %v4374_v16  ;;  %v4382_v54 = vunpack.c.l.bf16 %v4374_v16 }
 0x9e2   :  { %v4470_v32 = vpack.c.b16 %v4466_v40, %v4465_v8  ;;  %v4390_v21 = vsub.f32 %v4366_v61, %v4382_v54 }
 0x9e4   :  { %4498 = vmatmul.bf16.gmra.mxu0 %v4470_v32  ;;  %4575 = vmatmul.bf16.gmra.mxu1 %v4470_v32  ;;  %v4394_v9 = vpack.c.bf16 %v4390_v21, %v4389_v3 }
 0x9e6   :  { %4604 = vmatmul.bf16.gmra.mxu2 %v4394_v9 }
 0xa03   :  { %v4561_v52 = vpop.f32.mrf.mxu1 }
 0xa04   :  { %v4484_v56 = vpop.f32.mrf.mxu0 }
 0xa05   :  { %v4562_v27 = vadd.f32 %v4561_v52, %v4484_v56 }
 0xa09   :  { %v4590_v24 = vpop.f32.mrf.mxu2 }
 0xa0a   :  { %v4610_v49 = vadd.f32 %v4590_v24, %v4562_v27 }
 0xa0b   :  { %v4563_v36 = vpop.f32.mrf.mxu1 }
 0xa0c   :  { %v4618_v6 = vadd.f32 %v4610_v49, %v12368_v44  ;;  %v4486_v33 = vpop.f32.mrf.mxu0 }
 0xa0d   :  { %v4564_v13 = vadd.f32 %v4563_v36, %v4486_v33 }
 0xa0e   :  { %v12832_v22 = vadd.f32 %v12828_v53, %v4618_v6 }
 0xa10   :  { %15925 = vst [vmem:[#allocation50_spill] sm:$0xff] %v12832_v22  ;;  %v4663_v18 = vsel %vm55_vm0, %v12832_v22, 0.0 }
 0xa11   :  { %v4592_v28 = vpop.f32.mrf.mxu2  ;;  %4664 = vadd.xlane.f32.xlu0 %v4663_v18 }
 0xa12   :  { %v4611_v43 = vadd.f32 %v4592_v28, %v4564_v13 }
 0xa13   :  { %v4566_v1 = vpop.f32.mrf.mxu1 }
 0xa14   :  { %v4619_v26 = vadd.f32 %v4611_v43, %v12376_v30  ;;  %v4489_v41 = vpop.f32.mrf.mxu0 }
 0xa15   :  { %v4567_v35 = vadd.f32 %v4566_v1, %v4489_v41 }
 0xa16   :  { %v12838_v46 = vadd.f32 %v12828_v53, %v4619_v26 }
 0xa18   :  { %15926 = vst [vmem:[#allocation52_spill] sm:$0xff] %v12838_v46  ;;  %v4666_v44 = vsel %vm55_vm0, %v12838_v46, 0.0 }
 0xa19   :  { %4667 = vadd.xlane.f32.xlu1 %v4666_v44  ;;  %v4595_v14 = vpop.f32.mrf.mxu2 }
 0xa1a   :  { %v4612_v59 = vadd.f32 %v4595_v14, %v4567_v35 }
 0xa1b   :  { %v4568_v38 = vpop.f32.mrf.mxu1 }
 0xa1c   :  { %v4620_v47 = vadd.f32 %v4612_v59, %v12384_v10  ;;  %v4491_v63 = vpop.f32.mrf.mxu0 }
 0xa1d   :  { %v4569_v58 = vadd.f32 %v4568_v38, %v4491_v63 }
 0xa1e   :  { %v12844_v45 = vadd.f32 %v12828_v53, %v4620_v47 }
 0xa20   :  { %15927 = vst [vmem:[#allocation11_spill] sm:$0xff] %v12844_v45  ;;  %v4669_v30 = vsel %vm55_vm0, %v12844_v45, 0.0 }
 0xa21   :  { %v4597_v12 = vpop.f32.mrf.mxu2  ;;  %4670 = vadd.xlane.f32.xlu2 %v4669_v30 }
 0xa22   :  { %v4613_v42 = vadd.f32 %v4597_v12, %v4569_v58 }
 0xa24   :  { %v4621_v23 = vadd.f32 %v4613_v42, %v12392_v15  ;;  %v4494_v37 = vpop.f32.mrf.mxu0  ;;  %v4571_v4 = vpop.f32.mrf.mxu1 }
 0xa25   :  { %v4572_v31 = vadd.f32 %v4571_v4, %v4494_v37 }
 0xa26   :  { %v12850_v48 = vadd.f32 %v12828_v53, %v4621_v23 }
 0xa28   :  { %15928 = vst [vmem:[#allocation12_spill] sm:$0xff] %v12850_v48  ;;  %v4672_v10 = vsel %vm55_vm0, %v12850_v48, 0.0 }
 0xa29   :  { %4673 = vadd.xlane.f32.xlu0 %v4672_v10 }
 0xa2c   :  { %v4600_v2 = vpop.f32.mrf.mxu2  ;;  %v4496_v11 = vpop.f32.mrf.mxu0 }
 0xa2d   :  { %v4614_v57 = vadd.f32 %v4600_v2, %v4572_v31  ;;  %v4573_v5 = vpop.f32.mrf.mxu1 }
 0xa2e   :  { %v4574_v15 = vadd.f32 %v4573_v5, %v4496_v11 }
 0xa2f   :  { %v4622_v50 = vadd.f32 %v4614_v57, %v12400_v34 }
 0xa31   :  { %v12856_v39 = vadd.f32 %v12828_v53, %v4622_v50 }
 0xa33   :  { %15929 = vst [vmem:[#allocation16_spill] sm:$0xff] %v12856_v39  ;;  %v4675_v20 = vsel %vm55_vm0, %v12856_v39, 0.0 }
 0xa34   :  { %4676 = vadd.xlane.f32.xlu1 %v4675_v20  ;;  %v4602_v51 = vpop.f32.mrf.mxu2  ;;  %v9608_v20 = vld [vmem:[%s15570_s2 + $0x70] sm:$0xff] }
 0xa35   :  { %v4615_v62 = vadd.f32 %v4602_v51, %v4574_v15  ;;  %v9606_v15 = vld [vmem:[%s15570_s2 + $0x60] sm:$0xff] }
 0xa37   :  { %v4623_v29 = vadd.f32 %v4615_v62, %v12408_v60  ;;  %v4887_v62 = vpack.c.bf16 %v9606_v15, %v9606_v15 }
 0xa39   :  { %v12862_v0 = vadd.f32 %v12828_v53, %v4623_v29  ;;  %v4888_v29 = vpack.c.bf16 %v9608_v20, %v9608_v20 }
 0xa3b   :  { %15930 = vst [vmem:[#allocation15_spill] sm:$0xff] %v12862_v0  ;;  %v4678_v34 = vsel %vm55_vm0, %v12862_v0, 0.0 }
 0xa3c   :  { %4679 = vadd.xlane.f32.xlu2 %v4678_v34 }
 0xa61   :  { %v4499_v61 = vpop.f32.mrf.mxu0  ;;  %v4576_v16 = vpop.f32.mrf.mxu1 }
 0xa62   :  { %v4577_v17 = vadd.f32 %v4576_v16, %v4499_v61  ;;  %v4891_v61 = vunpack.c.l.bf16 %v4887_v62  ;;  %v4892_v16 = vunpack.c.l.bf16 %v4888_v29 }
 0xa69   :  { %v4605_v8 = vpop.f32.mrf.mxu2  ;;  %v4501_v3 = vpop.f32.mrf.mxu0 }
 0xa6a   :  { %v4616_v40 = vadd.f32 %v4605_v8, %v4577_v17  ;;  %v4578_v21 = vpop.f32.mrf.mxu1  ;;  %v9602_v8 = vld [vmem:[%s15570_s2 + $0x40] sm:$0xff] }
 0xa6b   :  { %v4579_v52 = vadd.f32 %v4578_v21, %v4501_v3  ;;  %v4966_v3 = vunpack.c.l.b16 %v4887_v62  ;;  %v4967_v21 = vunpack.c.l.b16 %v4888_v29 }
 0xa6c   :  { %v4624_v54 = vadd.f32 %v4616_v40, %v12416_v19  ;;  %v9604_v40 = vld [vmem:[%s15570_s2 + $0x50] sm:$0xff] }
 0xa6e   :  { %v12868_v32 = vadd.f32 %v12828_v53, %v4624_v54  ;;  %v4895_v54 = vsub.f32 %v9606_v15, %v4891_v61 }
 0xa70   :  { %15931 = vst [vmem:[#allocation23_spill] sm:$0xff] %v12868_v32  ;;  %v4681_v60 = vsel %vm55_vm0, %v12868_v32, 0.0 }
 0xa71   :  { %4682 = vadd.xlane.f32.xlu2 %v4681_v60  ;;  %v4607_v9 = vpop.f32.mrf.mxu2  ;;  %v4896_v60 = vsub.f32 %v9608_v20, %v4892_v16 }
 0xa72   :  { %v4617_v24 = vadd.f32 %v4607_v9, %v4579_v52  ;;  %v4885_v9 = vpack.c.bf16 %v9602_v8, %v9602_v8  ;;  %v4886_v52 = vpack.c.bf16 %v9604_v40, %v9604_v40 }
 0xa74   :  { %v4625_v25 = vadd.f32 %v4617_v24, %v12435_v7  ;;  %v4889_v24 = vunpack.c.l.bf16 %v4885_v9 }
 0xa76   :  { %v12882_v13 = vadd.f32 %v12828_v53, %v4625_v25 }
 0xa78   :  { %15932 = vst [vmem:[#allocation24_spill] sm:$0xff] %v12882_v13  ;;  %v4684_v43 = vsel %vm55_vm0, %v12882_v13, 0.0 }
 0xa84   :  { %v4665_v56 = vpop.xlane.xlu0 %4664 }
 0xa85   :  { %v4687_v27 = vmul.f32 %v4665_v56, %v15916_v55  ;;  %v12940_v56 = vpack.c.bf16 %v4896_v60, %v4895_v54 }
 0xa87   :  { %v12874_v49 = vsub.f32 %v12832_v22, %v4687_v27  ;;  %15933 = vst [vmem:[#allocation28_spill] sm:$0xff] %v12940_v56  ;;  %v12942_v27 = vpack.c.b16 %v4967_v21, %v4966_v3  ;;  %4937 = vmatpush.bf16.msra.mxu3 %v12940_v56 }
 0xa89   :  { %v4703_v19 = vmul.f32 %v12874_v49, %v12874_v49  ;;  %15934 = vst [vmem:[#allocation27_spill] sm:$0xff] %v12942_v27  ;;  %4978 = vmatpush.bf16.msrb.mxu0 %v12942_v27  ;;  %5019 = vmatpush.bf16.msrb.mxu1 %v12942_v27 }
 0xa8b   :  { %v4711_v36 = vsel %vm55_vm0, %v4703_v19, 0.0  ;;  %v4890_v19 = vunpack.c.l.bf16 %v4886_v52 }
 0xa8c   :  { %v4668_v6 = vpop.xlane.xlu1 %4667  ;;  %4712 = vadd.xlane.f32.xlu0 %v4711_v36 }
 0xa8d   :  { %v4688_v33 = vmul.f32 %v4668_v6, %v15916_v55  ;;  %v4964_v6 = vunpack.c.l.b16 %v4885_v9 }
 0xa8f   :  { %v12885_v18 = vsub.f32 %v12838_v46, %v4688_v33  ;;  %v4965_v33 = vunpack.c.l.b16 %v4886_v52 }
 0xa91   :  { %v4704_v28 = vmul.f32 %v12885_v18, %v12885_v18 }
 0xa93   :  { %v4714_v7 = vsel %vm55_vm0, %v4704_v28, 0.0 }
 0xa94   :  { %4715 = vadd.xlane.f32.xlu1 %v4714_v7  ;;  %4685 = vadd.xlane.f32.xlu0 %v4684_v43  ;;  %v4671_v1 = vpop.xlane.xlu2 %4670  ;;  %v4893_v7 = vsub.f32 %v9602_v8, %v4889_v24 }
 0xa95   :  { %v4689_v26 = vmul.f32 %v4671_v1, %v15916_v55  ;;  %v4894_v1 = vsub.f32 %v9604_v40, %v4890_v19 }
 0xa97   :  { %v12894_v41 = vsub.f32 %v12844_v45, %v4689_v26  ;;  %v12949_v26 = vpack.c.b16 %v4965_v33, %v4964_v6 }
 0xa99   :  { %v4705_v53 = vmul.f32 %v12894_v41, %v12894_v41  ;;  %15935 = vst [vmem:[#allocation19_spill] sm:$0xff] %v12949_v26  ;;  %4979 = vmatpush.bf16.msrb.mxu0 %v12949_v26  ;;  %5020 = vmatpush.bf16.msrb.mxu1 %v12949_v26 }
 0xa9b   :  { %v4717_v35 = vsel %vm55_vm0, %v4705_v53, 0.0 }
 0xa9c   :  { %v4674_v44 = vpop.xlane.xlu0 %4673  ;;  %4718 = vadd.xlane.f32.xlu1 %v4717_v35 }
 0xa9d   :  { %v4690_v14 = vmul.f32 %v4674_v44, %v15916_v55 }
 0xa9f   :  { %v12901_v59 = vsub.f32 %v12850_v48, %v4690_v14  ;;  %v12954_v14 = vpack.c.bf16 %v4894_v1, %v4893_v7 }
 0xaa1   :  { %v4706_v47 = vmul.f32 %v12901_v59, %v12901_v59  ;;  %15936 = vst [vmem:[#allocation18_spill] sm:$0xff] %v12954_v14  ;;  %4938 = vmatpush.bf16.msra.mxu3 %v12954_v14 }
 0xaa3   :  { %v4720_v63 = vsel %vm55_vm0, %v4706_v47, 0.0 }
 0xaa4   :  { %4721 = vadd.xlane.f32.xlu2 %v4720_v63 }
 0xaa7   :  { %v4677_v38 = vpop.xlane.xlu1 %4676 }
 0xaa8   :  { %v4691_v58 = vmul.f32 %v4677_v38, %v15916_v55 }
 0xaaa   :  { %v12908_v30 = vsub.f32 %v12856_v39, %v4691_v58 }
 0xaac   :  { %v4707_v12 = vmul.f32 %v12908_v30, %v12908_v30 }
 0xaae   :  { %v4723_v42 = vsel %vm55_vm0, %v4707_v12, 0.0 }
 0xaaf   :  { %v4680_v23 = vpop.xlane.xlu2 %4679  ;;  %4724 = vadd.xlane.f32.xlu0 %v4723_v42 }
 0xab0   :  { %v4692_v10 = vmul.f32 %v4680_v23, %v15916_v55 }
 0xab2   :  { %v12915_v37 = vsub.f32 %v12862_v0, %v4692_v10  ;;  %v9601_v10 = vld [vmem:[%s15569_s1 + $0x8] sm:$0x7f] }
 0xab4   :  { %v4708_v4 = vmul.f32 %v12915_v37, %v12915_v37 }
 0xab6   :  { %v4726_v31 = vsel %vm55_vm0, %v4708_v4, 0.0 }
 0xab7   :  { %4727 = vadd.xlane.f32.xlu1 %v4726_v31 }
 0xae4   :  { %v4683_v2 = vpop.xlane.xlu2 %4682 }
 0xae5   :  { %v4693_v57 = vmul.f32 %v4683_v2, %v15916_v55 }
 0xae7   :  { %v12922_v50 = vsub.f32 %v12868_v32, %v4693_v57 }
 0xae9   :  { %v4709_v11 = vmul.f32 %v12922_v50, %v12922_v50 }
 0xaeb   :  { %v4729_v5 = vsel %vm55_vm0, %v4709_v11, 0.0 }
 0xaec   :  { %4730 = vadd.xlane.f32.xlu2 %v4729_v5  ;;  %v12966_v5 = vperm.slane %v9601_v10, 0 }
 0xaff   :  { %v4713_v51 = vpop.xlane.xlu0 %4712 }
 0xb00   :  { %v4735_v34 = vmul.f32 %v4713_v51, %v15916_v55 }
 0xb02   :  { %v4743_v17 = vadd.f32 1e-05, %v4735_v34  ;;  %v12969_v34 = vperm.slane %v9601_v10, 1 }
 0xb04   :  { %9964 = vrsqrt.f32 %v4743_v17  ;;  %vm4757_vm8 = vweird.f32 %v4743_v17 }
 0xb07   :  { %v4716_v25 = vpop.xlane.xlu1 %4715  ;;  %v4686_v36 = vpop.xlane.xlu0 %4685 }
 0xb08   :  { %v4736_v28 = vmul.f32 %v4716_v25, %v15916_v55  ;;  %v4694_v43 = vmul.f32 %v4686_v36, %v15916_v55 }
 0xb0a   :  { %v9965_v53 = vpop.eup %9964  ;;  %v4744_v35 = vadd.f32 1e-05, %v4736_v28  ;;  %v12952_v44 = vsub.f32 %v12882_v13, %v4694_v43 }
 0xb0b   :  { %v4752_v47 = vmul.f32 %v9965_v53, %v4743_v17  ;;  %vm4758_vm7 = vweird.f32 %v9965_v53 }
 0xb0c   :  { %9966 = vrsqrt.f32 %v4744_v35  ;;  %v4710_v63 = vmul.f32 %v12952_v44, %v12952_v44  ;;  %vm4759_vm9 = vmor %vm4757_vm8, %vm4758_vm7  ;;  %vm4767_vm14 = vweird.f32 %v4744_v35 }
 0xb0d   :  { %v4753_v38 = vmul.f32 %v9965_v53, %v4752_v47 }
 0xb0e   :  { %v4732_v58 = vsel %vm55_vm0, %v4710_v63, 0.0 }
 0xb0f   :  { %v4754_v12 = vmul.f32 0.5, %v4753_v38  ;;  %4733 = vadd.xlane.f32.xlu0 %v4732_v58  ;;  %v4719_v42 = vpop.xlane.xlu1 %4718 }
 0xb10   :  { %v4737_v23 = vmul.f32 %v4719_v42, %v15916_v55 }
 0xb11   :  { %v4755_v4 = vsub.f32 1.5, %v4754_v12 }
 0xb12   :  { %v9967_v31 = vpop.eup %9966  ;;  %v4745_v2 = vadd.f32 1e-05, %v4737_v23 }
 0xb13   :  { %v4756_v57 = vmul.f32 %v9965_v53, %v4755_v4  ;;  %v4762_v11 = vmul.f32 %v9967_v31, %v4744_v35  ;;  %vm4768_vm10 = vweird.f32 %v9967_v31 }
 0xb14   :  { %9968 = vrsqrt.f32 %v4745_v2  ;;  %vm4769_vm15 = vmor %vm4767_vm14, %vm4768_vm10  ;;  %vm4777_vm2 = vweird.f32 %v4745_v2 }
 0xb15   :  { %v4760_v15 = vsel %vm4759_vm9, %v9965_v53, %v4756_v57  ;;  %v4763_v20 = vmul.f32 %v9967_v31, %v4762_v11 }
 0xb16   :  { %v4831_v51 = vmul.f32 %v4760_v15, %v12874_v49 }
 0xb17   :  { %v4764_v62 = vmul.f32 0.5, %v4763_v20  ;;  %v4722_v29 = vpop.xlane.xlu2 %4721 }
 0xb18   :  { %v4840_v61 = vmul.f32 %v12966_v5, %v4831_v51  ;;  %v4738_v16 = vmul.f32 %v4722_v29, %v15916_v55 }
 0xb19   :  { %v4765_v8 = vsub.f32 1.5, %v4764_v62 }
 0xb1a   :  { %v9969_v17 = vpop.eup %9968  ;;  %v4746_v40 = vadd.f32 1e-05, %v4738_v16  ;;  %v4849_v3 = vadd.f32 %v12969_v34, %v4840_v61 }
 0xb1b   :  { %v4766_v54 = vmul.f32 %v9967_v31, %v4765_v8  ;;  %v4772_v60 = vmul.f32 %v9969_v17, %v4745_v2  ;;  %vm4778_vm1 = vweird.f32 %v9969_v17 }
 0xb1c   :  { %9970 = vrsqrt.f32 %v4746_v40  ;;  %v4857_v24 = vpack.c.bf16 %v4849_v3, %v4849_v3  ;;  %vm4779_vm3 = vmor %vm4777_vm2, %vm4778_vm1  ;;  %vm4787_vm5 = vweird.f32 %v4746_v40 }
 0xb1d   :  { %v4770_v49 = vsel %vm4769_vm15, %v9967_v31, %v4766_v54  ;;  %v4773_v21 = vmul.f32 %v9969_v17, %v4772_v60 }
 0xb1e   :  { %v4832_v9 = vmul.f32 %v4770_v49, %v12885_v18  ;;  %v4865_v43 = vunpack.c.l.bf16 %v4857_v24  ;;  %v4907_v47 = vunpack.c.l.b16 %v4857_v24 }
 0xb1f   :  { %v4774_v52 = vmul.f32 0.5, %v4773_v21 }
 0xb20   :  { %v4841_v19 = vmul.f32 %v12966_v5, %v4832_v9  ;;  %v4873_v23 = vsub.f32 %v4849_v3, %v4865_v43 }
 0xb21   :  { %v4775_v25 = vsub.f32 1.5, %v4774_v52 }
 0xb22   :  { %v9971_v36 = vpop.eup %9970  ;;  %v4850_v6 = vadd.f32 %v12969_v34, %v4841_v19  ;;  %v4725_v1 = vpop.xlane.xlu0 %4724 }
 0xb23   :  { %v4776_v33 = vmul.f32 %v9969_v17, %v4775_v25  ;;  %v4782_v28 = vmul.f32 %v9971_v36, %v4746_v40  ;;  %v4739_v18 = vmul.f32 %v4725_v1, %v15916_v55  ;;  %vm4788_vm4 = vweird.f32 %v9971_v36 }
 0xb24   :  { %v4858_v7 = vpack.c.bf16 %v4850_v6, %v4850_v6  ;;  %vm4789_vm6 = vmor %vm4787_vm5, %vm4788_vm4 }
 0xb25   :  { %v4780_v53 = vsel %vm4779_vm3, %v9969_v17, %v4776_v33  ;;  %v4783_v35 = vmul.f32 %v9971_v36, %v4782_v28  ;;  %v4747_v42 = vadd.f32 1e-05, %v4739_v18 }
 0xb26   :  { %v4866_v63 = vunpack.c.l.bf16 %v4858_v7  ;;  %v4908_v38 = vunpack.c.l.b16 %v4858_v7  ;;  %v4833_v58 = vmul.f32 %v4780_v53, %v12894_v41 }
 0xb27   :  { %v4784_v12 = vmul.f32 0.5, %v4783_v35  ;;  %9972 = vrsqrt.f32 %v4747_v42  ;;  %vm4797_vm8 = vweird.f32 %v4747_v42 }
 0xb28   :  { %v4874_v10 = vsub.f32 %v4850_v6, %v4866_v63  ;;  %v4915_v4 = vpack.c.b16 %v4908_v38, %v4907_v47  ;;  %v4842_v31 = vmul.f32 %v12966_v5, %v4833_v58 }
 0xb29   :  { %v4785_v2 = vsub.f32 1.5, %v4784_v12 }
 0xb2a   :  { %9626 = vmatmul.msk.bf16.vlgmr.msra.gmra.mxu3 %vm55_vm0, %v4915_v4  ;;  %9630 = vmatmul.msk.bf16.vlgmr.msrb.gmra.mxu0 %vm55_vm0, %v4915_v4  ;;  %v4881_v57 = vpack.c.bf16 %v4874_v10, %v4873_v23  ;;  %v4728_v41 = vpop.xlane.xlu1 %4727  ;;  %v4851_v51 = vadd.f32 %v12969_v34, %v4842_v31 }
 0xb2b   :  { %v4786_v11 = vmul.f32 %v9971_v36, %v4785_v2  ;;  %v4740_v20 = vmul.f32 %v4728_v41, %v15916_v55 }
 0xb2c   :  { %9634 = vmatmul.msk.bf16.vlgmr.msrb.gmra.mxu1 %vm55_vm0, %v4881_v57  ;;  %v4859_v17 = vpack.c.bf16 %v4851_v51, %v4851_v51 }
 0xb2d   :  { %v4790_v15 = vsel %vm4789_vm6, %v9971_v36, %v4786_v11  ;;  %v9973_v29 = vpop.eup %9972  ;;  %v4748_v61 = vadd.f32 1e-05, %v4740_v20 }
 0xb2e   :  { %v4834_v62 = vmul.f32 %v4790_v15, %v12901_v59  ;;  %v4792_v8 = vmul.f32 %v9973_v29, %v4747_v42  ;;  %v4909_v49 = vunpack.c.l.b16 %v4859_v17  ;;  %v4867_v21 = vunpack.c.l.bf16 %v4859_v17 }
 0xb2f   :  { %9974 = vrsqrt.f32 %v4748_v61  ;;  %vm4798_vm7 = vweird.f32 %v9973_v29  ;;  %vm4807_vm14 = vweird.f32 %v4748_v61 }
 0xb30   :  { %v4843_v16 = vmul.f32 %v12966_v5, %v4834_v62  ;;  %v4793_v54 = vmul.f32 %v9973_v29, %v4792_v8  ;;  %vm4799_vm9 = vmor %vm4797_vm8, %vm4798_vm7  ;;  %v4875_v6 = vsub.f32 %v4851_v51, %v4867_v21 }
 0xb32   :  { %v4852_v40 = vadd.f32 %v12969_v34, %v4843_v16  ;;  %v4794_v60 = vmul.f32 0.5, %v4793_v54 }
 0xb34   :  { %v4860_v3 = vpack.c.bf16 %v4852_v40, %v4852_v40  ;;  %v4795_v9 = vsub.f32 1.5, %v4794_v60 }
 0xb35   :  { %v9975_v19 = vpop.eup %9974 }
 0xb36   :  { %v4910_v52 = vunpack.c.l.b16 %v4860_v3  ;;  %v4868_v24 = vunpack.c.l.bf16 %v4860_v3  ;;  %v4796_v59 = vmul.f32 %v9973_v29, %v4795_v9  ;;  %v4802_v25 = vmul.f32 %v9975_v19, %v4748_v61 }
 0xb37   :  { %vm4808_vm10 = vweird.f32 %v9975_v19 }
 0xb38   :  { %v4916_v36 = vpack.c.b16 %v4910_v52, %v4909_v49  ;;  %v4876_v33 = vsub.f32 %v4852_v40, %v4868_v24  ;;  %v4800_v28 = vsel %vm4799_vm9, %v9973_v29, %v4796_v59  ;;  %v4803_v43 = vmul.f32 %v9975_v19, %v4802_v25  ;;  %vm4809_vm15 = vmor %vm4807_vm14, %vm4808_vm10 }
 0xb39   :  { %v4835_v7 = vmul.f32 %v4800_v28, %v12908_v30 }
 0xb3a   :  { %9627 = vmatmul.msk.bf16.gmra.mxu3 %vm55_vm0, %v4916_v36  ;;  %9631 = vmatmul.msk.bf16.gmra.mxu0 %vm55_vm0, %v4916_v36  ;;  %v4882_v1 = vpack.c.bf16 %v4876_v33, %v4875_v6  ;;  %v4804_v53 = vmul.f32 0.5, %v4803_v43 }
 0xb3b   :  { %v4844_v35 = vmul.f32 %v12966_v5, %v4835_v7 }
 0xb3c   :  { %9635 = vmatmul.msk.bf16.gmra.mxu1 %vm55_vm0, %v4882_v1  ;;  %v4805_v18 = vsub.f32 1.5, %v4804_v53 }
 0xb3d   :  { %v4853_v63 = vadd.f32 %v12969_v34, %v4844_v35 }
 0xb3e   :  { %v4806_v47 = vmul.f32 %v9975_v19, %v4805_v18 }
 0xb3f   :  { %v4861_v42 = vpack.c.bf16 %v4853_v63, %v4853_v63 }
 0xb40   :  { %v4810_v38 = vsel %vm4809_vm15, %v9975_v19, %v4806_v47 }
 0xb41   :  { %v4836_v58 = vmul.f32 %v4810_v38, %v12915_v37  ;;  %v4869_v10 = vunpack.c.l.bf16 %v4861_v42  ;;  %v4911_v4 = vunpack.c.l.b16 %v4861_v42 }
 0xb43   :  { %v4845_v12 = vmul.f32 %v12966_v5, %v4836_v58  ;;  %v4877_v11 = vsub.f32 %v4853_v63, %v4869_v10 }
 0xb45   :  { %v4854_v30 = vadd.f32 %v12969_v34, %v4845_v12 }
 0xb47   :  { %v4862_v23 = vpack.c.bf16 %v4854_v30, %v4854_v30 }
 0xb49   :  { %v4912_v31 = vunpack.c.l.b16 %v4862_v23  ;;  %v4870_v2 = vunpack.c.l.bf16 %v4862_v23 }
 0xb4b   :  { %v4917_v57 = vpack.c.b16 %v4912_v31, %v4911_v4  ;;  %v4878_v41 = vsub.f32 %v4854_v30, %v4870_v2 }
 0xb4d   :  { %9628 = vmatmul.msk.bf16.gmra.mxu3 %vm55_vm0, %v4917_v57  ;;  %9632 = vmatmul.msk.bf16.gmra.mxu0 %vm55_vm0, %v4917_v57  ;;  %v4883_v15 = vpack.c.bf16 %v4878_v41, %v4877_v11 }
 0xb4f   :  { %9636 = vmatmul.msk.bf16.gmra.mxu1 %vm55_vm0, %v4883_v15 }
 0xb5f   :  { %v4731_v37 = vpop.xlane.xlu2 %4730 }
 0xb60   :  { %v4741_v20 = vmul.f32 %v4731_v37, %v15916_v55 }
 0xb62   :  { %v4749_v51 = vadd.f32 1e-05, %v4741_v20 }
 0xb64   :  { %9976 = vrsqrt.f32 %v4749_v51  ;;  %vm4817_vm2 = vweird.f32 %v4749_v51 }
 0xb6a   :  { %v9977_v62 = vpop.eup %9976 }
 0xb6b   :  { %v4812_v29 = vmul.f32 %v9977_v62, %v4749_v51  ;;  %vm4818_vm1 = vweird.f32 %v9977_v62 }
 0xb6c   :  { %vm4819_vm3 = vmor %vm4817_vm2, %vm4818_vm1 }
 0xb6d   :  { %v4813_v61 = vmul.f32 %v9977_v62, %v4812_v29 }
 0xb6f   :  { %v4814_v16 = vmul.f32 0.5, %v4813_v61 }
 0xb71   :  { %v4815_v54 = vsub.f32 1.5, %v4814_v16 }
 0xb73   :  { %v4816_v60 = vmul.f32 %v9977_v62, %v4815_v54 }
 0xb75   :  { %v4820_v3 = vsel %vm4819_vm3, %v9977_v62, %v4816_v60 }
 0xb76   :  { %v4837_v9 = vmul.f32 %v4820_v3, %v12922_v50 }
 0xb78   :  { %v4846_v19 = vmul.f32 %v12966_v5, %v4837_v9 }
 0xb7a   :  { %v4855_v36 = vadd.f32 %v12969_v34, %v4846_v19 }
 0xb7c   :  { %v4863_v43 = vpack.c.bf16 %v4855_v36, %v4855_v36 }
 0xb7e   :  { %v4871_v1 = vunpack.c.l.bf16 %v4863_v43  ;;  %v4913_v53 = vunpack.c.l.b16 %v4863_v43 }
 0xb80   :  { %v4879_v63 = vsub.f32 %v4855_v36, %v4871_v1 }
 0xb82   :  { %v4734_v8 = vpop.xlane.xlu0 %4733 }
 0xb83   :  { %v4742_v17 = vmul.f32 %v4734_v8, %v15916_v55 }
 0xb85   :  { %v4750_v40 = vadd.f32 1e-05, %v4742_v17 }
 0xb87   :  { %9978 = vrsqrt.f32 %v4750_v40  ;;  %vm4827_vm5 = vweird.f32 %v4750_v40 }
 0xb8d   :  { %v9979_v49 = vpop.eup %9978 }
 0xb8e   :  { %v4822_v21 = vmul.f32 %v9979_v49, %v4750_v40  ;;  %vm4828_vm4 = vweird.f32 %v9979_v49 }
 0xb8f   :  { %vm4829_vm6 = vmor %vm4827_vm5, %vm4828_vm4 }
 0xb90   :  { %v4823_v52 = vmul.f32 %v9979_v49, %v4822_v21 }
 0xb92   :  { %v4824_v24 = vmul.f32 0.5, %v4823_v52 }
 0xb94   :  { %v4825_v59 = vsub.f32 1.5, %v4824_v24 }
 0xb96   :  { %v4826_v25 = vmul.f32 %v9979_v49, %v4825_v59 }
 0xb98   :  { %v4830_v6 = vsel %vm4829_vm6, %v9979_v49, %v4826_v25 }
 0xb99   :  { %v4838_v33 = vmul.f32 %v4830_v6, %v12952_v44 }
 0xb9b   :  { %v4847_v28 = vmul.f32 %v12966_v5, %v4838_v33 }
 0xb9d   :  { %v4856_v7 = vadd.f32 %v12969_v34, %v4847_v28 }
 0xb9f   :  { %v4864_v50 = vpack.c.bf16 %v4856_v7, %v4856_v7 }
 0xba1   :  { %v4914_v35 = vunpack.c.l.b16 %v4864_v50  ;;  %v4872_v18 = vunpack.c.l.bf16 %v4864_v50 }
 0xba3   :  { %v4918_v47 = vpack.c.b16 %v4914_v35, %v4913_v53  ;;  %v4880_v38 = vsub.f32 %v4856_v7, %v4872_v18 }
 0xba5   :  { %9629 = vmatmul.msk.bf16.gmra.mxu3 %vm55_vm0, %v4918_v47  ;;  %9633 = vmatmul.msk.bf16.gmra.mxu0 %vm55_vm0, %v4918_v47  ;;  %v4884_v58 = vpack.c.bf16 %v4880_v38, %v4879_v63 }
 0xba7   :  { %9637 = vmatmul.msk.bf16.gmra.mxu1 %vm55_vm0, %v4884_v58  ;;  %v4981_v44 = vpop.f32.mrf.mxu0 }
 0xba9   :  { %v5022_v5 = vpop.f32.mrf.mxu1 }
 0xbad   :  { %v4940_v12 = vpop.f32.mrf.mxu3 }
 0xbae   :  { %v4982_v42 = vadd.f32 %v4981_v44, %v4940_v12 }
 0xbaf   :  { %v4983_v30 = vpop.f32.mrf.mxu0 }
 0xbb0   :  { %v13011_v34 = vadd.f32 %v5022_v5, %v4982_v42 }
 0xbb1   :  { %v5024_v23 = vpop.f32.mrf.mxu1 }
 0xbb2   :  { %5058 = vrot.lane.b32.xlu0 %v13011_v34, %s10188_s20  ;;  %v13019_v2 = vpack.c.bf16 %v13011_v34, %v13011_v34  ;;  %v5130_v57 = vmul.f32 0.35355338, %v13011_v34 }
 0xbb4   :  { %v5862_v15 = vunpack.c.l.b16 %v13019_v2  ;;  %v13030_v62 = vpack.c.bf16 %v5130_v57, %v5130_v57 }
 0xbb5   :  { %v4942_v10 = vpop.f32.mrf.mxu3 }
 0xbb6   :  { %v4984_v4 = vadd.f32 %v4983_v30, %v4942_v10  ;;  %v5194_v17 = vunpack.c.l.bf16 %v13030_v62 }
 0xbb7   :  { %v4986_v41 = vpop.f32.mrf.mxu0 }
 0xbb8   :  { %v13015_v31 = vadd.f32 %v5024_v23, %v4984_v4  ;;  %v5226_v54 = vsub.f32 %v5130_v57, %v5194_v17 }
 0xbb9   :  { %v5027_v20 = vpop.f32.mrf.mxu1 }
 0xbba   :  { %5084 = vrot.lane.b32.xlu0 %v13015_v31, %s10187_s19  ;;  %v13026_v11 = vpack.c.bf16 %v13015_v31, %v13015_v31  ;;  %v5131_v8 = vmul.f32 0.35355338, %v13015_v31  ;;  %v5258_v6 = vpack.c.bf16 %v5226_v54, %v5226_v54 }
 0xbbc   :  { %v5863_v37 = vunpack.c.l.b16 %v13026_v11  ;;  %v13038_v3 = vpack.c.bf16 %v5131_v8, %v5131_v8  ;;  %v13045_v53 = vunpack.c.l.b16 %v5258_v6 }
 0xbbd   :  { %v4945_v51 = vpop.f32.mrf.mxu3 }
 0xbbe   :  { %v4987_v29 = vadd.f32 %v4986_v41, %v4945_v51  ;;  %v13032_v61 = vpack.c.b16 %v5863_v37, %v5862_v15  ;;  %v5195_v24 = vunpack.c.l.bf16 %v13038_v3  ;;  %15938 = vst [vmem:[#allocation35_spill] sm:$0xff] %v13045_v53 }
 0xbbf   :  { %v4988_v40 = vpop.f32.mrf.mxu0 }
 0xbc0   :  { %15937 = vst [vmem:[#allocation34_spill] sm:$0xff] %v13032_v61  ;;  %v5044_v16 = vadd.f32 %v5027_v20, %v4987_v29  ;;  %v5227_v36 = vsub.f32 %v5131_v8, %v5195_v24 }
 0xbc1   :  { %v5029_v9 = vpop.f32.mrf.mxu1 }
 0xbc2   :  { %5062 = vrot.lane.b32.xlu1 %v5044_v16, %s10188_s20  ;;  %5086 = vrot.lane.b32.xlu0 %v5044_v16, %s10187_s19  ;;  %v5292_v21 = vpack.c.bf16 %v5044_v16, %v5044_v16  ;;  %v5132_v25 = vmul.f32 0.35355338, %v5044_v16  ;;  %v5259_v28 = vpack.c.bf16 %v5227_v36, %v5227_v36 }
 0xbc4   :  { %v5324_v59 = vunpack.c.l.bf16 %v5292_v21  ;;  %v5164_v1 = vpack.c.bf16 %v5132_v25, %v5132_v25  ;;  %v13047_v35 = vunpack.c.l.b16 %v5259_v28  ;;  %v5864_v63 = vunpack.c.l.b16 %v5292_v21 }
 0xbc5   :  { %v4947_v60 = vpop.f32.mrf.mxu3 }
 0xbc6   :  { %v4989_v49 = vadd.f32 %v4988_v40, %v4947_v60  ;;  %v5356_v43 = vsub.f32 %v5044_v16, %v5324_v59  ;;  %15939 = vst [vmem:[#allocation44_spill] sm:$0xff] %v13047_v35  ;;  %v5424_v10 = vunpack.c.l.b16 %v5164_v1  ;;  %v5196_v51 = vunpack.c.l.bf16 %v5164_v1 }
 0xbc8   :  { %v5045_v52 = vadd.f32 %v5029_v9, %v4989_v49  ;;  %v5388_v12 = vpack.c.bf16 %v5356_v43, %v5356_v43  ;;  %v5228_v17 = vsub.f32 %v5132_v25, %v5196_v51 }
 0xbca   :  { %5060 = vrot.lane.b32.xlu1 %v13015_v31, %s10188_s20  ;;  %5064 = vrot.lane.b32.xlu2 %v5045_v52, %s10188_s20  ;;  %v5293_v19 = vpack.c.bf16 %v5045_v52, %v5045_v52  ;;  %v5133_v50 = vmul.f32 0.35355338, %v5045_v52  ;;  %v4991_v18 = vpop.f32.mrf.mxu0  ;;  %v5434_v37 = vunpack.c.l.b16 %v5388_v12  ;;  %v5260_v21 = vpack.c.bf16 %v5228_v17, %v5228_v17 }
 0xbcb   :  { %5110 = vrot.lane.b32.xlu0 %v5044_v16, %s10190_s22 }
 0xbcc   :  { %v5325_v33 = vunpack.c.l.bf16 %v5293_v19  ;;  %v5865_v38 = vunpack.c.l.b16 %v5293_v19  ;;  %v5165_v58 = vpack.c.bf16 %v5133_v50, %v5133_v50  ;;  %v5032_v42 = vpop.f32.mrf.mxu1 }
 0xbce   :  { %v5357_v7 = vsub.f32 %v5045_v52, %v5325_v33  ;;  %v13054_v23 = vpack.c.b16 %v5865_v38, %v5864_v63  ;;  %v5425_v4 = vunpack.c.l.b16 %v5165_v58  ;;  %v5197_v60 = vunpack.c.l.bf16 %v5165_v58 }
 0xbd0   :  { %v5389_v47 = vpack.c.bf16 %v5357_v7, %v5357_v7  ;;  %v4950_v5 = vpop.f32.mrf.mxu3  ;;  %15940 = vst [vmem:[#allocation36_spill] sm:$0xff] %v13054_v23  ;;  %v13058_v15 = vpack.c.b16 %v5425_v4, %v5424_v10  ;;  %v5229_v49 = vsub.f32 %v5133_v50, %v5197_v60 }
 0xbd1   :  { %v4992_v30 = vadd.f32 %v4991_v18, %v4950_v5 }
 0xbd2   :  { %5082 = vrot.lane.b32.xlu1 %v13011_v34, %s10187_s19  ;;  %5088 = vrot.lane.b32.xlu2 %v5045_v52, %s10187_s19  ;;  %v5435_v57 = vunpack.c.l.b16 %v5389_v47  ;;  %15941 = vst [vmem:[#allocation49_spill] sm:$0xff] %v13058_v15  ;;  %v4993_v29 = vpop.f32.mrf.mxu0  ;;  %v5261_v9 = vpack.c.bf16 %v5229_v49, %v5229_v49 }
 0xbd3   :  { %v13056_v41 = vadd.f32 %v5032_v42, %v4992_v30  ;;  %v5323_v30 = vunpack.c.l.bf16 %v13026_v11 }
 0xbd4   :  { %v13062_v20 = vpack.c.b16 %v5435_v57, %v5434_v37  ;;  %v5034_v54 = vpop.f32.mrf.mxu1  ;;  %v13075_v24 = vunpack.c.l.b16 %v5261_v9  ;;  %v5322_v37 = vunpack.c.l.bf16 %v13019_v2 }
 0xbd5   :  { %5066 = vrot.lane.b32.xlu0 %v13056_v41, %s10188_s20  ;;  %v13081_v59 = vpack.c.bf16 %v13056_v41, %v13056_v41  ;;  %v5134_v36 = vmul.f32 0.35355338, %v13056_v41 }
 0xbd6   :  { %15942 = vst [vmem:[#allocation48_spill] sm:$0xff] %v13062_v20  ;;  %v5354_v11 = vsub.f32 %v13011_v34, %v5322_v37 }
 0xbd7   :  { %15944 = vst [vmem:[#allocation41_spill] sm:$0xff] %v13075_v24  ;;  %v5901_v6 = vunpack.c.l.b16 %v13081_v59  ;;  %v13090_v28 = vpack.c.bf16 %v5134_v36, %v5134_v36 }
 0xbd8   :  { %v4952_v16 = vpop.f32.mrf.mxu3 }
 0xbd9   :  { %v4994_v8 = vadd.f32 %v4993_v29, %v4952_v16  ;;  %15945 = vst [vmem:[#allocation58_spill] sm:$0xff] %v13090_v28  ;;  %v5198_v50 = vunpack.c.l.bf16 %v13090_v28 }
 0xbda   :  { %5112 = vrot.lane.b32.xlu2 %v5045_v52, %s10190_s22  ;;  %5440 = vrot.lane.b32.xlu1 %v13062_v20, %s10189_s21  ;;  %v13073_v52 = vunpack.c.l.b16 %v5260_v21 }
 0xbdb   :  { %v13067_v40 = vadd.f32 %v5034_v54, %v4994_v8  ;;  %v5230_v1 = vsub.f32 %v5134_v36, %v5198_v50  ;;  %v5355_v8 = vsub.f32 %v13015_v31, %v5323_v30 }
 0xbdc   :  { %15943 = vst [vmem:[#allocation40_spill] sm:$0xff] %v13073_v52 }
 0xbdd   :  { %5108 = vrot.lane.b32.xlu0 %v13015_v31, %s10190_s22  ;;  %v13085_v25 = vpack.c.bf16 %v13067_v40, %v13067_v40  ;;  %v5135_v7 = vmul.f32 0.35355338, %v13067_v40  ;;  %v5262_v38 = vpack.c.bf16 %v5230_v1, %v5230_v1 }
 0xbdf   :  { %v5902_v33 = vunpack.c.l.b16 %v13085_v25  ;;  %v13096_v18 = vpack.c.bf16 %v5135_v7, %v5135_v7  ;;  %v13099_v5 = vunpack.c.l.b16 %v5262_v38 }
 0xbe1   :  { %v13092_v43 = vpack.c.b16 %v5902_v33, %v5901_v6  ;;  %15947 = vst [vmem:[#allocation62_spill] sm:$0xff] %v13096_v18  ;;  %v5199_v47 = vunpack.c.l.bf16 %v13096_v18  ;;  %v5387_v6 = vpack.c.bf16 %v5355_v8, %v5355_v8 }
 0xbe2   :  { %5068 = vrot.lane.b32.xlu2 %v13067_v40, %s10188_s20  ;;  %15948 = vst [vmem:[#allocation61_spill] sm:$0xff] %v13099_v5 }
 0xbe3   :  { %15946 = vst [vmem:[#allocation57_spill] sm:$0xff] %v13092_v43  ;;  %v5231_v63 = vsub.f32 %v5135_v7, %v5199_v47  ;;  %v5433_v30 = vunpack.c.l.b16 %v5387_v6 }
 0xbe5   :  { %v5263_v58 = vpack.c.bf16 %v5231_v63, %v5231_v63  ;;  %v5386_v63 = vpack.c.bf16 %v5354_v11, %v5354_v11  ;;  %v5327_v11 = vunpack.c.l.bf16 %v13085_v25 }
 0xbe7   :  { %v13101_v12 = vunpack.c.l.b16 %v5263_v58 }
 0xbe9   :  { %15949 = vst [vmem:[#allocation56_spill] sm:$0xff] %v13101_v12 }
 0xc22   :  { %v4996_v51 = vpop.f32.mrf.mxu0 }
 0xc24   :  { %v5059_v10 = vpop.permute.xlu0 %5058  ;;  %v5065_v57 = vpop.permute.xlu2 %5064 }
 0xc25   :  { %v5138_v4 = vmul.f32 0.35355338, %v5059_v10  ;;  %v5141_v29 = vmul.f32 0.35355338, %v5065_v57  ;;  %v5037_v17 = vpop.f32.mrf.mxu1  ;;  %v13119_v33 = vpack.c.bf16 %v5059_v10, %v5059_v10  ;;  %v13123_v31 = vpack.c.bf16 %v5065_v57, %v5065_v57 }
 0xc27   :  { %v13107_v16 = vpack.c.bf16 %v5138_v4, %v5138_v4  ;;  %v13110_v60 = vpack.c.bf16 %v5141_v29, %v5141_v29 }
 0xc28   :  { %v4955_v54 = vpop.f32.mrf.mxu3 }
 0xc29   :  { %v5202_v49 = vunpack.c.l.bf16 %v13107_v16  ;;  %v4997_v21 = vadd.f32 %v4996_v51, %v4955_v54  ;;  %v5205_v9 = vunpack.c.l.bf16 %v13110_v60  ;;  %v5333_v51 = vunpack.c.l.bf16 %v13123_v31 }
 0xc2a   :  { %v4998_v37 = vpop.f32.mrf.mxu0 }
 0xc2b   :  { %v13115_v36 = vsub.f32 %v5138_v4, %v5202_v49  ;;  %v13117_v2 = vadd.f32 %v5037_v17, %v4997_v21  ;;  %v13121_v7 = vsub.f32 %v5141_v29, %v5205_v9  ;;  %v5330_v4 = vunpack.c.l.bf16 %v13119_v33 }
 0xc2c   :  { %v5085_v50 = vpop.permute.xlu0 %5084  ;;  %v5089_v47 = vpop.permute.xlu2 %5088  ;;  %v5432_v49 = vunpack.c.l.b16 %v5386_v63  ;;  %v5365_v55 = vsub.f32 %v5065_v57, %v5333_v51  ;;  %v5326_v57 = vunpack.c.l.bf16 %v13081_v59 }
 0xc2d   :  { %v5147_v1 = vmul.f32 0.35355338, %v5085_v50  ;;  %5070 = vrot.lane.b32.xlu2 %v13117_v2, %s10188_s20  ;;  %v5149_v38 = vmul.f32 0.35355338, %v5089_v47  ;;  %v5039_v21 = vpop.f32.mrf.mxu1  ;;  %v13138_v6 = vpack.c.bf16 %v5085_v50, %v5085_v50  ;;  %v5362_v13 = vsub.f32 %v5059_v10, %v5330_v4 }
 0xc2e   :  { %v13142_v44 = vpack.c.b16 %v5433_v30, %v5432_v49  ;;  %v13148_v63 = vpack.c.bf16 %v5089_v47, %v5089_v47  ;;  %v13178_v45 = vsub.f32 %v13056_v41, %v5326_v57 }
 0xc2f   :  { %v13127_v58 = vpack.c.bf16 %v5147_v1, %v5147_v1  ;;  %v13131_v8 = vpack.c.bf16 %v5149_v38, %v5149_v38  ;;  %v5339_v4 = vunpack.c.l.bf16 %v13138_v6 }
 0xc30   :  { %v4957_v29 = vpop.f32.mrf.mxu3  ;;  %15952 = vst [vmem:[#allocation46_spill] sm:$0xff] %v13142_v44 }
 0xc31   :  { %15950 = vst [vmem:[#allocation59_spill] sm:$0xff] %v13127_v58  ;;  %v5211_v17 = vunpack.c.l.bf16 %v13127_v58  ;;  %v4999_v54 = vadd.f32 %v4998_v37, %v4957_v29  ;;  %v5213_v9 = vunpack.c.l.bf16 %v13131_v8  ;;  %v5371_v46 = vsub.f32 %v5085_v50, %v5339_v4 }
 0xc32   :  { %15951 = vst [vmem:[#allocation38_spill] sm:$0xff] %v13131_v8 }
 0xc33   :  { %v13136_v42 = vsub.f32 %v5147_v1, %v5211_v17  ;;  %v13140_v19 = vadd.f32 %v5039_v21, %v4999_v54  ;;  %v13144_v32 = vsub.f32 %v5149_v38, %v5213_v9  ;;  %v13163_v38 = vsub.f32 %v13067_v40, %v5327_v11 }
 0xc34   :  { %v5063_v0 = vpop.permute.xlu1 %5062  ;;  %v13146_v37 = vpop.permute.xlu0 %5086  ;;  %v5394_v17 = vpack.c.bf16 %v5362_v13, %v5362_v13  ;;  %v5397_v54 = vpack.c.bf16 %v5365_v55, %v5365_v55  ;;  %v5341_v21 = vunpack.c.l.bf16 %v13148_v63  ;;  %v5266_v11 = vpack.c.bf16 %v13115_v36, %v13115_v36 }
 0xc35   :  { %5438 = vrot.lane.b32.xlu2 %v13142_v44, %s10189_s21  ;;  %5096 = vrot.lane.b32.xlu0 %v13140_v19, %s10187_s19  ;;  %v5140_v25 = vmul.f32 0.35355338, %v5063_v0  ;;  %v13154_v1 = vpack.c.bf16 %v5063_v0, %v5063_v0  ;;  %v13156_v30 = vpop.permute.xlu2 %5112  ;;  %v5148_v59 = vmul.f32 0.35355338, %v13146_v37 }
 0xc36   :  { %5072 = vrot.lane.b32.xlu1 %v13140_v19, %s10188_s20  ;;  %v5157_v10 = vmul.f32 0.35355338, %v13156_v30  ;;  %v5545_v56 = vunpack.c.l.b16 %v5397_v54  ;;  %v13194_v14 = vsub.f32 %v5089_v47, %v5341_v21  ;;  %v13201_v4 = vunpack.c.l.b16 %v5266_v11  ;;  %s9449_s20 = sshll.u32 %s15573_s5, 4  ;;  %s9450_s20 = int_to_ptr.hbm [resolvable:$true] %s9449_s20 }
 0xc37   :  { %v13166_v51 = vpack.c.bf16 %v5140_v25, %v5140_v25  ;;  %v5332_v29 = vunpack.c.l.bf16 %v13154_v1  ;;  %v13185_v26 = vpack.c.bf16 %v5148_v59, %v5148_v59  ;;  %v5403_v47 = vpack.c.bf16 %v5371_v46, %v5371_v46 }
 0xc38   :  { %v13169_v49 = vpack.c.bf16 %v5157_v10, %v5157_v10  ;;  %15955 = vst [vmem:[#allocation25_spill] sm:$0xff] %v13201_v4  ;;  %v5275_v11 = vpack.c.bf16 %v13136_v42, %v13136_v42 }
 0xc39   :  { %v5204_v9 = vunpack.c.l.bf16 %v13166_v51  ;;  %v5364_v39 = vsub.f32 %v5063_v0, %v5332_v29  ;;  %15954 = vst [vmem:[#allocation63_spill] sm:$0xff] %v13185_v26  ;;  %v13187_v0 = vunpack.c.l.b16 %v5394_v17  ;;  %v5212_v50 = vunpack.c.l.bf16 %v13185_v26 }
 0xc3a   :  { %15953 = vst [vmem:[#allocation60_spill] sm:$0xff] %v13169_v49  ;;  %v5221_v48 = vunpack.c.l.bf16 %v13169_v49  ;;  %v13222_v17 = vmul.f32 0.35355338, %v13117_v2  ;;  %v13236_v52 = vunpack.c.l.b16 %v5403_v47 }
 0xc3b   :  { %v13183_v22 = vsub.f32 %v5140_v25, %v5204_v9  ;;  %v5396_v55 = vpack.c.bf16 %v5364_v39, %v5364_v39  ;;  %v13208_v54 = vsub.f32 %v5148_v59, %v5212_v50  ;;  %v13215_v9 = vpack.c.bf16 %v13117_v2, %v13117_v2 }
 0xc3c   :  { %v13192_v27 = vsub.f32 %v5157_v10, %v5221_v48  ;;  %v5061_v57 = vpop.permute.xlu1 %5060  ;;  %v13228_v50 = vpack.c.bf16 %v13146_v37, %v13146_v37 }
 0xc3d   :  { %5092 = vrot.lane.b32.xlu0 %v13067_v40, %s10187_s19  ;;  %v13199_v25 = vpop.permute.xlu0 %5110  ;;  %v5139_v48 = vmul.f32 0.35355338, %v5061_v57  ;;  %v13206_v10 = vpack.c.bf16 %v5061_v57, %v5061_v57  ;;  %v13211_v21 = vpop.permute.xlu2 %5068  ;;  %v5544_v59 = vunpack.c.l.b16 %v5396_v55  ;;  %v5328_v55 = vunpack.c.l.bf16 %v13215_v9 }
 0xc3e   :  { %5106 = vrot.lane.b32.xlu1 %v13011_v34, %s10190_s22  ;;  %v5156_v39 = vmul.f32 0.35355338, %v13199_v25  ;;  %v5143_v12 = vmul.f32 0.35355338, %v13211_v21  ;;  %v5340_v47 = vunpack.c.l.bf16 %v13228_v50 }
 0xc3f   :  { %v13218_v36 = vpack.c.bf16 %v5139_v48, %v5139_v48  ;;  %v5331_v34 = vunpack.c.l.bf16 %v13206_v10  ;;  %v13254_v46 = vpack.c.b16 %v5545_v56, %v5544_v59  ;;  %v13272_v56 = vpack.c.bf16 %v13140_v19, %v13140_v19 }
 0xc40   :  { %v13230_v13 = vpack.c.bf16 %v5156_v39, %v5156_v39  ;;  %v13243_v44 = vpack.c.bf16 %v5143_v12, %v5143_v12  ;;  %v5360_v8 = vsub.f32 %v13117_v2, %v5328_v55 }
 0xc41   :  { %v5203_v29 = vunpack.c.l.bf16 %v13218_v36  ;;  %v5363_v5 = vsub.f32 %v5061_v57, %v5331_v34  ;;  %v13247_v57 = vpack.c.bf16 %v13156_v30, %v13156_v30  ;;  %15958 = vst [vmem:[#allocation14_spill] sm:$0xff] %v13254_v46  ;;  %5550 = vrot.lane.b32.xlu2 %v13254_v46, %s10189_s21 }
 0xc42   :  { %15956 = vst [vmem:[#allocation42_spill] sm:$0xff] %v13230_v13  ;;  %v5220_v24 = vunpack.c.l.bf16 %v13230_v13  ;;  %v13256_v13 = vunpack.c.l.b16 %v5275_v11 }
 0xc43   :  { %v5235_v35 = vsub.f32 %v5139_v48, %v5203_v29  ;;  %v5395_v49 = vpack.c.bf16 %v5363_v5, %v5363_v5  ;;  %15957 = vst [vmem:[#allocation39_spill] sm:$0xff] %v13243_v44  ;;  %v5207_v5 = vunpack.c.l.bf16 %v13243_v44  ;;  %v13263_v48 = vpack.c.bf16 %v13211_v21, %v13211_v21 }
 0xc44   :  { %v5083_v42 = vpop.permute.xlu1 %5082  ;;  %v13250_v34 = vsub.f32 %v5156_v39, %v5220_v24  ;;  %15959 = vst [vmem:[#allocation37_spill] sm:$0xff] %v13256_v13  ;;  %v5268_v24 = vpack.c.bf16 %v13183_v22, %v13183_v22  ;;  %v5372_v22 = vsub.f32 %v13146_v37, %v5340_v47  ;;  %v5329_v37 = vunpack.c.l.bf16 %v13272_v56 }
 0xc45   :  { %5120 = vrot.lane.b32.xlu0 %v13140_v19, %s10190_s22  ;;  %v5267_v29 = vpack.c.bf16 %v5235_v35, %v5235_v35  ;;  %v5543_v53 = vunpack.c.l.b16 %v5395_v49  ;;  %v5239_v11 = vsub.f32 %v5143_v12, %v5207_v5  ;;  %v5146_v59 = vmul.f32 0.35355338, %v5083_v42 }
 0xc46   :  { %5094 = vrot.lane.b32.xlu1 %v13117_v2, %s10187_s19  ;;  %v13276_v44 = vpack.c.bf16 %v5083_v42, %v5083_v42  ;;  %v5335_v26 = vunpack.c.l.bf16 %v13263_v48  ;;  %v13294_v47 = vunpack.c.l.b16 %v5268_v24  ;;  %v5941_v24 = vunpack.c.l.b16 %v13206_v10 }
 0xc47   :  { %v13274_v35 = vunpack.c.l.b16 %v5267_v29  ;;  %v5067_v49 = vpop.permute.xlu0 %5066  ;;  %v13285_v29 = vpack.c.bf16 %v5146_v59, %v5146_v59  ;;  %v13289_v5 = vpack.c.b16 %v5543_v53, %v13187_v0 }
 0xc48   :  { %v5338_v12 = vunpack.c.l.bf16 %v13276_v44  ;;  %v5142_v20 = vmul.f32 0.35355338, %v5067_v49  ;;  %v13291_v43 = vpack.c.bf16 %v5067_v49, %v5067_v49  ;;  %15963 = vst [vmem:[#allocation45_spill] sm:$0xff] %v13294_v47  ;;  %v5367_v58 = vsub.f32 %v13211_v21, %v5335_v26 }
 0xc49   :  { %15960 = vst [vmem:[#allocation47_spill] sm:$0xff] %v13274_v35  ;;  %v5210_v46 = vunpack.c.l.bf16 %v13285_v29  ;;  %v5404_v35 = vpack.c.bf16 %v5372_v22, %v5372_v22  ;;  %5548 = vrot.lane.b32.xlu2 %v13289_v5, %s10189_s21  ;;  %v13317_v26 = vpack.c.bf16 %v13199_v25, %v13199_v25 }
 0xc4a   :  { %15961 = vst [vmem:[#allocation17_spill] sm:$0xff] %v13285_v29  ;;  %v5370_v39 = vsub.f32 %v5083_v42, %v5338_v12  ;;  %v13302_v0 = vpack.c.bf16 %v5142_v20, %v5142_v20  ;;  %v5334_v28 = vunpack.c.l.bf16 %v13291_v43  ;;  %v5276_v42 = vpack.c.bf16 %v13208_v54, %v13208_v54 }
 0xc4b   :  { %15962 = vst [vmem:[#allocation20_spill] sm:$0xff] %v13289_v5  ;;  %v5242_v18 = vsub.f32 %v5146_v59, %v5210_v46  ;;  %v5361_v12 = vsub.f32 %v13140_v19, %v5329_v37  ;;  %v5392_v46 = vpack.c.bf16 %v5360_v8, %v5360_v8  ;;  %v5399_v29 = vpack.c.bf16 %v5367_v58, %v5367_v58 }
 0xc4c   :  { %v5441_v4 = vpop.permute.xlu1 %5440  ;;  %15964 = vst [vmem:[#allocation30_spill] sm:$0xff] %v13302_v0  ;;  %v5402_v55 = vpack.c.bf16 %v5370_v39, %v5370_v39  ;;  %v5366_v22 = vsub.f32 %v5067_v49, %v5334_v28  ;;  %v5654_v37 = vunpack.c.l.b16 %v5404_v35  ;;  %v6098_v8 = vunpack.c.l.b16 %v13317_v26 }
 0xc4d   :  { %5114 = vrot.lane.b32.xlu0 %v13056_v41, %s10190_s22  ;;  %v5452_v53 = vsel %vm842_vm11, %v5441_v4, 0  ;;  %v5206_v4 = vunpack.c.l.bf16 %v13302_v0  ;;  %v5274_v10 = vpack.c.bf16 %v5242_v18, %v5242_v18  ;;  %v5489_v61 = vunpack.c.l.b16 %v5392_v46 }
 0xc4e   :  { %5090 = vrot.lane.b32.xlu1 %v13056_v41, %s10187_s19  ;;  %5460 = vmatpush.bf16.xpose.msrb.mxu2 %v5452_v53  ;;  %v5652_v21 = vunpack.c.l.b16 %v5402_v55  ;;  %v5271_v41 = vpack.c.bf16 %v5239_v11, %v5239_v11  ;;  %v5398_v59 = vpack.c.bf16 %v5366_v22, %v5366_v22  ;;  %v5393_v53 = vpack.c.bf16 %v5361_v12, %v5361_v12 }
 0xc4f   :  { %v5238_v39 = vsub.f32 %v5142_v20, %v5206_v4  ;;  %v13319_v54 = vpop.permute.xlu0 %5108  ;;  %v13321_v5 = vunpack.c.l.b16 %v5274_v10  ;;  %v6018_v20 = vunpack.c.l.b16 %v13276_v44  ;;  %v5284_v35 = vpack.c.bf16 %v13250_v34, %v13250_v34 }
 0xc50   :  { %v13324_v28 = vpack.c.b16 %v13236_v52, %v5652_v21  ;;  %v5155_v49 = vmul.f32 0.35355338, %v13319_v54  ;;  %v5490_v18 = vunpack.c.l.b16 %v5393_v53  ;;  %v13333_v58 = vunpack.c.l.b16 %v5271_v41 }
 0xc51   :  { %15965 = vst [vmem:[#allocation26_spill] sm:$0xff] %v13321_v5  ;;  %v5270_v0 = vpack.c.bf16 %v5238_v39, %v5238_v39  ;;  %v5597_v4 = vunpack.c.l.b16 %v5398_v59  ;;  %v5598_v12 = vunpack.c.l.b16 %v5399_v29  ;;  %v5980_v44 = vunpack.c.l.b16 %v13263_v48 }
 0xc52   :  { %v13331_v55 = vpack.c.bf16 %v5155_v49, %v5155_v49  ;;  %15966 = vst [vmem:[#allocation43_spill] sm:$0xff] %v13333_v58  ;;  %v13337_v22 = vpack.c.b16 %v5490_v18, %v5489_v61  ;;  %v5979_v21 = vunpack.c.l.b16 %v13291_v43  ;;  %v15969_v34 = vunpack.c.l.b16 %v13123_v31 }
 0xc53   :  { %v13335_v52 = vunpack.c.l.b16 %v5270_v0  ;;  %v15968_v0 = vunpack.c.l.b16 %v13154_v1  ;;  %v5904_v48 = vunpack.c.l.b16 %v13272_v56  ;;  %v15971_v43 = vunpack.c.l.b16 %v13228_v50 }
 0xc54   :  { %v5219_v10 = vunpack.c.l.bf16 %v13331_v55  ;;  %5495 = vrot.lane.b32.xlu2 %v13337_v22, %s10189_s21  ;;  %v15972_v39 = vunpack.c.l.b16 %v13148_v63  ;;  %v15974_v1 = vunpack.c.l.b16 %v13138_v6  ;;  %v13375_v31 = vpack.c.b16 %v5598_v12, %v5597_v4 }
 0xc55   :  { %15967 = vst [vmem:[#allocation21_spill] sm:$0xff] %v13335_v52  ;;  %5658 = vrot.lane.b32.xlu0 %v13324_v28, %s10189_s21  ;;  %v13356_v29 = vpack.c.b16 %v15969_v34, %v15968_v0  ;;  %v15976_v56 = vunpack.c.l.b16 %v13215_v9  ;;  %v5137_v50 = vmul.f32 0.35355338, %v13140_v19  ;;  %v15980_v63 = vpack.c.bf16 %v13194_v14, %v13194_v14 }
 0xc56   :  { %5118 = vrot.lane.b32.xlu1 %v13117_v2, %s10190_s22  ;;  %v13359_v46 = vsub.f32 %v5155_v49, %v5219_v10  ;;  %v15970_v2 = vunpack.c.l.b16 %v13119_v33  ;;  %v13369_v59 = vpack.c.b16 %v15972_v39, %v15971_v43  ;;  %v13373_v53 = vpack.c.b16 %v15974_v1, %v6018_v20 }
 0xc57   :  { %v13379_v49 = vpack.c.b16 %v5904_v48, %v15976_v56  ;;  %v15978_v33 = vunpack.c.l.b16 %v13247_v57  ;;  %v5655_v18 = vunpack.c.l.b16 %v15980_v63  ;;  %v13389_v10 = vunpack.c.l.b16 %v5276_v42 }
 0xc58   :  { %v13363_v41 = vpack.c.b16 %v5941_v24, %v15970_v2  ;;  %15973 = vst [vmem:[#allocation29_spill] sm:$0xff] %v13369_v59  ;;  %v13391_v6 = vunpack.c.l.b16 %v5284_v35  ;;  %v5168_v20 = vpack.c.bf16 %v13222_v17, %v13222_v17  ;;  %v15983_v9 = vpack.c.bf16 %v13121_v7, %v13121_v7 }
 0xc59   :  { %15975 = vst [vmem:[#allocation22_spill] sm:$0xff] %v13373_v53  ;;  %v13383_v24 = vpack.c.b16 %v15978_v33, %v6098_v8  ;;  %v15985_v8 = vpack.c.bf16 %v13144_v32, %v13144_v32  ;;  %v13405_v12 = vpack.c.b16 %v5980_v44, %v5979_v21  ;;  %v5169_v14 = vpack.c.bf16 %v5137_v50, %v5137_v50 }
 0xc5a   :  { %15977 = vst [vmem:[#allocation6_spill] sm:$0xff] %v13379_v49  ;;  %v13398_v4 = vunpack.c.l.b16 %v15983_v9  ;;  %v15988_v42 = vpack.c.bf16 %v13192_v27, %v13192_v27  ;;  %v5348_v0 = vunpack.c.l.bf16 %v13317_v26  ;;  %v13413_v34 = vpack.c.b16 %v5655_v18, %v5654_v37 }
 0xc5b   :  { %15979 = vst [vmem:[#allocation9_spill] sm:$0xff] %v13383_v24  ;;  %v13403_v19 = vunpack.c.l.b16 %v15985_v8  ;;  %v5479_v7 = vunpack.c.l.b16 %v5168_v20  ;;  %v5480_v48 = vunpack.c.l.b16 %v5169_v14  ;;  %v5200_v44 = vunpack.c.l.bf16 %v5168_v20 }
 0xc5c   :  { %15981 = vst [vmem:[#allocation7_spill] sm:$0xff] %v13389_v10  ;;  %v13410_v35 = vunpack.c.l.b16 %v15988_v42  ;;  %v5201_v21 = vunpack.c.l.bf16 %v5169_v14  ;;  %v5349_v2 = vunpack.c.l.bf16 %v13247_v57  ;;  %v5390_v27 = vpack.c.bf16 %v13178_v45, %v13178_v45  ;;  %5116 = vrot.lane.b32.xlu2 %v13067_v40, %s10190_s22 }
 0xc5d   :  { %15982 = vst [vmem:[#allocation13_spill] sm:$0xff] %v13391_v6  ;;  %5603 = vrot.lane.b32.xlu0 %v13375_v31, %s10189_s21  ;;  %v13430_v43 = vpack.c.b16 %v5480_v48, %v5479_v7  ;;  %v5232_v39 = vsub.f32 %v13222_v17, %v5200_v44  ;;  %v5380_v1 = vsub.f32 %v13199_v25, %v5348_v0 }
 0xc5e   :  { %15984 = vst [vmem:[#allocation53_spill] sm:$0xff] %v13398_v4  ;;  %5660 = vrot.lane.b32.xlu1 %v13413_v34, %s10189_s21  ;;  %v5233_v57 = vsub.f32 %v5137_v50, %v5201_v21  ;;  %v15990_v56 = vpack.c.bf16 %v13163_v38, %v13163_v38  ;;  %v5381_v18 = vsub.f32 %v13156_v30, %v5349_v2  ;;  %v5487_v20 = vunpack.c.l.b16 %v5390_v27 }
 0xc5f   :  { %15986 = vst [vmem:[#allocation54_spill] sm:$0xff] %v13403_v19  ;;  %v5264_v33 = vpack.c.bf16 %v5232_v39, %v5232_v39  ;;  %v5412_v40 = vpack.c.bf16 %v5380_v1, %v5380_v1  ;;  %v5423_v27 = vunpack.c.l.b16 %v13038_v3  ;;  %v5422_v39 = vunpack.c.l.b16 %v13030_v62 }
 0xc60   :  { %15987 = vst [vmem:[#allocation10_spill] sm:$0xff] %v13405_v12  ;;  %v5488_v45 = vunpack.c.l.b16 %v15990_v56  ;;  %v5265_v63 = vpack.c.bf16 %v5233_v57, %v5233_v57  ;;  %v5413_v38 = vpack.c.bf16 %v5381_v18, %v5381_v18 }
 0xc61   :  { %15989 = vst [vmem:[#allocation33_spill] sm:$0xff] %v13410_v35  ;;  %v13438_v9 = vunpack.c.l.b16 %v5264_v33  ;;  %v5764_v17 = vunpack.c.l.b16 %v5412_v40  ;;  %v13462_v57 = vpack.c.b16 %v5423_v27, %v5422_v39 }
 0xc62   :  { %v13440_v8 = vunpack.c.l.b16 %v5265_v63  ;;  %v13442_v14 = vpack.c.b16 %v5488_v45, %v5487_v20  ;;  %v5765_v30 = vunpack.c.l.b16 %v5413_v38  ;;  %v13479_v38 = vpack.c.bf16 %v13319_v54, %v13319_v54 }
 0xc63   :  { %15991 = vst [vmem:[#allocation51_spill] sm:$0xff] %v13438_v9 }
 0xc64   :  { %15992 = vst [vmem:[#allocation55_spill] sm:$0xff] %v13440_v8  ;;  %v13450_v50 = vpack.c.b16 %v5765_v30, %v5764_v17  ;;  %v5347_v37 = vunpack.c.l.bf16 %v13479_v38 }
 0xc65   :  { %5870 = vrot.lane.b32.xlu0 %v13054_v23, %s10189_s21  ;;  %15993 = vst [vmem:[#allocation32_spill] sm:$0xff] %v13462_v57 }
 0xc66   :  { %5493 = vrot.lane.b32.xlu1 %v13442_v14, %s10189_s21 }
 0xc6e   :  { %5770 = vrot.lane.b32.xlu1 %v13450_v50, %s10189_s21 }
 0xc87   :  { %v5071_v42 = vpop.permute.xlu2 %5070 }
 0xc88   :  { %v5144_v0 = vmul.f32 0.35355338, %v5071_v42  ;;  %v13467_v45 = vpack.c.bf16 %v5071_v42, %v5071_v42 }
 0xc8a   :  { %v13454_v7 = vpack.c.bf16 %v5144_v0, %v5144_v0  ;;  %v5336_v33 = vunpack.c.l.bf16 %v13467_v45 }
 0xc8c   :  { %v5208_v48 = vunpack.c.l.bf16 %v13454_v7 }
 0xc8e   :  { %v13457_v44 = vsub.f32 %v5144_v0, %v5208_v48  ;;  %v5368_v0 = vsub.f32 %v5071_v42, %v5336_v33 }
 0xc8f   :  { %v5439_v21 = vpop.permute.xlu2 %5438 }
 0xc90   :  { %v5449_v2 = vsel %vm842_vm11, %v5439_v21, 0 }
 0xc91   :  { %5461 = vmatpush.bf16.xpose.msrb.mxu2 %v5449_v2  ;;  %v5533_v2 = vunpack.c.l.b16 %v13218_v36 }
 0xc98   :  { %9638 = vmatmul.msk.bf16.vlgmr.msrb.gmra.mxu2 %vm842_vm11, %v13462_v57 }
 0xc9b   :  { %v5551_v1 = vpop.permute.xlu2 %5550 }
 0xc9c   :  { %v5562_v56 = vsel %vm842_vm11, %v5551_v1, 0 }
 0xc9d   :  { %5570 = vmatpush.bf16.xpose.msra.mxu0 %v5562_v56  ;;  %v5532_v56 = vunpack.c.l.b16 %v13107_v16  ;;  %v5379_v16 = vsub.f32 %v13319_v54, %v5347_v37 }
 0xc9f   :  { %v13496_v61 = vpack.c.b16 %v5533_v2, %v5532_v56  ;;  %v5411_v56 = vpack.c.bf16 %v5379_v16, %v5379_v16 }
 0xca1   :  { %15995 = vst [vmem:[#allocation31_spill] sm:$0xff] %v13496_v61 }
 0xca3   :  { %v5549_v40 = vpop.permute.xlu2 %5548 }
 0xca4   :  { %v5559_v30 = vsel %vm842_vm11, %v5549_v40, 0  ;;  %v5400_v40 = vpack.c.bf16 %v5368_v0, %v5368_v0 }
 0xca5   :  { %5571 = vmatpush.bf16.xpose.msra.mxu0 %v5559_v30 }
 0xca7   :  { %v13470_v63 = vpop.permute.xlu0 %5096 }
 0xca8   :  { %v5073_v18 = vpop.permute.xlu1 %5072  ;;  %v5153_v3 = vmul.f32 0.35355338, %v13470_v63  ;;  %9639 = vmatmul.msk.bf16.gmra.mxu2 %vm842_vm11, %v13058_v15  ;;  %v13510_v2 = vpack.c.bf16 %v13470_v63, %v13470_v63 }
 0xca9   :  { %v5145_v62 = vmul.f32 0.35355338, %v5073_v18  ;;  %v13475_v20 = vpack.c.bf16 %v5073_v18, %v5073_v18 }
 0xcaa   :  { %v13481_v17 = vpack.c.bf16 %v5153_v3, %v5153_v3 }
 0xcab   :  { %v13484_v48 = vpack.c.bf16 %v5145_v62, %v5145_v62  ;;  %v5337_v21 = vunpack.c.l.bf16 %v13475_v20 }
 0xcac   :  { %15994 = vst [vmem:[#allocation8_spill] sm:$0xff] %v13481_v17  ;;  %v5217_v27 = vunpack.c.l.bf16 %v13481_v17  ;;  %9642 = vmatmul.msk.bf16.vlgmr.msra.gmra.mxu0 %vm842_vm11, %v13496_v61 }
 0xcad   :  { %v5209_v39 = vunpack.c.l.bf16 %v13484_v48  ;;  %v5369_v1 = vsub.f32 %v5073_v18, %v5337_v21 }
 0xcae   :  { %v13492_v26 = vsub.f32 %v5153_v3, %v5217_v27  ;;  %v5496_v18 = vpop.permute.xlu2 %5495  ;;  %v5599_v3 = vunpack.c.l.b16 %v5400_v40 }
 0xcaf   :  { %v13494_v42 = vsub.f32 %v5145_v62, %v5209_v39  ;;  %v5401_v33 = vpack.c.bf16 %v5369_v1, %v5369_v1  ;;  %v5093_v25 = vpop.permute.xlu0 %5092  ;;  %v5507_v39 = vsel %vm842_vm11, %v5496_v18, 0  ;;  %v5345_v18 = vunpack.c.l.bf16 %v13510_v2 }
 0xcb0   :  { %v5107_v30 = vpop.permute.xlu1 %5106  ;;  %v5151_v36 = vmul.f32 0.35355338, %v5093_v25  ;;  %5515 = vmatpush.bf16.xpose.msrb.mxu3 %v5507_v39  ;;  %v13526_v9 = vpack.c.bf16 %v5093_v25, %v5093_v25  ;;  %v5534_v39 = vunpack.c.l.b16 %v13166_v51 }
 0xcb1   :  { %v5600_v11 = vunpack.c.l.b16 %v5401_v33  ;;  %v5154_v32 = vmul.f32 0.35355338, %v5107_v30  ;;  %v13498_v6 = vpack.c.bf16 %v5107_v30, %v5107_v30  ;;  %v5283_v33 = vpack.c.bf16 %v13359_v46, %v13359_v46 }
 0xcb2   :  { %v13501_v21 = vpack.c.bf16 %v5151_v36, %v5151_v36 }
 0xcb3   :  { %v13505_v62 = vpack.c.bf16 %v5154_v32, %v5154_v32  ;;  %v5346_v0 = vunpack.c.l.bf16 %v13498_v6  ;;  %v13515_v1 = vpack.c.b16 %v5600_v11, %v5599_v3 }
 0xcb4   :  { %15996 = vst [vmem:[#allocation64_spill] sm:$0xff] %v13501_v21  ;;  %v5215_v27 = vunpack.c.l.bf16 %v13501_v21 }
 0xcb5   :  { %v5218_v54 = vunpack.c.l.bf16 %v13505_v62  ;;  %v5378_v37 = vsub.f32 %v5107_v30, %v5346_v0  ;;  %15997 = vst [vmem:[#allocation65_spill] sm:$0xff] %v13515_v1  ;;  %5605 = vrot.lane.b32.xlu2 %v13515_v1, %s10189_s21 }
 0xcb6   :  { %v13517_v40 = vsub.f32 %v5151_v36, %v5215_v27  ;;  %v13531_v46 = vpop.permute.xlu2 %5116 }
 0xcb7   :  { %v5250_v35 = vsub.f32 %v5154_v32, %v5218_v54  ;;  %v5410_v10 = vpack.c.bf16 %v5378_v37, %v5378_v37  ;;  %v13523_v19 = vpop.permute.xlu0 %5120  ;;  %v5763_v32 = vunpack.c.l.b16 %v5411_v56  ;;  %v13536_v54 = vunpack.c.l.b16 %v5283_v33 }
 0xcb8   :  { %v5095_v11 = vpop.permute.xlu1 %5094  ;;  %v5161_v30 = vmul.f32 0.35355338, %v13523_v19  ;;  %v5159_v56 = vmul.f32 0.35355338, %v13531_v46  ;;  %v5279_v17 = vpack.c.bf16 %v13517_v40, %v13517_v40 }
 0xcb9   :  { %v5282_v16 = vpack.c.bf16 %v5250_v35, %v5250_v35  ;;  %v5762_v36 = vunpack.c.l.b16 %v5410_v10  ;;  %v5152_v3 = vmul.f32 0.35355338, %v5095_v11  ;;  %v13529_v0 = vpack.c.bf16 %v5095_v11, %v5095_v11  ;;  %15999 = vst [vmem:[#allocation67_spill] sm:$0xff] %v13536_v54 }
 0xcba   :  { %v13533_v27 = vpack.c.bf16 %v5161_v30, %v5161_v30  ;;  %v5377_v10 = vsub.f32 %v13470_v63, %v5345_v18  ;;  %v5343_v35 = vunpack.c.l.bf16 %v13526_v9  ;;  %v13554_v47 = vpack.c.bf16 %v5159_v56, %v5159_v56 }
 0xcbb   :  { %v13538_v37 = vunpack.c.l.b16 %v5282_v16  ;;  %v13540_v8 = vpack.c.bf16 %v5152_v3, %v5152_v3  ;;  %v5344_v52 = vunpack.c.l.bf16 %v13529_v0  ;;  %v13550_v16 = vpack.c.b16 %v5763_v32, %v5762_v36 }
 0xcbc   :  { %15998 = vst [vmem:[#allocation66_spill] sm:$0xff] %v13533_v27  ;;  %v5225_v58 = vunpack.c.l.bf16 %v13533_v27  ;;  %v5535_v63 = vunpack.c.l.b16 %v13110_v60  ;;  %v5409_v15 = vpack.c.bf16 %v5377_v10, %v5377_v10  ;;  %v5375_v61 = vsub.f32 %v5093_v25, %v5343_v35 }
 0xcbd   :  { %16000 = vst [vmem:[#allocation68_spill] sm:$0xff] %v13538_v37  ;;  %v5216_v51 = vunpack.c.l.bf16 %v13540_v8  ;;  %v5376_v33 = vsub.f32 %v5095_v11, %v5344_v52  ;;  %5768 = vrot.lane.b32.xlu2 %v13550_v16, %s10189_s21  ;;  %v5223_v5 = vunpack.c.l.bf16 %v13554_v47  ;;  %v5281_v11 = vpack.c.bf16 %v13492_v26, %v13492_v26 }
 0xcbe   :  { %16001 = vst [vmem:[#allocation69_spill] sm:$0xff] %v13540_v8  ;;  %v13552_v13 = vsub.f32 %v5161_v30, %v5225_v58  ;;  %v13560_v52 = vpack.c.b16 %v5535_v63, %v5534_v39  ;;  %v5272_v58 = vpack.c.bf16 %v13457_v44, %v13457_v44  ;;  %v13568_v36 = vpack.c.bf16 %v13523_v19, %v13523_v19 }
 0xcbf   :  { %16002 = vst [vmem:[#allocation70_spill] sm:$0xff] %v13554_v47  ;;  %v5248_v18 = vsub.f32 %v5152_v3, %v5216_v51  ;;  %v5408_v4 = vpack.c.bf16 %v5376_v33, %v5376_v33  ;;  %v5115_v27 = vpop.permute.xlu0 %5114  ;;  %v5255_v3 = vsub.f32 %v5159_v56, %v5223_v5  ;;  %v5273_v25 = vpack.c.bf16 %v13494_v42, %v13494_v42 }
 0xcc0   :  { %v5091_v37 = vpop.permute.xlu1 %5090  ;;  %16003 = vst [vmem:[#allocation71_spill] sm:$0xff] %v13560_v52  ;;  %9643 = vmatmul.msk.bf16.gmra.mxu0 %vm842_vm11, %v13560_v52  ;;  %v5158_v44 = vmul.f32 0.35355338, %v5115_v27  ;;  %v13578_v10 = vpack.c.bf16 %v5115_v27, %v5115_v27  ;;  %v5710_v26 = vunpack.c.l.b16 %v5409_v15  ;;  %v13582_v35 = vpack.c.bf16 %v13531_v46, %v13531_v46 }
 0xcc1   :  { %v5150_v60 = vmul.f32 0.35355338, %v5091_v37  ;;  %v5709_v30 = vunpack.c.l.b16 %v5408_v4  ;;  %v13570_v32 = vpack.c.bf16 %v5091_v37, %v5091_v37  ;;  %v5407_v4 = vpack.c.bf16 %v5375_v61, %v5375_v61 }
 0xcc2   :  { %v13585_v56 = vunpack.c.l.b16 %v5272_v58  ;;  %v13587_v51 = vunpack.c.l.b16 %v5281_v11  ;;  %v13590_v42 = vpack.c.bf16 %v5158_v44, %v5158_v44  ;;  %v5353_v63 = vunpack.c.l.bf16 %v13568_v36 }
 0xcc3   :  { %v13576_v39 = vpack.c.bf16 %v5150_v60, %v5150_v60  ;;  %v5342_v5 = vunpack.c.l.bf16 %v13570_v32  ;;  %v5350_v15 = vunpack.c.l.bf16 %v13578_v10  ;;  %v13594_v61 = vpack.c.b16 %v5710_v26, %v5709_v30 }
 0xcc4   :  { %16005 = vst [vmem:[#allocation73_spill] sm:$0xff] %v13590_v42  ;;  %v13596_v52 = vunpack.c.l.b16 %v5273_v25  ;;  %v5222_v11 = vunpack.c.l.bf16 %v13590_v42  ;;  %v5708_v47 = vunpack.c.l.b16 %v5407_v4  ;;  %v5280_v57 = vpack.c.bf16 %v5248_v18, %v5248_v18 }
 0xcc5   :  { %16004 = vst [vmem:[#allocation72_spill] sm:$0xff] %v13576_v39  ;;  %v5214_v33 = vunpack.c.l.bf16 %v13576_v39  ;;  %v5374_v54 = vsub.f32 %v5091_v37, %v5342_v5  ;;  %v5351_v1 = vunpack.c.l.bf16 %v13582_v35  ;;  %5715 = vrot.lane.b32.xlu1 %v13594_v61, %s10189_s21  ;;  %v5287_v30 = vpack.c.bf16 %v5255_v3, %v5255_v3 }
 0xcc6   :  { %v5254_v25 = vsub.f32 %v5158_v44, %v5222_v11  ;;  %v5385_v39 = vsub.f32 %v13523_v19, %v5353_v63  ;;  %v13607_v42 = vunpack.c.l.b16 %v5279_v17  ;;  %v13613_v23 = vunpack.c.l.b16 %v5280_v57 }
 0xcc7   :  { %v5246_v58 = vsub.f32 %v5150_v60, %v5214_v33  ;;  %v5659_v8 = vpop.permute.xlu0 %5658  ;;  %v5406_v21 = vpack.c.bf16 %v5374_v54, %v5374_v54  ;;  %v5382_v60 = vsub.f32 %v5115_v27, %v5350_v15  ;;  %v5383_v3 = vsub.f32 %v13531_v46, %v5351_v1 }
 0xcc8   :  { %v5119_v37 = vpop.permute.xlu1 %5118  ;;  %v5286_v4 = vpack.c.bf16 %v5254_v25, %v5254_v25  ;;  %v13619_v19 = vunpack.c.l.b16 %v5287_v30  ;;  %v5417_v63 = vpack.c.bf16 %v5385_v39, %v5385_v39  ;;  %v6284_v57 = vpack.c.b16 %v13596_v52, %v13585_v56  ;;  %v16006_v25 = vld [vmem:[#allocation34_spill] sm:$0xff] }
 0xcc9   :  { %v5278_v26 = vpack.c.bf16 %v5246_v58, %v5246_v58  ;;  %v5160_v5 = vmul.f32 0.35355338, %v5119_v37  ;;  %v5707_v40 = vunpack.c.l.b16 %v5406_v21  ;;  %v13605_v33 = vpack.c.bf16 %v5119_v37, %v5119_v37 }
 0xcca   :  { %v13623_v17 = vunpack.c.l.b16 %v5286_v4  ;;  %v5414_v15 = vpack.c.bf16 %v5382_v60, %v5382_v60  ;;  %v5415_v30 = vpack.c.bf16 %v5383_v3, %v5383_v3  ;;  %v5820_v60 = vunpack.c.l.b16 %v5417_v63 }
 0xccb   :  { %v13609_v18 = vunpack.c.l.b16 %v5278_v26  ;;  %v13611_v54 = vpack.c.bf16 %v5160_v5, %v5160_v5  ;;  %v5352_v44 = vunpack.c.l.bf16 %v13605_v33  ;;  %v13617_v58 = vpack.c.b16 %v5708_v47, %v5707_v40 }
 0xccc   :  { %v5817_v4 = vunpack.c.l.b16 %v5414_v15  ;;  %v5818_v21 = vunpack.c.l.b16 %v5415_v30  ;;  %v5669_v30 = vsel %vm842_vm11, %v5659_v8, 0 }
 0xccd   :  { %v5224_v27 = vunpack.c.l.bf16 %v13611_v54  ;;  %v5384_v11 = vsub.f32 %v5119_v37, %v5352_v44  ;;  %5713 = vrot.lane.b32.xlu2 %v13617_v58, %s10189_s21  ;;  %5868 = vrot.lane.b32.xlu1 %v16006_v25, %s10189_s21 }
 0xccf   :  { %v5256_v1 = vsub.f32 %v5160_v5, %v5224_v27  ;;  %v13632_v46 = vpop.permute.xlu0 %5603  ;;  %v5416_v26 = vpack.c.bf16 %v5384_v11, %v5384_v11  ;;  %v13645_v5 = vpack.c.b16 %v5818_v21, %v5817_v4  ;;  %v16007_v21 = vld [vmem:[#allocation17_spill] sm:$0xff]  ;;  %v16009_v4 = vld [vmem:[#allocation59_spill] sm:$0xff] }
 0xcd0   :  { %v5661_v39 = vpop.permute.xlu1 %5660 }
 0xcd1   :  { %v5672_v40 = vsel %vm842_vm11, %v5661_v39, 0  ;;  %v5819_v44 = vunpack.c.l.b16 %v5416_v26  ;;  %v5288_v27 = vpack.c.bf16 %v5256_v1, %v5256_v1  ;;  %v5289_v26 = vpack.c.bf16 %v13552_v13, %v13552_v13  ;;  %v16008_v1 = vld [vmem:[#allocation62_spill] sm:$0xff] }
 0xcd2   :  { %5680 = vmatpush.bf16.xpose.msra.mxu2 %v5672_v40  ;;  %v5642_v39 = vunpack.c.l.b16 %v16007_v21  ;;  %v5478_v40 = vunpack.c.l.b16 %v16008_v1  ;;  %v16011_v21 = vld [vmem:[#allocation57_spill] sm:$0xff]  ;;  %v6096_v1 = vunpack.c.l.b16 %v13498_v6  ;;  %v6057_v6 = vunpack.c.l.b16 %v13570_v32 }
 0xcd3   :  { %v13639_v47 = vpack.c.b16 %v5820_v60, %v5819_v44  ;;  %v13659_v60 = vunpack.c.l.b16 %v5288_v27  ;;  %v5643_v44 = vunpack.c.l.b16 %v16009_v4 }
 0xcd5   :  { %5948 = vrot.lane.b32.xlu2 %v13356_v29, %s10189_s21  ;;  %5825 = vrot.lane.b32.xlu0 %v13639_v47, %s10189_s21  ;;  %v13669_v13 = vpack.c.b16 %v5643_v44, %v5642_v39  ;;  %v16014_v44 = vld [vmem:[#allocation38_spill] sm:$0xff] }
 0xcd6   :  { %5823 = vrot.lane.b32.xlu1 %v13645_v5, %s10189_s21 }
 0xcd7   :  { %v5871_v3 = vpop.permute.xlu0 %5870 }
 0xcd8   :  { %v5494_v63 = vpop.permute.xlu1 %5493  ;;  %v13650_v15 = vsel %vm842_vm11, %v5871_v3, 0  ;;  %v16010_v3 = vld [vmem:[#allocation58_spill] sm:$0xff] }
 0xcd9   :  { %v5504_v11 = vsel %vm842_vm11, %v5494_v63, 0  ;;  %v5477_v37 = vunpack.c.l.b16 %v16010_v3  ;;  %v13663_v63 = vunpack.c.l.b16 %v5289_v26  ;;  %v5982_v26 = vunpack.c.l.b16 %v13475_v20 }
 0xcda   :  { %5516 = vmatpush.bf16.xpose.msrb.mxu3 %v5504_v11  ;;  %5681 = vmatpush.bf16.xpose.msra.mxu2 %v5669_v30  ;;  %v6097_v20 = vunpack.c.l.b16 %v13479_v38  ;;  %v5645_v3 = vunpack.c.l.b16 %v16014_v44  ;;  %v6060_v38 = vunpack.c.l.b16 %v13510_v2  ;;  %v6135_v2 = vunpack.c.l.b16 %v13578_v10  ;;  %v16022_v10 = vld [vmem:[#allocation14_spill] sm:$0xff] }
 0xcdb   :  { %v13671_v8 = vpack.c.b16 %v5478_v40, %v5477_v37  ;;  %v6424_v11 = vpack.c.b16 %v13663_v63, %v13659_v60  ;;  %v5981_v37 = vunpack.c.l.b16 %v13467_v45  ;;  %v16013_v40 = vld [vmem:[#allocation63_spill] sm:$0xff] }
 0xcdc   :  { %v5644_v4 = vunpack.c.l.b16 %v16013_v40  ;;  %v13700_v45 = vpack.c.b16 %v6097_v20, %v6096_v1  ;;  %v6138_v1 = vunpack.c.l.b16 %v13568_v36  ;;  %v16023_v20 = vld [vmem:[#allocation20_spill] sm:$0xff] }
 0xcdd   :  { %5909 = vrot.lane.b32.xlu2 %v13379_v49, %s10189_s21  ;;  %5946 = vrot.lane.b32.xlu0 %v13363_v41, %s10189_s21  ;;  %v13688_v39 = vpack.c.b16 %v5982_v26, %v5981_v37  ;;  %v6058_v26 = vunpack.c.l.b16 %v13526_v9  ;;  %v6137_v37 = vunpack.c.l.b16 %v13605_v33  ;;  %v6136_v9 = vunpack.c.l.b16 %v13582_v35  ;;  %v16020_v33 = vld [vmem:[#allocation48_spill] sm:$0xff] }
 0xcde   :  { %6026 = vrot.lane.b32.xlu1 %v13369_v59, %s10189_s21  ;;  %16015 = vst [vmem:[#allocation17_spill] sm:$0xff] %v13700_v45 }
 0xcdf   :  { %16012 = vst [vmem:[#allocation34_spill] sm:$0xff] %v13688_v39  ;;  %v13724_v40 = vpack.c.b16 %v6138_v1, %v6137_v37  ;;  %v13730_v36 = vpack.c.b16 %v6136_v9, %v6135_v2  ;;  %v16028_v37 = vld [vmem:[#allocation36_spill] sm:$0xff] }
 0xce0   :  { %v5771_v27 = vpop.permute.xlu1 %5770 }
 0xce1   :  { %v5782_v30 = vsel %vm842_vm11, %v5771_v27, 0  ;;  %9640 = vmatmul.msk.bf16.vlgmr.msrb.gmra.mxu3 %vm842_vm11, %v13671_v8  ;;  %9646 = vmatmul.msk.bf16.vlgmr.msra.gmra.mxu2 %vm842_vm11, %v13669_v13  ;;  %v13702_v27 = vpack.c.b16 %v5645_v3, %v5644_v4  ;;  %16018 = vst [vmem:[#allocation58_spill] sm:$0xff] %v13724_v40  ;;  %v16021_v4 = vld [vmem:[#allocation46_spill] sm:$0xff] }
 0xce2   :  { %5884 = vmatpush.bf16.xpose.msrb.mxu2 %v13650_v15  ;;  %5790 = vmatpush.bf16.xpose.msrb.mxu0 %v5782_v30  ;;  %v6059_v30 = vunpack.c.l.b16 %v13529_v0  ;;  %v13716_v0 = vpack.c.b16 %v6058_v26, %v6057_v6  ;;  %16019 = vst [vmem:[#allocation63_spill] sm:$0xff] %v13730_v36  ;;  %v16025_v6 = vld [vmem:[#allocation39_spill] sm:$0xff] }
 0xce4   :  { %16016 = vst [vmem:[#allocation62_spill] sm:$0xff] %v13716_v0  ;;  %v13718_v32 = vpack.c.b16 %v6060_v38, %v6059_v30  ;;  %v5752_v30 = vunpack.c.l.b16 %v13505_v62  ;;  %v5753_v38 = vunpack.c.l.b16 %v13331_v55  ;;  %v5590_v62 = vunpack.c.l.b16 %v13484_v48 }
 0xce5   :  { %6024 = vrot.lane.b32.xlu2 %v13373_v53, %s10189_s21  ;;  %5907 = vrot.lane.b32.xlu0 %v16011_v21, %s10189_s21 }
 0xce6   :  { %5987 = vrot.lane.b32.xlu1 %v13688_v39, %s10189_s21  ;;  %16017 = vst [vmem:[#allocation59_spill] sm:$0xff] %v13718_v32 }
 0xced   :  { %5985 = vrot.lane.b32.xlu2 %v13405_v12, %s10189_s21  ;;  %6104 = vrot.lane.b32.xlu0 %v13383_v24, %s10189_s21 }
 0xcee   :  { %6102 = vrot.lane.b32.xlu1 %v13700_v45, %s10189_s21 }
 0xcf1   :  { %9641 = vmatmul.msk.bf16.gmra.mxu3 %vm842_vm11, %v13430_v43  ;;  %9647 = vmatmul.msk.bf16.gmra.mxu2 %vm842_vm11, %v13702_v27 }
 0xcf5   :  { %6063 = vrot.lane.b32.xlu2 %v13716_v0, %s10189_s21  ;;  %6065 = vrot.lane.b32.xlu0 %v13718_v32, %s10189_s21 }
 0xcf6   :  { %6143 = vrot.lane.b32.xlu1 %v13724_v40, %s10189_s21 }
 0xcfd   :  { %7070 = vrot.lane.b32.xlu2 %v16020_v33, %s10191_s23  ;;  %6141 = vrot.lane.b32.xlu0 %v13730_v36, %s10189_s21  ;;  %s10196_s21 = smov [#allocation2]  }
 0xcfe   :  { %7068 = vrot.lane.b32.xlu1 %v16021_v4, %s10191_s23  ;;  %s9447_s22 = sshll.u32 %s10196_s21, 4  ;;  %s9448_s22 = int_to_ptr.vmem [resolvable:$true] %s9447_s22 }
 0xd05   :  { %7232 = vrot.lane.b32.xlu2 %v13324_v28, %s10191_s23  ;;  %7152 = vrot.lane.b32.xlu0 %v16022_v10, %s10191_s23 }
 0xd06   :  { %7150 = vrot.lane.b32.xlu1 %v16023_v20, %s10191_s23 }
 0xd0d   :  { %7273 = vrot.lane.b32.xlu2 %v13617_v58, %s10191_s23  ;;  %7111 = vrot.lane.b32.xlu0 %v13337_v22, %s10191_s23  ;;  %v5614_v22 = vsel %vm842_vm11, %v13632_v46, 0 }
 0xd0e   :  { %7234 = vrot.lane.b32.xlu1 %v13413_v34, %s10191_s23  ;;  %v16024_v34 = vld [vmem:[#allocation30_spill] sm:$0xff] }
 0xd0f   :  { %v5606_v35 = vpop.permute.xlu2 %5605  ;;  %v5587_v3 = vunpack.c.l.b16 %v16024_v34 }
 0xd10   :  { %v5617_v44 = vsel %vm842_vm11, %v5606_v35, 0  ;;  %v16029_v35 = vld [vmem:[#allocation72_spill] sm:$0xff] }
 0xd11   :  { %5625 = vmatpush.bf16.xpose.msra.mxu1 %v5617_v44  ;;  %v16030_v44 = vld [vmem:[#allocation64_spill] sm:$0xff] }
 0xd15   :  { %7438 = vrot.lane.b32.xlu2 %v13356_v29, %s10191_s23  ;;  %7191 = vrot.lane.b32.xlu0 %v13375_v31, %s10191_s23  ;;  %v5588_v29 = vunpack.c.l.b16 %v16025_v6 }
 0xd16   :  { %7109 = vrot.lane.b32.xlu1 %v13442_v14, %s10191_s23  ;;  %v13770_v14 = vpack.c.b16 %v5753_v38, %v5752_v30  ;;  %v16032_v30 = vld [vmem:[#allocation32_spill] sm:$0xff] }
 0xd17   :  { %v5769_v28 = vpop.permute.xlu2 %5768  ;;  %v13768_v31 = vpack.c.b16 %v5588_v29, %v5587_v3 }
 0xd18   :  { %v5779_v58 = vsel %vm842_vm11, %v5769_v28, 0  ;;  %v5698_v28 = vunpack.c.l.b16 %v16030_v44 }
 0xd19   :  { %5626 = vmatpush.bf16.xpose.msra.mxu1 %v5614_v22  ;;  %5791 = vmatpush.bf16.xpose.msrb.mxu0 %v5779_v58  ;;  %v16031_v22 = vld [vmem:[#allocation65_spill] sm:$0xff] }
 0xd1d   :  { %7275 = vrot.lane.b32.xlu2 %v13594_v61, %s10191_s23  ;;  %7386 = vrot.lane.b32.xlu0 %v16006_v25, %s10191_s23  ;;  %v16026_v61 = vld [vmem:[#allocation42_spill] sm:$0xff]  ;;  %v5589_v25 = vunpack.c.l.b16 %v13454_v7 }
 0xd1e   :  { %7316 = vrot.lane.b32.xlu1 %v13450_v50, %s10191_s23  ;;  %v5754_v46 = vunpack.c.l.b16 %v16026_v61  ;;  %v16027_v50 = vld [vmem:[#allocation60_spill] sm:$0xff] }
 0xd1f   :  { %v5755_v26 = vunpack.c.l.b16 %v16027_v50  ;;  %v13788_v2 = vpack.c.b16 %v5590_v62, %v5589_v25  ;;  %v16033_v62 = vld [vmem:[#allocation73_spill] sm:$0xff]  ;;  %v16034_v25 = vld [vmem:[#allocation70_spill] sm:$0xff] }
 0xd20   :  { %9644 = vmatmul.msk.bf16.vlgmr.msra.gmra.mxu1 %vm842_vm11, %v13768_v31  ;;  %9650 = vmatmul.msk.bf16.vlgmr.msrb.gmra.mxu0 %vm842_vm11, %v13770_v14  ;;  %v5807_v61 = vunpack.c.l.b16 %v16033_v62  ;;  %v5808_v50 = vunpack.c.l.b16 %v16034_v25  ;;  %v16039_v62 = vld [vmem:[#allocation66_spill] sm:$0xff] }
 0xd21   :  { %v13790_v9 = vpack.c.b16 %v5755_v26, %v5754_v46  ;;  %v16035_v26 = vld [vmem:[#allocation69_spill] sm:$0xff] }
 0xd25   :  { %7357 = vrot.lane.b32.xlu2 %v13639_v47, %s10191_s23 }
 0xd26   :  { %7314 = vrot.lane.b32.xlu1 %v13550_v16, %s10191_s23 }
 0xd27   :  { %v5714_v55 = vpop.permute.xlu2 %5713 }
 0xd28   :  { %v5724_v4 = vsel %vm842_vm11, %v5714_v55, 0 }
 0xd2e   :  { %7388 = vrot.lane.b32.xlu1 %v16028_v37, %s10191_s23  ;;  %v5699_v37 = vunpack.c.l.b16 %v16035_v26 }
 0xd2f   :  { %v5949_v1 = vpop.permute.xlu2 %5948 }
 0xd30   :  { %v13793_v47 = vsel %vm842_vm11, %v5949_v1, 0  ;;  %9645 = vmatmul.msk.bf16.gmra.mxu1 %vm842_vm11, %v13788_v2  ;;  %9651 = vmatmul.msk.bf16.gmra.mxu0 %vm842_vm11, %v13790_v9 }
 0xd31   :  { %5962 = vmatpush.bf16.xpose.msra.mxu0 %v13793_v47 }
 0xd36   :  { %7355 = vrot.lane.b32.xlu1 %v13645_v5, %s10191_s23  ;;  %v5697_v5 = vunpack.c.l.b16 %v16029_v35  ;;  %v16037_v35 = vld [vmem:[#allocation31_spill] sm:$0xff] }
 0xd37   :  { %v5716_v7 = vpop.permute.xlu1 %5715  ;;  %v5910_v16 = vpop.permute.xlu2 %5909 }
 0xd38   :  { %v5727_v48 = vsel %vm842_vm11, %v5716_v7, 0  ;;  %v13808_v20 = vsel %vm842_vm11, %v5910_v16, 0  ;;  %v13815_v58 = vpack.c.b16 %v5698_v28, %v5697_v5  ;;  %v13828_v7 = vpack.c.b16 %v5808_v50, %v5807_v61 }
 0xd39   :  { %5735 = vmatpush.bf16.xpose.msra.mxu3 %v5727_v48  ;;  %v16036_v48 = vld [vmem:[#allocation8_spill] sm:$0xff]  ;;  %v5810_v61 = vunpack.c.l.b16 %v16039_v62 }
 0xd3a   :  { %v5700_v16 = vunpack.c.l.b16 %v16036_v48 }
 0xd3e   :  { %7436 = vrot.lane.b32.xlu1 %v13363_v41, %s10191_s23 }
 0xd3f   :  { %v5869_v33 = vpop.permute.xlu1 %5868  ;;  %v6025_v1 = vpop.permute.xlu2 %6024 }
 0xd40   :  { %v5873_v10 = vsel %vm842_vm11, %v5869_v33, 0 }
 0xd41   :  { %5736 = vmatpush.bf16.xpose.msra.mxu3 %v5724_v4  ;;  %5885 = vmatpush.bf16.xpose.msrb.mxu2 %v5873_v10  ;;  %v13831_v4 = vpack.c.b16 %v5700_v16, %v5699_v37 }
 0xd46   :  { %7193 = vrot.lane.b32.xlu1 %v16031_v22, %s10191_s23  ;;  %v16038_v22 = vld [vmem:[#allocation49_spill] sm:$0xff] }
 0xd47   :  { %v5826_v41 = vpop.permute.xlu0 %5825 }
 0xd48   :  { %v5837_v34 = vsel %vm842_vm11, %v5826_v41, 0  ;;  %v5824_v3 = vpop.permute.xlu1 %5823  ;;  %9648 = vmatmul.msk.bf16.vlgmr.msra.gmra.mxu3 %vm842_vm11, %v13815_v58  ;;  %9654 = vmatmul.msk.bf16.vlgmr.msrb.gmra.mxu2 %vm842_vm11, %v16032_v30  ;;  %v6029_v41 = vsel %vm842_vm11, %v6025_v1, 0 }
 0xd49   :  { %5923 = vmatpush.bf16.xpose.msrb.mxu3 %v13808_v20  ;;  %5845 = vmatpush.bf16.xpose.msrb.mxu1 %v5837_v34  ;;  %v5834_v29 = vsel %vm842_vm11, %v5824_v3, 0  ;;  %v5986_v34 = vpop.permute.xlu2 %5985 }
 0xd4f   :  { %v5947_v6 = vpop.permute.xlu0 %5946 }
 0xd50   :  { %v5951_v38 = vsel %vm842_vm11, %v5947_v6, 0  ;;  %v6027_v55 = vpop.permute.xlu1 %6026 }
 0xd51   :  { %5846 = vmatpush.bf16.xpose.msrb.mxu1 %v5834_v29  ;;  %5963 = vmatpush.bf16.xpose.msra.mxu0 %v5951_v38  ;;  %v6032_v46 = vsel %vm842_vm11, %v6027_v55, 0  ;;  %v5990_v29 = vsel %vm842_vm11, %v5986_v34, 0  ;;  %v5809_v55 = vunpack.c.l.b16 %v13611_v54  ;;  %v16047_v34 = vld [vmem:[#allocation41_spill] sm:$0xff] }
 0xd52   :  { %6040 = vmatpush.bf16.xpose.msra.mxu2 %v6032_v46 }
 0xd53   :  { %v13849_v25 = vpack.c.b16 %v5810_v61, %v5809_v55 }
 0xd57   :  { %v5908_v33 = vpop.permute.xlu0 %5907 }
 0xd58   :  { %9652 = vmatmul.msk.bf16.vlgmr.msrb.gmra.mxu1 %vm842_vm11, %v13828_v7  ;;  %9658 = vmatmul.msk.bf16.vlgmr.msra.gmra.mxu0 %vm842_vm11, %v16037_v35  ;;  %v5912_v5 = vsel %vm842_vm11, %v5908_v33, 0  ;;  %v5988_v44 = vpop.permute.xlu1 %5987 }
 0xd59   :  { %5924 = vmatpush.bf16.xpose.msrb.mxu3 %v5912_v5  ;;  %v5993_v28 = vsel %vm842_vm11, %v5988_v44, 0  ;;  %9655 = vmatmul.msk.bf16.gmra.mxu2 %vm842_vm11, %v16038_v22 }
 0xd5a   :  { %9649 = vmatmul.msk.bf16.gmra.mxu3 %vm842_vm11, %v13831_v4  ;;  %6001 = vmatpush.bf16.xpose.msra.mxu1 %v5993_v28 }
 0xd5b   :  { %6041 = vmatpush.bf16.xpose.msra.mxu2 %v6029_v41 }
 0xd5f   :  { %v6105_v3 = vpop.permute.xlu0 %6104 }
 0xd60   :  { %v6110_v30 = vsel %vm842_vm11, %v6105_v3, 0  ;;  %v6103_v6 = vpop.permute.xlu1 %6102  ;;  %v16048_v3 = vld [vmem:[#allocation40_spill] sm:$0xff] }
 0xd61   :  { %6118 = vmatpush.bf16.xpose.msrb.mxu0 %v6110_v30  ;;  %v6107_v37 = vsel %vm842_vm11, %v6103_v6, 0 }
 0xd62   :  { %6002 = vmatpush.bf16.xpose.msra.mxu1 %v5990_v29 }
 0xd63   :  { %6192 = vmatpush.bf16.xpose.msrb.mxu2 %v13650_v15  ;;  %v16040_v15 = vld [vmem:[#allocation71_spill] sm:$0xff] }
 0xd64   :  { %v13912_v55 = vpop.f32.mrf.mxu3 }
 0xd67   :  { %v6066_v50 = vpop.permute.xlu0 %6065 }
 0xd68   :  { %v6071_v26 = vsel %vm842_vm11, %v6066_v50, 0  ;;  %9653 = vmatmul.msk.bf16.gmra.mxu1 %vm842_vm11, %v13849_v25  ;;  %9659 = vmatmul.msk.bf16.gmra.mxu0 %vm842_vm11, %v16040_v15  ;;  %v6144_v1 = vpop.permute.xlu1 %6143  ;;  %v16052_v50 = vld [vmem:[#allocation45_spill] sm:$0xff] }
 0xd69   :  { %6079 = vmatpush.bf16.xpose.msra.mxu3 %v6071_v26  ;;  %6119 = vmatpush.bf16.xpose.msrb.mxu0 %v6107_v37  ;;  %v6149_v54 = vsel %vm842_vm11, %v6144_v1, 0  ;;  %v16054_v1 = vld [vmem:[#allocation56_spill] sm:$0xff] }
 0xd6a   :  { %9656 = vmatmul.msk.bf16.vlgmr.msrb.gmra.mxu3 %vm842_vm11, %v13671_v8  ;;  %9662 = vmatmul.msk.bf16.vlgmr.msra.gmra.mxu2 %vm842_vm11, %v13669_v13  ;;  %v13874_v8 = vpop.f32.mrf.mxu2 }
 0xd6b   :  { %6193 = vmatpush.bf16.xpose.msrb.mxu2 %v5873_v10  ;;  %6157 = vmatpush.bf16.xpose.msrb.mxu1 %v6149_v54  ;;  %v6064_v10 = vpop.permute.xlu2 %6063 }
 0xd6c   :  { %v6068_v33 = vsel %vm842_vm11, %v6064_v10, 0 }
 0xd6f   :  { %v6142_v48 = vpop.permute.xlu0 %6141 }
 0xd70   :  { %v6146_v16 = vsel %vm842_vm11, %v6142_v48, 0  ;;  %v7069_v35 = vpop.permute.xlu1 %7068  ;;  %v16057_v48 = vld [vmem:[#allocation37_spill] sm:$0xff] }
 0xd71   :  { %6262 = vmatpush.bf16.xpose.msra.mxu0 %v13793_v47  ;;  %6080 = vmatpush.bf16.xpose.msra.mxu3 %v6068_v33 }
 0xd73   :  { %6332 = vmatpush.bf16.xpose.msra.mxu2 %v6032_v46  ;;  %6158 = vmatpush.bf16.xpose.msrb.mxu1 %v6146_v16  ;;  %v13888_v46 = vpop.f32.mrf.mxu2 }
 0xd77   :  { %v7153_v44 = vpop.permute.xlu0 %7152 }
 0xd78   :  { %9660 = vmatmul.msk.bf16.vlgmr.msra.gmra.mxu1 %vm842_vm11, %v13768_v31  ;;  %9666 = vmatmul.msk.bf16.vlgmr.msrb.gmra.mxu0 %vm842_vm11, %v13770_v14  ;;  %v7151_v13 = vpop.permute.xlu1 %7150  ;;  %v13880_v14 = vpop.f32.mrf.mxu0 }
 0xd79   :  { %6227 = vmatpush.bf16.xpose.msrb.mxu3 %v13808_v20  ;;  %6263 = vmatpush.bf16.xpose.msra.mxu0 %v5951_v38  ;;  %v7071_v20 = vpop.permute.xlu2 %7070 }
 0xd7a   :  { %9657 = vmatmul.msk.bf16.gmra.mxu3 %vm842_vm11, %v13430_v43  ;;  %9663 = vmatmul.msk.bf16.gmra.mxu2 %vm842_vm11, %v13702_v27  ;;  %v16041_v43 = vld [vmem:[#allocation44_spill] sm:$0xff]  ;;  %v16042_v27 = vld [vmem:[#allocation35_spill] sm:$0xff] }
 0xd7b   :  { %6333 = vmatpush.bf16.xpose.msra.mxu2 %v6029_v41  ;;  %6297 = vmatpush.bf16.xpose.msra.mxu1 %v5993_v28  ;;  %v16043_v38 = vpack.c.b16 %v16041_v43, %v16042_v27  ;;  %v16045_v28 = vld [vmem:[#allocation25_spill] sm:$0xff] }
 0xd80   :  { %v7235_v47 = vpop.permute.xlu1 %7234 }
 0xd81   :  { %6402 = vmatpush.bf16.xpose.msrb.mxu0 %v6110_v30  ;;  %6228 = vmatpush.bf16.xpose.msrb.mxu3 %v5912_v5  ;;  %v13892_v5 = vpop.f32.mrf.mxu2  ;;  %v16049_v30 = vpack.c.b16 %v16047_v34, %v16048_v3 }
 0xd83   :  { %6298 = vmatpush.bf16.xpose.msra.mxu1 %v5990_v29 }
 0xd88   :  { %9661 = vmatmul.msk.bf16.gmra.mxu1 %vm842_vm11, %v13788_v2  ;;  %9667 = vmatmul.msk.bf16.gmra.mxu0 %vm842_vm11, %v13790_v9  ;;  %v7110_v31 = vpop.permute.xlu1 %7109  ;;  %v13890_v9 = vpop.f32.mrf.mxu0 }
 0xd89   :  { %6403 = vmatpush.bf16.xpose.msrb.mxu0 %v6107_v37  ;;  %v7112_v37 = vpop.permute.xlu0 %7111 }
 0xd8a   :  { %9664 = vmatmul.msk.bf16.vlgmr.msra.gmra.mxu3 %vm842_vm11, %v13815_v58  ;;  %9670 = vmatmul.msk.bf16.vlgmr.msrb.gmra.mxu2 %vm842_vm11, %v16043_v38  ;;  %v16044_v58 = vld [vmem:[#allocation47_spill] sm:$0xff] }
 0xd8b   :  { %6367 = vmatpush.bf16.xpose.msra.mxu3 %v6071_v26  ;;  %7086 = vmatpush.bf16.msrb.mxu2 %v7071_v20  ;;  %v16046_v22 = vpack.c.b16 %v16044_v58, %v16045_v28  ;;  %v16062_v58 = vld [vmem:[#allocation21_spill] sm:$0xff] }
 0xd8f   :  { %7087 = vmatpush.bf16.msrb.mxu2 %v7069_v35  ;;  %v13932_v35 = vpop.f32.mrf.mxu3 }
 0xd90   :  { %v7317_v2 = vpop.permute.xlu1 %7316  ;;  %v13906_v6 = vpop.f32.mrf.mxu0 }
 0xd93   :  { %6368 = vmatpush.bf16.xpose.msra.mxu3 %v6068_v33 }
 0xd98   :  { %9668 = vmatmul.msk.bf16.vlgmr.msrb.gmra.mxu1 %vm842_vm11, %v13828_v7  ;;  %9674 = vmatmul.msk.bf16.vlgmr.msra.gmra.mxu0 %vm842_vm11, %v16046_v22  ;;  %v7315_v41 = vpop.permute.xlu1 %7314  ;;  %v13908_v7 = vpop.f32.mrf.mxu2  ;;  %v16065_v22 = vld [vmem:[#allocation68_spill] sm:$0xff] }
 0xd99   :  { %6437 = vmatpush.bf16.xpose.msrb.mxu1 %v6149_v54  ;;  %7168 = vmatpush.bf16.msra.mxu0 %v7153_v44  ;;  %v13916_v61 = vpop.f32.mrf.mxu0  ;;  %v16055_v54 = vld [vmem:[#allocation61_spill] sm:$0xff]  ;;  %v16061_v44 = vld [vmem:[#allocation43_spill] sm:$0xff] }
 0xd9a   :  { %9665 = vmatmul.msk.bf16.gmra.mxu3 %vm842_vm11, %v13831_v4  ;;  %9671 = vmatmul.msk.bf16.gmra.mxu2 %vm842_vm11, %v16049_v30  ;;  %v16051_v4 = vld [vmem:[#allocation53_spill] sm:$0xff]  ;;  %v16056_v10 = vpack.c.b16 %v16054_v1, %v16055_v54  ;;  %v16063_v28 = vpack.c.b16 %v16061_v44, %v16062_v58  ;;  %v16071_v1 = vld [vmem:[#allocation7_spill] sm:$0xff] }
 0xd9b   :  { %v16053_v26 = vpack.c.b16 %v16051_v4, %v16052_v50  ;;  %v16067_v4 = vld [vmem:[#allocation55_spill] sm:$0xff] }
 0xd9c   :  { %v16068_v50 = vld [vmem:[#allocation51_spill] sm:$0xff] }
 0xd9d   :  { %7169 = vmatpush.bf16.msra.mxu0 %v7151_v13  ;;  %v13934_v13 = vpop.f32.mrf.mxu1 }
 0xda0   :  { %v13910_v29 = vpop.permute.xlu1 %7388  ;;  %v13914_v62 = vpop.f32.mrf.mxu2 }
 0xda1   :  { %16050 = vst [vmem:[#allocation38_spill] sm:$0xff] %v13910_v29  ;;  %6438 = vmatpush.bf16.xpose.msrb.mxu1 %v6146_v16  ;;  %v16058_v16 = vld [vmem:[#allocation26_spill] sm:$0xff]  ;;  %v13936_v20 = vpop.f32.mrf.mxu0 }
 0xda2   :  { %v16059_v33 = vpack.c.b16 %v16057_v48, %v16058_v16 }
 0xda5   :  { %v13950_v3 = vpop.f32.mrf.mxu1 }
 0xda8   :  { %9669 = vmatmul.msk.bf16.gmra.mxu1 %vm842_vm11, %v13849_v25  ;;  %9675 = vmatmul.msk.bf16.gmra.mxu0 %vm842_vm11, %v16053_v26  ;;  %v7356_v15 = vpop.permute.xlu1 %7355  ;;  %v7233_v25 = vpop.permute.xlu2 %7232  ;;  %v16069_v26 = vpack.c.b16 %v16067_v4, %v16068_v50 }
 0xda9   :  { %v13938_v43 = vpop.f32.mrf.mxu2  ;;  %v13952_v30 = vpop.f32.mrf.mxu0 }
 0xdaa   :  { %9672 = vmatmul.msk.bf16.vlgmr.msrb.gmra.mxu3 %vm842_vm11, %v16056_v10  ;;  %9678 = vmatmul.msk.bf16.vlgmr.msra.gmra.mxu2 %vm842_vm11, %v16059_v33  ;;  %v13962_v10 = vpop.f32.mrf.mxu3 }
 0xdab   :  { %7127 = vmatpush.bf16.msrb.mxu3 %v7112_v37  ;;  %7250 = vmatpush.bf16.msra.mxu2 %v7235_v47  ;;  %v16064_v47 = vld [vmem:[#allocation67_spill] sm:$0xff]  ;;  %v16070_v37 = vld [vmem:[#allocation54_spill] sm:$0xff] }
 0xdac   :  { %v16066_v34 = vpack.c.b16 %v16064_v47, %v16065_v22  ;;  %v16072_v54 = vpack.c.b16 %v16070_v37, %v16071_v1  ;;  %v16075_v47 = vld [vmem:[#allocation13_spill] sm:$0xff] }
 0xdad   :  { %v13968_v33 = vpop.f32.mrf.mxu1 }
 0xdaf   :  { %7128 = vmatpush.bf16.msrb.mxu3 %v7110_v31  ;;  %7251 = vmatpush.bf16.msra.mxu2 %v7233_v25 }
 0xdb0   :  { %v13940_v27 = vpop.permute.xlu1 %7436  ;;  %v7274_v38 = vpop.permute.xlu2 %7273 }
 0xdb1   :  { %16060 = vst [vmem:[#allocation48_spill] sm:$0xff] %v13940_v27  ;;  %v13964_v48 = vpop.f32.mrf.mxu2  ;;  %v13970_v25 = vpop.f32.mrf.mxu0 }
 0xdb2   :  { %v13972_v44 = vpop.f32.mrf.mxu3 }
 0xdb5   :  { %v13988_v50 = vpop.f32.mrf.mxu1 }
 0xdb8   :  { %9676 = vmatmul.msk.bf16.vlgmr.msra.gmra.mxu1 %vm842_vm11, %v16063_v28  ;;  %9682 = vmatmul.msk.bf16.vlgmr.msrb.gmra.mxu0 %vm842_vm11, %v16066_v34  ;;  %v7194_v31 = vpop.permute.xlu1 %7193  ;;  %v13966_v16 = vpop.permute.xlu2 %7438  ;;  %v16074_v28 = vld [vmem:[#allocation33_spill] sm:$0xff]  ;;  %v16077_v34 = vpack.c.b16 %v13607_v42, %v13609_v18  ;;  %v16078_v42 = vpack.c.b16 %v13619_v19, %v13623_v17  ;;  %v16079_v18 = vpack.c.b16 %v13587_v51, %v13613_v23 }
 0xdb9   :  { %7332 = vmatpush.bf16.msrb.mxu0 %v7317_v2  ;;  %7209 = vmatpush.bf16.msra.mxu1 %v7194_v31  ;;  %v7192_v2 = vpop.permute.xlu0 %7191  ;;  %16073 = vst [vmem:[#allocation46_spill] sm:$0xff] %v13966_v16  ;;  %v13974_v58 = vpop.f32.mrf.mxu2 }
 0xdba   :  { %9673 = vmatmul.msk.bf16.gmra.mxu3 %vm842_vm11, %v16069_v26  ;;  %9679 = vmatmul.msk.bf16.gmra.mxu2 %vm842_vm11, %v16072_v54  ;;  %v13990_v26 = vpop.f32.mrf.mxu0 }
 0xdbd   :  { %7333 = vmatpush.bf16.msrb.mxu0 %v7315_v41  ;;  %7210 = vmatpush.bf16.msra.mxu1 %v7192_v2  ;;  %v16076_v41 = vpack.c.b16 %v16074_v28, %v16075_v47 }
 0xdc0   :  { %v7276_v22 = vpop.permute.xlu2 %7275 }
 0xdc8   :  { %9677 = vmatmul.msk.bf16.gmra.mxu1 %vm842_vm11, %v6284_v57  ;;  %9683 = vmatmul.msk.bf16.gmra.mxu0 %vm842_vm11, %v16076_v41  ;;  %v7358_v1 = vpop.permute.xlu2 %7357 }
 0xdca   :  { %9680 = vmatmul.msk.bf16.vlgmr.msra.gmra.mxu3 %vm842_vm11, %v16077_v34 }
 0xdcb   :  { %7291 = vmatpush.bf16.msra.mxu3 %v7276_v22  ;;  %v5738_v31 = vpop.f32.mrf.mxu3  ;;  %v5887_v4 = vpop.f32.mrf.mxu2 }
 0xdcc   :  { %v5888_v32 = vadd.f32 %v5887_v4, %v13874_v8 }
 0xdcf   :  { %7292 = vmatpush.bf16.msra.mxu3 %v7274_v38 }
 0xdd3   :  { %v13992_v52 = vpop.f32.mrf.mxu3  ;;  %v5889_v56 = vpop.f32.mrf.mxu2 }
 0xdd4   :  { %v5890_v21 = vadd.f32 %v5889_v56, %v13888_v46 }
 0xdd5   :  { %v5848_v57 = vpop.f32.mrf.mxu1  ;;  %v13994_v37 = vpop.f32.mrf.mxu0 }
 0xdd8   :  { %9684 = vmatmul.msk.bf16.vlgmr.msrb.gmra.mxu1 %vm842_vm11, %v16078_v42 }
 0xdd9   :  { %7373 = vmatpush.bf16.msrb.mxu1 %v7358_v1 }
 0xdda   :  { %9681 = vmatmul.msk.bf16.gmra.mxu3 %vm842_vm11, %v16079_v18 }
 0xddc   :  { %v5892_v38 = vpop.f32.mrf.mxu2 }
 0xddd   :  { %v5743_v54 = vpop.f32.mrf.mxu3  ;;  %7374 = vmatpush.bf16.msrb.mxu1 %v7356_v15  ;;  %v14004_v2 = vpop.f32.mrf.mxu1 }
 0xdde   :  { %v5967_v28 = vpop.f32.mrf.mxu0 }
 0xde4   :  { %v5894_v41 = vpop.f32.mrf.mxu2 }
 0xde5   :  { %v14006_v47 = vpop.f32.mrf.mxu3  ;;  %v14008_v22 = vpop.f32.mrf.mxu1 }
 0xde6   :  { %16080 = vst [vmem:[#allocation14_spill] sm:$0xff] %v14008_v22  ;;  %v5970_v19 = vpop.f32.mrf.mxu0 }
 0xde8   :  { %9685 = vmatmul.msk.bf16.gmra.mxu1 %vm842_vm11, %v6424_v11 }
 0xded   :  { %v14014_v23 = vpop.f32.mrf.mxu3  ;;  %v6043_v51 = vpop.f32.mrf.mxu2 }
 0xdee   :  { %v14016_v17 = vpop.f32.mrf.mxu1  ;;  %v14018_v15 = vpop.f32.mrf.mxu0 }
 0xdef   :  { %16081 = vst [vmem:[#allocation20_spill] sm:$0xff] %v14016_v17 }
 0xdf5   :  { %v14020_v34 = vpop.f32.mrf.mxu3  ;;  %v14022_v1 = vpop.f32.mrf.mxu2 }
 0xdf6   :  { %v14024_v42 = vpop.f32.mrf.mxu1  ;;  %v14026_v18 = vpop.f32.mrf.mxu0 }
 0xdfd   :  { %v14028_v40 = vpop.f32.mrf.mxu3  ;;  %v14030_v60 = vpop.f32.mrf.mxu2 }
 0xdfe   :  { %v14032_v63 = vpop.f32.mrf.mxu1  ;;  %v14034_v11 = vpop.f32.mrf.mxu0 }
 0xe05   :  { %v14036_v45 = vpop.f32.mrf.mxu3  ;;  %v14038_v0 = vpop.f32.mrf.mxu2 }
 0xe06   :  { %v14040_v12 = vpop.f32.mrf.mxu1  ;;  %v14042_v36 = vpop.f32.mrf.mxu0 }
 0xe07   :  { %16082 = vst [vmem:[#allocation30_spill] sm:$0xff] %v14040_v12 }
 0xe0d   :  { %v6082_v27 = vpop.f32.mrf.mxu3  ;;  %v6195_v24 = vpop.f32.mrf.mxu2 }
 0xe0e   :  { %v14045_v16 = vadd.f32 %v6082_v27, %v5738_v31  ;;  %v14047_v39 = vadd.f32 %v6195_v24, %v5888_v32  ;;  %v14049_v59 = vpop.f32.mrf.mxu1  ;;  %v14051_v53 = vpop.f32.mrf.mxu0  ;;  %v5893_v32 = vadd.f32 %v5892_v38, %v13892_v5 }
 0xe10   :  { %16083 = vst [vmem:[#allocation39_spill] sm:$0xff] %v14047_v39  ;;  %v6482_v29 = vsel %vm55_vm0, %v14047_v39, -inf  ;;  %v5968_v39 = vadd.f32 %v5967_v28, %v13890_v9  ;;  %v5895_v9 = vadd.f32 %v5894_v41, %v13908_v7  ;;  %v6044_v7 = vadd.f32 %v6043_v51, %v13914_v62 }
 0xe11   :  { %6483 = vmax.xlane.f32.xlu2 %v6482_v29  ;;  %v6046_v62 = vadd.f32 %v14022_v1, %v13938_v43  ;;  %v6049_v43 = vadd.f32 %v14030_v60, %v13964_v48  ;;  %v5929_v48 = vadd.f32 %v14020_v34, %v13932_v35  ;;  %v5932_v35 = vadd.f32 %v14028_v40, %v13962_v10 }
 0xe15   :  { %v14056_v49 = vpop.f32.mrf.mxu3  ;;  %v6197_v17 = vpop.f32.mrf.mxu2 }
 0xe16   :  { %v14058_v8 = vadd.f32 %v6197_v17, %v5890_v21  ;;  %v6160_v4 = vpop.f32.mrf.mxu1  ;;  %v6265_v27 = vpop.f32.mrf.mxu0  ;;  %v6085_v10 = vadd.f32 %v14056_v49, %v13992_v52  ;;  %v6127_v52 = vadd.f32 %v14042_v36, %v13970_v25  ;;  %v6129_v36 = vadd.f32 %v14051_v53, %v13990_v26 }
 0xe17   :  { %v14060_v31 = vadd.f32 %v6160_v4, %v5848_v57 }
 0xe18   :  { %v6485_v24 = vsel %vm55_vm0, %v14058_v8, -inf }
 0xe19   :  { %6486 = vmax.xlane.f32.xlu1 %v6485_v24 }
 0xe1d   :  { %v6087_v29 = vpop.f32.mrf.mxu3  ;;  %v6200_v22 = vpop.f32.mrf.mxu2 }
 0xe1e   :  { %v14066_v46 = vadd.f32 %v6087_v29, %v5743_v54  ;;  %v14068_v56 = vadd.f32 %v6200_v22, %v5893_v32  ;;  %v14070_v21 = vpop.f32.mrf.mxu1  ;;  %v6267_v17 = vpop.f32.mrf.mxu0  ;;  %v5971_v54 = vadd.f32 %v5970_v19, %v13906_v6  ;;  %v5966_v6 = vadd.f32 %v13994_v37, %v13880_v14 }
 0xe1f   :  { %v14072_v12 = vadd.f32 %v6267_v17, %v5968_v39  ;;  %v5973_v14 = vadd.f32 %v14018_v15, %v13916_v61  ;;  %v5927_v61 = vadd.f32 %v14014_v23, %v13912_v55  ;;  %v6122_v55 = vadd.f32 %v14026_v18, %v13936_v20 }
 0xe20   :  { %v6488_v57 = vsel %vm55_vm0, %v14068_v56, -inf  ;;  %v14095_v41 = vadd.f32 %v6265_v27, %v5966_v6  ;;  %v6051_v23 = vadd.f32 %v14038_v0, %v13974_v58  ;;  %v5934_v58 = vadd.f32 %v14036_v45, %v13972_v44 }
 0xe21   :  { %6489 = vmax.xlane.f32.xlu1 %v6488_v57  ;;  %v6509_v5 = vsel %vm55_vm0, %v14072_v12, -inf  ;;  %v6124_v18 = vadd.f32 %v14034_v11, %v13952_v30  ;;  %v6005_v30 = vadd.f32 %v14024_v42, %v13934_v13  ;;  %v6007_v13 = vadd.f32 %v14032_v63, %v13950_v3 }
 0xe22   :  { %6510 = vmax.xlane.f32.xlu2 %v6509_v5  ;;  %v6163_v25 = vadd.f32 %v14070_v21, %v14004_v2 }
 0xe25   :  { %v14080_v38 = vpop.f32.mrf.mxu3  ;;  %v6202_v28 = vpop.f32.mrf.mxu2 }
 0xe26   :  { %v14082_v22 = vadd.f32 %v6202_v28, %v5895_v9  ;;  %v14084_v4 = vpop.f32.mrf.mxu1  ;;  %v6270_v39 = vpop.f32.mrf.mxu0 }
 0xe27   :  { %v14086_v24 = vadd.f32 %v6270_v39, %v5971_v54  ;;  %v6506_v54 = vsel %vm55_vm0, %v14095_v41, -inf }
 0xe28   :  { %v6491_v32 = vsel %vm55_vm0, %v14082_v22, -inf }
 0xe29   :  { %6492 = vmax.xlane.f32.xlu0 %v6491_v32  ;;  %v6512_v29 = vsel %vm55_vm0, %v14086_v24, -inf }
 0xe2a   :  { %6513 = vmax.xlane.f32.xlu2 %v6512_v29 }
 0xe2d   :  { %v6230_v19 = vpop.f32.mrf.mxu3  ;;  %v6335_v17 = vpop.f32.mrf.mxu2 }
 0xe2e   :  { %v14097_v57 = vadd.f32 %v6335_v17, %v6044_v7  ;;  %v14099_v5 = vpop.f32.mrf.mxu1  ;;  %v6272_v28 = vpop.f32.mrf.mxu0  ;;  %v14121_v15 = vadd.f32 %v6230_v19, %v5927_v61 }
 0xe2f   :  { %v14109_v37 = vadd.f32 %v6272_v28, %v5973_v14 }
 0xe30   :  { %v6530_v9 = vsel %vm55_vm0, %v14097_v57, -inf  ;;  %v6494_v14 = vsel %vm55_vm0, %v14121_v15, -inf }
 0xe31   :  { %6531 = vmax.xlane.f32.xlu1 %v6530_v9  ;;  %6507 = vmax.xlane.f32.xlu0 %v6506_v54  ;;  %v6515_v6 = vsel %vm55_vm0, %v14109_v37, -inf }
 0xe35   :  { %v6232_v51 = vpop.f32.mrf.mxu3  ;;  %v6337_v27 = vpop.f32.mrf.mxu2 }
 0xe36   :  { %v14111_v39 = vadd.f32 %v6337_v27, %v6046_v62  ;;  %v6300_v32 = vpop.f32.mrf.mxu1  ;;  %v6405_v54 = vpop.f32.mrf.mxu0  ;;  %v14137_v19 = vadd.f32 %v6232_v51, %v5929_v48 }
 0xe37   :  { %v14135_v60 = vadd.f32 %v6405_v54, %v6122_v55  ;;  %v14174_v11 = vadd.f32 %v6300_v32, %v6005_v30 }
 0xe38   :  { %v6533_v29 = vsel %vm55_vm0, %v14111_v39, -inf  ;;  %v6497_v0 = vsel %vm55_vm0, %v14137_v19, -inf }
 0xe39   :  { %6534 = vmax.xlane.f32.xlu0 %v6533_v29  ;;  %6516 = vmax.xlane.f32.xlu1 %v6515_v6  ;;  %v6554_v20 = vsel %vm55_vm0, %v14135_v60, -inf  ;;  %v6518_v49 = vsel %vm55_vm0, %v14174_v11, -inf }
 0xe3d   :  { %v6235_v1 = vpop.f32.mrf.mxu3  ;;  %v6340_v7 = vpop.f32.mrf.mxu2 }
 0xe3e   :  { %v14123_v17 = vadd.f32 %v6340_v7, %v6049_v43  ;;  %v6302_v9 = vpop.f32.mrf.mxu1  ;;  %v6407_v34 = vpop.f32.mrf.mxu0  ;;  %v14155_v51 = vadd.f32 %v6235_v1, %v5932_v35 }
 0xe3f   :  { %v14159_v7 = vadd.f32 %v6407_v34, %v6124_v18  ;;  %v14190_v42 = vadd.f32 %v6302_v9, %v6007_v13 }
 0xe40   :  { %v6536_v28 = vsel %vm55_vm0, %v14123_v17, -inf }
 0xe41   :  { %6537 = vmax.xlane.f32.xlu2 %v6536_v28  ;;  %6495 = vmax.xlane.f32.xlu0 %v6494_v14  ;;  %v6500_v14 = vsel %vm55_vm0, %v14155_v51, -inf  ;;  %v6557_v45 = vsel %vm55_vm0, %v14159_v7, -inf  ;;  %v6521_v35 = vsel %vm55_vm0, %v14190_v42, -inf }
 0xe45   :  { %v6237_v62 = vpop.f32.mrf.mxu3  ;;  %v6342_v27 = vpop.f32.mrf.mxu2 }
 0xe46   :  { %v14139_v29 = vadd.f32 %v6342_v27, %v6051_v23  ;;  %v14141_v6 = vpop.f32.mrf.mxu1  ;;  %v14157_v43 = vadd.f32 %v6237_v62, %v5934_v58  ;;  %v6410_v23 = vpop.f32.mrf.mxu0 }
 0xe48   :  { %v6539_v61 = vsel %vm55_vm0, %v14139_v29, -inf  ;;  %v6503_v40 = vsel %vm55_vm0, %v14157_v43, -inf }
 0xe49   :  { %6540 = vmax.xlane.f32.xlu1 %v6539_v61  ;;  %6555 = vmax.xlane.f32.xlu0 %v6554_v20  ;;  %v14194_v61 = vadd.f32 %v6410_v23, %v6127_v52  ;;  %v16086_v23 = vld [vmem:[#allocation20_spill] sm:$0xff] }
 0xe4a   :  { %6498 = vmax.xlane.f32.xlu2 %v6497_v0 }
 0xe4d   :  { %v6370_v54 = vpop.f32.mrf.mxu3 }
 0xe4e   :  { %v6307_v28 = vpop.f32.mrf.mxu1  ;;  %v14172_v44 = vadd.f32 %v6370_v54, %v14045_v16  ;;  %v6012_v16 = vadd.f32 %v14049_v59, %v13988_v50  ;;  %v6412_v63 = vpop.f32.mrf.mxu0  ;;  %v6560_v59 = vsel %vm55_vm0, %v14194_v61, -inf  ;;  %v6090_v50 = vadd.f32 %v14080_v38, %v14006_v47  ;;  %v16084_v47 = vld [vmem:[#allocation30_spill] sm:$0xff] }
 0xe4f   :  { %v14208_v9 = vadd.f32 %v6412_v63, %v6129_v36  ;;  %v6010_v21 = vadd.f32 %v16084_v47, %v13968_v33  ;;  %v16085_v38 = vld [vmem:[#allocation14_spill] sm:$0xff] }
 0xe50   :  { %v6542_v27 = vsel %vm55_vm0, %v14172_v44, -inf  ;;  %v14192_v32 = vadd.f32 %v6307_v28, %v6012_v16  ;;  %v6166_v28 = vadd.f32 %v14084_v4, %v16085_v38 }
 0xe51   :  { %6501 = vmax.xlane.f32.xlu1 %v6500_v14  ;;  %6504 = vmax.xlane.f32.xlu0 %v6503_v40  ;;  %v6563_v53 = vsel %vm55_vm0, %v14208_v9, -inf  ;;  %v14225_v14 = vadd.f32 %v14141_v6, %v6010_v21 }
 0xe52   :  { %6558 = vmax.xlane.f32.xlu2 %v6557_v45  ;;  %v6527_v3 = vsel %vm55_vm0, %v14192_v32, -inf }
 0xe53   :  { %v6524_v45 = vsel %vm55_vm0, %v14225_v14, -inf }
 0xe55   :  { %v6372_v1 = vpop.f32.mrf.mxu3 }
 0xe56   :  { %v14176_v55 = vadd.f32 %v6372_v1, %v6085_v10  ;;  %v6440_v48 = vpop.f32.mrf.mxu1 }
 0xe57   :  { %v14239_v4 = vadd.f32 %v6440_v48, %v14060_v31 }
 0xe58   :  { %v6545_v62 = vsel %vm55_vm0, %v14176_v55, -inf }
 0xe59   :  { %6546 = vmax.xlane.f32.xlu0 %v6545_v62  ;;  %6543 = vmax.xlane.f32.xlu1 %v6542_v27  ;;  %v6566_v6 = vsel %vm55_vm0, %v14239_v4, -inf  ;;  %v6168_v62 = vadd.f32 %v14099_v5, %v16086_v23 }
 0xe5a   :  { %6519 = vmax.xlane.f32.xlu2 %v6518_v49 }
 0xe5d   :  { %v6375_v20 = vpop.f32.mrf.mxu3 }
 0xe5e   :  { %v6442_v0 = vpop.f32.mrf.mxu1  ;;  %v14234_v10 = vadd.f32 %v6375_v20, %v14066_v46  ;;  %v16087_v46 = vld [vmem:[#allocation39_spill] sm:$0xff] }
 0xe5f   :  { %v14210_v58 = vadd.f32 %v6442_v0, %v6163_v25 }
 0xe60   :  { %v6548_v33 = vsel %vm55_vm0, %v14234_v10, -inf }
 0xe61   :  { %6522 = vmax.xlane.f32.xlu1 %v6521_v35  ;;  %6528 = vmax.xlane.f32.xlu0 %v6527_v3  ;;  %v6569_v26 = vsel %vm55_vm0, %v14210_v58, -inf  ;;  %v14255_v35 = vpop.permute.xlu0 %7386 }
 0xe62   :  { %6561 = vmax.xlane.f32.xlu2 %v6560_v59 }
 0xe65   :  { %v6377_v34 = vpop.f32.mrf.mxu3 }
 0xe66   :  { %v14212_v18 = vadd.f32 %v6377_v34, %v6090_v50  ;;  %v6445_v2 = vpop.f32.mrf.mxu1 }
 0xe67   :  { %v14227_v40 = vadd.f32 %v6445_v2, %v6166_v28 }
 0xe68   :  { %v6551_v54 = vsel %vm55_vm0, %v14212_v18, -inf }
 0xe69   :  { %6564 = vmax.xlane.f32.xlu1 %v6563_v53  ;;  %6570 = vmax.xlane.f32.xlu0 %v6569_v26  ;;  %v6572_v30 = vsel %vm55_vm0, %v14227_v40, -inf }
 0xe6a   :  { %6552 = vmax.xlane.f32.xlu2 %v6551_v54 }
 0xe6e   :  { %v6447_v1 = vpop.f32.mrf.mxu1 }
 0xe6f   :  { %v14245_v27 = vadd.f32 %v6447_v1, %v6168_v62 }
 0xe71   :  { %6525 = vmax.xlane.f32.xlu1 %v6524_v45  ;;  %6573 = vmax.xlane.f32.xlu0 %v6572_v30  ;;  %v6575_v52 = vsel %vm55_vm0, %v14245_v27, -inf }
 0xe79   :  { %6549 = vmax.xlane.f32.xlu1 %v6548_v33 }
 0xe81   :  { %6567 = vmax.xlane.f32.xlu1 %v6566_v6 }
 0xe84   :  { %v6484_v49 = vpop.xlane.xlu2 %6483 }
 0xe85   :  { %v6578_v13 = vsub.f32 %v16087_v46, %v6484_v49 }
 0xe87   :  { %v6610_v16 = vmul.f32 1.442695, %v6578_v13 }
 0xe89   :  { %9980 = vpow2.f32 %v6610_v16  ;;  %6576 = vmax.xlane.f32.xlu1 %v6575_v52 }
 0xe8c   :  { %v6487_v31 = vpop.xlane.xlu1 %6486 }
 0xe8d   :  { %v6579_v48 = vsub.f32 %v14058_v8, %v6487_v31 }
 0xe8f   :  { %v14251_v20 = vpop.eup %9980  ;;  %v6612_v0 = vmul.f32 1.442695, %v6579_v48 }
 0xe90   :  { %v6674_v5 = vsel %vm55_vm0, %v14251_v20, 0.0 }
 0xe91   :  { %9982 = vpow2.f32 %v6612_v0  ;;  %6675 = vadd.xlane.f32.xlu0 %v6674_v5 }
 0xe94   :  { %v6490_v3 = vpop.xlane.xlu1 %6489 }
 0xe95   :  { %v6580_v63 = vsub.f32 %v14068_v56, %v6490_v3  ;;  %v6511_v59 = vpop.xlane.xlu2 %6510 }
 0xe96   :  { %v6587_v36 = vsub.f32 %v14072_v12, %v6511_v59 }
 0xe97   :  { %v14259_v25 = vpop.eup %9982  ;;  %v6614_v50 = vmul.f32 1.442695, %v6580_v63 }
 0xe98   :  { %v6628_v8 = vmul.f32 1.442695, %v6587_v36  ;;  %v6677_v34 = vsel %vm55_vm0, %v14259_v25, 0.0 }
 0xe99   :  { %9984 = vpow2.f32 %v6614_v50  ;;  %6678 = vadd.xlane.f32.xlu2 %v6677_v34 }
 0xe9a   :  { %9986 = vpow2.f32 %v6628_v8 }
 0xe9c   :  { %v6493_v54 = vpop.xlane.xlu0 %6492 }
 0xe9d   :  { %v6581_v53 = vsub.f32 %v14082_v22, %v6493_v54  ;;  %v6514_v6 = vpop.xlane.xlu2 %6513 }
 0xe9f   :  { %v14264_v26 = vpop.eup %9984  ;;  %v6616_v2 = vmul.f32 1.442695, %v6581_v53 }
 0xea0   :  { %v14266_v56 = vpop.eup %9986  ;;  %v6680_v12 = vsel %vm55_vm0, %v14264_v26, 0.0 }
 0xea1   :  { %9988 = vpow2.f32 %v6616_v2  ;;  %6681 = vadd.xlane.f32.xlu1 %v6680_v12  ;;  %v6701_v47 = vsel %vm55_vm0, %v14266_v56, 0.0 }
 0xea2   :  { %6702 = vadd.xlane.f32.xlu2 %v6701_v47 }
 0xea4   :  { %v6508_v21 = vpop.xlane.xlu0 %6507  ;;  %v6532_v38 = vpop.xlane.xlu1 %6531 }
 0xea5   :  { %v6586_v28 = vsub.f32 %v14095_v41, %v6508_v21  ;;  %v6594_v30 = vsub.f32 %v14097_v57, %v6532_v38  ;;  %v6588_v41 = vsub.f32 %v14086_v24, %v6514_v6 }
 0xea7   :  { %v14273_v45 = vpop.eup %9988  ;;  %v6626_v22 = vmul.f32 1.442695, %v6586_v28  ;;  %v6642_v1 = vmul.f32 1.442695, %v6594_v30  ;;  %v6630_v16 = vmul.f32 1.442695, %v6588_v41 }
 0xea8   :  { %v6683_v33 = vsel %vm55_vm0, %v14273_v45, 0.0 }
 0xea9   :  { %6684 = vadd.xlane.f32.xlu0 %v6683_v33  ;;  %9990 = vpow2.f32 %v6626_v22 }
 0xeaa   :  { %9992 = vpow2.f32 %v6642_v1 }
 0xeac   :  { %v6535_v23 = vpop.xlane.xlu0 %6534  ;;  %v6517_v57 = vpop.xlane.xlu1 %6516 }
 0xead   :  { %v6595_v62 = vsub.f32 %v14111_v39, %v6535_v23  ;;  %v6589_v39 = vsub.f32 %v14109_v37, %v6517_v57 }
 0xeaf   :  { %v6644_v49 = vmul.f32 1.442695, %v6595_v62  ;;  %v14279_v46 = vpop.eup %9990 }
 0xeb0   :  { %v6698_v13 = vsel %vm55_vm0, %v14279_v46, 0.0  ;;  %v14285_v0 = vpop.eup %9992 }
 0xeb1   :  { %9994 = vpow2.f32 %v6644_v49  ;;  %6699 = vadd.xlane.f32.xlu0 %v6698_v13  ;;  %v6722_v63 = vsel %vm55_vm0, %v14285_v0, 0.0 }
 0xeb2   :  { %9996 = vpow2.f32 %v6630_v16 }
 0xeb4   :  { %v6538_v52 = vpop.xlane.xlu2 %6537  ;;  %v6496_v31 = vpop.xlane.xlu0 %6495 }
 0xeb5   :  { %v6596_v48 = vsub.f32 %v14123_v17, %v6538_v52  ;;  %v6582_v24 = vsub.f32 %v14121_v15, %v6496_v31  ;;  %v6632_v17 = vmul.f32 1.442695, %v6589_v39 }
 0xeb7   :  { %v6646_v5 = vmul.f32 1.442695, %v6596_v48  ;;  %v14288_v3 = vpop.eup %9994  ;;  %v6618_v36 = vmul.f32 1.442695, %v6582_v24 }
 0xeb8   :  { %v6725_v59 = vsel %vm55_vm0, %v14288_v3, 0.0  ;;  %v14296_v54 = vpop.eup %9996 }
 0xeb9   :  { %9998 = vpow2.f32 %v6646_v5  ;;  %6723 = vadd.xlane.f32.xlu0 %v6722_v63  ;;  %6726 = vadd.xlane.f32.xlu2 %v6725_v59  ;;  %v6704_v47 = vsel %vm55_vm0, %v14296_v54, 0.0 }
 0xeba   :  { %10000 = vpow2.f32 %v6632_v17 }
 0xebb   :  { %10002 = vpow2.f32 %v6618_v36 }
 0xebc   :  { %v6541_v50 = vpop.xlane.xlu1 %6540  ;;  %v6556_v8 = vpop.xlane.xlu0 %6555 }
 0xebd   :  { %v6499_v37 = vpop.xlane.xlu2 %6498  ;;  %v6602_v34 = vsub.f32 %v14135_v60, %v6556_v8  ;;  %v6597_v30 = vsub.f32 %v14139_v29, %v6541_v50 }
 0xebe   :  { %v6583_v2 = vsub.f32 %v14137_v19, %v6499_v37 }
 0xebf   :  { %v14298_v53 = vpop.eup %9998  ;;  %v6658_v15 = vmul.f32 1.442695, %v6602_v34  ;;  %v6648_v23 = vmul.f32 1.442695, %v6597_v30 }
 0xec0   :  { %v6728_v12 = vsel %vm55_vm0, %v14298_v53, 0.0  ;;  %v6620_v21 = vmul.f32 1.442695, %v6583_v2  ;;  %v14305_v38 = vpop.eup %10000 }
 0xec1   :  { %6729 = vadd.xlane.f32.xlu0 %v6728_v12  ;;  %6705 = vadd.xlane.f32.xlu2 %v6704_v47  ;;  %10004 = vpow2.f32 %v6658_v15  ;;  %v14307_v22 = vpop.eup %10002  ;;  %v6707_v33 = vsel %vm55_vm0, %v14305_v38, 0.0  ;;  %v16088_v12 = vld [vmem:[#allocation6_spill] sm:$0xff] }
 0xec2   :  { %10006 = vpow2.f32 %v6620_v21  ;;  %v6686_v6 = vsel %vm55_vm0, %v14307_v22, 0.0 }
 0xec3   :  { %10008 = vpow2.f32 %v6648_v23 }
 0xec4   :  { %v6502_v60 = vpop.xlane.xlu1 %6501  ;;  %v6505_v16 = vpop.xlane.xlu0 %6504 }
 0xec5   :  { %v6559_v28 = vpop.xlane.xlu2 %6558  ;;  %v6584_v41 = vsub.f32 %v14155_v51, %v6502_v60 }
 0xec6   :  { %v6603_v5 = vsub.f32 %v14159_v7, %v6559_v28 }
 0xec7   :  { %v14310_v19 = vpop.eup %10004  ;;  %v6622_v57 = vmul.f32 1.442695, %v6584_v41 }
 0xec8   :  { %v6746_v1 = vsel %vm55_vm0, %v14310_v19, 0.0  ;;  %v14320_v29 = vpop.eup %10006  ;;  %v6660_v59 = vmul.f32 1.442695, %v6603_v5 }
 0xec9   :  { %6708 = vadd.xlane.f32.xlu0 %v6707_v33  ;;  %6687 = vadd.xlane.f32.xlu2 %v6686_v6  ;;  %v6689_v13 = vsel %vm55_vm0, %v14320_v29, 0.0  ;;  %v14325_v48 = vpop.eup %10008  ;;  %10010 = vpow2.f32 %v6622_v57 }
 0xeca   :  { %6747 = vadd.xlane.f32.xlu1 %v6746_v1  ;;  %v6731_v51 = vsel %vm55_vm0, %v14325_v48, 0.0 }
 0xecc   :  { %v14318_v62 = vpop.xlane.xlu1 %6543  ;;  %v6547_v8 = vpop.xlane.xlu0 %6546 }
 0xecd   :  { %v6520_v49 = vpop.xlane.xlu2 %6519  ;;  %v6599_v21 = vsub.f32 %v14176_v55, %v6547_v8 }
 0xecf   :  { %v14332_v50 = vpop.eup %10010  ;;  %v6652_v1 = vmul.f32 1.442695, %v6599_v21 }
 0xed0   :  { %v6692_v34 = vsel %vm55_vm0, %v14332_v50, 0.0 }
 0xed1   :  { %6690 = vadd.xlane.f32.xlu2 %v6689_v13 }
 0xed4   :  { %v6523_v52 = vpop.xlane.xlu1 %6522  ;;  %v6529_v60 = vpop.xlane.xlu0 %6528 }
 0xed5   :  { %v6562_v31 = vpop.xlane.xlu2 %6561  ;;  %v6591_v63 = vsub.f32 %v14190_v42, %v6523_v52 }
 0xed6   :  { %v6604_v39 = vsub.f32 %v14194_v61, %v6562_v31  ;;  %v6585_v61 = vsub.f32 %v14157_v43, %v6505_v16 }
 0xed7   :  { %v6636_v17 = vmul.f32 1.442695, %v6591_v63 }
 0xed8   :  { %v6662_v24 = vmul.f32 1.442695, %v6604_v39  ;;  %v6624_v15 = vmul.f32 1.442695, %v6585_v61 }
 0xed9   :  { %6732 = vadd.xlane.f32.xlu2 %v6731_v51 }
 0xeda   :  { %10012 = vpow2.f32 %v6662_v24 }
 0xedb   :  { %10014 = vpow2.f32 %v6660_v59 }
 0xedc   :  { %v6565_v36 = vpop.xlane.xlu1 %6564  ;;  %10016 = vpow2.f32 %v6636_v17  ;;  %v6571_v16 = vpop.xlane.xlu0 %6570 }
 0xedd   :  { %v6605_v7 = vsub.f32 %v14208_v9, %v6565_v36  ;;  %10018 = vpow2.f32 %v6624_v15  ;;  %v6590_v9 = vsub.f32 %v14174_v11, %v6520_v49  ;;  %v6553_v41 = vpop.xlane.xlu2 %6552  ;;  %v6598_v11 = vsub.f32 %v14172_v44, %v14318_v62 }
 0xede   :  { %v6601_v55 = vsub.f32 %v14212_v18, %v6553_v41  ;;  %v6593_v44 = vsub.f32 %v14192_v32, %v6529_v60 }
 0xedf   :  { %v6664_v2 = vmul.f32 1.442695, %v6605_v7  ;;  %v6634_v6 = vmul.f32 1.442695, %v6590_v9  ;;  %v6650_v52 = vmul.f32 1.442695, %v6598_v11 }
 0xee0   :  { %v14335_v37 = vpop.eup %10012  ;;  %v6656_v39 = vmul.f32 1.442695, %v6601_v55  ;;  %v6640_v63 = vmul.f32 1.442695, %v6593_v44 }
 0xee1   :  { %v6752_v42 = vsel %vm55_vm0, %v14335_v37, 0.0  ;;  %6693 = vadd.xlane.f32.xlu2 %v6692_v34  ;;  %v14344_v47 = vpop.eup %10014  ;;  %10020 = vpow2.f32 %v6664_v2 }
 0xee2   :  { %6753 = vadd.xlane.f32.xlu0 %v6752_v42  ;;  %v14346_v43 = vpop.eup %10016  ;;  %v6749_v33 = vsel %vm55_vm0, %v14344_v47, 0.0  ;;  %10022 = vpow2.f32 %v6634_v6 }
 0xee3   :  { %7413 = vrot.lane.b32.xlu1 %v16088_v12, %s10191_s23  ;;  %v6713_v30 = vsel %vm55_vm0, %v14346_v43, 0.0  ;;  %v14354_v23 = vpop.eup %10018  ;;  %10024 = vpow2.f32 %v6652_v1  ;;  %v6607_v12 = vsub.f32 %v14210_v58, %v6571_v16 }
 0xee4   :  { %v6526_v28 = vpop.xlane.xlu1 %6525  ;;  %v6695_v57 = vsel %vm55_vm0, %v14354_v23, 0.0  ;;  %10026 = vpow2.f32 %v6650_v52  ;;  %v14375_v59 = vpop.xlane.xlu0 %6573 }
 0xee5   :  { %10028 = vpow2.f32 %v6656_v39  ;;  %v6592_v51 = vsub.f32 %v14225_v14, %v6526_v28  ;;  %v6668_v28 = vmul.f32 1.442695, %v6607_v12 }
 0xee6   :  { %10030 = vpow2.f32 %v6640_v63 }
 0xee7   :  { %v14356_v13 = vpop.eup %10020  ;;  %v6638_v32 = vmul.f32 1.442695, %v6592_v51  ;;  %v16089_v51 = vld [vmem:[#allocation57_spill] sm:$0xff] }
 0xee8   :  { %v6755_v49 = vsel %vm55_vm0, %v14356_v13, 0.0  ;;  %v14365_v5 = vpop.eup %10022 }
 0xee9   :  { %6750 = vadd.xlane.f32.xlu2 %v6749_v33  ;;  %v14367_v24 = vpop.eup %10024  ;;  %v6710_v18 = vsel %vm55_vm0, %v14365_v5, 0.0  ;;  %10032 = vpow2.f32 %v6638_v32 }
 0xeea   :  { %6714 = vadd.xlane.f32.xlu0 %v6713_v30  ;;  %v6737_v62 = vsel %vm55_vm0, %v14367_v24, 0.0  ;;  %v14377_v17 = vpop.eup %10026 }
 0xeeb   :  { %v14379_v8 = vpop.eup %10028  ;;  %v6734_v7 = vsel %vm55_vm0, %v14377_v17, 0.0 }
 0xeec   :  { %v6550_v31 = vpop.xlane.xlu1 %6549  ;;  %v6743_v42 = vsel %vm55_vm0, %v14379_v8, 0.0  ;;  %v14387_v2 = vpop.eup %10030 }
 0xeed   :  { %v6600_v14 = vsub.f32 %v14234_v10, %v6550_v31 }
 0xeef   :  { %v6654_v9 = vmul.f32 1.442695, %v6600_v14  ;;  %v14392_v21 = vpop.eup %10032 }
 0xef0   :  { %v6716_v6 = vsel %vm55_vm0, %v14392_v21, 0.0 }
 0xef1   :  { %6696 = vadd.xlane.f32.xlu2 %v6695_v57 }
 0xef2   :  { %6756 = vadd.xlane.f32.xlu0 %v6755_v49 }
 0xef4   :  { %v6568_v36 = vpop.xlane.xlu1 %6567 }
 0xef5   :  { %v6606_v61 = vsub.f32 %v14239_v4, %v6568_v36  ;;  %v6719_v4 = vsel %vm55_vm0, %v14387_v2, 0.0 }
 0xef7   :  { %v6666_v34 = vmul.f32 1.442695, %v6606_v61 }
 0xef9   :  { %6711 = vadd.xlane.f32.xlu2 %v6710_v18 }
 0xefa   :  { %6738 = vadd.xlane.f32.xlu0 %v6737_v62 }
 0xefc   :  { %v14394_v30 = vpop.xlane.xlu1 %6576 }
 0xf01   :  { %6735 = vadd.xlane.f32.xlu2 %v6734_v7 }
 0xf02   :  { %6744 = vadd.xlane.f32.xlu0 %v6743_v42 }
 0xf04   :  { %v6676_v15 = vpop.xlane.xlu0 %6675 }
 0xf05   :  { %10034 = vrcp.f32 %v6676_v15 }
 0xf06   :  { %10036 = vpow2.f32 %v6666_v34 }
 0xf07   :  { %10038 = vpow2.f32 %v6654_v9 }
 0xf09   :  { %6720 = vadd.xlane.f32.xlu2 %v6719_v4 }
 0xf0b   :  { %v10035_v60 = vpop.eup %10034 }
 0xf0c   :  { %v6802_v10 = vmul.f32 %v10035_v60, %v6676_v15  ;;  %v6679_v33 = vpop.xlane.xlu2 %6678  ;;  %v14398_v58 = vpop.eup %10036 }
 0xf0d   :  { %10040 = vrcp.f32 %v6679_v33  ;;  %6717 = vadd.xlane.f32.xlu1 %v6716_v6  ;;  %v6758_v11 = vsel %vm55_vm0, %v14398_v58, 0.0  ;;  %v14402_v55 = vpop.eup %10038 }
 0xf0e   :  { %v6834_v1 = vsub.f32 2.0, %v6802_v10  ;;  %10042 = vpow2.f32 %v6668_v28  ;;  %v6740_v39 = vsel %vm55_vm0, %v14402_v55, 0.0 }
 0xf10   :  { %v6866_v41 = vmul.f32 %v10035_v60, %v6834_v1 }
 0xf11   :  { %6759 = vadd.xlane.f32.xlu2 %v6758_v11 }
 0xf12   :  { %v6898_v49 = vmul.f32 %v14251_v20, %v6866_v41 }
 0xf13   :  { %v10041_v57 = vpop.eup %10040 }
 0xf14   :  { %v6930_v16 = vpack.c.bf16 %v6898_v49, %v6898_v49  ;;  %v6803_v52 = vmul.f32 %v10041_v57, %v6679_v33  ;;  %v6682_v31 = vpop.xlane.xlu1 %6681  ;;  %v14407_v18 = vpop.eup %10042 }
 0xf15   :  { %10044 = vrcp.f32 %v6682_v31  ;;  %v6703_v44 = vpop.xlane.xlu2 %6702  ;;  %6741 = vadd.xlane.f32.xlu1 %v6740_v39  ;;  %v6761_v32 = vsel %vm55_vm0, %v14407_v18, 0.0 }
 0xf16   :  { %v6962_v62 = vunpack.c.l.bf16 %v6930_v16  ;;  %v6835_v63 = vsub.f32 2.0, %v6803_v52  ;;  %7411 = vrot.lane.b32.xlu0 %v16089_v51, %s10191_s23  ;;  %10046 = vrcp.f32 %v6703_v44  ;;  %v7062_v9 = vunpack.c.l.b16 %v6930_v16  ;;  %v16090_v16 = vld [vmem:[#allocation38_spill] sm:$0xff] }
 0xf18   :  { %v6994_v20 = vsub.f32 %v6898_v49, %v6962_v62  ;;  %v6867_v36 = vmul.f32 %v10041_v57, %v6835_v63 }
 0xf19   :  { %6762 = vadd.xlane.f32.xlu2 %v6761_v32 }
 0xf1a   :  { %v6899_v61 = vmul.f32 %v14259_v25, %v6867_v36  ;;  %v7026_v33 = vpack.c.bf16 %v6994_v20, %v6994_v20 }
 0xf1b   :  { %v10045_v7 = vpop.eup %10044 }
 0xf1c   :  { %v10047_v42 = vpop.eup %10046  ;;  %v6931_v14 = vpack.c.bf16 %v6899_v61, %v6899_v61  ;;  %v6804_v34 = vmul.f32 %v10045_v7, %v6682_v31  ;;  %v6685_v15 = vpop.xlane.xlu0 %6684  ;;  %v14421_v31 = vunpack.c.l.b16 %v7026_v33 }
 0xf1d   :  { %v6811_v12 = vmul.f32 %v10047_v42, %v6703_v44  ;;  %10048 = vrcp.f32 %v6685_v15 }
 0xf1e   :  { %v6963_v4 = vunpack.c.l.bf16 %v6931_v14  ;;  %v7063_v60 = vunpack.c.l.b16 %v6931_v14  ;;  %v6836_v28 = vsub.f32 2.0, %v6804_v34  ;;  %v6609_v14 = vsub.f32 %v14245_v27, %v14394_v30  ;;  %v16092_v27 = vld [vmem:[#allocation29_spill] sm:$0xff] }
 0xf1f   :  { %v6843_v10 = vsub.f32 2.0, %v6811_v12 }
 0xf20   :  { %v6995_v6 = vsub.f32 %v6899_v61, %v6963_v4  ;;  %v14414_v1 = vpack.c.b16 %v7063_v60, %v7062_v9  ;;  %v6868_v41 = vmul.f32 %v10045_v7, %v6836_v28  ;;  %v6672_v33 = vmul.f32 1.442695, %v6609_v14 }
 0xf21   :  { %v6875_v11 = vmul.f32 %v10047_v42, %v6843_v10 }
 0xf22   :  { %v7027_v25 = vpack.c.bf16 %v6995_v6, %v6995_v6  ;;  %v6900_v49 = vmul.f32 %v14264_v26, %v6868_v41  ;;  %9686 = vmatmul.msk.bf16.vlgmr.msrb.gmra.mxu2 %vm55_vm0, %v14414_v1  ;;  %v16091_v41 = vld [vmem:[#allocation22_spill] sm:$0xff] }
 0xf23   :  { %v10049_v57 = vpop.eup %10048  ;;  %v6907_v52 = vmul.f32 %v14266_v56, %v6875_v11  ;;  %7398 = vmatpush.bf16.msrb.mxu2 %v16090_v16 }
 0xf24   :  { %v14423_v39 = vunpack.c.l.b16 %v7027_v25  ;;  %v6932_v44 = vpack.c.bf16 %v6900_v49, %v6900_v49  ;;  %v6805_v62 = vmul.f32 %v10049_v57, %v6685_v15  ;;  %v6700_v51 = vpop.xlane.xlu0 %6699 }
 0xf25   :  { %v6939_v63 = vpack.c.bf16 %v6907_v52, %v6907_v52  ;;  %10050 = vrcp.f32 %v6700_v51 }
 0xf26   :  { %v6964_v26 = vunpack.c.l.bf16 %v6932_v44  ;;  %v6837_v36 = vsub.f32 2.0, %v6805_v62  ;;  %v7064_v28 = vunpack.c.l.b16 %v6932_v44 }
 0xf27   :  { %v6971_v32 = vunpack.c.l.bf16 %v6939_v63  ;;  %7399 = vmatpush.bf16.msrb.mxu2 %v14255_v35 }
 0xf28   :  { %v6996_v56 = vsub.f32 %v6900_v49, %v6964_v26  ;;  %v6869_v61 = vmul.f32 %v10049_v57, %v6837_v36  ;;  %v7145_v26 = vunpack.c.l.b16 %v6939_v63 }
 0xf29   :  { %v7003_v7 = vsub.f32 %v6907_v52, %v6971_v32 }
 0xf2a   :  { %v6901_v42 = vmul.f32 %v14273_v45, %v6869_v61 }
 0xf2b   :  { %v10051_v34 = vpop.eup %10050 }
 0xf2c   :  { %v6933_v15 = vpack.c.bf16 %v6901_v42, %v6901_v42  ;;  %v6810_v12 = vmul.f32 %v10051_v34, %v6700_v51  ;;  %v6727_v9 = vpop.xlane.xlu2 %6726  ;;  %v6724_v4 = vpop.xlane.xlu0 %6723 }
 0xf2d   :  { %10052 = vrcp.f32 %v6727_v9 }
 0xf2e   :  { %v6965_v60 = vunpack.c.l.bf16 %v6933_v15  ;;  %v7065_v10 = vunpack.c.l.b16 %v6933_v15  ;;  %v6842_v6 = vsub.f32 2.0, %v6810_v12  ;;  %10054 = vrcp.f32 %v6724_v4  ;;  %7486 = vrot.lane.b32.xlu1 %v16091_v41, %s10191_s23 }
 0xf2f   :  { %10056 = vpow2.f32 %v6672_v33  ;;  %v7028_v15 = vpack.c.bf16 %v6996_v56, %v6996_v56 }
 0xf30   :  { %v6997_v11 = vsub.f32 %v6901_v42, %v6965_v60  ;;  %v14433_v45 = vpack.c.b16 %v7065_v10, %v7064_v28  ;;  %v6874_v25 = vmul.f32 %v10051_v34, %v6842_v6  ;;  %v16093_v34 = vld [vmem:[#allocation34_spill] sm:$0xff]  ;;  %v7035_v60 = vpack.c.bf16 %v7003_v7, %v7003_v7 }
 0xf31   :  { %7488 = vrot.lane.b32.xlu2 %v16092_v27, %s10191_s23 }
 0xf32   :  { %9687 = vmatmul.msk.bf16.gmra.mxu2 %vm55_vm0, %v14433_v45  ;;  %v6906_v30 = vmul.f32 %v14279_v46, %v6874_v25  ;;  %v7029_v36 = vpack.c.bf16 %v6997_v11, %v6997_v11  ;;  %v14451_v11 = vunpack.c.l.b16 %v7028_v15  ;;  %v16094_v25 = vld [vmem:[#allocation46_spill] sm:$0xff]  ;;  %v16097_v15 = vld [vmem:[#allocation9_spill] sm:$0xff] }
 0xf33   :  { %v10053_v49 = vpop.eup %10052 }
 0xf34   :  { %v10055_v57 = vpop.eup %10054  ;;  %v6938_v52 = vpack.c.bf16 %v6906_v30, %v6906_v30  ;;  %v6819_v44 = vmul.f32 %v10053_v49, %v6727_v9  ;;  %v6706_v62 = vpop.xlane.xlu2 %6705  ;;  %v14446_v63 = vunpack.c.l.b16 %v7029_v36 }
 0xf35   :  { %v6730_v51 = vpop.xlane.xlu0 %6729  ;;  %v6818_v32 = vmul.f32 %v10055_v57, %v6724_v4  ;;  %10058 = vrcp.f32 %v6706_v62  ;;  %v14442_v46 = vpop.eup %10056 }
 0xf36   :  { %v6970_v61 = vunpack.c.l.bf16 %v6938_v52  ;;  %v7144_v42 = vunpack.c.l.b16 %v6938_v52  ;;  %v6851_v14 = vsub.f32 2.0, %v6819_v44  ;;  %10060 = vrcp.f32 %v6730_v51  ;;  %7463 = vrot.lane.b32.xlu1 %v16093_v34, %s10191_s23 }
 0xf37   :  { %v6850_v12 = vsub.f32 2.0, %v6818_v32  ;;  %v6767_v7 = vsel %vm55_vm0, %v14442_v46, 0.0 }
 0xf38   :  { %v7002_v28 = vsub.f32 %v6906_v30, %v6970_v61  ;;  %v14444_v9 = vpack.c.b16 %v7145_v26, %v7144_v42  ;;  %v6883_v10 = vmul.f32 %v10053_v49, %v6851_v14  ;;  %v14457_v30 = vunpack.c.l.b16 %v7035_v60 }
 0xf39   :  { %v6882_v4 = vmul.f32 %v10055_v57, %v6850_v12 }
 0xf3a   :  { %v7034_v33 = vpack.c.bf16 %v7002_v28, %v7002_v28  ;;  %v6915_v6 = vmul.f32 %v14288_v3, %v6883_v10  ;;  %9690 = vmatmul.msk.bf16.vlgmr.msra.gmra.mxu0 %vm55_vm0, %v14444_v9  ;;  %16095 = vst [vmem:[#allocation42_spill] sm:$0xff] %v14457_v30 }
 0xf3b   :  { %v10059_v41 = vpop.eup %10058  ;;  %v6914_v56 = vmul.f32 %v14285_v0, %v6882_v4  ;;  %7448 = vmatpush.bf16.msra.mxu0 %v16094_v25 }
 0xf3c   :  { %v10061_v27 = vpop.eup %10060  ;;  %v14459_v49 = vunpack.c.l.b16 %v7034_v33  ;;  %v6947_v57 = vpack.c.bf16 %v6915_v6, %v6915_v6  ;;  %v6812_v3 = vmul.f32 %v10059_v41, %v6706_v62  ;;  %v6688_v52 = vpop.xlane.xlu2 %6687 }
 0xf3d   :  { %v6946_v44 = vpack.c.bf16 %v6914_v56, %v6914_v56  ;;  %v6820_v26 = vmul.f32 %v10061_v27, %v6730_v51  ;;  %10062 = vrcp.f32 %v6688_v52  ;;  %v6748_v36 = vpop.xlane.xlu1 %6747  ;;  %v6709_v32 = vpop.xlane.xlu0 %6708  ;;  %v16098_v51 = vld [vmem:[#allocation48_spill] sm:$0xff] }
 0xf3e   :  { %16096 = vst [vmem:[#allocation60_spill] sm:$0xff] %v14459_v49  ;;  %v6979_v42 = vunpack.c.l.bf16 %v6947_v57  ;;  %v7227_v14 = vunpack.c.l.b16 %v6947_v57  ;;  %v6844_v34 = vsub.f32 2.0, %v6812_v3  ;;  %7538 = vrot.lane.b32.xlu1 %v16097_v15, %s10191_s23  ;;  %10064 = vrcp.f32 %v6748_v36 }
 0xf3f   :  { %v6978_v12 = vunpack.c.l.bf16 %v6946_v44  ;;  %v7226_v62 = vunpack.c.l.b16 %v6946_v44  ;;  %v6852_v60 = vsub.f32 2.0, %v6820_v26  ;;  %7449 = vmatpush.bf16.msra.mxu0 %v16098_v51  ;;  %10066 = vrcp.f32 %v6709_v32 }
 0xf40   :  { %6768 = vadd.xlane.f32.xlu0 %v6767_v7  ;;  %v7011_v28 = vsub.f32 %v6915_v6, %v6979_v42  ;;  %v6876_v10 = vmul.f32 %v10059_v41, %v6844_v34 }
 0xf41   :  { %v7010_v4 = vsub.f32 %v6914_v56, %v6978_v12  ;;  %v14468_v33 = vpack.c.b16 %v7227_v14, %v7226_v62  ;;  %v6884_v61 = vmul.f32 %v10061_v27, %v6852_v60 }
 0xf42   :  { %v7043_v0 = vpack.c.bf16 %v7011_v28, %v7011_v28  ;;  %v6908_v57 = vmul.f32 %v14296_v54, %v6876_v10 }
 0xf43   :  { %v10063_v3 = vpop.eup %10062  ;;  %v7042_v20 = vpack.c.bf16 %v7010_v4, %v7010_v4  ;;  %v6916_v15 = vmul.f32 %v14298_v53, %v6884_v61  ;;  %9694 = vmatmul.msk.bf16.vlgmr.msra.gmra.mxu2 %vm55_vm0, %v14468_v33  ;;  %v16101_v53 = vld [vmem:[#allocation59_spill] sm:$0xff] }
 0xf44   :  { %v14474_v44 = vunpack.c.l.b16 %v7043_v0  ;;  %v6940_v7 = vpack.c.bf16 %v6908_v57, %v6908_v57  ;;  %v6806_v6 = vmul.f32 %v10063_v3, %v6688_v52  ;;  %v6691_v41 = vpop.xlane.xlu2 %6690  ;;  %v10065_v26 = vpop.eup %10064 }
 0xf45   :  { %v14476_v56 = vunpack.c.l.b16 %v7042_v20  ;;  %v14478_v42 = vpack.c.bf16 %v6916_v15, %v6916_v15  ;;  %10068 = vrcp.f32 %v6691_v41  ;;  %v10067_v27 = vpop.eup %10066  ;;  %v6826_v34 = vmul.f32 %v10065_v26, %v6748_v36 }
 0xf46   :  { %16099 = vst [vmem:[#allocation36_spill] sm:$0xff] %v14474_v44  ;;  %v6972_v54 = vunpack.c.l.bf16 %v6940_v7  ;;  %v6838_v14 = vsub.f32 2.0, %v6806_v6  ;;  %7513 = vrot.lane.b32.xlu1 %v16101_v53, %s10191_s23  ;;  %v6813_v52 = vmul.f32 %v10067_v27, %v6709_v32  ;;  %v6608_v20 = vsub.f32 %v14227_v40, %v14375_v59 }
 0xf47   :  { %16100 = vst [vmem:[#allocation72_spill] sm:$0xff] %v14476_v56  ;;  %v6980_v61 = vunpack.c.l.bf16 %v14478_v42  ;;  %v6858_v60 = vsub.f32 2.0, %v6826_v34 }
 0xf48   :  { %v7004_v12 = vsub.f32 %v6908_v57, %v6972_v54  ;;  %v6870_v62 = vmul.f32 %v10063_v3, %v6838_v14  ;;  %v6845_v10 = vsub.f32 2.0, %v6813_v52  ;;  %v6670_v49 = vmul.f32 1.442695, %v6608_v20  ;;  %v16102_v3 = vld [vmem:[#allocation63_spill] sm:$0xff] }
 0xf49   :  { %v14487_v28 = vsub.f32 %v6916_v15, %v6980_v61  ;;  %v6890_v4 = vmul.f32 %v10065_v26, %v6858_v60 }
 0xf4a   :  { %v6902_v36 = vmul.f32 %v14307_v22, %v6870_v62  ;;  %v6877_v53 = vmul.f32 %v10067_v27, %v6845_v10 }
 0xf4b   :  { %v10069_v6 = vpop.eup %10068  ;;  %v6922_v0 = vmul.f32 %v14310_v19, %v6890_v4  ;;  %v7146_v19 = vunpack.c.l.b16 %v6940_v7  ;;  %v16104_v4 = vld [vmem:[#allocation18_spill] sm:$0xff] }
 0xf4c   :  { %v6934_v30 = vpack.c.bf16 %v6902_v36, %v6902_v36  ;;  %v6807_v56 = vmul.f32 %v10069_v6, %v6691_v41  ;;  %v6733_v32 = vpop.xlane.xlu2 %6732  ;;  %v6909_v44 = vmul.f32 %v14305_v38, %v6877_v53 }
 0xf4d   :  { %10070 = vrcp.f32 %v6733_v32  ;;  %v14492_v59 = vpack.c.bf16 %v6922_v0, %v6922_v0 }
 0xf4e   :  { %v6966_v40 = vunpack.c.l.bf16 %v6934_v30  ;;  %v6839_v57 = vsub.f32 2.0, %v6807_v56  ;;  %7561 = vrot.lane.b32.xlu1 %v16102_v3, %s10191_s23  ;;  %v6941_v22 = vpack.c.bf16 %v6909_v44, %v6909_v44  ;;  %10072 = vpow2.f32 %v6670_v49  ;;  %v16103_v56 = vld [vmem:[#allocation10_spill] sm:$0xff] }
 0xf4f   :  { %v6986_v26 = vunpack.c.l.bf16 %v14492_v59 }
 0xf50   :  { %v6998_v15 = vsub.f32 %v6902_v36, %v6966_v40  ;;  %v6871_v27 = vmul.f32 %v10069_v6, %v6839_v57  ;;  %v6973_v54 = vunpack.c.l.bf16 %v6941_v22  ;;  %v7147_v41 = vunpack.c.l.b16 %v6941_v22 }
 0xf51   :  { %v14497_v14 = vsub.f32 %v6922_v0, %v6986_v26  ;;  %v7103_v0 = vunpack.c.l.b16 %v6934_v30  ;;  %v7036_v6 = vpack.c.bf16 %v7004_v12, %v7004_v12 }
 0xf52   :  { %v6903_v38 = vmul.f32 %v14320_v29, %v6871_v27  ;;  %v7005_v61 = vsub.f32 %v6909_v44, %v6973_v54  ;;  %v14500_v52 = vpack.c.b16 %v7147_v41, %v7146_v19  ;;  %v7030_v53 = vpack.c.bf16 %v6998_v15, %v6998_v15  ;;  %v16106_v54 = vld [vmem:[#allocation62_spill] sm:$0xff] }
 0xf53   :  { %v10071_v34 = vpop.eup %10070  ;;  %v14521_v15 = vunpack.c.l.b16 %v7036_v6 }
 0xf54   :  { %7461 = vrot.lane.b32.xlu0 %v16103_v56, %s10191_s23  ;;  %v6935_v20 = vpack.c.bf16 %v6903_v38, %v6903_v38  ;;  %v6821_v49 = vmul.f32 %v10071_v34, %v6733_v32  ;;  %v6694_v62 = vpop.xlane.xlu2 %6693  ;;  %v7037_v10 = vpack.c.bf16 %v7005_v61, %v7005_v61  ;;  %9691 = vmatmul.msk.bf16.gmra.mxu0 %vm55_vm0, %v14500_v52  ;;  %v14506_v7 = vpop.eup %10072  ;;  %v14526_v19 = vunpack.c.l.b16 %v7030_v53 }
 0xf55   :  { %v6754_v60 = vpop.xlane.xlu0 %6753  ;;  %10074 = vrcp.f32 %v6694_v62  ;;  %v6764_v22 = vsel %vm55_vm0, %v14506_v7, 0.0  ;;  %v14517_v27 = vpop.permute.xlu1 %7413  ;;  %16105 = vst [vmem:[#allocation64_spill] sm:$0xff] %v14521_v15  ;;  %v16109_v15 = vld [vmem:[#allocation58_spill] sm:$0xff] }
 0xf56   :  { %v6967_v29 = vunpack.c.l.bf16 %v6935_v20  ;;  %v7104_v36 = vunpack.c.l.b16 %v6935_v20  ;;  %v6853_v44 = vsub.f32 2.0, %v6821_v49  ;;  %8068 = vrot.lane.b32.xlu1 %v16104_v4, %s10192_s24  ;;  %10076 = vrcp.f32 %v6754_v60 }
 0xf57   :  { %v14512_v3 = vunpack.c.l.b16 %v7037_v10 }
 0xf58   :  { %v6999_v32 = vsub.f32 %v6903_v38, %v6967_v29  ;;  %v14510_v40 = vpack.c.b16 %v7104_v36, %v7103_v0  ;;  %v6885_v57 = vmul.f32 %v10071_v34, %v6853_v44  ;;  %v7228_v36 = vunpack.c.l.b16 %v14478_v42 }
 0xf5a   :  { %v7031_v26 = vpack.c.bf16 %v6999_v32, %v6999_v32  ;;  %v6917_v30 = vmul.f32 %v14325_v48, %v6885_v57  ;;  %9688 = vmatmul.msk.bf16.vlgmr.msrb.gmra.mxu3 %vm55_vm0, %v14510_v40  ;;  %6765 = vadd.xlane.f32.xlu2 %v6764_v22 }
 0xf5b   :  { %v10075_v12 = vpop.eup %10074  ;;  %7423 = vmatpush.bf16.msrb.mxu3 %v14517_v27 }
 0xf5c   :  { %7511 = vrot.lane.b32.xlu0 %v16106_v54, %s10191_s23  ;;  %v14528_v41 = vunpack.c.l.b16 %v7031_v26  ;;  %v6949_v38 = vpack.c.bf16 %v6917_v30, %v6917_v30  ;;  %v6808_v48 = vmul.f32 %v10075_v12, %v6694_v62  ;;  %v6751_v34 = vpop.xlane.xlu2 %6750  ;;  %v10077_v56 = vpop.eup %10076  ;;  %v16107_v26 = vld [vmem:[#allocation28_spill] sm:$0xff] }
 0xf5d   :  { %v6715_v61 = vpop.xlane.xlu0 %6714  ;;  %10078 = vrcp.f32 %v6751_v34  ;;  %v6828_v29 = vmul.f32 %v10077_v56, %v6754_v60 }
 0xf5e   :  { %v6981_v10 = vunpack.c.l.bf16 %v6949_v38  ;;  %v6840_v0 = vsub.f32 2.0, %v6808_v48  ;;  %10080 = vrcp.f32 %v6715_v61  ;;  %v7229_v44 = vunpack.c.l.b16 %v6949_v38 }
 0xf5f   :  { %v6860_v62 = vsub.f32 2.0, %v6828_v29 }
 0xf60   :  { %v7013_v4 = vsub.f32 %v6917_v30, %v6981_v10  ;;  %v6872_v6 = vmul.f32 %v10075_v12, %v6840_v0  ;;  %v14535_v53 = vpack.c.b16 %v7229_v44, %v7228_v36 }
 0xf61   :  { %v6892_v57 = vmul.f32 %v10077_v56, %v6860_v62 }
 0xf62   :  { %v6904_v32 = vmul.f32 %v14332_v50, %v6872_v6  ;;  %9695 = vmatmul.msk.bf16.gmra.mxu2 %vm55_vm0, %v14535_v53  ;;  %v7045_v0 = vpack.c.bf16 %v7013_v4, %v7013_v4 }
 0xf63   :  { %v10079_v22 = vpop.eup %10078  ;;  %v6924_v42 = vmul.f32 %v14335_v37, %v6892_v57  ;;  %v7044_v37 = vpack.c.bf16 %v14487_v28, %v14487_v28  ;;  %v7308_v28 = vunpack.c.l.b16 %v14492_v59 }
 0xf64   :  { %8070 = vrot.lane.b32.xlu0 %v16107_v26, %s10192_s24  ;;  %v14542_v60 = vpack.c.bf16 %v6904_v32, %v6904_v32  ;;  %v6827_v54 = vmul.f32 %v10079_v22, %v6751_v34  ;;  %v6697_v30 = vpop.xlane.xlu2 %6696  ;;  %v10081_v38 = vpop.eup %10080  ;;  %v14556_v20 = vunpack.c.l.b16 %v7045_v0 }
 0xf65   :  { %v6757_v12 = vpop.xlane.xlu0 %6756  ;;  %10082 = vrcp.f32 %v6697_v30  ;;  %v14546_v50 = vpack.c.bf16 %v6924_v42, %v6924_v42  ;;  %v6815_v10 = vmul.f32 %v10081_v38, %v6715_v61  ;;  %v14559_v49 = vunpack.c.l.b16 %v7044_v37 }
 0xf66   :  { %v6968_v48 = vunpack.c.l.bf16 %v14542_v60  ;;  %v6859_v56 = vsub.f32 2.0, %v6827_v54  ;;  %10084 = vrcp.f32 %v6757_v12 }
 0xf67   :  { %v6988_v36 = vunpack.c.l.bf16 %v14546_v50  ;;  %v6847_v6 = vsub.f32 2.0, %v6815_v10 }
 0xf68   :  { %v14548_v29 = vsub.f32 %v6904_v32, %v6968_v48  ;;  %v6891_v44 = vmul.f32 %v10079_v22, %v6859_v56 }
 0xf69   :  { %v14553_v34 = vsub.f32 %v6924_v42, %v6988_v36  ;;  %v6879_v57 = vmul.f32 %v10081_v38, %v6847_v6 }
 0xf6a   :  { %v6923_v62 = vmul.f32 %v14344_v47, %v6891_v44 }
 0xf6b   :  { %v10083_v26 = vpop.eup %10082  ;;  %v6911_v4 = vmul.f32 %v14346_v43, %v6879_v57  ;;  %v7050_v43 = vpack.c.bf16 %v14497_v14, %v14497_v14 }
 0xf6c   :  { %v6955_v61 = vpack.c.bf16 %v6923_v62, %v6923_v62  ;;  %v6712_v32 = vpop.xlane.xlu2 %6711  ;;  %v10085_v48 = vpop.eup %10084  ;;  %v6809_v22 = vmul.f32 %v10083_v26, %v6697_v30 }
 0xf6d   :  { %v6739_v54 = vpop.xlane.xlu0 %6738  ;;  %10086 = vrcp.f32 %v6712_v32  ;;  %v14562_v10 = vpack.c.bf16 %v6911_v4, %v6911_v4  ;;  %v6829_v38 = vmul.f32 %v10085_v48, %v6757_v12 }
 0xf6e   :  { %v6987_v42 = vunpack.c.l.bf16 %v6955_v61  ;;  %v7309_v56 = vunpack.c.l.b16 %v6955_v61  ;;  %v6841_v47 = vsub.f32 2.0, %v6809_v22  ;;  %10088 = vrcp.f32 %v6739_v54  ;;  %v16108_v61 = vld [vmem:[#allocation17_spill] sm:$0xff] }
 0xf6f   :  { %v6975_v30 = vunpack.c.l.bf16 %v14562_v10  ;;  %v6861_v59 = vsub.f32 2.0, %v6829_v38 }
 0xf70   :  { %v7019_v36 = vsub.f32 %v6923_v62, %v6987_v42  ;;  %v14568_v44 = vpack.c.b16 %v7309_v56, %v7308_v28  ;;  %v6873_v6 = vmul.f32 %v10083_v26, %v6841_v47  ;;  %v14580_v62 = vunpack.c.l.b16 %v7050_v43 }
 0xf71   :  { %v14571_v57 = vsub.f32 %v6911_v4, %v6975_v30  ;;  %v6893_v14 = vmul.f32 %v10085_v48, %v6861_v59  ;;  %v7105_v30 = vunpack.c.l.b16 %v14542_v60  ;;  %v7310_v60 = vunpack.c.l.b16 %v14546_v50 }
 0xf72   :  { %v7051_v37 = vpack.c.bf16 %v7019_v36, %v7019_v36  ;;  %7536 = vrot.lane.b32.xlu2 %v16108_v61, %s10191_s23  ;;  %9698 = vmatmul.msk.bf16.vlgmr.msrb.gmra.mxu0 %vm55_vm0, %v14568_v44  ;;  %v6905_v22 = vmul.f32 %v14354_v23, %v6873_v6  ;;  %v7052_v50 = vpack.c.bf16 %v14553_v34, %v14553_v34 }
 0xf73   :  { %v10087_v12 = vpop.eup %10086  ;;  %9702 = vmatmul.msk.bf16.vlgmr.msrb.gmra.mxu2 %vm55_vm0, %v14414_v1  ;;  %v6925_v38 = vmul.f32 %v14356_v13, %v6893_v14 }
 0xf74   :  { %v14582_v26 = vunpack.c.l.b16 %v7051_v37  ;;  %v6814_v28 = vmul.f32 %v10087_v12, %v6712_v32  ;;  %v6736_v4 = vpop.xlane.xlu2 %6735  ;;  %v10089_v56 = vpop.eup %10088  ;;  %v6937_v47 = vpack.c.bf16 %v6905_v22, %v6905_v22 }
 0xf75   :  { %v6745_v42 = vpop.xlane.xlu0 %6744  ;;  %10090 = vrcp.f32 %v6736_v4  ;;  %v6823_v48 = vmul.f32 %v10089_v56, %v6739_v54  ;;  %v6957_v43 = vpack.c.bf16 %v6925_v38, %v6925_v38 }
 0xf76   :  { %v6846_v23 = vsub.f32 2.0, %v6814_v28  ;;  %v6969_v1 = vunpack.c.l.bf16 %v6937_v47  ;;  %10092 = vrcp.f32 %v6745_v42  ;;  %v7106_v6 = vunpack.c.l.b16 %v6937_v47 }
 0xf77   :  { %v6855_v32 = vsub.f32 2.0, %v6823_v48  ;;  %v6989_v61 = vunpack.c.l.bf16 %v6957_v43  ;;  %v7311_v48 = vunpack.c.l.b16 %v6957_v43 }
 0xf78   :  { %v6878_v59 = vmul.f32 %v10087_v12, %v6846_v23  ;;  %v7001_v37 = vsub.f32 %v6905_v22, %v6969_v1  ;;  %v14588_v0 = vpack.c.b16 %v7106_v6, %v7105_v30 }
 0xf79   :  { %v6887_v14 = vmul.f32 %v10089_v56, %v6855_v32  ;;  %v7021_v54 = vsub.f32 %v6925_v38, %v6989_v61  ;;  %v7032_v32 = vpack.c.bf16 %v14548_v29, %v14548_v29 }
 0xf7a   :  { %v6910_v13 = vmul.f32 %v14365_v5, %v6878_v59  ;;  %7563 = vrot.lane.b32.xlu2 %v16109_v15, %s10191_s23  ;;  %9689 = vmatmul.msk.bf16.gmra.mxu3 %vm55_vm0, %v14588_v0  ;;  %v7186_v5 = vunpack.c.l.b16 %v14562_v10  ;;  %v7033_v56 = vpack.c.bf16 %v7001_v37, %v7001_v37  ;;  %s10197_s23 = smov 128  }
 0xf7b   :  { %v10091_v28 = vpop.eup %10090  ;;  %v6919_v12 = vmul.f32 %v14367_v24, %v6887_v14  ;;  %v7053_v1 = vpack.c.bf16 %v7021_v54, %v7021_v54  ;;  %v7039_v24 = vpack.c.bf16 %v14571_v57, %v14571_v57  ;;  %v14606_v14 = vpack.c.b16 %v7311_v48, %v7310_v60 }
 0xf7c   :  { %v6942_v47 = vpack.c.bf16 %v6910_v13, %v6910_v13  ;;  %v6822_v22 = vmul.f32 %v10091_v28, %v6736_v4  ;;  %v6721_v23 = vpop.xlane.xlu2 %6720  ;;  %v10093_v30 = vpop.eup %10092  ;;  %v14608_v54 = vunpack.c.l.b16 %v7033_v56  ;;  %v14623_v48 = vunpack.c.l.b16 %v7052_v50 }
 0xf7d   :  { %10094 = vrcp.f32 %v6721_v23  ;;  %v6951_v38 = vpack.c.bf16 %v6919_v12, %v6919_v12  ;;  %v6825_v4 = vmul.f32 %v10093_v30, %v6745_v42  ;;  %v14610_v29 = vunpack.c.l.b16 %v7053_v1 }
 0xf7e   :  { %v6974_v15 = vunpack.c.l.bf16 %v6942_v47  ;;  %v7185_v6 = vunpack.c.l.b16 %v6942_v47  ;;  %v6854_v59 = vsub.f32 2.0, %v6822_v22  ;;  %v14616_v42 = vunpack.c.l.b16 %v7032_v32  ;;  %16111 = vst [vmem:[#allocation65_spill] sm:$0xff] %v14623_v48 }
 0xf7f   :  { %v6983_v10 = vunpack.c.l.bf16 %v6951_v38  ;;  %v6857_v22 = vsub.f32 2.0, %v6825_v4  ;;  %v7268_v50 = vunpack.c.l.b16 %v6951_v38 }
 0xf80   :  { %v7006_v43 = vsub.f32 %v6910_v13, %v6974_v15  ;;  %v14604_v61 = vpack.c.b16 %v7186_v5, %v7185_v6  ;;  %v6718_v37 = vpop.xlane.xlu1 %6717  ;;  %v6886_v47 = vmul.f32 %v10091_v28, %v6854_v59  ;;  %v16110_v28 = vld [vmem:[#allocation27_spill] sm:$0xff] }
 0xf81   :  { %10096 = vrcp.f32 %v6718_v37  ;;  %v7015_v34 = vsub.f32 %v6919_v12, %v6983_v10  ;;  %v6889_v60 = vmul.f32 %v10093_v30, %v6857_v22  ;;  %v14625_v12 = vunpack.c.l.b16 %v7039_v24 }
 0xf82   :  { %v7038_v36 = vpack.c.bf16 %v7006_v43, %v7006_v43  ;;  %9692 = vmatmul.msk.bf16.vlgmr.msra.gmra.mxu1 %vm55_vm0, %v14604_v61  ;;  %9699 = vmatmul.msk.bf16.gmra.mxu0 %vm55_vm0, %v14606_v14  ;;  %v6918_v13 = vmul.f32 %v14377_v17, %v6886_v47 }
 0xf83   :  { %v10095_v57 = vpop.eup %10094  ;;  %9703 = vmatmul.msk.bf16.gmra.mxu2 %vm55_vm0, %v14433_v45  ;;  %8117 = vrot.lane.b32.xlu2 %v16110_v28, %s10192_s24  ;;  %16112 = vst [vmem:[#allocation32_spill] sm:$0xff] %v14625_v12  ;;  %v6921_v6 = vmul.f32 %v14379_v8, %v6889_v60  ;;  %v7047_v8 = vpack.c.bf16 %v7015_v34, %v7015_v34 }
 0xf84   :  { %v14627_v5 = vunpack.c.l.b16 %v7038_v36  ;;  %v6817_v56 = vmul.f32 %v10095_v57, %v6721_v23  ;;  %v6760_v1 = vpop.xlane.xlu2 %6759  ;;  %v6950_v15 = vpack.c.bf16 %v6918_v13, %v6918_v13 }
 0xf85   :  { %10098 = vrcp.f32 %v6760_v1  ;;  %v14636_v23 = vpack.c.bf16 %v6921_v6, %v6921_v6 }
 0xf86   :  { %16113 = vst [vmem:[#allocation73_spill] sm:$0xff] %v14627_v5  ;;  %v6849_v30 = vsub.f32 2.0, %v6817_v56  ;;  %v6982_v36 = vunpack.c.l.bf16 %v6950_v15  ;;  %v7267_v24 = vunpack.c.l.b16 %v6950_v15 }
 0xf87   :  { %v10097_v32 = vpop.eup %10096  ;;  %v6985_v28 = vunpack.c.l.bf16 %v14636_v23 }
 0xf88   :  { %v14638_v4 = vpop.permute.xlu0 %7411  ;;  %v6881_v43 = vmul.f32 %v10095_v57, %v6849_v30  ;;  %v6816_v10 = vmul.f32 %v10097_v32, %v6718_v37  ;;  %v6742_v47 = vpop.xlane.xlu1 %6741  ;;  %v7014_v22 = vsub.f32 %v6918_v13, %v6982_v36  ;;  %v14641_v60 = vpack.c.b16 %v7268_v50, %v7267_v24 }
 0xf89   :  { %7424 = vmatpush.bf16.msrb.mxu3 %v14638_v4  ;;  %10100 = vrcp.f32 %v6742_v47  ;;  %v14645_v59 = vsub.f32 %v6921_v6, %v6985_v28  ;;  %v14649_v13 = vunpack.c.l.b16 %v7047_v8 }
 0xf8a   :  { %v6913_v38 = vmul.f32 %v14387_v2, %v6881_v43  ;;  %v6848_v56 = vsub.f32 2.0, %v6816_v10  ;;  %v7046_v45 = vpack.c.bf16 %v7014_v22, %v7014_v22  ;;  %9696 = vmatmul.msk.bf16.vlgmr.msra.gmra.mxu3 %vm55_vm0, %v14641_v60 }
 0xf8b   :  { %v10099_v15 = vpop.eup %10098 }
 0xf8c   :  { %v6945_v37 = vpack.c.bf16 %v6913_v38, %v6913_v38  ;;  %v6880_v34 = vmul.f32 %v10097_v32, %v6848_v56  ;;  %v6830_v57 = vmul.f32 %v10099_v15, %v6760_v1  ;;  %v6763_v30 = vpop.xlane.xlu2 %6762  ;;  %v14651_v50 = vunpack.c.l.b16 %v7046_v45 }
 0xf8d   :  { %10102 = vrcp.f32 %v6763_v30 }
 0xf8e   :  { %v6977_v36 = vunpack.c.l.bf16 %v6945_v37  ;;  %v6912_v2 = vmul.f32 %v14392_v21, %v6880_v34  ;;  %v6862_v24 = vsub.f32 2.0, %v6830_v57  ;;  %v7188_v5 = vunpack.c.l.b16 %v6945_v37 }
 0xf8f   :  { %v10101_v43 = vpop.eup %10100 }
 0xf90   :  { %v7009_v10 = vsub.f32 %v6913_v38, %v6977_v36  ;;  %v6944_v22 = vpack.c.bf16 %v6912_v2, %v6912_v2  ;;  %v6894_v28 = vmul.f32 %v10099_v15, %v6862_v24  ;;  %v6824_v17 = vmul.f32 %v10101_v43, %v6742_v47 }
 0xf92   :  { %v6976_v32 = vunpack.c.l.bf16 %v6944_v22  ;;  %v6926_v1 = vmul.f32 %v14398_v58, %v6894_v28  ;;  %v6856_v8 = vsub.f32 2.0, %v6824_v17  ;;  %9706 = vmatmul.msk.bf16.vlgmr.msra.gmra.mxu0 %vm55_vm0, %v14444_v9  ;;  %v7187_v56 = vunpack.c.l.b16 %v6944_v22 }
 0xf93   :  { %v10103_v45 = vpop.eup %10102  ;;  %v7041_v37 = vpack.c.bf16 %v7009_v10, %v7009_v10 }
 0xf94   :  { %v7008_v21 = vsub.f32 %v6912_v2, %v6976_v32  ;;  %v6958_v34 = vpack.c.bf16 %v6926_v1, %v6926_v1  ;;  %v6888_v57 = vmul.f32 %v10101_v43, %v6856_v8  ;;  %v7489_v12 = vpop.permute.xlu2 %7488  ;;  %v6831_v48 = vmul.f32 %v10103_v45, %v6763_v30 }
 0xf95   :  { %v14659_v6 = vpack.c.b16 %v7188_v5, %v7187_v56  ;;  %7498 = vmatpush.bf16.msra.mxu2 %v7489_v12  ;;  %v7270_v43 = vunpack.c.l.b16 %v14636_v23  ;;  %v7049_v56 = vpack.c.bf16 %v14645_v59, %v14645_v59 }
 0xf96   :  { %v6990_v38 = vunpack.c.l.bf16 %v6958_v34  ;;  %v6920_v47 = vmul.f32 %v14402_v55, %v6888_v57  ;;  %v6863_v15 = vsub.f32 2.0, %v6831_v48  ;;  %v7040_v58 = vpack.c.bf16 %v7008_v21, %v7008_v21 }
 0xf97   :  { %9693 = vmatmul.msk.bf16.gmra.mxu1 %vm55_vm0, %v14659_v6  ;;  %v14670_v48 = vunpack.c.l.b16 %v7041_v37  ;;  %v7349_v21 = vunpack.c.l.b16 %v6958_v34 }
 0xf98   :  { %v7022_v9 = vsub.f32 %v6926_v1, %v6990_v38  ;;  %v6952_v17 = vpack.c.bf16 %v6920_v47, %v6920_v47  ;;  %v6895_v36 = vmul.f32 %v10103_v45, %v6863_v15  ;;  %v14666_v30 = vunpack.c.l.b16 %v7040_v58 }
 0xf9a   :  { %v6984_v2 = vunpack.c.l.bf16 %v6952_v17  ;;  %v7269_v24 = vunpack.c.l.b16 %v6952_v17  ;;  %v6927_v5 = vmul.f32 %v14407_v18, %v6895_v36  ;;  %v7700_v8 = vpack.c.b16 %v14670_v48, %v14666_v30 }
 0xf9b   :  { %v7054_v23 = vpack.c.bf16 %v7022_v9, %v7022_v9  ;;  %v14691_v9 = vunpack.c.l.b16 %v7049_v56 }
 0xf9c   :  { %v7016_v22 = vsub.f32 %v6920_v47, %v6984_v2  ;;  %v14668_v28 = vpack.c.b16 %v7270_v43, %v7269_v24  ;;  %v6959_v55 = vpack.c.bf16 %v6927_v5, %v6927_v5 }
 0xf9d   :  { %v14685_v47 = vunpack.c.l.b16 %v7054_v23 }
 0xf9e   :  { %9697 = vmatmul.msk.bf16.gmra.mxu3 %vm55_vm0, %v14668_v28  ;;  %v6991_v32 = vunpack.c.l.bf16 %v6959_v55  ;;  %v7048_v1 = vpack.c.bf16 %v7016_v22, %v7016_v22  ;;  %v7350_v18 = vunpack.c.l.b16 %v6959_v55  ;;  %v16114_v22 = vpack.c.b16 %v14423_v39, %v14421_v31 }
 0xf9f   :  { %v16115_v39 = vpack.c.b16 %v14446_v63, %v14451_v11 }
 0xfa0   :  { %v7487_v10 = vpop.permute.xlu1 %7486  ;;  %v7023_v45 = vsub.f32 %v6927_v5, %v6991_v32  ;;  %v14681_v38 = vunpack.c.l.b16 %v7048_v1  ;;  %v14687_v15 = vpack.c.b16 %v7350_v18, %v7349_v21 }
 0xfa1   :  { %7499 = vmatpush.bf16.msra.mxu2 %v7487_v10 }
 0xfa2   :  { %9707 = vmatmul.msk.bf16.gmra.mxu0 %vm55_vm0, %v14500_v52  ;;  %v7055_v57 = vpack.c.bf16 %v7023_v45, %v7023_v45 }
 0xfa4   :  { %9710 = vmatmul.msk.bf16.vlgmr.msra.gmra.mxu2 %vm55_vm0, %v14468_v33  ;;  %v14689_v58 = vunpack.c.l.b16 %v7055_v57  ;;  %v7770_v33 = vpack.c.b16 %v14691_v9, %v14681_v38  ;;  %v16131_v9 = vld [vmem:[#allocation32_spill] sm:$0xff] }
 0xfa5   :  { %7608 = vmatpush.bf16.msrb.mxu2 %v16090_v16  ;;  %v14705_v34 = vpop.f32.mrf.mxu2 }
 0xfa6   :  { %v7839_v16 = vpack.c.b16 %v14689_v58, %v14685_v47 }
 0xfa7   :  { %9700 = vmatmul.msk.bf16.vlgmr.msrb.gmra.mxu1 %vm55_vm0, %v14687_v15 }
 0xfa8   :  { %v14698_v52 = vpop.permute.xlu1 %7463 }
 0xfa9   :  { %7609 = vmatpush.bf16.msrb.mxu2 %v14255_v35  ;;  %7473 = vmatpush.bf16.msra.mxu1 %v14698_v52 }
 0xfad   :  { %7748 = vmatpush.bf16.msra.mxu2 %v7489_v12  ;;  %v14709_v2 = vpop.f32.mrf.mxu2 }
 0xfae   :  { %9704 = vmatmul.msk.bf16.vlgmr.msrb.gmra.mxu3 %vm55_vm0, %v14510_v40 }
 0xfb0   :  { %v7539_v59 = vpop.permute.xlu1 %7538 }
 0xfb1   :  { %7749 = vmatpush.bf16.msra.mxu2 %v7487_v10  ;;  %7548 = vmatpush.bf16.msrb.mxu0 %v7539_v59 }
 0xfb3   :  { %v6769_v35 = vpop.xlane.xlu0 %6768 }
 0xfb4   :  { %10104 = vrcp.f32 %v6769_v35  ;;  %9711 = vmatmul.msk.bf16.gmra.mxu2 %vm55_vm0, %v14535_v53 }
 0xfb5   :  { %v14718_v32 = vpop.f32.mrf.mxu2 }
 0xfb8   :  { %v7514_v12 = vpop.permute.xlu1 %7513 }
 0xfb9   :  { %7523 = vmatpush.bf16.msra.mxu3 %v7514_v12 }
 0xfba   :  { %v10105_v17 = vpop.eup %10104 }
 0xfbb   :  { %v6833_v36 = vmul.f32 %v10105_v17, %v6769_v35 }
 0xfbd   :  { %v6865_v37 = vsub.f32 2.0, %v6833_v36 }
 0xfbe   :  { %9705 = vmatmul.msk.bf16.gmra.mxu3 %vm55_vm0, %v14588_v0  ;;  %v14721_v0 = vpop.f32.mrf.mxu2 }
 0xfbf   :  { %v6897_v24 = vmul.f32 %v10105_v17, %v6865_v37 }
 0xfc1   :  { %v6929_v40 = vmul.f32 %v14442_v46, %v6897_v24 }
 0xfc3   :  { %v6961_v43 = vpack.c.bf16 %v6929_v40, %v6929_v40 }
 0xfc4   :  { %9718 = vmatmul.msk.bf16.vlgmr.msrb.gmra.mxu2 %vm55_vm0, %v16114_v22  ;;  %v16119_v22 = vpack.c.b16 %v14528_v41, %v14526_v19  ;;  %v16121_v19 = vld [vmem:[#allocation42_spill] sm:$0xff]  ;;  %v16122_v41 = vld [vmem:[#allocation60_spill] sm:$0xff] }
 0xfc5   :  { %v6993_v5 = vunpack.c.l.bf16 %v6961_v43  ;;  %v7352_v21 = vunpack.c.l.b16 %v6961_v43 }
 0xfc6   :  { %v7462_v53 = vpop.permute.xlu0 %7461 }
 0xfc7   :  { %v7025_v55 = vsub.f32 %v6929_v40, %v6993_v5  ;;  %7474 = vmatpush.bf16.msra.mxu1 %v7462_v53 }
 0xfc9   :  { %v7057_v36 = vpack.c.bf16 %v7025_v55, %v7025_v55 }
 0xfcd   :  { %v6766_v1 = vpop.xlane.xlu2 %6765 }
 0xfce   :  { %v7512_v10 = vpop.permute.xlu0 %7511  ;;  %10106 = vrcp.f32 %v6766_v1 }
 0xfcf   :  { %7524 = vmatpush.bf16.msra.mxu3 %v7512_v10 }
 0xfd2   :  { %9712 = vmatmul.msk.bf16.vlgmr.msra.gmra.mxu3 %vm55_vm0, %v14641_v60  ;;  %v14733_v60 = vpop.f32.mrf.mxu2 }
 0xfd3   :  { %7643 = vmatpush.bf16.msrb.mxu3 %v14517_v27 }
 0xfd4   :  { %v10107_v31 = vpop.eup %10106  ;;  %9719 = vmatmul.msk.bf16.gmra.mxu2 %vm55_vm0, %v16115_v39 }
 0xfd5   :  { %v6832_v46 = vmul.f32 %v10107_v31, %v6766_v1  ;;  %v7537_v23 = vpop.permute.xlu2 %7536 }
 0xfd6   :  { %7549 = vmatpush.bf16.msrb.mxu0 %v7537_v23 }
 0xfd7   :  { %7644 = vmatpush.bf16.msrb.mxu3 %v14638_v4  ;;  %v6864_v45 = vsub.f32 2.0, %v6832_v46  ;;  %v16125_v46 = vld [vmem:[#allocation64_spill] sm:$0xff] }
 0xfd9   :  { %v6896_v27 = vmul.f32 %v10107_v31, %v6864_v45  ;;  %9714 = vmatmul.msk.bf16.vlgmr.msrb.gmra.mxu0 %vm55_vm0, %v14568_v44  ;;  %v16123_v31 = vpack.c.b16 %v16121_v19, %v16122_v41 }
 0xfda   :  { %7678 = vmatpush.bf16.msra.mxu0 %v16094_v25  ;;  %v7562_v25 = vpop.permute.xlu1 %7561 }
 0xfdb   :  { %7783 = vmatpush.bf16.msra.mxu3 %v7514_v12  ;;  %v6928_v4 = vmul.f32 %v14506_v7, %v6896_v27  ;;  %v14740_v7 = vpop.f32.mrf.mxu0  ;;  %v14746_v12 = vpop.f32.mrf.mxu2 }
 0xfdd   :  { %v6960_v63 = vpack.c.bf16 %v6928_v4, %v6928_v4  ;;  %v7564_v11 = vpop.permute.xlu2 %7563  ;;  %v14754_v24 = vpop.f32.mrf.mxu3 }
 0xfde   :  { %7679 = vmatpush.bf16.msra.mxu0 %v16098_v51  ;;  %7573 = vmatpush.bf16.msrb.mxu1 %v7564_v11  ;;  %v16116_v51 = vld [vmem:[#allocation36_spill] sm:$0xff] }
 0xfdf   :  { %7784 = vmatpush.bf16.msra.mxu3 %v7512_v10  ;;  %v6992_v18 = vunpack.c.l.bf16 %v6960_v63  ;;  %v7351_v56 = vunpack.c.l.b16 %v6960_v63 }
 0xfe1   :  { %v7024_v57 = vsub.f32 %v6928_v4, %v6992_v18  ;;  %v7354_v44 = vpack.c.b16 %v7352_v21, %v7351_v56 }
 0xfe2   :  { %7818 = vmatpush.bf16.msrb.mxu0 %v7539_v59  ;;  %9713 = vmatmul.msk.bf16.gmra.mxu3 %vm55_vm0, %v14668_v28  ;;  %v16117_v59 = vld [vmem:[#allocation72_spill] sm:$0xff]  ;;  %v14752_v28 = vunpack.c.l.b16 %v7057_v36 }
 0xfe3   :  { %7574 = vmatpush.bf16.msrb.mxu1 %v7562_v25  ;;  %v16118_v35 = vpack.c.b16 %v16116_v51, %v16117_v59  ;;  %v7056_v17 = vpack.c.bf16 %v7024_v57, %v7024_v57  ;;  %v14758_v43 = vpop.f32.mrf.mxu0 }
 0xfe4   :  { %9701 = vmatmul.msk.bf16.gmra.mxu1 %vm55_vm0, %v7354_v44 }
 0xfe5   :  { %9726 = vmatmul.msk.bf16.vlgmr.msra.gmra.mxu2 %vm55_vm0, %v16118_v35  ;;  %v14750_v37 = vunpack.c.l.b16 %v7056_v17  ;;  %v14756_v40 = vpop.f32.mrf.mxu2  ;;  %v14775_v1 = vpop.f32.mrf.mxu3 }
 0xfe6   :  { %7819 = vmatpush.bf16.msrb.mxu0 %v7537_v23  ;;  %v16126_v23 = vpack.c.b16 %v14512_v3, %v16125_v46  ;;  %v16128_v3 = vpack.c.b16 %v14582_v26, %v14580_v62  ;;  %v16129_v26 = vld [vmem:[#allocation65_spill] sm:$0xff] }
 0xfe7   :  { %v7840_v5 = vpack.c.b16 %v14752_v28, %v14750_v37  ;;  %v16130_v56 = vpack.c.b16 %v14610_v29, %v16129_v26 }
 0xfe9   :  { %9715 = vmatmul.msk.bf16.gmra.mxu0 %vm55_vm0, %v14606_v14  ;;  %v16120_v14 = vpack.c.b16 %v14556_v20, %v14559_v49  ;;  %v16124_v20 = vpack.c.b16 %v14608_v54, %v14616_v42  ;;  %v16127_v54 = vpack.c.b16 %v14649_v13, %v14651_v50 }
 0xfeb   :  { %v14773_v55 = vpop.f32.mrf.mxu0 }
 0xfed   :  { %v14777_v10 = vpop.f32.mrf.mxu2 }
 0xff2   :  { %9720 = vmatmul.msk.bf16.vlgmr.msrb.gmra.mxu3 %vm55_vm0, %v16119_v22 }
 0xff3   :  { %v14783_v39 = vpop.f32.mrf.mxu0 }
 0xff4   :  { %9708 = vmatmul.msk.bf16.vlgmr.msra.gmra.mxu1 %vm55_vm0, %v14604_v61 }
 0xff5   :  { %7713 = vmatpush.bf16.msra.mxu1 %v14698_v52  ;;  %9727 = vmatmul.msk.bf16.gmra.mxu2 %vm55_vm0, %v16120_v14 }
 0xff6   :  { %v7401_v52 = vpop.f32.mrf.mxu2 }
 0xff7   :  { %v7402_v41 = vadd.f32 %v7401_v52, %v14705_v34 }
 0xff9   :  { %7714 = vmatpush.bf16.msra.mxu1 %v7462_v53  ;;  %9722 = vmatmul.msk.bf16.vlgmr.msra.gmra.mxu0 %vm55_vm0, %v16123_v31 }
 0xffb   :  { %v14793_v53 = vpop.f32.mrf.mxu0 }
 0xffd   :  { %v7135_v61 = vpop.f32.mrf.mxu3 }
 0xffe   :  { %v14799_v45 = vpop.f32.mrf.mxu2 }
 0xfff   :  { %v14826_v18 = vpop.f32.mrf.mxu1 }
0x1002   :  { %9721 = vmatmul.msk.bf16.gmra.mxu3 %vm55_vm0, %v16124_v20 }
0x1003   :  { %v14805_v42 = vpop.f32.mrf.mxu0 }
0x1004   :  { %9709 = vmatmul.msk.bf16.gmra.mxu1 %vm55_vm0, %v14659_v6 }
0x1005   :  { %v14791_v49 = vpop.f32.mrf.mxu3 }
0x1006   :  { %v7406_v6 = vpop.f32.mrf.mxu2 }
0x1007   :  { %v14834_v38 = vpop.f32.mrf.mxu1 }
0x1009   :  { %9723 = vmatmul.msk.bf16.gmra.mxu0 %vm55_vm0, %v16126_v23 }
0x100b   :  { %v14815_v63 = vpop.f32.mrf.mxu0 }
0x100d   :  { %v7294_v27 = vpop.f32.mrf.mxu3 }
0x100e   :  { %v14817_v13 = vpop.f32.mrf.mxu2 }
0x1012   :  { %9728 = vmatmul.msk.bf16.vlgmr.msra.gmra.mxu3 %vm55_vm0, %v16127_v54 }
0x1014   :  { %9716 = vmatmul.msk.bf16.vlgmr.msrb.gmra.mxu1 %vm55_vm0, %v14687_v15  ;;  %v14824_v15 = vpop.f32.mrf.mxu0  ;;  %v14844_v35 = vpop.f32.mrf.mxu1 }
0x1015   :  { %7853 = vmatpush.bf16.msrb.mxu1 %v7564_v11  ;;  %v14809_v4 = vpop.f32.mrf.mxu3 }
0x1019   :  { %7854 = vmatpush.bf16.msrb.mxu1 %v7562_v25  ;;  %9730 = vmatmul.msk.bf16.vlgmr.msrb.gmra.mxu0 %vm55_vm0, %v16128_v3 }
0x101c   :  { %v7451_v25 = vpop.f32.mrf.mxu0  ;;  %v14852_v14 = vpop.f32.mrf.mxu1 }
0x1021   :  { %v7299_v50 = vpop.f32.mrf.mxu3 }
0x1022   :  { %9729 = vmatmul.msk.bf16.gmra.mxu3 %vm55_vm0, %v7770_v33  ;;  %v16132_v33 = vld [vmem:[#allocation73_spill] sm:$0xff] }
0x1024   :  { %9717 = vmatmul.msk.bf16.gmra.mxu1 %vm55_vm0, %v7354_v44  ;;  %v16133_v44 = vpack.c.b16 %v16131_v9, %v16132_v33  ;;  %v7453_v17 = vpop.f32.mrf.mxu0  ;;  %v14861_v23 = vpop.f32.mrf.mxu1 }
0x1027   :  { %v7501_v11 = vpop.f32.mrf.mxu2 }
0x1029   :  { %v14828_v62 = vpop.f32.mrf.mxu3  ;;  %9731 = vmatmul.msk.bf16.gmra.mxu0 %vm55_vm0, %v16130_v56 }
0x102c   :  { %v14854_v19 = vpop.f32.mrf.mxu0  ;;  %v14874_v3 = vpop.f32.mrf.mxu1 }
0x102f   :  { %v7503_v21 = vpop.f32.mrf.mxu2 }
0x1031   :  { %v7426_v57 = vpop.f32.mrf.mxu3 }
0x1032   :  { %v7427_v37 = vadd.f32 %v7426_v57, %v14754_v24 }
0x1034   :  { %9724 = vmatmul.msk.bf16.vlgmr.msra.gmra.mxu1 %vm55_vm0, %v16133_v44  ;;  %v14863_v54 = vpop.f32.mrf.mxu0 }
0x1037   :  { %v14840_v51 = vpop.f32.mrf.mxu2 }
0x1039   :  { %v14842_v59 = vpop.f32.mrf.mxu3 }
0x103f   :  { %v14846_v29 = vpop.f32.mrf.mxu2 }
0x1041   :  { %v7431_v36 = vpop.f32.mrf.mxu3 }
0x1042   :  { %v7432_v22 = vadd.f32 %v7431_v36, %v7135_v61 }
0x1044   :  { %9725 = vmatmul.msk.bf16.gmra.mxu1 %vm55_vm0, %v7700_v8  ;;  %v7407_v8 = vadd.f32 %v7406_v6, %v14718_v32 }
0x1047   :  { %v7611_v31 = vpop.f32.mrf.mxu2 }
0x1048   :  { %v14857_v20 = vadd.f32 %v7611_v31, %v7402_v41 }
0x1049   :  { %v14859_v46 = vpop.f32.mrf.mxu3 }
0x104a   :  { %16134 = vst [vmem:[#allocation70_spill] sm:$0xff] %v14859_v46 }
0x104f   :  { %v14865_v61 = vpop.f32.mrf.mxu2 }
0x1054   :  { %9732 = vmatmul.msk.bf16.vlgmr.msrb.gmra.mxu1 %vm55_vm0, %v7839_v16  ;;  %v7502_v16 = vadd.f32 %v7501_v11, %v14733_v60 }
0x1055   :  { %v7526_v30 = vpop.f32.mrf.mxu3 }
0x1056   :  { %v14871_v48 = vadd.f32 %v7526_v30, %v7294_v27  ;;  %v7551_v34 = vpop.f32.mrf.mxu0 }
0x1057   :  { %v7616_v52 = vpop.f32.mrf.mxu2 }
0x1058   :  { %v14876_v26 = vadd.f32 %v7616_v52, %v7407_v8 }
0x105d   :  { %v14878_v56 = vpop.f32.mrf.mxu3 }
0x105e   :  { %v7553_v9 = vpop.f32.mrf.mxu0 }
0x105f   :  { %v14880_v33 = vpop.f32.mrf.mxu2 }
0x1061   :  { %v14882_v44 = vpop.f32.mrf.mxu1 }
0x1064   :  { %9733 = vmatmul.msk.bf16.gmra.mxu1 %vm55_vm0, %v7840_v5  ;;  %v7452_v5 = vadd.f32 %v7451_v25, %v14740_v7 }
0x1065   :  { %v7531_v47 = vpop.f32.mrf.mxu3 }
0x1066   :  { %v14888_v58 = vadd.f32 %v7531_v47, %v7299_v50  ;;  %v7556_v32 = vpop.f32.mrf.mxu0 }
0x1068   :  { %v7751_v27 = vpop.f32.mrf.mxu2 }
0x1069   :  { %v7882_v6 = vadd.f32 %v7751_v27, %v7502_v16  ;;  %v14891_v36 = vpop.f32.mrf.mxu1  ;;  %v7454_v16 = vadd.f32 %v7453_v17, %v14758_v43  ;;  %v7504_v27 = vadd.f32 %v7503_v21, %v14746_v12  ;;  %v7507_v12 = vadd.f32 %v14840_v51, %v14756_v40 }
0x106b   :  { %7938 = vrot.lane.b32.xlu1 %v7882_v6, %s10193_s25 }
0x106d   :  { %v14894_v41 = vpop.f32.mrf.mxu3 }
0x106e   :  { %v7558_v31 = vpop.f32.mrf.mxu0 }
0x1070   :  { %v7753_v52 = vpop.f32.mrf.mxu2 }
0x1071   :  { %v7476_v30 = vpop.f32.mrf.mxu1  ;;  %v7883_v24 = vadd.f32 %v7753_v52, %v7504_v27  ;;  %v7457_v27 = vadd.f32 %v14854_v19, %v14773_v55 }
0x1075   :  { %v7646_v28 = vpop.f32.mrf.mxu3 }
0x1076   :  { %v14898_v50 = vadd.f32 %v7646_v28, %v7427_v37  ;;  %v7681_v8 = vpop.f32.mrf.mxu0 }
0x1077   :  { %v7874_v60 = vadd.f32 %v7681_v8, %v7452_v5  ;;  %v16135_v5 = vld [vmem:[#allocation19_spill] sm:$0xff] }
0x1078   :  { %v7756_v43 = vpop.f32.mrf.mxu2 }
0x1079   :  { %v14900_v11 = vpop.f32.mrf.mxu1  ;;  %7906 = vrot.lane.b32.xlu0 %v7874_v60, %s10194_s26  ;;  %v7884_v17 = vadd.f32 %v7756_v43, %v7507_v12  ;;  %v7552_v60 = vadd.f32 %v7551_v34, %v14793_v53  ;;  %v7459_v34 = vadd.f32 %v14863_v54, %v14783_v39  ;;  %v7559_v12 = vadd.f32 %v7558_v31, %v14824_v15 }
0x107a   :  { %v7479_v15 = vadd.f32 %v14900_v11, %v14834_v38  ;;  %v8071_v38 = vpop.permute.xlu0 %8070  ;;  %v8069_v11 = vpop.permute.xlu1 %8068 }
0x107b   :  { %8092 = vmatpush.bf16.msrb.mxu2 %v8071_v38 }
0x107d   :  { %v14903_v47 = vpop.f32.mrf.mxu3 }
0x107e   :  { %v7683_v6 = vpop.f32.mrf.mxu0 }
0x107f   :  { %v7875_v57 = vadd.f32 %v7683_v6, %v7454_v16  ;;  %v7554_v6 = vadd.f32 %v7553_v9, %v14805_v42  ;;  %8093 = vmatpush.bf16.msrb.mxu2 %v8069_v11 }
0x1080   :  { %v7758_v53 = vpop.f32.mrf.mxu2 }
0x1081   :  { %v14907_v46 = vpop.f32.mrf.mxu1  ;;  %7908 = vrot.lane.b32.xlu2 %v7875_v57, %s10194_s26  ;;  %7940 = vrot.lane.b32.xlu0 %v7883_v24, %s10193_s25 }
0x1085   :  { %v7651_v7 = vpop.f32.mrf.mxu3 }
0x1086   :  { %v14911_v25 = vadd.f32 %v7651_v7, %v7432_v22  ;;  %v7686_v37 = vpop.f32.mrf.mxu0 }
0x1087   :  { %v7876_v24 = vadd.f32 %v7686_v37, %v7457_v27  ;;  %v7557_v37 = vadd.f32 %v7556_v32, %v14815_v63  ;;  %v7529_v63 = vadd.f32 %v14878_v56, %v14809_v4  ;;  %v7482_v27 = vadd.f32 %v14907_v46, %v14844_v35 }
0x1088   :  { %v7534_v56 = vadd.f32 %v14894_v41, %v14828_v62 }
0x1089   :  { %v14913_v28 = vpop.f32.mrf.mxu1  ;;  %8115 = vrot.lane.b32.xlu0 %v16135_v5, %s10192_s24  ;;  %v7509_v5 = vadd.f32 %v14846_v29, %v14777_v10  ;;  %v8118_v29 = vpop.permute.xlu2 %8117 }
0x108a   :  { %8127 = vmatpush.bf16.msrb.mxu3 %v8118_v29  ;;  %8168 = vmatpush.bf16.msra.mxu0 %v8118_v29 }
0x108b   :  { %v7885_v19 = vadd.f32 %v7758_v53, %v7509_v5  ;;  %v7484_v53 = vadd.f32 %v14913_v28, %v14852_v14 }
0x108d   :  { %v14929_v40 = vpop.f32.mrf.mxu3 }
0x108e   :  { %v7688_v21 = vpop.f32.mrf.mxu0 }
0x108f   :  { %v7877_v42 = vadd.f32 %v7688_v21, %v7459_v34 }
0x1091   :  { %v14919_v8 = vpop.f32.mrf.mxu1  ;;  %7942 = vrot.lane.b32.xlu0 %v7884_v17, %s10193_s25 }
0x1095   :  { %v7786_v9 = vpop.f32.mrf.mxu3 }
0x1096   :  { %v7821_v22 = vpop.f32.mrf.mxu0 }
0x1097   :  { %v7890_v52 = vadd.f32 %v7821_v22, %v7552_v60  ;;  %v7477_v60 = vadd.f32 %v7476_v30, %v14826_v18  ;;  %v7886_v18 = vadd.f32 %v7786_v9, %v14871_v48 }
0x1099   :  { %v14923_v16 = vpop.f32.mrf.mxu1  ;;  %7970 = vrot.lane.b32.xlu2 %v7890_v52, %s10195_s27 }
0x109a   :  { %v7579_v34 = vadd.f32 %v14923_v16, %v14874_v3 }
0x109d   :  { %v7788_v21 = vpop.f32.mrf.mxu3 }
0x109e   :  { %v7823_v51 = vpop.f32.mrf.mxu0  ;;  %v7887_v31 = vadd.f32 %v7788_v21, %v7529_v63 }
0x109f   :  { %v7891_v57 = vadd.f32 %v7823_v51, %v7554_v6 }
0x10a1   :  { %v7581_v7 = vpop.f32.mrf.mxu1  ;;  %7972 = vrot.lane.b32.xlu1 %v7891_v57, %s10195_s27  ;;  %7910 = vrot.lane.b32.xlu2 %v7876_v24, %s10194_s26  ;;  %v7577_v57 = vadd.f32 %v14919_v8, %v14861_v23 }
0x10a5   :  { %v7791_v52 = vpop.f32.mrf.mxu3 }
0x10a6   :  { %v7826_v55 = vpop.f32.mrf.mxu0  ;;  %v7888_v8 = vadd.f32 %v7791_v52, %v14888_v58  ;;  %v7409_v52 = vadd.f32 %v14817_v13, %v14721_v0 }
0x10a7   :  { %v7892_v39 = vadd.f32 %v7826_v55, %v7557_v37  ;;  %v7582_v55 = vadd.f32 %v7581_v7, %v14882_v44 }
0x10a9   :  { %v7583_v43 = vpop.f32.mrf.mxu1  ;;  %7912 = vrot.lane.b32.xlu1 %v7877_v42, %s10194_s26  ;;  %7944 = vrot.lane.b32.xlu2 %v7885_v19, %s10193_s25 }
0x10aa   :  { %v7584_v14 = vadd.f32 %v7583_v43, %v14891_v36  ;;  %v7404_v36 = vadd.f32 %v14799_v45, %v14709_v2 }
0x10ad   :  { %v7793_v48 = vpop.f32.mrf.mxu3 }
0x10ae   :  { %v7828_v17 = vpop.f32.mrf.mxu0  ;;  %v7889_v24 = vadd.f32 %v7793_v48, %v7534_v56 }
0x10af   :  { %v7893_v54 = vadd.f32 %v7828_v17, %v7559_v12  ;;  %v7867_v17 = vadd.f32 %v14865_v61, %v7404_v36 }
0x10b1   :  { %v7716_v22 = vpop.f32.mrf.mxu1  ;;  %7974 = vrot.lane.b32.xlu1 %v7892_v39, %s10195_s27  ;;  %7976 = vrot.lane.b32.xlu0 %v7893_v54, %s10195_s27 }
0x10b2   :  { %v7878_v10 = vadd.f32 %v7716_v22, %v7477_v60 }
0x10b4   :  { %7914 = vrot.lane.b32.xlu2 %v7878_v10, %s10194_s26 }
0x10b9   :  { %v7718_v32 = vpop.f32.mrf.mxu1  ;;  %7946 = vrot.lane.b32.xlu0 %v7886_v18, %s10193_s25 }
0x10ba   :  { %v7879_v30 = vadd.f32 %v7718_v32, %v7479_v15 }
0x10bc   :  { %7916 = vrot.lane.b32.xlu1 %v7879_v30, %s10194_s26  ;;  %7948 = vrot.lane.b32.xlu2 %v7887_v31, %s10193_s25 }
0x10c1   :  { %v7721_v6 = vpop.f32.mrf.mxu1 }
0x10c2   :  { %v7880_v4 = vadd.f32 %v7721_v6, %v7482_v27  ;;  %v7869_v27 = vadd.f32 %v14880_v33, %v7409_v52 }
0x10c4   :  { %7918 = vrot.lane.b32.xlu2 %v7880_v4, %s10194_s26 }
0x10c9   :  { %v7723_v51 = vpop.f32.mrf.mxu1 }
0x10ca   :  { %v7881_v41 = vadd.f32 %v7723_v51, %v7484_v53 }
0x10cc   :  { %7952 = vrot.lane.b32.xlu2 %v7889_v24, %s10193_s25 }
0x10d1   :  { %v7856_v35 = vpop.f32.mrf.mxu1 }
0x10d2   :  { %v7894_v46 = vadd.f32 %v7856_v35, %v7577_v57 }
0x10d4   :  { %7978 = vrot.lane.b32.xlu1 %v7894_v46, %s10195_s27 }
0x10d9   :  { %v7858_v62 = vpop.f32.mrf.mxu1 }
0x10da   :  { %v7895_v5 = vadd.f32 %v7858_v62, %v7579_v34 }
0x10db   :  { %v7909_v44 = vpop.permute.xlu2 %7908 }
0x10dc   :  { %7920 = vrot.lane.b32.xlu1 %v7881_v41, %s10194_s26  ;;  %7980 = vrot.lane.b32.xlu0 %v7895_v5, %s10195_s27  ;;  %v7995_v39 = vsel %vm842_vm11, %v7867_v17, %v7909_v44 }
0x10dd   :  { %v7939_v7 = vpop.permute.xlu1 %7938 }
0x10e1   :  { %v7861_v23 = vpop.f32.mrf.mxu1 }
0x10e2   :  { %v7896_v19 = vadd.f32 %v7861_v23, %v7582_v55 }
0x10e4   :  { %7982 = vrot.lane.b32.xlu1 %v7896_v19, %s10195_s27  ;;  %7950 = vrot.lane.b32.xlu0 %v7888_v8, %s10193_s25  ;;  %v7429_v19 = vadd.f32 %v14842_v59, %v14775_v1 }
0x10e9   :  { %v7863_v3 = vpop.f32.mrf.mxu1 }
0x10ea   :  { %v7897_v28 = vadd.f32 %v7863_v3, %v7584_v14 }
0x10eb   :  { %v7907_v16 = vpop.permute.xlu0 %7906 }
0x10ec   :  { %7984 = vrot.lane.b32.xlu0 %v7897_v28, %s10195_s27  ;;  %v7994_v58 = vsel %vm842_vm11, %v14857_v20, %v7907_v16  ;;  %v7871_v28 = vadd.f32 %v14903_v47, %v7429_v19 }
0x10ed   :  { %v8002_v12 = vsel %vm3403_vm13, %v7994_v58, %v7939_v7 }
0x10f3   :  { %v7941_v42 = vpop.permute.xlu0 %7940  ;;  %v7971_v37 = vpop.permute.xlu2 %7970 }
0x10f4   :  { %v8010_v43 = vsel %vm3412_vm12, %v8002_v12, %v7971_v37  ;;  %v8003_v54 = vsel %vm3403_vm13, %v7995_v39, %v7941_v42 }
0x10f5   :  { %v8018_v60 = vpack.c.bf16 %v8010_v43, %v8010_v43 }
0x10f7   :  { %v8026_v20 = vunpack.c.l.bf16 %v8018_v60  ;;  %v8054_v21 = vunpack.c.l.b16 %v8018_v60 }
0x10f9   :  { %v8034_v32 = vsub.f32 %v8010_v43, %v8026_v20 }
0x10fb   :  { %v8116_v9 = vpop.permute.xlu0 %8115  ;;  %v7911_v18 = vpop.permute.xlu2 %7910 }
0x10fc   :  { %8128 = vmatpush.bf16.msrb.mxu3 %v8116_v9  ;;  %8169 = vmatpush.bf16.msra.mxu0 %v8116_v9  ;;  %v7996_v4 = vsel %vm842_vm11, %v14876_v26, %v7911_v18 }
0x1103   :  { %v7943_v31 = vpop.permute.xlu0 %7942  ;;  %v7945_v38 = vpop.permute.xlu2 %7944 }
0x1104   :  { %v8004_v48 = vsel %vm3403_vm13, %v7996_v4, %v7943_v31 }
0x110e   :  { %v7915_v55 = vpop.permute.xlu2 %7914 }
0x110f   :  { %v7998_v14 = vsel %vm842_vm11, %v14898_v50, %v7915_v55  ;;  %v16138_v55 = vld [vmem:[#allocation52_spill] sm:$0xff] }
0x1113   :  { %v7973_v22 = vpop.permute.xlu1 %7972 }
0x1114   :  { %v8011_v10 = vsel %vm3412_vm12, %v8003_v54, %v7973_v22 }
0x1115   :  { %v8019_v29 = vpack.c.bf16 %v8011_v10, %v8011_v10 }
0x1116   :  { %v7949_v16 = vpop.permute.xlu2 %7948 }
0x1117   :  { %v8027_v63 = vunpack.c.l.bf16 %v8019_v29  ;;  %v8055_v15 = vunpack.c.l.b16 %v8019_v29  ;;  %v16136_v29 = vld [vmem:[#allocation70_spill] sm:$0xff] }
0x1119   :  { %v8035_v2 = vsub.f32 %v8011_v10, %v8027_v63  ;;  %v8062_v45 = vpack.c.b16 %v8055_v15, %v8054_v21  ;;  %v7434_v21 = vadd.f32 %v16136_v29, %v14791_v49 }
0x111b   :  { %v8042_v30 = vpack.c.bf16 %v8035_v2, %v8034_v32  ;;  %v7913_v61 = vpop.permute.xlu1 %7912  ;;  %9734 = vmatmul.msk.bf16.vlgmr.msrb.gmra.mxu2 %vm55_vm0, %v8062_v45  ;;  %9738 = vmatmul.msk.bf16.vlgmr.msrb.gmra.mxu3 %vm55_vm0, %v8062_v45  ;;  %v7873_v15 = vadd.f32 %v14929_v40, %v7434_v21 }
0x111c   :  { %v7997_v6 = vsel %vm842_vm11, %v7869_v27, %v7913_v61 }
0x111d   :  { %9742 = vmatmul.msk.bf16.vlgmr.msra.gmra.mxu0 %vm55_vm0, %v8042_v30  ;;  %v8005_v11 = vsel %vm3403_vm13, %v7997_v6, %v7945_v38 }
0x111e   :  { %v7919_v17 = vpop.permute.xlu2 %7918 }
0x111f   :  { %v8000_v54 = vsel %vm842_vm11, %v14911_v25, %v7919_v17 }
0x1123   :  { %v7975_v56 = vpop.permute.xlu1 %7974  ;;  %v7977_v51 = vpop.permute.xlu0 %7976 }
0x1124   :  { %v8012_v24 = vsel %vm3412_vm12, %v8004_v48, %v7975_v56  ;;  %v8013_v0 = vsel %vm3412_vm12, %v8005_v11, %v7977_v51 }
0x1125   :  { %v8020_v13 = vpack.c.bf16 %v8012_v24, %v8012_v24  ;;  %v8021_v57 = vpack.c.bf16 %v8013_v0, %v8013_v0 }
0x1126   :  { %v7953_v2 = vpop.permute.xlu2 %7952 }
0x1127   :  { %v8028_v35 = vunpack.c.l.bf16 %v8020_v13  ;;  %v8056_v33 = vunpack.c.l.b16 %v8020_v13  ;;  %v8029_v46 = vunpack.c.l.bf16 %v8021_v57  ;;  %v8057_v53 = vunpack.c.l.b16 %v8021_v57  ;;  %v15029_v13 = vld [vmem:[%s15569_s1 + $0x8] sm:$0x7f] }
0x1128   :  { %v15032_v57 = vperm.slane %v15029_v13, 2 }
0x1129   :  { %v8036_v34 = vsub.f32 %v8012_v24, %v8028_v35  ;;  %v8037_v62 = vsub.f32 %v8013_v0, %v8029_v46  ;;  %v8063_v26 = vpack.c.b16 %v8057_v53, %v8056_v33  ;;  %v16137_v35 = vld [vmem:[#allocation50_spill] sm:$0xff] }
0x112b   :  { %v8043_v41 = vpack.c.bf16 %v8037_v62, %v8036_v34  ;;  %9735 = vmatmul.msk.bf16.gmra.mxu2 %vm55_vm0, %v8063_v26  ;;  %9739 = vmatmul.msk.bf16.gmra.mxu3 %vm55_vm0, %v8063_v26  ;;  %v7947_v23 = vpop.permute.xlu0 %7946 }
0x112c   :  { %v8006_v3 = vsel %vm3403_vm13, %v7998_v14, %v7947_v23 }
0x112d   :  { %9743 = vmatmul.msk.bf16.gmra.mxu0 %vm55_vm0, %v8043_v41 }
0x112e   :  { %v7917_v5 = vpop.permute.xlu1 %7916 }
0x112f   :  { %v7999_v9 = vsel %vm842_vm11, %v7871_v28, %v7917_v5 }
0x1130   :  { %v8007_v7 = vsel %vm3403_vm13, %v7999_v9, %v7949_v16  ;;  %v16139_v9 = vld [vmem:[#allocation11_spill] sm:$0xff] }
0x1146   :  { %v7979_v8 = vpop.permute.xlu1 %7978 }
0x1147   :  { %v8014_v42 = vsel %vm3412_vm12, %v8006_v3, %v7979_v8 }
0x1148   :  { %v8022_v44 = vpack.c.bf16 %v8014_v42, %v8014_v42 }
0x114a   :  { %v8030_v1 = vunpack.c.l.bf16 %v8022_v44  ;;  %v8058_v36 = vunpack.c.l.b16 %v8022_v44 }
0x114c   :  { %v8038_v60 = vsub.f32 %v8014_v42, %v8030_v1 }
0x114e   :  { %v7921_v58 = vpop.permute.xlu1 %7920  ;;  %v7981_v37 = vpop.permute.xlu0 %7980 }
0x114f   :  { %v8015_v12 = vsel %vm3412_vm12, %v8007_v7, %v7981_v37  ;;  %v8001_v25 = vsel %vm842_vm11, %v7873_v15, %v7921_v58 }
0x1150   :  { %v8023_v59 = vpack.c.bf16 %v8015_v12, %v8015_v12  ;;  %v8009_v45 = vsel %vm3403_vm13, %v8001_v25, %v7953_v2 }
0x1152   :  { %v8031_v50 = vunpack.c.l.bf16 %v8023_v59  ;;  %v8059_v43 = vunpack.c.l.b16 %v8023_v59 }
0x1154   :  { %v8039_v47 = vsub.f32 %v8015_v12, %v8031_v50  ;;  %v8064_v39 = vpack.c.b16 %v8059_v43, %v8058_v36  ;;  %v16140_v50 = vld [vmem:[#allocation12_spill] sm:$0xff] }
0x1156   :  { %v8044_v22 = vpack.c.bf16 %v8039_v47, %v8038_v60  ;;  %v7983_v10 = vpop.permute.xlu1 %7982  ;;  %9736 = vmatmul.msk.bf16.gmra.mxu2 %vm55_vm0, %v8064_v39  ;;  %9740 = vmatmul.msk.bf16.gmra.mxu3 %vm55_vm0, %v8064_v39  ;;  %v7951_v20 = vpop.permute.xlu0 %7950 }
0x1157   :  { %v8008_v63 = vsel %vm3403_vm13, %v8000_v54, %v7951_v20  ;;  %v16141_v20 = vld [vmem:[#allocation16_spill] sm:$0xff] }
0x1158   :  { %9744 = vmatmul.msk.bf16.gmra.mxu0 %vm55_vm0, %v8044_v22  ;;  %v8016_v18 = vsel %vm3412_vm12, %v8008_v63, %v7983_v10 }
0x1159   :  { %v8024_v32 = vpack.c.bf16 %v8016_v18, %v8016_v18 }
0x115b   :  { %v8032_v61 = vunpack.c.l.bf16 %v8024_v32  ;;  %v8060_v49 = vunpack.c.l.b16 %v8024_v32 }
0x115d   :  { %v8040_v4 = vsub.f32 %v8016_v18, %v8032_v61 }
0x115e   :  { %v7985_v31 = vpop.permute.xlu0 %7984 }
0x115f   :  { %v8017_v30 = vsel %vm3412_vm12, %v8009_v45, %v7985_v31  ;;  %v16142_v45 = vld [vmem:[#allocation15_spill] sm:$0xff] }
0x1160   :  { %v8025_v52 = vpack.c.bf16 %v8017_v30, %v8017_v30 }
0x1162   :  { %v8033_v27 = vunpack.c.l.bf16 %v8025_v52  ;;  %v8061_v6 = vunpack.c.l.b16 %v8025_v52 }
0x1164   :  { %v8041_v38 = vsub.f32 %v8017_v30, %v8033_v27  ;;  %v8065_v48 = vpack.c.b16 %v8061_v6, %v8060_v49 }
0x1166   :  { %v8045_v40 = vpack.c.bf16 %v8041_v38, %v8040_v4  ;;  %9737 = vmatmul.msk.bf16.gmra.mxu2 %vm55_vm0, %v8065_v48  ;;  %9741 = vmatmul.msk.bf16.gmra.mxu3 %vm55_vm0, %v8065_v48  ;;  %v16143_v38 = vld [vmem:[#allocation23_spill] sm:$0xff] }
0x1168   :  { %9745 = vmatmul.msk.bf16.gmra.mxu0 %vm55_vm0, %v8045_v40 }
0x119a   :  { %v8171_v56 = vpop.f32.mrf.mxu0 }
0x119e   :  { %v8095_v11 = vpop.f32.mrf.mxu2  ;;  %v8130_v51 = vpop.f32.mrf.mxu3 }
0x119f   :  { %v8131_v24 = vadd.f32 %v8130_v51, %v8095_v11 }
0x11a1   :  { %v8191_v0 = vadd.f32 %v8171_v56, %v8131_v24 }
0x11a2   :  { %v8173_v46 = vpop.f32.mrf.mxu0 }
0x11a3   :  { %v8199_v33 = vadd.f32 %v8191_v0, %v16137_v35  ;;  %v16144_v35 = vld [vmem:[#allocation5_spill] sm:$0xff] }
0x11a5   :  { %v15036_v53 = vadd.f32 %v15032_v57, %v8199_v33 }
0x11a6   :  { %v8097_v34 = vpop.f32.mrf.mxu2  ;;  %v8132_v62 = vpop.f32.mrf.mxu3 }
0x11a7   :  { %v8133_v26 = vadd.f32 %v8132_v62, %v8097_v34  ;;  %v8216_v41 = vsel %vm55_vm0, %v15036_v53, 0.0 }
0x11a8   :  { %8217 = vadd.xlane.f32.xlu2 %v8216_v41  ;;  %v16145_v41 = vld [vmem:[#allocation24_spill] sm:$0xff] }
0x11a9   :  { %v8192_v5 = vadd.f32 %v8173_v46, %v8133_v26 }
0x11aa   :  { %v8176_v8 = vpop.f32.mrf.mxu0 }
0x11ab   :  { %v8200_v23 = vadd.f32 %v8192_v5, %v16138_v55 }
0x11ad   :  { %v8209_v19 = vadd.f32 %v15032_v57, %v8200_v23 }
0x11ae   :  { %v8100_v14 = vpop.f32.mrf.mxu2  ;;  %v8135_v3 = vpop.f32.mrf.mxu3 }
0x11af   :  { %v8136_v28 = vadd.f32 %v8135_v3, %v8100_v14  ;;  %v8219_v16 = vsel %vm55_vm0, %v8209_v19, 0.0 }
0x11b0   :  { %8220 = vadd.xlane.f32.xlu1 %v8219_v16 }
0x11b1   :  { %v8193_v42 = vadd.f32 %v8176_v8, %v8136_v28 }
0x11b2   :  { %v8178_v59 = vpop.f32.mrf.mxu0 }
0x11b3   :  { %v8201_v44 = vadd.f32 %v8193_v42, %v16139_v9 }
0x11b5   :  { %v15045_v58 = vadd.f32 %v15032_v57, %v8201_v44 }
0x11b6   :  { %v8102_v7 = vpop.f32.mrf.mxu2  ;;  %v8137_v37 = vpop.f32.mrf.mxu3 }
0x11b7   :  { %v8138_v12 = vadd.f32 %v8137_v37, %v8102_v7  ;;  %v8222_v1 = vsel %vm55_vm0, %v15045_v58, 0.0 }
0x11b8   :  { %8223 = vadd.xlane.f32.xlu0 %v8222_v1 }
0x11b9   :  { %v8194_v36 = vadd.f32 %v8178_v59, %v8138_v12 }
0x11bb   :  { %v8202_v43 = vadd.f32 %v8194_v36, %v16140_v50 }
0x11bd   :  { %v15051_v17 = vadd.f32 %v15032_v57, %v8202_v43 }
0x11bf   :  { %v8225_v60 = vsel %vm55_vm0, %v15051_v17, 0.0 }
0x11c0   :  { %8226 = vadd.xlane.f32.xlu2 %v8225_v60 }
0x11d5   :  { %v8181_v47 = vpop.f32.mrf.mxu0 }
0x11d9   :  { %v8105_v39 = vpop.f32.mrf.mxu2  ;;  %v8140_v54 = vpop.f32.mrf.mxu3 }
0x11da   :  { %v8141_v22 = vadd.f32 %v8140_v54, %v8105_v39 }
0x11dc   :  { %v8195_v10 = vadd.f32 %v8181_v47, %v8141_v22 }
0x11dd   :  { %v8183_v21 = vpop.f32.mrf.mxu0 }
0x11de   :  { %v8203_v29 = vadd.f32 %v8195_v10, %v16141_v20 }
0x11e0   :  { %v8212_v63 = vadd.f32 %v15032_v57, %v8203_v29 }
0x11e1   :  { %v8107_v15 = vpop.f32.mrf.mxu2  ;;  %v8142_v18 = vpop.f32.mrf.mxu3 }
0x11e2   :  { %v8143_v25 = vadd.f32 %v8142_v18, %v8107_v15  ;;  %v8228_v32 = vsel %vm55_vm0, %v8212_v63, 0.0 }
0x11e3   :  { %8229 = vadd.xlane.f32.xlu1 %v8228_v32 }
0x11e4   :  { %v8196_v2 = vadd.f32 %v8183_v21, %v8143_v25 }
0x11e5   :  { %v8186_v6 = vpop.f32.mrf.mxu0 }
0x11e6   :  { %v8204_v31 = vadd.f32 %v8196_v2, %v16142_v45 }
0x11e8   :  { %v8213_v30 = vadd.f32 %v15032_v57, %v8204_v31 }
0x11e9   :  { %v8110_v61 = vpop.f32.mrf.mxu2  ;;  %v8145_v52 = vpop.f32.mrf.mxu3 }
0x11ea   :  { %v8146_v49 = vadd.f32 %v8145_v52, %v8110_v61  ;;  %v8231_v27 = vsel %vm55_vm0, %v8213_v30, 0.0 }
0x11eb   :  { %8232 = vadd.xlane.f32.xlu0 %v8231_v27 }
0x11ec   :  { %v8197_v4 = vadd.f32 %v8186_v6, %v8146_v49 }
0x11ed   :  { %v8188_v46 = vpop.f32.mrf.mxu0 }
0x11ee   :  { %v8205_v48 = vadd.f32 %v8197_v4, %v16143_v38 }
0x11f0   :  { %v15063_v40 = vadd.f32 %v15032_v57, %v8205_v48 }
0x11f1   :  { %v8112_v11 = vpop.f32.mrf.mxu2  ;;  %v8147_v51 = vpop.f32.mrf.mxu3 }
0x11f2   :  { %v8234_v56 = vsel %vm55_vm0, %v15063_v40, 0.0  ;;  %v8148_v24 = vadd.f32 %v8147_v51, %v8112_v11 }
0x11f3   :  { %8235 = vadd.xlane.f32.xlu0 %v8234_v56 }
0x11f4   :  { %v8198_v34 = vadd.f32 %v8188_v46, %v8148_v24  ;;  %v9607_v24 = vld [vmem:[%s15570_s2 + $0x68] sm:$0xff] }
0x11f6   :  { %v8206_v5 = vadd.f32 %v8198_v34, %v16145_v41  ;;  %v8440_v34 = vpack.c.bf16 %v9607_v24, %v9607_v24  ;;  %v9605_v41 = vld [vmem:[%s15570_s2 + $0x58] sm:$0xff] }
0x11f8   :  { %v15079_v3 = vadd.f32 %v15032_v57, %v8206_v5 }
0x11fa   :  { %v8237_v16 = vsel %vm55_vm0, %v15079_v3, 0.0 }
0x121b   :  { %v8218_v0 = vpop.xlane.xlu2 %8217 }
0x121c   :  { %v8240_v33 = vmul.f32 %v8218_v0, %v16144_v35  ;;  %v9609_v0 = vld [vmem:[%s15570_s2 + $0x78] sm:$0xff] }
0x121e   :  { %v15069_v62 = vsub.f32 %v15036_v53, %v8240_v33  ;;  %v9603_v33 = vld [vmem:[%s15570_s2 + $0x48] sm:$0xff] }
0x1220   :  { %v8256_v26 = vmul.f32 %v15069_v62, %v15069_v62 }
0x1222   :  { %v8264_v55 = vsel %vm55_vm0, %v8256_v26, 0.0  ;;  %v8441_v26 = vpack.c.bf16 %v9609_v0, %v9609_v0 }
0x1223   :  { %v8221_v23 = vpop.xlane.xlu1 %8220  ;;  %8265 = vadd.xlane.f32.xlu2 %v8264_v55  ;;  %v15145_v55 = vperm.slane %v15029_v13, 3 }
0x1224   :  { %v8241_v8 = vmul.f32 %v8221_v23, %v16144_v35 }
0x1226   :  { %v15076_v14 = vsub.f32 %v8209_v19, %v8241_v8  ;;  %v8438_v8 = vpack.c.bf16 %v9603_v33, %v9603_v33 }
0x1228   :  { %v8257_v53 = vmul.f32 %v15076_v14, %v15076_v14 }
0x122a   :  { %v8267_v28 = vsel %vm55_vm0, %v8257_v53, 0.0  ;;  %v8439_v53 = vpack.c.bf16 %v9605_v41, %v9605_v41 }
0x122b   :  { %8268 = vadd.xlane.f32.xlu1 %v8267_v28  ;;  %8238 = vadd.xlane.f32.xlu2 %v8237_v16  ;;  %v8224_v42 = vpop.xlane.xlu0 %8223 }
0x122c   :  { %v8242_v9 = vmul.f32 %v8224_v42, %v16144_v35  ;;  %v8444_v42 = vunpack.c.l.bf16 %v8440_v34 }
0x122e   :  { %v15088_v44 = vsub.f32 %v15045_v58, %v8242_v9  ;;  %v15151_v9 = vperm.slane %v15029_v13, 4 }
0x1230   :  { %v8258_v57 = vmul.f32 %v15088_v44, %v15088_v44 }
0x1232   :  { %v8270_v19 = vsel %vm55_vm0, %v8258_v57, 0.0  ;;  %v8445_v57 = vunpack.c.l.bf16 %v8441_v26 }
0x1233   :  { %v8227_v7 = vpop.xlane.xlu2 %8226  ;;  %8271 = vadd.xlane.f32.xlu1 %v8270_v19  ;;  %v8519_v19 = vunpack.c.l.b16 %v8440_v34 }
0x1234   :  { %v8243_v37 = vmul.f32 %v8227_v7, %v16144_v35 }
0x1236   :  { %v15095_v12 = vsub.f32 %v15051_v17, %v8243_v37 }
0x1238   :  { %v8259_v1 = vmul.f32 %v15095_v12, %v15095_v12 }
0x123a   :  { %v8273_v59 = vsel %vm55_vm0, %v8259_v1, 0.0  ;;  %v8448_v1 = vsub.f32 %v9607_v24, %v8444_v42 }
0x123b   :  { %8274 = vadd.xlane.f32.xlu0 %v8273_v59  ;;  %v8520_v59 = vunpack.c.l.b16 %v8441_v26 }
0x1256   :  { %v8230_v36 = vpop.xlane.xlu1 %8229 }
0x1257   :  { %v8244_v50 = vmul.f32 %v8230_v36, %v16144_v35 }
0x1259   :  { %v15101_v43 = vsub.f32 %v8212_v63, %v8244_v50  ;;  %v8449_v50 = vsub.f32 %v9609_v0, %v8445_v57 }
0x125b   :  { %v8260_v60 = vmul.f32 %v15101_v43, %v15101_v43 }
0x125d   :  { %v8276_v47 = vsel %vm55_vm0, %v8260_v60, 0.0  ;;  %v8442_v60 = vunpack.c.l.bf16 %v8438_v8 }
0x125e   :  { %8277 = vadd.xlane.f32.xlu2 %v8276_v47  ;;  %v8233_v39 = vpop.xlane.xlu0 %8232  ;;  %v8443_v47 = vunpack.c.l.bf16 %v8439_v53 }
0x125f   :  { %v8245_v54 = vmul.f32 %v8233_v39, %v16144_v35 }
0x1261   :  { %v15107_v22 = vsub.f32 %v8213_v30, %v8245_v54 }
0x1263   :  { %v8261_v10 = vmul.f32 %v15107_v22, %v15107_v22 }
0x1265   :  { %v8279_v20 = vsel %vm55_vm0, %v8261_v10, 0.0  ;;  %v8522_v10 = vpack.c.b16 %v8520_v59, %v8519_v19 }
0x1266   :  { %8280 = vadd.xlane.f32.xlu1 %v8279_v20  ;;  %v8236_v29 = vpop.xlane.xlu0 %8235  ;;  %v8517_v20 = vunpack.c.l.b16 %v8438_v8 }
0x1267   :  { %v8246_v21 = vmul.f32 %v8236_v29, %v16144_v35  ;;  %v8518_v29 = vunpack.c.l.b16 %v8439_v53  ;;  %8531 = vmatpush.bf16.msra.mxu2 %v8522_v10  ;;  %8572 = vmatpush.bf16.msra.mxu3 %v8522_v10 }
0x1269   :  { %v15114_v63 = vsub.f32 %v15063_v40, %v8246_v21 }
0x126b   :  { %v8262_v15 = vmul.f32 %v15114_v63, %v15114_v63 }
0x126d   :  { %v8282_v18 = vsel %vm55_vm0, %v8262_v15, 0.0 }
0x126e   :  { %8283 = vadd.xlane.f32.xlu0 %v8282_v18  ;;  %v8451_v18 = vpack.c.bf16 %v8449_v50, %v8448_v1 }
0x1270   :  { %8490 = vmatpush.bf16.msra.mxu1 %v8451_v18 }
0x1296   :  { %v8266_v25 = vpop.xlane.xlu2 %8265 }
0x1297   :  { %v8288_v32 = vmul.f32 %v8266_v25, %v16144_v35  ;;  %v8446_v25 = vsub.f32 %v9603_v33, %v8442_v60 }
0x1299   :  { %v8296_v2 = vadd.f32 1e-05, %v8288_v32 }
0x129b   :  { %10108 = vrsqrt.f32 %v8296_v2  ;;  %vm8310_vm12 = vweird.f32 %v8296_v2 }
0x129e   :  { %v8269_v45 = vpop.xlane.xlu1 %8268  ;;  %v8239_v30 = vpop.xlane.xlu2 %8238 }
0x129f   :  { %v8289_v31 = vmul.f32 %v8269_v45, %v16144_v35  ;;  %v8247_v61 = vmul.f32 %v8239_v30, %v16144_v35 }
0x12a1   :  { %v10109_v52 = vpop.eup %10108  ;;  %v15122_v49 = vadd.f32 1e-05, %v8289_v31  ;;  %v15125_v6 = vsub.f32 %v15079_v3, %v8247_v61 }
0x12a2   :  { %v8305_v27 = vmul.f32 %v10109_v52, %v8296_v2  ;;  %vm8311_vm11 = vweird.f32 %v10109_v52  ;;  %v8447_v2 = vsub.f32 %v9605_v41, %v8443_v47 }
0x12a3   :  { %10110 = vrsqrt.f32 %v15122_v49  ;;  %v8263_v38 = vmul.f32 %v15125_v6, %v15125_v6  ;;  %vm8312_vm13 = vmor %vm8310_vm12, %vm8311_vm11  ;;  %vm8320_vm8 = vweird.f32 %v15122_v49 }
0x12a4   :  { %v8306_v4 = vmul.f32 %v10109_v52, %v8305_v27 }
0x12a5   :  { %v8285_v56 = vsel %vm55_vm0, %v8263_v38, 0.0 }
0x12a6   :  { %v8307_v48 = vmul.f32 0.5, %v8306_v4  ;;  %v8272_v11 = vpop.xlane.xlu1 %8271  ;;  %8286 = vadd.xlane.f32.xlu2 %v8285_v56 }
0x12a7   :  { %v8290_v51 = vmul.f32 %v8272_v11, %v16144_v35 }
0x12a8   :  { %v8308_v46 = vsub.f32 1.5, %v8307_v48 }
0x12a9   :  { %v10111_v5 = vpop.eup %10110  ;;  %v15147_v23 = vadd.f32 1e-05, %v8290_v51 }
0x12aa   :  { %v8309_v28 = vmul.f32 %v10109_v52, %v8308_v46  ;;  %v8315_v16 = vmul.f32 %v10111_v5, %v15122_v49  ;;  %vm8321_vm7 = vweird.f32 %v10111_v5 }
0x12ab   :  { %10112 = vrsqrt.f32 %v15147_v23  ;;  %vm8322_vm9 = vmor %vm8320_vm8, %vm8321_vm7  ;;  %vm8330_vm14 = vweird.f32 %v15147_v23 }
0x12ac   :  { %v8313_v7 = vsel %vm8312_vm13, %v10109_v52, %v8309_v28  ;;  %v8316_v37 = vmul.f32 %v10111_v5, %v8315_v16  ;;  %v8450_v52 = vpack.c.bf16 %v8447_v2, %v8446_v25 }
0x12ad   :  { %v8384_v36 = vmul.f32 %v8313_v7, %v15069_v62  ;;  %v8521_v62 = vpack.c.b16 %v8518_v29, %v8517_v20 }
0x12ae   :  { %v8317_v39 = vmul.f32 0.5, %v8316_v37  ;;  %v8275_v54 = vpop.xlane.xlu0 %8274  ;;  %8491 = vmatpush.bf16.msra.mxu1 %v8450_v52 }
0x12af   :  { %v8393_v21 = vmul.f32 %v15145_v55, %v8384_v36  ;;  %v8291_v15 = vmul.f32 %v8275_v54, %v16144_v35  ;;  %8532 = vmatpush.bf16.msra.mxu2 %v8521_v62  ;;  %8573 = vmatpush.bf16.msra.mxu3 %v8521_v62 }
0x12b0   :  { %v8318_v32 = vsub.f32 1.5, %v8317_v39 }
0x12b1   :  { %v10113_v45 = vpop.eup %10112  ;;  %v8299_v31 = vadd.f32 1e-05, %v8291_v15  ;;  %v8402_v27 = vadd.f32 %v15151_v9, %v8393_v21 }
0x12b2   :  { %v8319_v30 = vmul.f32 %v10111_v5, %v8318_v32  ;;  %v8325_v61 = vmul.f32 %v10113_v45, %v15147_v23  ;;  %vm8331_vm10 = vweird.f32 %v10113_v45 }
0x12b3   :  { %10114 = vrsqrt.f32 %v8299_v31  ;;  %v8410_v11 = vpack.c.bf16 %v8402_v27, %v8402_v27  ;;  %vm8332_vm15 = vmor %vm8330_vm14, %vm8331_vm10  ;;  %vm8340_vm2 = vweird.f32 %v8299_v31 }
0x12b4   :  { %v8323_v4 = vsel %vm8322_vm9, %v10111_v5, %v8319_v30  ;;  %v8326_v38 = vmul.f32 %v10113_v45, %v8325_v61 }
0x12b5   :  { %v8385_v48 = vmul.f32 %v8323_v4, %v15076_v14  ;;  %v8418_v34 = vunpack.c.l.bf16 %v8410_v11  ;;  %v8460_v5 = vunpack.c.l.b16 %v8410_v11 }
0x12b6   :  { %v8327_v56 = vmul.f32 0.5, %v8326_v38 }
0x12b7   :  { %v8394_v51 = vmul.f32 %v15145_v55, %v8385_v48  ;;  %v8426_v16 = vsub.f32 %v8402_v27, %v8418_v34 }
0x12b8   :  { %v8328_v24 = vsub.f32 1.5, %v8327_v56 }
0x12b9   :  { %v10115_v49 = vpop.eup %10114  ;;  %v8403_v0 = vadd.f32 %v15151_v9, %v8394_v51 }
0x12ba   :  { %v8329_v33 = vmul.f32 %v10113_v45, %v8328_v24  ;;  %v8335_v46 = vmul.f32 %v10115_v49, %v8299_v31  ;;  %vm8341_vm1 = vweird.f32 %v10115_v49 }
0x12bb   :  { %v8411_v26 = vpack.c.bf16 %v8403_v0, %v8403_v0  ;;  %vm8342_vm3 = vmor %vm8340_vm2, %vm8341_vm1 }
0x12bc   :  { %v8336_v41 = vmul.f32 %v10115_v49, %v8335_v46  ;;  %v8333_v53 = vsel %vm8332_vm15, %v10113_v45, %v8329_v33 }
0x12bd   :  { %v8419_v14 = vunpack.c.l.bf16 %v8411_v26  ;;  %v8461_v8 = vunpack.c.l.b16 %v8411_v26  ;;  %v8386_v19 = vmul.f32 %v8333_v53, %v15088_v44 }
0x12be   :  { %v8337_v28 = vmul.f32 0.5, %v8336_v41 }
0x12bf   :  { %v8427_v42 = vsub.f32 %v8403_v0, %v8419_v14  ;;  %v8468_v57 = vpack.c.b16 %v8461_v8, %v8460_v5  ;;  %v8395_v1 = vmul.f32 %v15145_v55, %v8386_v19 }
0x12c0   :  { %v8338_v7 = vsub.f32 1.5, %v8337_v28 }
0x12c1   :  { %9746 = vmatmul.msk.bf16.vlgmr.msra.gmra.mxu1 %vm55_vm0, %v8468_v57  ;;  %9750 = vmatmul.msk.bf16.vlgmr.msra.gmra.mxu2 %vm55_vm0, %v8468_v57  ;;  %v8434_v37 = vpack.c.bf16 %v8427_v42, %v8426_v16  ;;  %v8404_v44 = vadd.f32 %v15151_v9, %v8395_v1 }
0x12c2   :  { %v8339_v23 = vmul.f32 %v10115_v49, %v8338_v7 }
0x12c3   :  { %9754 = vmatmul.msk.bf16.vlgmr.msra.gmra.mxu3 %vm55_vm0, %v8434_v37  ;;  %v8412_v47 = vpack.c.bf16 %v8404_v44, %v8404_v44 }
0x12c4   :  { %v8343_v59 = vsel %vm8342_vm3, %v10115_v49, %v8339_v23 }
0x12c5   :  { %v8387_v36 = vmul.f32 %v8343_v59, %v15095_v12  ;;  %v8420_v54 = vunpack.c.l.bf16 %v8412_v47  ;;  %v8462_v10 = vunpack.c.l.b16 %v8412_v47 }
0x12c7   :  { %v8396_v50 = vmul.f32 %v15145_v55, %v8387_v36  ;;  %v8428_v15 = vsub.f32 %v8404_v44, %v8420_v54 }
0x12c9   :  { %v8405_v60 = vadd.f32 %v15151_v9, %v8396_v50 }
0x12cb   :  { %v8413_v39 = vpack.c.bf16 %v8405_v60, %v8405_v60 }
0x12cd   :  { %v8463_v20 = vunpack.c.l.b16 %v8413_v39  ;;  %v8421_v29 = vunpack.c.l.bf16 %v8413_v39 }
0x12cf   :  { %v8469_v21 = vpack.c.b16 %v8463_v20, %v8462_v10  ;;  %v8429_v18 = vsub.f32 %v8405_v60, %v8421_v29 }
0x12d1   :  { %v8278_v25 = vpop.xlane.xlu2 %8277  ;;  %9747 = vmatmul.msk.bf16.gmra.mxu1 %vm55_vm0, %v8469_v21  ;;  %9751 = vmatmul.msk.bf16.gmra.mxu2 %vm55_vm0, %v8469_v21  ;;  %v8435_v12 = vpack.c.bf16 %v8429_v18, %v8428_v15 }
0x12d2   :  { %v8292_v32 = vmul.f32 %v8278_v25, %v16144_v35 }
0x12d3   :  { %9755 = vmatmul.msk.bf16.gmra.mxu3 %vm55_vm0, %v8435_v12 }
0x12d4   :  { %v8300_v2 = vadd.f32 1e-05, %v8292_v32 }
0x12d6   :  { %10116 = vrsqrt.f32 %v8300_v2  ;;  %vm8350_vm5 = vweird.f32 %v8300_v2 }
0x12d9   :  { %v8281_v62 = vpop.xlane.xlu1 %8280 }
0x12da   :  { %v8293_v45 = vmul.f32 %v8281_v62, %v16144_v35 }
0x12dc   :  { %v10117_v31 = vpop.eup %10116  ;;  %v8301_v30 = vadd.f32 1e-05, %v8293_v45 }
0x12dd   :  { %v8345_v61 = vmul.f32 %v10117_v31, %v8300_v2  ;;  %vm8351_vm4 = vweird.f32 %v10117_v31 }
0x12de   :  { %10118 = vrsqrt.f32 %v8301_v30  ;;  %vm8352_vm6 = vmor %vm8350_vm5, %vm8351_vm4  ;;  %vm8360_vm12 = vweird.f32 %v8301_v30 }
0x12df   :  { %v8346_v52 = vmul.f32 %v10117_v31, %v8345_v61 }
0x12e1   :  { %v8347_v27 = vmul.f32 0.5, %v8346_v52  ;;  %v8284_v23 = vpop.xlane.xlu0 %8283 }
0x12e3   :  { %v8348_v4 = vsub.f32 1.5, %v8347_v27 }
0x12e4   :  { %v10119_v38 = vpop.eup %10118 }
0x12e5   :  { %v8349_v48 = vmul.f32 %v10117_v31, %v8348_v4  ;;  %v8355_v56 = vmul.f32 %v10119_v38, %v8301_v30  ;;  %vm8361_vm11 = vweird.f32 %v10119_v38 }
0x12e6   :  { %vm8362_vm13 = vmor %vm8360_vm12, %vm8361_vm11 }
0x12e7   :  { %v8353_v11 = vsel %vm8352_vm6, %v10117_v31, %v8349_v48  ;;  %v8356_v51 = vmul.f32 %v10119_v38, %v8355_v56 }
0x12e8   :  { %v8388_v24 = vmul.f32 %v8353_v11, %v15101_v43 }
0x12e9   :  { %v8357_v49 = vmul.f32 0.5, %v8356_v51 }
0x12ea   :  { %v8397_v0 = vmul.f32 %v15145_v55, %v8388_v24 }
0x12eb   :  { %v8358_v33 = vsub.f32 1.5, %v8357_v49 }
0x12ec   :  { %v8406_v34 = vadd.f32 %v15151_v9, %v8397_v0 }
0x12ed   :  { %v8359_v46 = vmul.f32 %v10119_v38, %v8358_v33 }
0x12ee   :  { %v8414_v14 = vpack.c.bf16 %v8406_v34, %v8406_v34 }
0x12ef   :  { %v8363_v26 = vsel %vm8362_vm13, %v10119_v38, %v8359_v46 }
0x12f0   :  { %v8389_v41 = vmul.f32 %v8363_v26, %v15107_v22  ;;  %v8422_v43 = vunpack.c.l.bf16 %v8414_v14  ;;  %v8464_v28 = vunpack.c.l.b16 %v8414_v14  ;;  %v8294_v22 = vmul.f32 %v8284_v23, %v16144_v35 }
0x12f2   :  { %v8398_v5 = vmul.f32 %v15145_v55, %v8389_v41  ;;  %v8430_v19 = vsub.f32 %v8406_v34, %v8422_v43  ;;  %v8302_v1 = vadd.f32 1e-05, %v8294_v22 }
0x12f4   :  { %v8407_v8 = vadd.f32 %v15151_v9, %v8398_v5  ;;  %10120 = vrsqrt.f32 %v8302_v1  ;;  %vm8370_vm8 = vweird.f32 %v8302_v1 }
0x12f6   :  { %v8415_v53 = vpack.c.bf16 %v8407_v8, %v8407_v8 }
0x12f8   :  { %v8465_v16 = vunpack.c.l.b16 %v8415_v53  ;;  %v8423_v42 = vunpack.c.l.bf16 %v8415_v53 }
0x12fa   :  { %v8470_v57 = vpack.c.b16 %v8465_v16, %v8464_v28  ;;  %v8431_v7 = vsub.f32 %v8407_v8, %v8423_v42  ;;  %v10121_v59 = vpop.eup %10120 }
0x12fb   :  { %v8365_v36 = vmul.f32 %v10121_v59, %v8302_v1  ;;  %vm8371_vm7 = vweird.f32 %v10121_v59 }
0x12fc   :  { %9748 = vmatmul.msk.bf16.gmra.mxu1 %vm55_vm0, %v8470_v57  ;;  %9752 = vmatmul.msk.bf16.gmra.mxu2 %vm55_vm0, %v8470_v57  ;;  %v8436_v37 = vpack.c.bf16 %v8431_v7, %v8430_v19  ;;  %vm8372_vm9 = vmor %vm8370_vm8, %vm8371_vm7 }
0x12fd   :  { %v8366_v50 = vmul.f32 %v10121_v59, %v8365_v36 }
0x12fe   :  { %9756 = vmatmul.msk.bf16.gmra.mxu3 %vm55_vm0, %v8436_v37 }
0x12ff   :  { %v8367_v44 = vmul.f32 0.5, %v8366_v50 }
0x1301   :  { %v8368_v39 = vsub.f32 1.5, %v8367_v44 }
0x1303   :  { %v8369_v10 = vmul.f32 %v10121_v59, %v8368_v39 }
0x1305   :  { %v8373_v20 = vsel %vm8372_vm9, %v10121_v59, %v8369_v10 }
0x1306   :  { %v8390_v15 = vmul.f32 %v8373_v20, %v15114_v63 }
0x1308   :  { %v8399_v32 = vmul.f32 %v15145_v55, %v8390_v15 }
0x130a   :  { %v8408_v62 = vadd.f32 %v15151_v9, %v8399_v32 }
0x130c   :  { %v8416_v61 = vpack.c.bf16 %v8408_v62, %v8408_v62 }
0x130e   :  { %v8424_v27 = vunpack.c.l.bf16 %v8416_v61  ;;  %v8466_v4 = vunpack.c.l.b16 %v8416_v61 }
0x1310   :  { %v8432_v11 = vsub.f32 %v8408_v62, %v8424_v27 }
0x1319   :  { %v8287_v60 = vpop.xlane.xlu2 %8286 }
0x131a   :  { %v8295_v47 = vmul.f32 %v8287_v60, %v16144_v35 }
0x131c   :  { %v8303_v54 = vadd.f32 1e-05, %v8295_v47 }
0x131e   :  { %10122 = vrsqrt.f32 %v8303_v54  ;;  %vm8380_vm14 = vweird.f32 %v8303_v54 }
0x1324   :  { %v10123_v29 = vpop.eup %10122 }
0x1325   :  { %v8375_v21 = vmul.f32 %v10123_v29, %v8303_v54  ;;  %vm8381_vm10 = vweird.f32 %v10123_v29 }
0x1326   :  { %vm8382_vm15 = vmor %vm8380_vm14, %vm8381_vm10 }
0x1327   :  { %v8376_v18 = vmul.f32 %v10123_v29, %v8375_v21 }
0x1329   :  { %v8377_v25 = vmul.f32 0.5, %v8376_v18 }
0x132b   :  { %v8378_v12 = vsub.f32 1.5, %v8377_v25 }
0x132d   :  { %v8379_v2 = vmul.f32 %v10123_v29, %v8378_v12 }
0x132f   :  { %v8383_v45 = vsel %vm8382_vm15, %v10123_v29, %v8379_v2 }
0x1330   :  { %v8391_v31 = vmul.f32 %v8383_v45, %v15125_v6 }
0x1332   :  { %v8400_v30 = vmul.f32 %v15145_v55, %v8391_v31 }
0x1334   :  { %v8409_v52 = vadd.f32 %v15151_v9, %v8400_v30  ;;  %v15199_v9 = vperm.slane %v15029_v13, 6 }
0x1336   :  { %v8417_v63 = vpack.c.bf16 %v8409_v52, %v8409_v52 }
0x1338   :  { %v8467_v38 = vunpack.c.l.b16 %v8417_v63  ;;  %v8425_v48 = vunpack.c.l.bf16 %v8417_v63 }
0x133a   :  { %v8471_v56 = vpack.c.b16 %v8467_v38, %v8466_v4  ;;  %v8433_v51 = vsub.f32 %v8409_v52, %v8425_v48 }
0x133c   :  { %9749 = vmatmul.msk.bf16.gmra.mxu1 %vm55_vm0, %v8471_v56  ;;  %9753 = vmatmul.msk.bf16.gmra.mxu2 %vm55_vm0, %v8471_v56  ;;  %v8437_v24 = vpack.c.bf16 %v8433_v51, %v8432_v11 }
0x133e   :  { %9757 = vmatmul.msk.bf16.gmra.mxu3 %vm55_vm0, %v8437_v24  ;;  %v8493_v6 = vpop.f32.mrf.mxu1 }
0x1344   :  { %v8534_v55 = vpop.f32.mrf.mxu2 }
0x1345   :  { %v8535_v49 = vadd.f32 %v8534_v55, %v8493_v6 }
0x1346   :  { %v8575_v0 = vpop.f32.mrf.mxu3  ;;  %v8495_v41 = vpop.f32.mrf.mxu1 }
0x1347   :  { %v8595_v33 = vadd.f32 %v8575_v0, %v8535_v49 }
0x1349   :  { %v15202_v46 = vadd.f32 %v15199_v9, %v8595_v33 }
0x134b   :  { %v15205_v34 = vmul.f32 0.70710677, %v15202_v46 }
0x134c   :  { %v8536_v28 = vpop.f32.mrf.mxu2 }
0x134d   :  { %v8628_v26 = vmul.f32 %v15205_v34, %v15205_v34  ;;  %v8537_v13 = vadd.f32 %v8536_v28, %v8495_v41 }
0x134e   :  { %v8577_v57 = vpop.f32.mrf.mxu3  ;;  %v8498_v59 = vpop.f32.mrf.mxu1 }
0x134f   :  { %v8629_v5 = vmin.f32 %v8628_v26, 16.0  ;;  %v8596_v19 = vadd.f32 %v8577_v57, %v8537_v13  ;;  %v9624_v13 = vld [vmem:[%s15571_s3 + $0xf0] sm:$0xff] }
0x1351   :  { %v8630_v14 = vmul.f32 2.1237322e-06, %v8629_v5  ;;  %v8641_v8 = vmul.f32 3.8918573e-05, %v8629_v5  ;;  %v15210_v23 = vadd.f32 %v15199_v9, %v8596_v19 }
0x1353   :  { %v8631_v53 = vadd.f32 0.00028619796, %v8630_v14  ;;  %v8642_v43 = vadd.f32 0.001143296, %v8641_v8  ;;  %v15213_v36 = vmul.f32 0.70710677, %v15210_v23 }
0x1354   :  { %v8539_v60 = vpop.f32.mrf.mxu2 }
0x1355   :  { %v8632_v16 = vmul.f32 %v8631_v53, %v8629_v5  ;;  %v8643_v42 = vmul.f32 %v8642_v43, %v8629_v5  ;;  %v8668_v47 = vmul.f32 %v15213_v36, %v15213_v36  ;;  %v8540_v39 = vadd.f32 %v8539_v60, %v8498_v59 }
0x1356   :  { %v8580_v20 = vpop.f32.mrf.mxu3  ;;  %v8500_v30 = vpop.f32.mrf.mxu1  ;;  %v9006_v59 = vpack.c.bf16 %v9624_v13, %v9624_v13 }
0x1357   :  { %v8633_v7 = vadd.f32 0.0036580483, %v8632_v16  ;;  %v8644_v37 = vadd.f32 0.014752088, %v8643_v42  ;;  %v8669_v29 = vmin.f32 %v8668_v47, 16.0  ;;  %v8597_v21 = vadd.f32 %v8580_v20, %v8540_v39 }
0x1358   :  { %v9022_v20 = vunpack.c.l.bf16 %v9006_v59 }
0x1359   :  { %v8634_v22 = vmul.f32 %v8633_v7, %v8629_v5  ;;  %v8645_v1 = vmul.f32 %v8644_v37, %v8629_v5  ;;  %v8670_v18 = vmul.f32 2.1237322e-06, %v8669_v29  ;;  %v8681_v25 = vmul.f32 3.8918573e-05, %v8669_v29  ;;  %v9625_v7 = vld [vmem:[%s15571_s3 + $0xf8] sm:$0xff] }
0x135a   :  { %v15218_v32 = vadd.f32 %v15199_v9, %v8597_v21  ;;  %v9007_v47 = vpack.c.bf16 %v9625_v7, %v9625_v7 }
0x135b   :  { %v8635_v50 = vadd.f32 0.05243302, %v8634_v22  ;;  %v8646_v44 = vadd.f32 0.112945676, %v8645_v1  ;;  %v8671_v62 = vadd.f32 0.00028619796, %v8670_v18 }
0x135c   :  { %v8682_v45 = vadd.f32 0.001143296, %v8681_v25  ;;  %v15223_v61 = vmul.f32 0.70710677, %v15218_v32  ;;  %v8541_v52 = vpop.f32.mrf.mxu2  ;;  %v9023_v18 = vunpack.c.l.bf16 %v9007_v47 }
0x135d   :  { %v8636_v54 = vmul.f32 %v8635_v50, %v8629_v5  ;;  %v8647_v10 = vmul.f32 %v8646_v44, %v8629_v5  ;;  %v8672_v63 = vmul.f32 %v8671_v62, %v8669_v29  ;;  %v8542_v4 = vadd.f32 %v8541_v52, %v8500_v30 }
0x135e   :  { %v8683_v27 = vmul.f32 %v8682_v45, %v8669_v29  ;;  %v8582_v48 = vpop.f32.mrf.mxu3  ;;  %v8708_v51 = vmul.f32 %v15223_v61, %v15223_v61 }
0x135f   :  { %v8648_v15 = vadd.f32 0.4994258, %v8647_v10  ;;  %v8637_v12 = vadd.f32 0.18741608, %v8636_v54  ;;  %v8673_v56 = vadd.f32 0.0036580483, %v8672_v63  ;;  %v8598_v24 = vadd.f32 %v8582_v48, %v8542_v4 }
0x1360   :  { %v8684_v11 = vadd.f32 0.014752088, %v8683_v27  ;;  %v15229_v0 = vmin.f32 %v8708_v51, 16.0  ;;  %v9038_v63 = vsub.f32 %v9624_v13, %v9022_v20  ;;  %v9039_v48 = vsub.f32 %v9625_v7, %v9023_v18 }
0x1361   :  { %v8649_v2 = vmul.f32 %v8648_v15, %v8629_v5  ;;  %v8638_v38 = vmul.f32 %v8637_v12, %v8629_v5  ;;  %v8674_v55 = vmul.f32 %v8673_v56, %v8669_v29  ;;  %v15233_v41 = vadd.f32 %v15199_v9, %v8598_v24 }
0x1362   :  { %v8685_v49 = vmul.f32 %v8684_v11, %v8669_v29  ;;  %v8710_v8 = vmul.f32 2.1237322e-06, %v15229_v0  ;;  %v8721_v43 = vmul.f32 3.8918573e-05, %v15229_v0 }
0x1363   :  { %v15220_v31 = vadd.f32 1.0, %v8649_v2  ;;  %v8639_v33 = vadd.f32 1.1283791, %v8638_v38  ;;  %v8675_v5 = vadd.f32 0.05243302, %v8674_v55 }
0x1364   :  { %v8686_v14 = vadd.f32 0.112945676, %v8685_v49  ;;  %v15239_v28 = vmul.f32 0.70710677, %v15233_v41  ;;  %v8711_v37 = vadd.f32 0.00028619796, %v8710_v8 }
0x1365   :  { %10124 = vrcp.f32 %v15220_v31  ;;  %v8662_v6 = vand.u32 2147483648, %v15220_v31  ;;  %v8660_v26 = vand.u32 2147483647, %v15220_v31  ;;  %vm8656_vm1 = vweird.f32 %v15220_v31  ;;  %v9622_v49 = vld [vmem:[%s15571_s3 + $0xe0] sm:$0xff] }
0x1366   :  { %v8676_v57 = vmul.f32 %v8675_v5, %v8669_v29  ;;  %v8687_v19 = vmul.f32 %v8686_v14, %v8669_v29  ;;  %v8722_v22 = vadd.f32 0.001143296, %v8721_v43  ;;  %v8748_v1 = vmul.f32 %v15239_v28, %v15239_v28 }
0x1367   :  { %v8663_v42 = vor.u32 1.1754944e-38, %v8662_v6  ;;  %v8712_v39 = vmul.f32 %v8711_v37, %v15229_v0  ;;  %vm8661_vm4 = vcmp.eq.f32.partialorder %v8660_v26, 8.507059e+37  ;;  %v8612_v5 = vmul.f32 0.5, %v15202_v46 }
0x1368   :  { %v8677_v44 = vadd.f32 0.18741608, %v8676_v57  ;;  %v8688_v60 = vadd.f32 0.4994258, %v8687_v19  ;;  %v8723_v54 = vmul.f32 %v8722_v22, %v15229_v0  ;;  %v15252_v10 = vmin.f32 %v8748_v1, 16.0  ;;  %v9623_v1 = vld [vmem:[%s15571_s3 + $0xe8] sm:$0xff] }
0x1369   :  { %v8713_v12 = vadd.f32 0.0036580483, %v8712_v39  ;;  %v15272_v57 = vpack.c.bf16 %v9622_v49, %v9622_v49  ;;  %v9005_v18 = vpack.c.bf16 %v9623_v1, %v9623_v1 }
0x136a   :  { %v8689_v15 = vmul.f32 %v8688_v60, %v8669_v29  ;;  %v8678_v25 = vmul.f32 %v8677_v44, %v8669_v29  ;;  %v8724_v2 = vadd.f32 0.014752088, %v8723_v54  ;;  %v8750_v62 = vmul.f32 2.1237322e-06, %v15252_v10 }
0x136b   :  { %v10125_v53 = vpop.eup %10124  ;;  %v8761_v52 = vmul.f32 3.8918573e-05, %v15252_v10  ;;  %v8714_v27 = vmul.f32 %v8713_v12, %v15229_v0  ;;  %v8640_v29 = vmul.f32 %v8639_v33, %v15205_v34  ;;  %v9047_v33 = vpack.c.bf16 %v9039_v48, %v9038_v63 }
0x136c   :  { %v8652_v16 = vmul.f32 %v10125_v53, %v15220_v31  ;;  %vm8657_vm2 = vweird.f32 %v10125_v53  ;;  %v15255_v30 = vadd.f32 1.0, %v8689_v15  ;;  %v8725_v4 = vmul.f32 %v8724_v2, %v15229_v0 }
0x136d   :  { %vm8658_vm3 = vmor %vm8656_vm1, %vm8657_vm2  ;;  %v8751_v38 = vadd.f32 0.00028619796, %v8750_v62  ;;  %v8715_v51 = vadd.f32 0.05243302, %v8714_v27  ;;  %v8762_v31 = vadd.f32 0.001143296, %v8761_v52  ;;  %9072 = vmatpush.bf16.msrb.mxu0 %v9047_v33  ;;  %v9021_v63 = vunpack.c.l.bf16 %v9005_v18 }
0x136e   :  { %v8653_v50 = vsub.f32 1.0, %v8652_v16  ;;  %10126 = vrcp.f32 %v15255_v30  ;;  %v8726_v6 = vadd.f32 0.112945676, %v8725_v4  ;;  %v8679_v14 = vadd.f32 1.1283791, %v8678_v25  ;;  %v9619_v33 = vld [vmem:[%s15571_s3 + $0xc8] sm:$0xff] }
0x136f   :  { %v8752_v55 = vmul.f32 %v8751_v38, %v15252_v10  ;;  %v8716_v34 = vmul.f32 %v8715_v51, %v15229_v0  ;;  %v8763_v43 = vmul.f32 %v8762_v31, %v15252_v10  ;;  %v9127_v16 = vunpack.c.l.b16 %v9006_v59  ;;  %v9618_v31 = vld [vmem:[%s15571_s3 + $0xc0] sm:$0xff] }
0x1370   :  { %v8654_v21 = vmul.f32 %v10125_v53, %v8653_v50  ;;  %v8727_v8 = vmul.f32 %v8726_v6, %v15229_v0  ;;  %v8700_v44 = vand.u32 2147483647, %v15255_v30  ;;  %v8702_v15 = vand.u32 2147483648, %v15255_v30 }
0x1371   :  { %v8717_v13 = vadd.f32 0.18741608, %v8716_v34  ;;  %v8764_v22 = vadd.f32 0.014752088, %v8763_v43  ;;  %v9020_v25 = vunpack.c.l.bf16 %v15272_v57  ;;  %v8613_v27 = vmul.f32 0.5, %v15210_v23 }
0x1372   :  { %v8655_v45 = vadd.f32 %v10125_v53, %v8654_v21  ;;  %v8728_v37 = vadd.f32 0.4994258, %v8727_v8  ;;  %v15297_v4 = vmul.f32 0.5, %v15233_v41  ;;  %v8680_v48 = vmul.f32 %v8679_v14, %v15213_v36  ;;  %v9620_v41 = vld [vmem:[%s15571_s3 + $0xd0] sm:$0xff]  ;;  %v9621_v36 = vld [vmem:[%s15571_s3 + $0xd8] sm:$0xff] }
0x1373   :  { %v8718_v60 = vmul.f32 %v8717_v13, %v15229_v0  ;;  %v8765_v20 = vmul.f32 %v8764_v22, %v15252_v10  ;;  %v9036_v38 = vsub.f32 %v9622_v49, %v9020_v25  ;;  %vm8696_vm6 = vweird.f32 %v15255_v30 }
0x1374   :  { %v8659_v56 = vsel %vm8658_vm3, %v10125_v53, %v8655_v45  ;;  %v8753_v53 = vadd.f32 0.0036580483, %v8752_v55  ;;  %v10127_v19 = vpop.eup %10126  ;;  %v8729_v39 = vmul.f32 %v8728_v37, %v15229_v0  ;;  %v9125_v23 = vunpack.c.l.b16 %v15272_v57 }
0x1375   :  { %v8664_v11 = vsel %vm8661_vm4, %v8663_v42, %v8659_v56  ;;  %v9128_v42 = vunpack.c.l.b16 %v9007_v47  ;;  %v8692_v50 = vmul.f32 %v10127_v19, %v15255_v30  ;;  %vm8697_vm5 = vweird.f32 %v10127_v19 }
0x1376   :  { %v8665_v24 = vmul.f32 %v8664_v11, %v8640_v29  ;;  %v8754_v46 = vmul.f32 %v8753_v53, %v15252_v10  ;;  %v15287_v12 = vadd.f32 1.0, %v8729_v39  ;;  %v8766_v62 = vadd.f32 0.112945676, %v8765_v20  ;;  %vm8698_vm11 = vmor %vm8696_vm6, %vm8697_vm5 }
0x1377   :  { %v9136_v59 = vpack.c.b16 %v9128_v42, %v9127_v16  ;;  %v8693_v21 = vsub.f32 1.0, %v8692_v50  ;;  %v8719_v52 = vadd.f32 1.1283791, %v8718_v60  ;;  %v8703_v56 = vor.u32 1.1754944e-38, %v8702_v15 }
0x1378   :  { %v9758_v26 = vclamps-f32 %v8665_v24, 1.0  ;;  %v8755_v54 = vadd.f32 0.05243302, %v8754_v46  ;;  %10128 = vrcp.f32 %v15287_v12  ;;  %v8767_v51 = vmul.f32 %v8766_v62, %v15252_v10 }
0x1379   :  { %9145 = vmatpush.bf16.msrb.mxu1 %v9136_v59  ;;  %9170 = vmatpush.bf16.msrb.mxu2 %v9136_v59  ;;  %v8694_v45 = vmul.f32 %v10127_v19, %v8693_v21  ;;  %v9037_v24 = vsub.f32 %v9623_v1, %v9021_v63  ;;  %vm8701_vm12 = vcmp.eq.f32.partialorder %v8700_v44, 8.507059e+37  ;;  %v15312_v55 = vmul.f32 %v8719_v52, %v15223_v61 }
0x137a   :  { %v8948_v7 = vadd.f32 1.0, %v9758_v26  ;;  %v8756_v2 = vmul.f32 %v8755_v54, %v15252_v10  ;;  %v9126_v34 = vunpack.c.l.b16 %v9005_v18  ;;  %v8740_v8 = vand.u32 2147483647, %v15287_v12 }
0x137b   :  { %v8695_v29 = vadd.f32 %v10127_v19, %v8694_v45  ;;  %v9046_v14 = vpack.c.bf16 %v9037_v24, %v9036_v38  ;;  %v9002_v53 = vpack.c.bf16 %v9620_v41, %v9620_v41  ;;  %v9003_v43 = vpack.c.bf16 %v9621_v36, %v9621_v36  ;;  %v9617_v38 = vld [vmem:[%s15571_s3 + $0xb8] sm:$0xff] }
0x137c   :  { %v15281_v47 = vmul.f32 %v8948_v7, %v8612_v5  ;;  %v8757_v11 = vadd.f32 0.18741608, %v8756_v2  ;;  %v8768_v5 = vadd.f32 0.4994258, %v8767_v51  ;;  %vm8736_vm13 = vweird.f32 %v15287_v12  ;;  %v9616_v2 = vld [vmem:[%s15571_s3 + $0xb0] sm:$0xff] }
0x137d   :  { %v8699_v30 = vsel %vm8698_vm11, %v10127_v19, %v8695_v29  ;;  %9073 = vmatpush.bf16.msrb.mxu0 %v9046_v14  ;;  %v9135_v42 = vpack.c.b16 %v9126_v34, %v9125_v23  ;;  %v9000_v57 = vpack.c.bf16 %v9618_v31, %v9618_v31  ;;  %v8742_v37 = vand.u32 2147483648, %v15287_v12 }
0x137e   :  { %v15292_v0 = vpack.c.bf16 %v15281_v47, %v15281_v47  ;;  %v8704_v49 = vsel %vm8701_vm12, %v8703_v56, %v8699_v30  ;;  %v15321_v13 = vpop.eup %10128  ;;  %v8758_v61 = vmul.f32 %v8757_v11, %v15252_v10  ;;  %v8769_v16 = vmul.f32 %v8768_v5, %v15252_v10 }
0x137f   :  { %v8705_v26 = vmul.f32 %v8704_v49, %v8680_v48  ;;  %v8732_v7 = vmul.f32 %v15321_v13, %v15287_v12  ;;  %v9001_v46 = vpack.c.bf16 %v9619_v33, %v9619_v33  ;;  %9146 = vmatpush.bf16.msrb.mxu1 %v9135_v42  ;;  %9171 = vmatpush.bf16.msrb.mxu2 %v9135_v42  ;;  %v9018_v1 = vunpack.c.l.bf16 %v9002_v53  ;;  %v8544_v49 = vpop.f32.mrf.mxu2 }
0x1380   :  { %v8972_v6 = vunpack.c.l.bf16 %v15292_v0  ;;  %v15329_v22 = vadd.f32 1.0, %v8769_v16  ;;  %v9019_v50 = vunpack.c.l.bf16 %v9003_v43  ;;  %v9123_v44 = vunpack.c.l.b16 %v9002_v53  ;;  %v9614_v16 = vld [vmem:[%s15571_s3 + $0xa0] sm:$0xff] }
0x1381   :  { %v9759_v19 = vclamps-f32 %v8705_v26, 1.0  ;;  %v8733_v59 = vsub.f32 1.0, %v8732_v7  ;;  %v9124_v10 = vunpack.c.l.b16 %v9003_v43  ;;  %v9016_v39 = vunpack.c.l.bf16 %v9000_v57  ;;  %v8503_v43 = vpop.f32.mrf.mxu1 }
0x1382   :  { %vm8737_vm7 = vweird.f32 %v15321_v13  ;;  %vm15332_vm8 = vcmp.eq.f32.partialorder %v8740_v8, 8.507059e+37  ;;  %v8759_v20 = vadd.f32 1.1283791, %v8758_v61  ;;  %10130 = vrcp.f32 %v15329_v22  ;;  %v8585_v61 = vpop.f32.mrf.mxu3 }
0x1383   :  { %v8949_v60 = vadd.f32 1.0, %v9759_v19  ;;  %v8734_v15 = vmul.f32 %v15321_v13, %v8733_v59  ;;  %v9034_v18 = vsub.f32 %v9620_v41, %v9018_v1  ;;  %v9035_v25 = vsub.f32 %v9621_v36, %v9019_v50  ;;  %vm15357_vm9 = vmor %vm8736_vm13, %vm8737_vm7 }
0x1384   :  { %v8780_v62 = vand.u32 2147483647, %v15329_v22  ;;  %v8782_v45 = vand.u32 2147483648, %v15329_v22  ;;  %v9134_v52 = vpack.c.b16 %v9124_v10, %v9123_v44  ;;  %v9017_v63 = vunpack.c.l.bf16 %v9001_v46 }
0x1385   :  { %v15337_v21 = vmul.f32 %v8949_v60, %v8613_v27  ;;  %v8735_v48 = vadd.f32 %v15321_v13, %v8734_v15  ;;  %v9045_v29 = vpack.c.bf16 %v9035_v25, %v9034_v18  ;;  %v9032_v56 = vsub.f32 %v9618_v31, %v9016_v39  ;;  %v9613_v18 = vld [vmem:[%s15571_s3 + $0x98] sm:$0xff] }
0x1386   :  { %9147 = vmatpush.bf16.msrb.mxu1 %v9134_v52  ;;  %9172 = vmatpush.bf16.msrb.mxu2 %v9134_v52  ;;  %v9033_v11 = vsub.f32 %v9619_v33, %v9017_v63  ;;  %v9121_v51 = vunpack.c.l.b16 %v9000_v57  ;;  %v9122_v24 = vunpack.c.l.b16 %v9001_v46  ;;  %v8998_v23 = vpack.c.bf16 %v9616_v2, %v9616_v2 }
0x1387   :  { %v15350_v27 = vpack.c.bf16 %v15337_v21, %v15337_v21  ;;  %v8743_v36 = vor.u32 1.1754944e-38, %v8742_v37  ;;  %v15362_v30 = vmul.f32 %v8759_v20, %v15239_v28  ;;  %vm8776_vm10 = vweird.f32 %v15329_v22  ;;  %9074 = vmatpush.bf16.msrb.mxu0 %v9045_v29  ;;  %v9612_v37 = vld [vmem:[%s15571_s3 + $0x90] sm:$0xff] }
0x1388   :  { %v8999_v31 = vpack.c.bf16 %v9617_v38, %v9617_v38  ;;  %v10131_v5 = vpop.eup %10130  ;;  %v8739_v14 = vsel %vm15357_vm9, %v15321_v13, %v8735_v48  ;;  %v9044_v34 = vpack.c.bf16 %v9033_v11, %v9032_v56  ;;  %v9133_v12 = vpack.c.b16 %v9122_v24, %v9121_v51  ;;  %v9615_v13 = vld [vmem:[%s15571_s3 + $0xa8] sm:$0xff] }
0x1389   :  { %v9014_v33 = vunpack.c.l.bf16 %v8998_v23  ;;  %v8973_v26 = vunpack.c.l.bf16 %v15350_v27  ;;  %v8772_v8 = vmul.f32 %v10131_v5, %v15329_v22  ;;  %vm15370_vm14 = vcmp.eq.f32.partialorder %v8780_v62, 8.507059e+37  ;;  %v9611_v22 = vld [vmem:[%s15571_s3 + $0x88] sm:$0xff] }
0x138a   :  { %v8783_v53 = vor.u32 1.1754944e-38, %v8782_v45  ;;  %9148 = vmatpush.bf16.msrb.mxu1 %v9133_v12  ;;  %9173 = vmatpush.bf16.msrb.mxu2 %v9133_v12  ;;  %v9015_v42 = vunpack.c.l.bf16 %v8999_v31  ;;  %v9119_v19 = vunpack.c.l.b16 %v8998_v23  ;;  %v9120_v7 = vunpack.c.l.b16 %v8999_v31  ;;  %v9610_v31 = vld [vmem:[%s15571_s3 + $0x80] sm:$0xff]  ;;  %v8505_v12 = vpop.f32.mrf.mxu1 }
0x138b   :  { %v9030_v57 = vsub.f32 %v9616_v2, %v9014_v33  ;;  %v9057_v46 = vunpack.c.l.b16 %v15350_v27  ;;  %v8744_v1 = vsel %vm15332_vm8, %v8743_v36, %v8739_v14  ;;  %v8773_v50 = vsub.f32 1.0, %v8772_v8  ;;  %9075 = vmatpush.bf16.msrb.mxu0 %v9044_v34  ;;  %v8546_v36 = vpop.f32.mrf.mxu2 }
0x138c   :  { %v8545_v44 = vadd.f32 %v8544_v49, %v8503_v43  ;;  %v9031_v60 = vsub.f32 %v9617_v38, %v9015_v42  ;;  %v9132_v59 = vpack.c.b16 %v9120_v7, %v9119_v19  ;;  %v8996_v10 = vpack.c.bf16 %v9614_v16, %v9614_v16  ;;  %v8587_v43 = vpop.f32.mrf.mxu3 }
0x138d   :  { %v8997_v39 = vpack.c.bf16 %v9615_v13, %v9615_v13  ;;  %v8774_v20 = vmul.f32 %v10131_v5, %v8773_v50  ;;  %vm8777_vm15 = vweird.f32 %v10131_v5  ;;  %v8994_v25 = vpack.c.bf16 %v9612_v37, %v9612_v37 }
0x138e   :  { %v8599_v15 = vadd.f32 %v8585_v61, %v8545_v44  ;;  %v9043_v2 = vpack.c.bf16 %v9031_v60, %v9030_v57  ;;  %9149 = vmatpush.bf16.msrb.mxu1 %v9132_v59  ;;  %9174 = vmatpush.bf16.msrb.mxu2 %v9132_v59  ;;  %v9012_v54 = vunpack.c.l.bf16 %v8996_v10  ;;  %v9117_v45 = vunpack.c.l.b16 %v8996_v10  ;;  %vm8778_vm1 = vmor %vm8776_vm10, %vm8777_vm15 }
0x138f   :  { %v9013_v62 = vunpack.c.l.bf16 %v8997_v39  ;;  %v15390_v52 = vsub.f32 %v15337_v21, %v8973_v26  ;;  %v8775_v63 = vadd.f32 %v10131_v5, %v8774_v20  ;;  %v9118_v48 = vunpack.c.l.b16 %v8997_v39 }
0x1390   :  { %v15393_v38 = vadd.f32 %v15199_v9, %v8599_v15  ;;  %9076 = vmatpush.bf16.msrb.mxu0 %v9043_v2  ;;  %v9028_v29 = vsub.f32 %v9614_v16, %v9012_v54  ;;  %v8995_v11 = vpack.c.bf16 %v9613_v18, %v9613_v18  ;;  %v9010_v51 = vunpack.c.l.bf16 %v8994_v25 }
0x1391   :  { %v9029_v56 = vsub.f32 %v9615_v13, %v9013_v62  ;;  %v8745_v24 = vmul.f32 %v8744_v1, %v15312_v55  ;;  %v8779_v23 = vsel %vm8778_vm1, %v10131_v5, %v8775_v63  ;;  %v9131_v21 = vpack.c.b16 %v9118_v48, %v9117_v45 }
0x1392   :  { %v15399_v41 = vmul.f32 0.70710677, %v15393_v38  ;;  %v8784_v49 = vsel %vm15370_vm14, %v8783_v53, %v8779_v23  ;;  %v9011_v34 = vunpack.c.l.bf16 %v8995_v11  ;;  %v9026_v55 = vsub.f32 %v9612_v37, %v9010_v51 }
0x1393   :  { %v9042_v14 = vpack.c.bf16 %v9029_v56, %v9028_v29  ;;  %v8785_v5 = vmul.f32 %v8784_v49, %v15362_v30  ;;  %9150 = vmatpush.bf16.msrb.mxu1 %v9131_v21  ;;  %9175 = vmatpush.bf16.msrb.mxu2 %v9131_v21  ;;  %v9115_v26 = vunpack.c.l.b16 %v8994_v25  ;;  %v9116_v8 = vunpack.c.l.b16 %v8995_v11 }
0x1394   :  { %v8788_v33 = vmul.f32 %v15399_v41, %v15399_v41  ;;  %v9027_v61 = vsub.f32 %v9613_v18, %v9011_v34  ;;  %v8547_v16 = vadd.f32 %v8546_v36, %v8505_v12  ;;  %v8992_v13 = vpack.c.bf16 %v9610_v31, %v9610_v31 }
0x1395   :  { %9077 = vmatpush.bf16.msrb.mxu0 %v9042_v14  ;;  %v8993_v28 = vpack.c.bf16 %v9611_v22, %v9611_v22  ;;  %v9760_v53 = vclamps-f32 %v8745_v24, 1.0  ;;  %v9761_v42 = vclamps-f32 %v8785_v5, 1.0  ;;  %v9130_v19 = vpack.c.b16 %v9116_v8, %v9115_v26 }
0x1396   :  { %v15412_v57 = vmin.f32 %v8788_v33, 16.0  ;;  %v9041_v30 = vpack.c.bf16 %v9027_v61, %v9026_v55  ;;  %v8600_v7 = vadd.f32 %v8587_v43, %v8547_v16  ;;  %v9008_v37 = vunpack.c.l.bf16 %v8992_v13 }
0x1397   :  { %v9009_v1 = vunpack.c.l.bf16 %v8993_v28  ;;  %v8951_v50 = vadd.f32 1.0, %v9761_v42  ;;  %9151 = vmatpush.bf16.msrb.mxu1 %v9130_v19  ;;  %9176 = vmatpush.bf16.msrb.mxu2 %v9130_v19  ;;  %v9113_v59 = vunpack.c.l.b16 %v8992_v13  ;;  %v9114_v15 = vunpack.c.l.b16 %v8993_v28 }
0x1398   :  { %v8790_v44 = vmul.f32 2.1237322e-06, %v15412_v57  ;;  %v8801_v60 = vmul.f32 3.8918573e-05, %v15412_v57  ;;  %v15417_v10 = vadd.f32 %v15199_v9, %v8600_v7  ;;  %v9024_v39 = vsub.f32 %v9610_v31, %v9008_v37 }
0x1399   :  { %9078 = vmatpush.bf16.msrb.mxu0 %v9041_v30  ;;  %v9025_v20 = vsub.f32 %v9611_v22, %v9009_v1  ;;  %v8980_v18 = vsub.f32 %v15281_v47, %v8972_v6  ;;  %v9056_v25 = vunpack.c.l.b16 %v15292_v0  ;;  %v8950_v62 = vadd.f32 1.0, %v9760_v53 }
0x139a   :  { %v8791_v2 = vadd.f32 0.00028619796, %v8790_v44  ;;  %v8802_v54 = vadd.f32 0.001143296, %v8801_v60  ;;  %v15424_v45 = vmul.f32 0.70710677, %v15417_v10  ;;  %v9129_v48 = vpack.c.b16 %v9114_v15, %v9113_v59 }
0x139b   :  { %v9040_v63 = vpack.c.bf16 %v9025_v20, %v9024_v39  ;;  %v9064_v11 = vpack.c.b16 %v9057_v46, %v9056_v25  ;;  %v8988_v51 = vpack.c.bf16 %v15390_v52, %v8980_v18  ;;  %v8614_v47 = vmul.f32 0.5, %v15218_v32 }
0x139c   :  { %v8792_v29 = vmul.f32 %v8791_v2, %v15412_v57  ;;  %v8803_v56 = vmul.f32 %v8802_v54, %v15412_v57  ;;  %v8959_v0 = vmul.f32 %v8951_v50, %v15297_v4  ;;  %v8828_v6 = vmul.f32 %v15424_v45, %v15424_v45  ;;  %9152 = vmatpush.bf16.msrb.mxu1 %v9129_v48 }
0x139d   :  { %9079 = vmatpush.bf16.msrb.mxu0 %v9040_v63  ;;  %9177 = vmatpush.bf16.msrb.mxu2 %v9129_v48  ;;  %v8958_v21 = vmul.f32 %v8950_v62, %v8614_v47 }
0x139e   :  { %v8793_v24 = vadd.f32 0.0036580483, %v8792_v29  ;;  %v8804_v23 = vadd.f32 0.014752088, %v8803_v56  ;;  %v15435_v36 = vmin.f32 %v8828_v6, 16.0  ;;  %v8967_v4 = vpack.c.bf16 %v8959_v0, %v8959_v0 }
0x139f   :  { %9153 = vmatmul.bf16.vlgmr.msrb.gmra.mxu1 %v9064_v11  ;;  %v8966_v14 = vpack.c.bf16 %v8958_v21, %v8958_v21 }
0x13a0   :  { %v8805_v27 = vmul.f32 %v8804_v23, %v15412_v57  ;;  %9080 = vmatmul.bf16.vlgmr.msrb.gmra.mxu0 %v9064_v11  ;;  %v8830_v46 = vmul.f32 2.1237322e-06, %v15435_v36  ;;  %v8841_v32 = vmul.f32 3.8918573e-05, %v15435_v36  ;;  %9178 = vmatmul.bf16.vlgmr.msrb.gmra.mxu2 %v8988_v51  ;;  %v8794_v52 = vmul.f32 %v8793_v24, %v15412_v57 }
0x13a1   :  { %v8975_v12 = vunpack.c.l.bf16 %v8967_v4  ;;  %v8974_v61 = vunpack.c.l.bf16 %v8966_v14  ;;  %v9059_v13 = vunpack.c.l.b16 %v8967_v4  ;;  %v9058_v30 = vunpack.c.l.b16 %v8966_v14 }
0x13a2   :  { %v8806_v31 = vadd.f32 0.112945676, %v8805_v27  ;;  %v8831_v22 = vadd.f32 0.00028619796, %v8830_v46  ;;  %v8842_v49 = vadd.f32 0.001143296, %v8841_v32 }
0x13a3   :  { %v8795_v33 = vadd.f32 0.05243302, %v8794_v52  ;;  %v8983_v53 = vsub.f32 %v8959_v0, %v8975_v12  ;;  %v8982_v1 = vsub.f32 %v8958_v21, %v8974_v61  ;;  %v9065_v50 = vpack.c.b16 %v9059_v13, %v9058_v30 }
0x13a4   :  { %v8807_v34 = vmul.f32 %v8806_v31, %v15412_v57  ;;  %v8832_v55 = vmul.f32 %v8831_v22, %v15435_v36  ;;  %v8843_v5 = vmul.f32 %v8842_v49, %v15435_v36 }
0x13a5   :  { %v8796_v42 = vmul.f32 %v8795_v33, %v15412_v57  ;;  %v8989_v60 = vpack.c.bf16 %v8983_v53, %v8982_v1 }
0x13a6   :  { %v8808_v26 = vadd.f32 0.4994258, %v8807_v34  ;;  %v8833_v8 = vadd.f32 0.0036580483, %v8832_v55  ;;  %v8844_v43 = vadd.f32 0.014752088, %v8843_v5 }
0x13a7   :  { %v8797_v59 = vadd.f32 0.18741608, %v8796_v42 }
0x13a8   :  { %v8809_v16 = vmul.f32 %v8808_v26, %v15412_v57  ;;  %v8845_v28 = vmul.f32 %v8844_v43, %v15435_v36  ;;  %v8834_v7 = vmul.f32 %v8833_v8, %v15435_v36  ;;  %v8616_v43 = vmul.f32 0.5, %v15393_v38 }
0x13a9   :  { %v8798_v25 = vmul.f32 %v8797_v59, %v15412_v57  ;;  %v8617_v59 = vmul.f32 0.5, %v15417_v10 }
0x13aa   :  { %v8810_v19 = vadd.f32 1.0, %v8809_v16  ;;  %v8846_v37 = vadd.f32 0.112945676, %v8845_v28  ;;  %v8835_v39 = vadd.f32 0.05243302, %v8834_v7 }
0x13ab   :  { %v8799_v48 = vadd.f32 1.1283791, %v8798_v25 }
0x13ac   :  { %10132 = vrcp.f32 %v8810_v19  ;;  %v8847_v44 = vmul.f32 %v8846_v37, %v15435_v36  ;;  %v8836_v54 = vmul.f32 %v8835_v39, %v15435_v36  ;;  %v8822_v29 = vand.u32 2147483648, %v8810_v19 }
0x13ad   :  { %v8820_v11 = vand.u32 2147483647, %v8810_v19  ;;  %vm8816_vm3 = vweird.f32 %v8810_v19  ;;  %v8800_v21 = vmul.f32 %v8799_v48, %v15399_v41 }
0x13ae   :  { %v8848_v20 = vadd.f32 0.4994258, %v8847_v44  ;;  %v8837_v51 = vadd.f32 0.18741608, %v8836_v54  ;;  %v8823_v24 = vor.u32 1.1754944e-38, %v8822_v29 }
0x13af   :  { %9156 = vmatmul.bf16.gmra.mxu1 %v9065_v50  ;;  %vm8821_vm5 = vcmp.eq.f32.partialorder %v8820_v11, 8.507059e+37 }
0x13b0   :  { %9083 = vmatmul.bf16.gmra.mxu0 %v9065_v50  ;;  %v8849_v15 = vmul.f32 %v8848_v20, %v15435_v36  ;;  %9181 = vmatmul.bf16.gmra.mxu2 %v8989_v60  ;;  %v8838_v46 = vmul.f32 %v8837_v51, %v15435_v36 }
0x13b2   :  { %v10133_v18 = vpop.eup %10132  ;;  %v8850_v62 = vadd.f32 1.0, %v8849_v15  ;;  %v8839_v55 = vadd.f32 1.1283791, %v8838_v46 }
0x13b3   :  { %v8812_v2 = vmul.f32 %v10133_v18, %v8810_v19  ;;  %vm8817_vm2 = vweird.f32 %v10133_v18 }
0x13b4   :  { %10134 = vrcp.f32 %v8850_v62  ;;  %vm8818_vm4 = vmor %vm8816_vm3, %vm8817_vm2  ;;  %v8862_v5 = vand.u32 2147483648, %v8850_v62  ;;  %v8860_v33 = vand.u32 2147483647, %v8850_v62  ;;  %vm8856_vm11 = vweird.f32 %v8850_v62 }
0x13b5   :  { %v8813_v63 = vsub.f32 1.0, %v8812_v2  ;;  %v8840_v16 = vmul.f32 %v8839_v55, %v15424_v45 }
0x13b6   :  { %v8863_v61 = vor.u32 1.1754944e-38, %v8862_v5  ;;  %vm8861_vm13 = vcmp.eq.f32.partialorder %v8860_v33, 8.507059e+37 }
0x13b7   :  { %v8814_v56 = vmul.f32 %v10133_v18, %v8813_v63 }
0x13b9   :  { %v8815_v47 = vadd.f32 %v10133_v18, %v8814_v56  ;;  %v8508_v0 = vpop.f32.mrf.mxu1 }
0x13ba   :  { %v10135_v57 = vpop.eup %10134 }
0x13bb   :  { %v8819_v27 = vsel %vm8818_vm4, %v10133_v18, %v8815_v47  ;;  %v8852_v52 = vmul.f32 %v10135_v57, %v8850_v62  ;;  %vm8857_vm6 = vweird.f32 %v10135_v57 }
0x13bc   :  { %v8824_v4 = vsel %vm8821_vm5, %v8823_v24, %v8819_v27  ;;  %vm8858_vm12 = vmor %vm8856_vm11, %vm8857_vm6 }
0x13bd   :  { %v8825_v22 = vmul.f32 %v8824_v4, %v8800_v21  ;;  %v8853_v49 = vsub.f32 1.0, %v8852_v52 }
0x13bf   :  { %v8549_v6 = vpop.f32.mrf.mxu2  ;;  %v9762_v34 = vclamps-f32 %v8825_v22, 1.0  ;;  %v8854_v12 = vmul.f32 %v10135_v57, %v8853_v49 }
0x13c0   :  { %v8550_v23 = vadd.f32 %v8549_v6, %v8508_v0 }
0x13c1   :  { %v8590_v32 = vpop.f32.mrf.mxu3  ;;  %v8952_v26 = vadd.f32 1.0, %v9762_v34  ;;  %v8855_v36 = vadd.f32 %v10135_v57, %v8854_v12  ;;  %v8510_v37 = vpop.f32.mrf.mxu1 }
0x13c2   :  { %v8601_v31 = vadd.f32 %v8590_v32, %v8550_v23 }
0x13c3   :  { %v8859_v13 = vsel %vm8858_vm12, %v10135_v57, %v8855_v36  ;;  %v8960_v42 = vmul.f32 %v8952_v26, %v8616_v43 }
0x13c4   :  { %v15455_v14 = vadd.f32 %v15199_v9, %v8601_v31  ;;  %v8864_v53 = vsel %vm8861_vm13, %v8863_v61, %v8859_v13 }
0x13c5   :  { %v8865_v19 = vmul.f32 %v8864_v53, %v8840_v16  ;;  %v8968_v15 = vpack.c.bf16 %v8960_v42, %v8960_v42 }
0x13c6   :  { %v15458_v41 = vmul.f32 0.70710677, %v15455_v14 }
0x13c7   :  { %v8551_v1 = vpop.f32.mrf.mxu2  ;;  %v9763_v50 = vclamps-f32 %v8865_v19, 1.0  ;;  %v8976_v29 = vunpack.c.l.bf16 %v8968_v15  ;;  %v9060_v56 = vunpack.c.l.b16 %v8968_v15 }
0x13c8   :  { %v8868_v8 = vmul.f32 %v15458_v41, %v15458_v41  ;;  %v8552_v60 = vadd.f32 %v8551_v1, %v8510_v37 }
0x13c9   :  { %v8592_v45 = vpop.f32.mrf.mxu3  ;;  %v8953_v39 = vadd.f32 1.0, %v9763_v50 }
0x13ca   :  { %v15464_v28 = vmin.f32 %v8868_v8, 16.0  ;;  %v8602_v18 = vadd.f32 %v8592_v45, %v8552_v60 }
0x13cb   :  { %v8961_v25 = vmul.f32 %v8953_v39, %v8617_v59 }
0x13cc   :  { %v8870_v30 = vmul.f32 2.1237322e-06, %v15464_v28  ;;  %v8881_v7 = vmul.f32 3.8918573e-05, %v15464_v28  ;;  %v15472_v62 = vadd.f32 %v15199_v9, %v8602_v18  ;;  %v8984_v9 = vsub.f32 %v8960_v42, %v8976_v29 }
0x13cd   :  { %v8969_v48 = vpack.c.bf16 %v8961_v25, %v8961_v25 }
0x13ce   :  { %v8871_v44 = vadd.f32 0.00028619796, %v8870_v30  ;;  %v8882_v38 = vadd.f32 0.001143296, %v8881_v7  ;;  %v15476_v10 = vmul.f32 0.70710677, %v15472_v62 }
0x13cf   :  { %v9061_v47 = vunpack.c.l.b16 %v8969_v48  ;;  %v8977_v0 = vunpack.c.l.bf16 %v8969_v48 }
0x13d0   :  { %v8883_v20 = vmul.f32 %v8882_v38, %v15464_v28  ;;  %v8872_v2 = vmul.f32 %v8871_v44, %v15464_v28  ;;  %v8908_v6 = vmul.f32 %v15476_v10, %v15476_v10 }
0x13d1   :  { %v9066_v23 = vpack.c.b16 %v9061_v47, %v9060_v56  ;;  %v8985_v57 = vsub.f32 %v8961_v25, %v8977_v0 }
0x13d2   :  { %v8884_v54 = vadd.f32 0.014752088, %v8883_v20  ;;  %v8873_v11 = vadd.f32 0.0036580483, %v8872_v2  ;;  %v8909_v21 = vmin.f32 %v8908_v6, 16.0 }
0x13d3   :  { %9088 = vmatmul.bf16.gmra.mxu0 %v9066_v23  ;;  %9161 = vmatmul.bf16.gmra.mxu1 %v9066_v23  ;;  %v8990_v32 = vpack.c.bf16 %v8985_v57, %v8984_v9  ;;  %v8618_v9 = vmul.f32 0.5, %v15455_v14 }
0x13d4   :  { %v8885_v63 = vmul.f32 %v8884_v54, %v15464_v28  ;;  %v8874_v27 = vmul.f32 %v8873_v11, %v15464_v28  ;;  %v8910_v4 = vmul.f32 2.1237322e-06, %v8909_v21  ;;  %v8921_v52 = vmul.f32 3.8918573e-05, %v8909_v21 }
0x13d5   :  { %9186 = vmatmul.bf16.gmra.mxu2 %v8990_v32 }
0x13d6   :  { %v8886_v51 = vadd.f32 0.112945676, %v8885_v63  ;;  %v8911_v22 = vadd.f32 0.00028619796, %v8910_v4  ;;  %v8922_v49 = vadd.f32 0.001143296, %v8921_v52 }
0x13d7   :  { %v8875_v34 = vadd.f32 0.05243302, %v8874_v27  ;;  %v8619_v4 = vmul.f32 0.5, %v15472_v62 }
0x13d8   :  { %v8887_v24 = vmul.f32 %v8886_v51, %v15464_v28  ;;  %v8912_v5 = vmul.f32 %v8911_v22, %v8909_v21  ;;  %v8923_v12 = vmul.f32 %v8922_v49, %v8909_v21 }
0x13d9   :  { %v8876_v26 = vmul.f32 %v8875_v34, %v15464_v28 }
0x13da   :  { %v8888_v46 = vadd.f32 0.4994258, %v8887_v24  ;;  %v8924_v33 = vadd.f32 0.014752088, %v8923_v12  ;;  %v8913_v36 = vadd.f32 0.0036580483, %v8912_v5 }
0x13db   :  { %v8877_v16 = vadd.f32 0.18741608, %v8876_v26 }
0x13dc   :  { %v8889_v31 = vmul.f32 %v8888_v46, %v15464_v28  ;;  %v8925_v8 = vmul.f32 %v8924_v33, %v8909_v21  ;;  %v8914_v13 = vmul.f32 %v8913_v36, %v8909_v21 }
0x13dd   :  { %v8878_v7 = vmul.f32 %v8877_v16, %v15464_v28 }
0x13de   :  { %v8890_v55 = vadd.f32 1.0, %v8889_v31  ;;  %v8926_v43 = vadd.f32 0.112945676, %v8925_v8  ;;  %v8915_v37 = vadd.f32 0.05243302, %v8914_v13 }
0x13df   :  { %v8879_v45 = vadd.f32 1.1283791, %v8878_v7  ;;  %v10159_v7 = vld [vmem:[%s15569_s1 + $0x8] sm:$0x7f] }
0x13e0   :  { %10136 = vrcp.f32 %v8890_v55  ;;  %v8927_v42 = vmul.f32 %v8926_v43, %v8909_v21  ;;  %v8902_v50 = vand.u32 2147483648, %v8890_v55  ;;  %v8900_v38 = vand.u32 2147483647, %v8890_v55 }
0x13e1   :  { %vm8896_vm8 = vweird.f32 %v8890_v55  ;;  %v8916_v39 = vmul.f32 %v8915_v37, %v8909_v21  ;;  %v8880_v25 = vmul.f32 %v8879_v45, %v15458_v41  ;;  %v9203_v37 = vperm.slane %v10159_v7, 5 }
0x13e2   :  { %v8928_v30 = vadd.f32 0.4994258, %v8927_v42  ;;  %v8903_v15 = vor.u32 1.1754944e-38, %v8902_v50  ;;  %vm8901_vm10 = vcmp.eq.f32.partialorder %v8900_v38, 8.507059e+37 }
0x13e3   :  { %v8917_v28 = vadd.f32 0.18741608, %v8916_v39 }
0x13e4   :  { %v8929_v44 = vmul.f32 %v8928_v30, %v8909_v21 }
0x13e5   :  { %v8918_v63 = vmul.f32 %v8917_v28, %v8909_v21 }
0x13e6   :  { %v10137_v61 = vpop.eup %10136  ;;  %v8930_v59 = vadd.f32 1.0, %v8929_v44 }
0x13e7   :  { %v8892_v53 = vmul.f32 %v10137_v61, %v8890_v55  ;;  %vm8897_vm7 = vweird.f32 %v10137_v61  ;;  %v8919_v51 = vadd.f32 1.1283791, %v8918_v63 }
0x13e8   :  { %vm8898_vm9 = vmor %vm8896_vm8, %vm8897_vm7  ;;  %10138 = vrcp.f32 %v8930_v59  ;;  %v8942_v11 = vand.u32 2147483648, %v8930_v59  ;;  %v8940_v0 = vand.u32 2147483647, %v8930_v59  ;;  %vm8936_vm15 = vweird.f32 %v8930_v59 }
0x13e9   :  { %v8893_v19 = vsub.f32 1.0, %v8892_v53  ;;  %v8920_v41 = vmul.f32 %v8919_v51, %v15476_v10 }
0x13ea   :  { %v8943_v23 = vor.u32 1.1754944e-38, %v8942_v11  ;;  %vm8941_vm2 = vcmp.eq.f32.partialorder %v8940_v0, 8.507059e+37 }
0x13eb   :  { %v8894_v1 = vmul.f32 %v10137_v61, %v8893_v19 }
0x13ed   :  { %v8895_v60 = vadd.f32 %v10137_v61, %v8894_v1 }
0x13ee   :  { %v10139_v54 = vpop.eup %10138 }
0x13ef   :  { %v8899_v20 = vsel %vm8898_vm9, %v10137_v61, %v8895_v60  ;;  %v8932_v48 = vmul.f32 %v10139_v54, %v8930_v59  ;;  %vm8937_vm14 = vweird.f32 %v10139_v54 }
0x13f0   :  { %v8904_v18 = vsel %vm8901_vm10, %v8903_v15, %v8899_v20  ;;  %vm8938_vm1 = vmor %vm8936_vm15, %vm8937_vm14 }
0x13f1   :  { %v8905_v2 = vmul.f32 %v8904_v18, %v8880_v25  ;;  %v8933_v56 = vsub.f32 1.0, %v8932_v48 }
0x13f3   :  { %v9764_v29 = vclamps-f32 %v8905_v2, 1.0  ;;  %v8934_v47 = vmul.f32 %v10139_v54, %v8933_v56 }
0x13f5   :  { %v8954_v6 = vadd.f32 1.0, %v9764_v29  ;;  %v8935_v24 = vadd.f32 %v10139_v54, %v8934_v47 }
0x13f7   :  { %v8939_v57 = vsel %vm8938_vm1, %v10139_v54, %v8935_v24  ;;  %v8962_v27 = vmul.f32 %v8954_v6, %v8618_v9 }
0x13f8   :  { %v8944_v21 = vsel %vm8941_vm2, %v8943_v23, %v8939_v57 }
0x13f9   :  { %v8945_v46 = vmul.f32 %v8944_v21, %v8920_v41  ;;  %v8970_v31 = vpack.c.bf16 %v8962_v27, %v8962_v27 }
0x13fb   :  { %v9765_v32 = vclamps-f32 %v8945_v46, 1.0  ;;  %v8978_v34 = vunpack.c.l.bf16 %v8970_v31  ;;  %v9062_v55 = vunpack.c.l.b16 %v8970_v31 }
0x13fd   :  { %v8955_v52 = vadd.f32 1.0, %v9765_v32  ;;  %v8986_v14 = vsub.f32 %v8962_v27, %v8978_v34 }
0x13ff   :  { %v8963_v22 = vmul.f32 %v8955_v52, %v8619_v4 }
0x1401   :  { %v8971_v49 = vpack.c.bf16 %v8963_v22, %v8963_v22 }
0x1403   :  { %v9063_v5 = vunpack.c.l.b16 %v8971_v49  ;;  %v8979_v12 = vunpack.c.l.bf16 %v8971_v49 }
0x1405   :  { %v9067_v33 = vpack.c.b16 %v9063_v5, %v9062_v55  ;;  %v8987_v26 = vsub.f32 %v8963_v22, %v8979_v12 }
0x1407   :  { %9091 = vmatmul.bf16.gmra.mxu0 %v9067_v33  ;;  %9164 = vmatmul.bf16.gmra.mxu1 %v9067_v33  ;;  %v8991_v10 = vpack.c.bf16 %v8987_v26, %v8986_v14 }
0x1409   :  { %9189 = vmatmul.bf16.gmra.mxu2 %v8991_v10 }
0x141c   :  { %v9154_v8 = vpop.f32.mrf.mxu1 }
0x141d   :  { %v9081_v36 = vpop.f32.mrf.mxu0 }
0x1423   :  { %v9179_v43 = vpop.f32.mrf.mxu2 }
0x1424   :  { %v9155_v62 = vpop.f32.mrf.mxu1 }
0x1425   :  { %v9082_v61 = vpop.f32.mrf.mxu0 }
0x142b   :  { %v9180_v16 = vpop.f32.mrf.mxu2 }
0x142c   :  { %v9157_v53 = vpop.f32.mrf.mxu1 }
0x142d   :  { %v9084_v13 = vpop.f32.mrf.mxu0 }
0x142e   :  { %v9158_v42 = vadd.f32 %v9157_v53, %v9084_v13  ;;  %v9210_v53 = vld [vmem:[%s15572_s4 + $0x10] sm:$0xff] }
0x1433   :  { %v9182_v19 = vpop.f32.mrf.mxu2 }
0x1434   :  { %v9195_v30 = vadd.f32 %v9182_v19, %v9158_v42  ;;  %v9159_v44 = vpop.f32.mrf.mxu1  ;;  %v9211_v42 = vld [vmem:[%s15572_s4 + $0x18] sm:$0xff] }
0x1435   :  { %v9086_v50 = vpop.f32.mrf.mxu0  ;;  %v9328_v7 = vpack.c.bf16 %v9211_v42, %v9211_v42 }
0x1436   :  { %v9199_v1 = vadd.f32 %v9195_v30, %v15045_v58  ;;  %v9160_v60 = vadd.f32 %v9159_v44, %v9086_v50  ;;  %v9327_v30 = vpack.c.bf16 %v9210_v53, %v9210_v53 }
0x1438   :  { %v9204_v38 = vadd.f32 %v9203_v37, %v9199_v1  ;;  %v9209_v1 = vld [vmem:[%s15572_s4 + $0x8] sm:$0xff] }
0x1439   :  { %v9326_v44 = vpack.c.bf16 %v9209_v1, %v9209_v1 }
0x143a   :  { %v9213_v59 = vsel %vm55_vm0, %v9204_v38, 0.0 }
0x143b   :  { %v9184_v45 = vpop.f32.mrf.mxu2  ;;  %9214 = vadd.xlane.f32.xlu1 %v9213_v59  ;;  %v9331_v59 = vunpack.c.l.bf16 %v9327_v30 }
0x143c   :  { %v9196_v39 = vadd.f32 %v9184_v45, %v9160_v60  ;;  %v9332_v45 = vunpack.c.l.bf16 %v9328_v7 }
0x143e   :  { %v9200_v20 = vadd.f32 %v9196_v39, %v15051_v17  ;;  %v9380_v39 = vunpack.c.l.b16 %v9327_v30 }
0x1440   :  { %v9205_v15 = vadd.f32 %v9203_v37, %v9200_v20 }
0x1442   :  { %v9216_v18 = vsel %vm55_vm0, %v9205_v15, 0.0 }
0x1443   :  { %9217 = vadd.xlane.f32.xlu0 %v9216_v18 }
0x1450   :  { %v9089_v25 = vpop.f32.mrf.mxu0  ;;  %v9162_v28 = vpop.f32.mrf.mxu1 }
0x1451   :  { %v9335_v25 = vsub.f32 %v9210_v53, %v9331_v59  ;;  %v9336_v28 = vsub.f32 %v9211_v42, %v9332_v45 }
0x1458   :  { %v9090_v2 = vpop.f32.mrf.mxu0  ;;  %v9163_v54 = vpop.f32.mrf.mxu1 }
0x1459   :  { %v9187_v58 = vpop.f32.mrf.mxu2 }
0x145a   :  { %v9330_v58 = vunpack.c.l.bf16 %v9326_v44 }
0x1461   :  { %v9188_v63 = vpop.f32.mrf.mxu2 }
0x1484   :  { %v9092_v48 = vpop.f32.mrf.mxu0  ;;  %v9165_v29 = vpop.f32.mrf.mxu1 }
0x1485   :  { %v9166_v56 = vadd.f32 %v9165_v29, %v9092_v48  ;;  %v9338_v48 = vpack.c.bf16 %v9336_v28, %v9335_v25 }
0x1487   :  { %9361 = vmatpush.bf16.msrb.mxu3 %v9338_v48 }
0x148c   :  { %v9190_v11 = vpop.f32.mrf.mxu2  ;;  %v9094_v0 = vpop.f32.mrf.mxu0 }
0x148d   :  { %v9197_v51 = vadd.f32 %v9190_v11, %v9166_v56  ;;  %v9167_v6 = vpop.f32.mrf.mxu1  ;;  %v9379_v56 = vunpack.c.l.b16 %v9326_v44 }
0x148e   :  { %v9168_v24 = vadd.f32 %v9167_v6, %v9094_v0  ;;  %v15541_v0 = vld [vmem:[%s15572_s4 + $0x20] sm:$0x7] }
0x148f   :  { %v9201_v47 = vadd.f32 %v9197_v51, %v15063_v40  ;;  %v9334_v51 = vsub.f32 %v9209_v1, %v9330_v58 }
0x1491   :  { %v9206_v17 = vadd.f32 %v9203_v37, %v9201_v47 }
0x1493   :  { %v9219_v23 = vsel %vm55_vm0, %v9206_v17, 0.0 }
0x1494   :  { %9220 = vadd.xlane.f32.xlu2 %v9219_v23  ;;  %v9192_v9 = vpop.f32.mrf.mxu2 }
0x1495   :  { %v9198_v41 = vadd.f32 %v9192_v9, %v9168_v24 }
0x1497   :  { %v9202_v57 = vadd.f32 %v9198_v41, %v15079_v3  ;;  %v15544_v41 = vperm.slane %v15541_v0, 0 }
0x1499   :  { %v9207_v21 = vadd.f32 %v9203_v37, %v9202_v57  ;;  %v9208_v37 = vld [vmem:[%s15572_s4] sm:$0xff] }
0x149a   :  { %v9325_v50 = vpack.c.bf16 %v9208_v37, %v9208_v37 }
0x149b   :  { %v9222_v27 = vsel %vm55_vm0, %v9207_v21, 0.0 }
0x149c   :  { %9223 = vadd.xlane.f32.xlu1 %v9222_v27  ;;  %v9329_v18 = vunpack.c.l.bf16 %v9325_v50  ;;  %v9378_v29 = vunpack.c.l.b16 %v9325_v50 }
0x149e   :  { %v9333_v63 = vsub.f32 %v9208_v37, %v9329_v18  ;;  %v9382_v47 = vpack.c.b16 %v9379_v56, %v9378_v29 }
0x14ae   :  { %v9215_v46 = vpop.xlane.xlu1 %9214 }
0x14af   :  { %v9225_v32 = vmul.f32 %v9215_v46, %v16144_v35 }
0x14b1   :  { %v15501_v4 = vsub.f32 %v9204_v38, %v9225_v32  ;;  %v9306_v32 = vperm.slane %v15541_v0, 1 }
0x14b3   :  { %v9233_v40 = vmul.f32 %v15501_v4, %v15501_v4 }
0x14b5   :  { %v9237_v52 = vsel %vm55_vm0, %v9233_v40, 0.0 }
0x14b6   :  { %v9218_v31 = vpop.xlane.xlu0 %9217  ;;  %9238 = vadd.xlane.f32.xlu0 %v9237_v52 }
0x14b7   :  { %v9226_v22 = vmul.f32 %v9218_v31, %v16144_v35 }
0x14b9   :  { %v15507_v49 = vsub.f32 %v9205_v15, %v9226_v22  ;;  %v9381_v15 = vunpack.c.l.b16 %v9328_v7 }
0x14bb   :  { %v9234_v3 = vmul.f32 %v15507_v49, %v15507_v49  ;;  %v9383_v54 = vpack.c.b16 %v9381_v15, %v9380_v39 }
0x14bd   :  { %v9240_v34 = vsel %vm55_vm0, %v9234_v3, 0.0  ;;  %9392 = vmatpush.bf16.msra.mxu0 %v9383_v54  ;;  %9417 = vmatpush.bf16.msra.mxu1 %v9383_v54 }
0x14be   :  { %9241 = vadd.xlane.f32.xlu2 %v9240_v34 }
0x14c1   :  { %9393 = vmatpush.bf16.msra.mxu0 %v9382_v47  ;;  %9418 = vmatpush.bf16.msra.mxu1 %v9382_v47 }
0x1507   :  { %v9221_v55 = vpop.xlane.xlu2 %9220 }
0x1508   :  { %v9227_v5 = vmul.f32 %v9221_v55, %v16144_v35 }
0x150a   :  { %v15513_v12 = vsub.f32 %v9206_v17, %v9227_v5  ;;  %v9337_v17 = vpack.c.bf16 %v9334_v51, %v9333_v63 }
0x150c   :  { %v9235_v33 = vmul.f32 %v15513_v12, %v15513_v12  ;;  %9362 = vmatpush.bf16.msrb.mxu3 %v9337_v17 }
0x150e   :  { %v9243_v14 = vsel %vm55_vm0, %v9235_v33, 0.0 }
0x150f   :  { %9244 = vadd.xlane.f32.xlu1 %v9243_v14  ;;  %v9224_v26 = vpop.xlane.xlu1 %9223 }
0x1510   :  { %v9228_v10 = vmul.f32 %v9224_v26, %v16144_v35 }
0x1512   :  { %v15519_v36 = vsub.f32 %v9207_v21, %v9228_v10 }
0x1514   :  { %v9236_v8 = vmul.f32 %v15519_v36, %v15519_v36 }
0x1516   :  { %v9246_v43 = vsel %vm55_vm0, %v9236_v8, 0.0 }
0x1517   :  { %9247 = vadd.xlane.f32.xlu0 %v9246_v43 }
0x1529   :  { %v9239_v61 = vpop.xlane.xlu0 %9238 }
0x152a   :  { %v9249_v62 = vmul.f32 %v9239_v61, %v16144_v35 }
0x152c   :  { %v9253_v16 = vadd.f32 1e-05, %v9249_v62 }
0x152e   :  { %10140 = vrsqrt.f32 %v9253_v16  ;;  %vm9263_vm4 = vweird.f32 %v9253_v16 }
0x1531   :  { %v9242_v13 = vpop.xlane.xlu2 %9241 }
0x1532   :  { %v9250_v19 = vmul.f32 %v9242_v13, %v16144_v35 }
0x1534   :  { %v10141_v38 = vpop.eup %10140  ;;  %v9254_v60 = vadd.f32 1e-05, %v9250_v19 }
0x1535   :  { %v9258_v20 = vmul.f32 %v10141_v38, %v9253_v16  ;;  %vm9264_vm3 = vweird.f32 %v10141_v38 }
0x1536   :  { %10142 = vrsqrt.f32 %v9254_v60  ;;  %vm9265_vm5 = vmor %vm9263_vm4, %vm9264_vm3  ;;  %vm9273_vm11 = vweird.f32 %v9254_v60 }
0x1537   :  { %v9259_v2 = vmul.f32 %v10141_v38, %v9258_v20 }
0x1539   :  { %v9260_v11 = vmul.f32 0.5, %v9259_v2 }
0x153b   :  { %v9261_v6 = vsub.f32 1.5, %v9260_v11 }
0x153c   :  { %v10143_v24 = vpop.eup %10142 }
0x153d   :  { %v9262_v23 = vmul.f32 %v10141_v38, %v9261_v6  ;;  %v9268_v9 = vmul.f32 %v10143_v24, %v9254_v60  ;;  %vm9274_vm6 = vweird.f32 %v10143_v24 }
0x153e   :  { %vm9275_vm12 = vmor %vm9273_vm11, %vm9274_vm6 }
0x153f   :  { %v9266_v57 = vsel %vm9265_vm5, %v10141_v38, %v9262_v23  ;;  %v9269_v21 = vmul.f32 %v10143_v24, %v9268_v9 }
0x1540   :  { %v9297_v27 = vmul.f32 %v9266_v57, %v15501_v4  ;;  %v9434_v57 = vperm.slane %v15541_v0, 2 }
0x1541   :  { %v9270_v46 = vmul.f32 0.5, %v9269_v21 }
0x1542   :  { %v9302_v40 = vmul.f32 %v15544_v41, %v9297_v27 }
0x1543   :  { %v9271_v52 = vsub.f32 1.5, %v9270_v46 }
0x1544   :  { %v9307_v22 = vadd.f32 %v9306_v32, %v9302_v40 }
0x1545   :  { %v9272_v31 = vmul.f32 %v10143_v24, %v9271_v52 }
0x1546   :  { %v9311_v55 = vpack.c.bf16 %v9307_v22, %v9307_v22 }
0x1547   :  { %v9276_v3 = vsel %vm9275_vm12, %v10143_v24, %v9272_v31 }
0x1548   :  { %v9298_v34 = vmul.f32 %v9276_v3, %v15507_v49  ;;  %v9315_v14 = vunpack.c.l.bf16 %v9311_v55  ;;  %v9343_v26 = vunpack.c.l.b16 %v9311_v55 }
0x154a   :  { %v9303_v5 = vmul.f32 %v15544_v41, %v9298_v34  ;;  %v9319_v43 = vsub.f32 %v9307_v22, %v9315_v14 }
0x154c   :  { %v9308_v33 = vadd.f32 %v9306_v32, %v9303_v5 }
0x154e   :  { %v9312_v4 = vpack.c.bf16 %v9308_v33, %v9308_v33 }
0x1550   :  { %v9316_v10 = vunpack.c.l.bf16 %v9312_v4  ;;  %v9344_v8 = vunpack.c.l.b16 %v9312_v4 }
0x1552   :  { %v9320_v61 = vsub.f32 %v9308_v33, %v9316_v10  ;;  %v9347_v62 = vpack.c.b16 %v9344_v8, %v9343_v26 }
0x1554   :  { %9766 = vmatmul.msk.bf16.vlgmr.msrb.gmra.mxu3 %vm55_vm0, %v9347_v62  ;;  %9768 = vmatmul.msk.bf16.vlgmr.msra.gmra.mxu0 %vm55_vm0, %v9347_v62  ;;  %v9323_v16 = vpack.c.bf16 %v9320_v61, %v9319_v43 }
0x1556   :  { %9770 = vmatmul.msk.bf16.vlgmr.msra.gmra.mxu1 %vm55_vm0, %v9323_v16 }
0x1582   :  { %v9245_v49 = vpop.xlane.xlu1 %9244 }
0x1583   :  { %v9251_v13 = vmul.f32 %v9245_v49, %v16144_v35 }
0x1585   :  { %v9255_v53 = vadd.f32 1e-05, %v9251_v13 }
0x1587   :  { %10144 = vrsqrt.f32 %v9255_v53  ;;  %vm9283_vm7 = vweird.f32 %v9255_v53 }
0x158a   :  { %v9248_v42 = vpop.xlane.xlu0 %9247 }
0x158b   :  { %v9252_v19 = vmul.f32 %v9248_v42, %v16144_v35 }
0x158d   :  { %v10145_v30 = vpop.eup %10144  ;;  %v9256_v7 = vadd.f32 1e-05, %v9252_v19 }
0x158e   :  { %v9278_v37 = vmul.f32 %v10145_v30, %v9255_v53  ;;  %vm9284_vm13 = vweird.f32 %v10145_v30 }
0x158f   :  { %10146 = vrsqrt.f32 %v9256_v7  ;;  %vm9285_vm8 = vmor %vm9283_vm7, %vm9284_vm13  ;;  %vm9293_vm10 = vweird.f32 %v9256_v7 }
0x1590   :  { %v9279_v1 = vmul.f32 %v10145_v30, %v9278_v37 }
0x1592   :  { %v9280_v50 = vmul.f32 0.5, %v9279_v1 }
0x1594   :  { %v9281_v44 = vsub.f32 1.5, %v9280_v50 }
0x1595   :  { %v10147_v38 = vpop.eup %10146 }
0x1596   :  { %v9282_v60 = vmul.f32 %v10145_v30, %v9281_v44  ;;  %v9288_v59 = vmul.f32 %v10147_v38, %v9256_v7  ;;  %vm9294_vm9 = vweird.f32 %v10147_v38 }
0x1597   :  { %vm9295_vm14 = vmor %vm9293_vm10, %vm9294_vm9 }
0x1598   :  { %v9286_v45 = vsel %vm9285_vm8, %v10145_v30, %v9282_v60  ;;  %v9289_v39 = vmul.f32 %v10147_v38, %v9288_v59 }
0x1599   :  { %v9299_v20 = vmul.f32 %v9286_v45, %v15513_v12 }
0x159a   :  { %v9290_v15 = vmul.f32 0.5, %v9289_v39 }
0x159b   :  { %v9304_v35 = vmul.f32 %v15544_v41, %v9299_v20 }
0x159c   :  { %v9291_v18 = vsub.f32 1.5, %v9290_v15 }
0x159d   :  { %v9309_v28 = vadd.f32 %v9306_v32, %v9304_v35 }
0x159e   :  { %v9292_v25 = vmul.f32 %v10147_v38, %v9291_v18 }
0x159f   :  { %v9313_v63 = vpack.c.bf16 %v9309_v28, %v9309_v28 }
0x15a0   :  { %v9296_v2 = vsel %vm9295_vm14, %v10147_v38, %v9292_v25 }
0x15a1   :  { %v9300_v54 = vmul.f32 %v9296_v2, %v15519_v36  ;;  %v9317_v56 = vunpack.c.l.bf16 %v9313_v63  ;;  %v9345_v11 = vunpack.c.l.b16 %v9313_v63 }
0x15a3   :  { %v9305_v58 = vmul.f32 %v15544_v41, %v9300_v54  ;;  %v9321_v6 = vsub.f32 %v9309_v28, %v9317_v56 }
0x15a5   :  { %v9310_v48 = vadd.f32 %v9306_v32, %v9305_v58 }
0x15a7   :  { %v9314_v29 = vpack.c.bf16 %v9310_v48, %v9310_v48 }
0x15a9   :  { %v9346_v12 = vunpack.c.l.b16 %v9314_v29  ;;  %v9318_v51 = vunpack.c.l.bf16 %v9314_v29 }
0x15ab   :  { %v9348_v47 = vpack.c.b16 %v9346_v12, %v9345_v11  ;;  %v9322_v17 = vsub.f32 %v9310_v48, %v9318_v51 }
0x15ad   :  { %9767 = vmatmul.msk.bf16.gmra.mxu3 %vm55_vm0, %v9348_v47  ;;  %9769 = vmatmul.msk.bf16.gmra.mxu0 %vm55_vm0, %v9348_v47  ;;  %v9324_v24 = vpack.c.bf16 %v9322_v17, %v9321_v6 }
0x15af   :  { %9771 = vmatmul.msk.bf16.gmra.mxu1 %vm55_vm0, %v9324_v24 }
0x15d1   :  { %v9395_v36 = vpop.f32.mrf.mxu0 }
0x15d3   :  { %v9420_v23 = vpop.f32.mrf.mxu1 }
0x15d7   :  { %v9364_v9 = vpop.f32.mrf.mxu3 }
0x15d8   :  { %v9396_v41 = vadd.f32 %v9395_v36, %v9364_v9 }
0x15d9   :  { %v9397_v46 = vpop.f32.mrf.mxu0 }
0x15da   :  { %v9430_v21 = vadd.f32 %v9420_v23, %v9396_v41 }
0x15db   :  { %v9422_v52 = vpop.f32.mrf.mxu1 }
0x15dc   :  { %v9435_v27 = vadd.f32 %v9434_v57, %v9430_v21 }
0x15de   :  { %9439 = vst [vmem:[#allocation2] sm:$0xff] %v9435_v27 }
0x15df   :  { %v9366_v32 = vpop.f32.mrf.mxu3 }
0x15e0   :  { %v9398_v40 = vadd.f32 %v9397_v46, %v9366_v32 }
0x15e2   :  { %v9431_v31 = vadd.f32 %v9422_v52, %v9398_v40 }
0x15e4   :  { %v9436_v22 = vadd.f32 %v9434_v57, %v9431_v31 }
0x15e6   :  { %9440 = vst [vmem:[#allocation2 + $0x8] sm:$0xff] %v9436_v22 }
0x162a   :  { %v9400_v3 = vpop.f32.mrf.mxu0 }
0x162c   :  { %v9425_v34 = vpop.f32.mrf.mxu1 }
0x1630   :  { %v9369_v55 = vpop.f32.mrf.mxu3 }
0x1631   :  { %v9401_v5 = vadd.f32 %v9400_v3, %v9369_v55 }
0x1632   :  { %v9402_v4 = vpop.f32.mrf.mxu0 }
0x1633   :  { %v9432_v33 = vadd.f32 %v9425_v34, %v9401_v5 }
0x1634   :  { %v9427_v10 = vpop.f32.mrf.mxu1 }
0x1635   :  { %v9437_v14 = vadd.f32 %v9434_v57, %v9432_v33 }
0x1637   :  { %9441 = vst [vmem:[#allocation2 + $0x10] sm:$0xff] %v9437_v14 }
0x1638   :  { %v9371_v26 = vpop.f32.mrf.mxu3 }
0x1639   :  { %v9403_v0 = vadd.f32 %v9402_v4, %v9371_v26 }
0x163b   :  { %v9433_v8 = vadd.f32 %v9427_v10, %v9403_v0 }
0x163d   :  { %v9438_v43 = vadd.f32 %v9434_v57, %v9433_v8 }
0x163f   :  { %9442 = vst [vmem:[#allocation2 + $0x18] sm:$0xff] %v9438_v43 }
0x1640   :  { %9455 = dma.vmem_to_hbm [thread:$0]  %s9448_s22, 512, %s9450_s20, [#allocation3], %s10197_s23, %s10197_s23, %s10194_s26  }
0x1641   :  { %10184 = dma.done.wait [#allocation3], 512  }
0x1642   :  { %10185 = vsyncadd [#allocation3], 4294966784 }
0x1643   :  { %9460 = vsyncpa [#allocation3], 1 }

</bundles_post_ra>
